<compile_context>
chip_gen: v7x
topology: tpu7x:2x2x1
jax: 0.10.0
libtpu: 0.0.40
codegen_flags: <defaults>
</compile_context>

<pallas_src>
import functools

import jax
import jax.numpy as jnp
import numpy as np
from jax.experimental import pallas as pl
from jax.experimental.pallas import tpu as pltpu


# ---------------------------------------------------------------------------
# Fixed network geometry (LeNet on 32x32 RGB, from Net.__init__)
# ---------------------------------------------------------------------------
CIN, C1, C2 = 3, 6, 16
KH = KW = 5
NOFF = KH * KW            # 25 kernel taps
KPAD = 8                  # channel rows per tap block (sublane aligned)
KIM = NOFF * KPAD         # 200 = contraction dim of both conv GEMMs
IMG = 32
GRID = IMG * IMG          # flattened 32x32 grid per sample
FC1, FC2, FC3 = 300, 100, 10
VCHUNK = 32               # per-channel chunk stride of the flattened fc1 input
VWIDTH = C2 * VCHUNK      # 512 (padded / permuted 16*5*5 = 400)


def _r128(v):
    return ((v + 127) // 128) * 128


def _plan(n_batch):
    """Column widths of the per-stage spatial buffers (padded, lane-dense)."""
    w_t2 = n_batch * GRID                                    # pool2 grid
    w_y2 = _r128(w_t2 + 2 * IMG + 2)                         # conv2 out (pool2 shifts <= 66)
    w_t1 = _r128(w_y2 + 2 * ((KH - 1) * IMG + (KW - 1)))     # pool1 out (conv2 shifts <= 264)
    w_y1 = _r128(w_t1 + IMG + 1)                             # conv1 out (pool1 shifts <= 33)
    w_x = _r128(w_y1 + (KH - 1) * IMG + (KW - 1))            # padded input (conv1 shifts <= 132)
    return w_x, w_y1, w_t1, w_y2, w_t2


# ---------------------------------------------------------------------------
# The fused forward kernel
# ---------------------------------------------------------------------------
def _net_kernel(x_ref, w1_ref, b1_ref, w2_ref, b2_ref,
                fw1_ref, fb1_ref, fw2_ref, fb2_ref, fw3_ref, fb3_ref, sel_ref,
                out_ref,
                xp_ref, im_ref, y1_ref, t1_ref, y2_ref, v_ref,
                *, n_batch, widths):
    _, w_y1, w_t1, w_y2, w_t2 = widths
    f32 = jnp.float32

    # Stage 0: lay samples side by side on a zero-padded flat 32x32 grid.
    # Channel rows are padded 3 -> 8 so every im2col block is sublane aligned.
    xp_ref[...] = jnp.zeros_like(xp_ref)
    for n in range(n_batch):
        xp_ref[0:CIN, n * GRID:(n + 1) * GRID] = x_ref[n]

    # Stage 1: conv1 + bias + relu as a single GEMM over an in-VMEM im2col
    # buffer.  Tap (dy, dx) is a column shift of dy*32+dx on the flat grid.
    for o in range(NOFF):
        dy, dx = divmod(o, KW)
        off = dy * IMG + dx
        im_ref[o * KPAD:(o + 1) * KPAD, 0:w_y1] = xp_ref[:, off:off + w_y1]
    y1_ref[...] = jnp.maximum(
        jnp.dot(w1_ref[...], im_ref[...], preferred_element_type=f32)
        + b1_ref[...], 0.0)

    # Stage 2: 2x2/2 max-pool = max of 4 column shifts.  The pooled value stays
    # at its (even, even) grid position (dilation-2 storage), so no compaction.
    t1_ref[...] = jnp.maximum(
        jnp.maximum(y1_ref[:, 0:w_t1], y1_ref[:, 1:1 + w_t1]),
        jnp.maximum(y1_ref[:, IMG:IMG + w_t1], y1_ref[:, IMG + 1:IMG + 1 + w_t1]))

    # Stage 3: conv2 + bias + relu on the dilation-2 grid (tap shifts doubled),
    # again a single K=200 GEMM.
    for o in range(NOFF):
        dy, dx = divmod(o, KW)
        off = 2 * (dy * IMG + dx)
        im_ref[o * KPAD:(o + 1) * KPAD, 0:w_y2] = t1_ref[:, off:off + w_y2]
    y2_ref[...] = jnp.maximum(
        jnp.dot(w2_ref[...], im_ref[:, 0:w_y2], preferred_element_type=f32)
        + b2_ref[...], 0.0)

    # Stage 4: second 2x2 pool on the dilation-2 grid (shifts 0, 2, 64, 66);
    # results land at dilation-4 positions.
    t2 = jnp.maximum(
        jnp.maximum(y2_ref[:, 0:w_t2], y2_ref[:, 2:2 + w_t2]),
        jnp.maximum(y2_ref[:, 2 * IMG:2 * IMG + w_t2],
                    y2_ref[:, 2 * IMG + 2:2 * IMG + 2 + w_t2]))

    # Stage 5: gather the 16 x 5 x 5 pooled values per sample (dilation-4 grid
    # positions) with a tiny selection GEMM, scatter into the flattened fc1
    # input layout (channel c occupies columns [c*32, c*32+25)).
    v_ref[...] = jnp.zeros_like(v_ref)
    for n in range(n_batch):
        p_n = jnp.dot(t2[:, n * GRID:(n + 1) * GRID], sel_ref[...],
                      preferred_element_type=f32)              # (16, 25)
        for c in range(C2):
            v_ref[n:n + 1, c * VCHUNK:c * VCHUNK + KH * KW] = p_n[c:c + 1, :]

    # Stage 6: fused fc1 -> fc2 -> fc3 -> log_softmax (weights pre-transposed
    # and pre-permuted once, outside the jitted forward).
    h = jnp.maximum(
        jnp.dot(v_ref[...], fw1_ref[...], preferred_element_type=f32)
        + fb1_ref[...], 0.0)
    h = jnp.maximum(
        jnp.dot(h, fw2_ref[...], preferred_element_type=f32) + fb2_ref[...], 0.0)
    z = jnp.dot(h, fw3_ref[...], preferred_element_type=f32) + fb3_ref[...]
    z = z - jnp.max(z, axis=-1, keepdims=True)
    out_ref[...] = z - jnp.log(jnp.sum(jnp.exp(z), axis=-1, keepdims=True))


# ---------------------------------------------------------------------------
# One-time (outside jit) repack of the PyTorch-layout parameters
# ---------------------------------------------------------------------------
def prepare_params(params):
    w1, b1, w2, b2, fw1, fb1, fw2, fb2, fw3, fb3 = params
    f32 = jnp.float32

    def conv_blocked(w, rows):
        cout, cin = w.shape[0], w.shape[1]
        wb = jnp.transpose(w, (2, 3, 0, 1)).reshape(NOFF, cout, cin)   # (25, cout, cin)
        wb = jnp.pad(wb, ((0, 0), (0, rows - cout), (0, KPAD - cin)))
        return jnp.transpose(wb, (1, 0, 2)).reshape(rows, KIM).astype(f32)

    w1c = conv_blocked(w1, KPAD)     # (8, 200)   (conv1 out channels padded 6->8)
    w2c = conv_blocked(w2, C2)       # (16, 200)
    b1p = jnp.pad(b1, (0, KPAD - C1)).reshape(KPAD, 1).astype(f32)
    b2p = b2.reshape(C2, 1).astype(f32)

    # fc1 weight: transposed + re-rowed to the kernel's padded (c*32 + j)
    # flattening of the 16x5x5 pooled activations (j = 5*h + w).
    fw1t = jnp.transpose(fw1).reshape(C2, KH * KW, FC1)                # (16, 25, 300)
    fw1p = jnp.pad(fw1t, ((0, 0), (0, VCHUNK - KH * KW), (0, 0)))
    fw1p = fw1p.reshape(VWIDTH, FC1).astype(f32)                       # (512, 300)

    fw2p = jnp.transpose(fw2).astype(f32)    # (300, 100)
    fw3p = jnp.transpose(fw3).astype(f32)    # (100, 10)

    # Selection matrix: column j = 5*h + w picks grid position 128*h + 4*w
    # (the dilation-4 location of pooled value (h, w)).
    sel = np.zeros((GRID, KH * KW), np.float32)
    for h in range(KH):
        for w in range(KW):
            sel[(4 * h) * IMG + 4 * w, KH * h + w] = 1.0

    return (w1c, b1p, w2c, b2p,
            fw1p, fb1.reshape(1, FC1).astype(f32),
            fw2p, fb2.reshape(1, FC2).astype(f32),
            fw3p, fb3.reshape(1, FC3).astype(f32),
            jnp.asarray(sel))


# ---------------------------------------------------------------------------
# Forward wrapper: one pallas_call, no grid (whole model fits in VMEM)
# ---------------------------------------------------------------------------
def net_forward(x, prepared):
    """x: (N, 3, 32, 32) float32; prepared = prepare_params(params)."""
    n_batch = x.shape[0]
    widths = _plan(n_batch)
    w_x, w_y1, w_t1, w_y2, _ = widths
    kernel = functools.partial(_net_kernel, n_batch=n_batch, widths=widths)
    call = pl.pallas_call(
        kernel,
        out_shape=jax.ShapeDtypeStruct((n_batch, FC3), jnp.float32),
        in_specs=[pl.BlockSpec(memory_space=pltpu.MemorySpace.VMEM)] * 12,
        out_specs=pl.BlockSpec(memory_space=pltpu.MemorySpace.VMEM),
        scratch_shapes=[
            pltpu.VMEM((KPAD, w_x), jnp.float32),         # zero-padded input grid
            pltpu.VMEM((KIM, w_y1), jnp.float32),         # shared im2col buffer
            pltpu.VMEM((KPAD, w_y1), jnp.float32),        # conv1 + relu
            pltpu.VMEM((KPAD, w_t1), jnp.float32),        # pool1 (dilation 2)
            pltpu.VMEM((C2, w_y2), jnp.float32),          # conv2 + relu
            pltpu.VMEM((n_batch, VWIDTH), jnp.float32),   # flattened fc1 input
        ],
    )
    # Note: for large batches, split the batch over a grid axis marked
    # "parallel" so v7x's two TensorCores share the work; at N=2 it is not worth it.
    x_flat = x.reshape(n_batch, CIN, GRID)                 # free row-major reshape
    return call(x_flat, *prepared)


# ---------------------------------------------------------------------------
# Plain-JAX reference (correctness cross-check)
# ---------------------------------------------------------------------------
def reference_forward(x, params):
    w1, b1, w2, b2, fw1, fb1, fw2, fb2, fw3, fb3 = params
    dn = ("NCHW", "OIHW", "NCHW")

    def conv(x, w, b):
        y = jax.lax.conv_general_dilated(x, w, (1, 1), "VALID", dimension_numbers=dn)
        return jnp.maximum(y + b[None, :, None, None], 0.0)

    def pool(x):
        return jax.lax.reduce_window(x, -jnp.inf, jax.lax.max,
                                     (1, 1, 2, 2), (1, 1, 2, 2), "VALID")

    x = pool(conv(x, w1, b1))
    x = pool(conv(x, w2, b2))
    x = x.reshape(-1, 16 * 5 * 5)
    x = jnp.maximum(x @ fw1.T + fb1, 0.0)
    x = jnp.maximum(x @ fw2.T + fb2, 0.0)
    x = x @ fw3.T + fb3
    return jax.nn.log_softmax(x, axis=-1)


# ---------------------------------------------------------------------------
# Deterministic parameter init (shapes from Net.__init__)
# ---------------------------------------------------------------------------
def init_params(key):
    ks = jax.random.split(key, 10)

    def w(k, shape, fan_in):
        return (jax.random.normal(k, shape, jnp.float32) / jnp.sqrt(fan_in)).astype(jnp.float32)

    def b(k, n):
        return (0.01 * jax.random.normal(k, (n,), jnp.float32)).astype(jnp.float32)

    w1 = w(ks[0], (C1, CIN, KH, KW), CIN * KH * KW);   b1 = b(ks[1], C1)
    w2 = w(ks[2], (C2, C1, KH, KW), C1 * KH * KW);     b2 = b(ks[3], C2)
    fw1 = w(ks[4], (FC1, C2 * 5 * 5), C2 * 5 * 5);     fb1 = b(ks[5], FC1)
    fw2 = w(ks[6], (FC2, FC1), FC1);                   fb2 = b(ks[7], FC2)
    fw3 = w(ks[8], (FC3, FC2), FC2);                   fb3 = b(ks[9], FC3)
    return (w1, b1, w2, b2, fw1, fb1, fw2, fb2, fw3, fb3)


if __name__ == "__main__":
    root = jax.random.PRNGKey(0)
    kp, kx = jax.random.split(root)
    params = init_params(kp)
    # Input must be (N, 3, 32, 32) so that x.view(-1, 16*5*5) is consistent.
    x = jax.random.normal(kx, (2, CIN, IMG, IMG), jnp.float32)

    prepared = prepare_params(params)          # one-time weight repack (outside jit)

    out = jax.block_until_ready(jax.jit(net_forward)(x, prepared))
    ref = jax.block_until_ready(jax.jit(reference_forward)(x, params))

    assert out.shape == (2, FC3), out.shape
    err = float(jnp.max(jnp.abs(out - ref)))
    assert jnp.allclose(out, ref, atol=1e-3, rtol=1e-3), f"mismatch: max abs err {err}"
    print("KERNEL_OK")
</pallas_src>

<mosaic_0001>
module attributes {stable_mosaic.version = 11 : i64} {
  func.func @_net_kernel(%arg0: memref<2x3x1024xf32, #tpu.memory_space<vmem>>, %arg1: memref<8x200xf32, #tpu.memory_space<vmem>>, %arg2: memref<8x1xf32, #tpu.memory_space<vmem>>, %arg3: memref<16x200xf32, #tpu.memory_space<vmem>>, %arg4: memref<16x1xf32, #tpu.memory_space<vmem>>, %arg5: memref<512x300xf32, #tpu.memory_space<vmem>>, %arg6: memref<1x300xf32, #tpu.memory_space<vmem>>, %arg7: memref<300x100xf32, #tpu.memory_space<vmem>>, %arg8: memref<1x100xf32, #tpu.memory_space<vmem>>, %arg9: memref<100x10xf32, #tpu.memory_space<vmem>>, %arg10: memref<1x10xf32, #tpu.memory_space<vmem>>, %arg11: memref<1024x25xf32, #tpu.memory_space<vmem>>, %arg12: memref<2x10xf32, #tpu.memory_space<vmem>>, %arg13: memref<8x2944xf32, #tpu.memory_space<vmem>>, %arg14: memref<200x2688xf32, #tpu.memory_space<vmem>>, %arg15: memref<8x2688xf32, #tpu.memory_space<vmem>>, %arg16: memref<8x2560xf32, #tpu.memory_space<vmem>>, %arg17: memref<16x2176xf32, #tpu.memory_space<vmem>>, %arg18: memref<2x512xf32, #tpu.memory_space<vmem>>) attributes {dimension_semantics = [], scalar_prefetch = 0 : i64, scratch_operands = 6 : i64, tpu.core_type = #tpu.core_type<tc>} {
    %cst = arith.constant 0.000000e+00 : f32
    %0 = vector.broadcast %cst : f32 to vector<8x2944xf32>
    %c0 = arith.constant 0 : index
    %c0_0 = arith.constant 0 : index
    %1 = vector.load %arg13[%c0, %c0_0] : memref<8x2944xf32, #tpu.memory_space<vmem>>, vector<8x2944xf32>
    tpu.vector_store %arg13[%c0, %c0_0], %0 {strides = array<i32>} : memref<8x2944xf32, #tpu.memory_space<vmem>>, vector<8x2944xf32>,
    %c0_1 = arith.constant 0 : index
    %c0_2 = arith.constant 0 : index
    %c0_3 = arith.constant 0 : index
    %2 = vector.load %arg0[%c0_1, %c0_2, %c0_3] : memref<2x3x1024xf32, #tpu.memory_space<vmem>>, vector<1x3x1024xf32>
    %3 = vector.shape_cast %2 : vector<1x3x1024xf32> to vector<3x1024xf32>
    %c0_4 = arith.constant 0 : index
    %c0_5 = arith.constant 0 : index
    %4 = vector.load %arg13[%c0_4, %c0_5] : memref<8x2944xf32, #tpu.memory_space<vmem>>, vector<3x1024xf32>
    tpu.vector_store %arg13[%c0_4, %c0_5], %3 {strides = array<i32>} : memref<8x2944xf32, #tpu.memory_space<vmem>>, vector<3x1024xf32>,
    %c1 = arith.constant 1 : index
    %c0_6 = arith.constant 0 : index
    %c0_7 = arith.constant 0 : index
    %5 = vector.load %arg0[%c1, %c0_6, %c0_7] : memref<2x3x1024xf32, #tpu.memory_space<vmem>>, vector<1x3x1024xf32>
    %6 = vector.shape_cast %5 : vector<1x3x1024xf32> to vector<3x1024xf32>
    %c0_8 = arith.constant 0 : index
    %c1024 = arith.constant 1024 : index
    %7 = vector.load %arg13[%c0_8, %c1024] : memref<8x2944xf32, #tpu.memory_space<vmem>>, vector<3x1024xf32>
    tpu.vector_store %arg13[%c0_8, %c1024], %6 {strides = array<i32>} : memref<8x2944xf32, #tpu.memory_space<vmem>>, vector<3x1024xf32>,
    %c0_9 = arith.constant 0 : index
    %c0_10 = arith.constant 0 : index
    %8 = vector.load %arg13[%c0_9, %c0_10] : memref<8x2944xf32, #tpu.memory_space<vmem>>, vector<8x2688xf32>
    %c0_11 = arith.constant 0 : index
    %c0_12 = arith.constant 0 : index
    %9 = vector.load %arg14[%c0_11, %c0_12] : memref<200x2688xf32, #tpu.memory_space<vmem>>, vector<8x2688xf32>
    tpu.vector_store %arg14[%c0_11, %c0_12], %8 {strides = array<i32>} : memref<200x2688xf32, #tpu.memory_space<vmem>>, vector<8x2688xf32>,
    %c0_13 = arith.constant 0 : index
    %c1_14 = arith.constant 1 : index
    %10 = vector.load %arg13[%c0_13, %c1_14] : memref<8x2944xf32, #tpu.memory_space<vmem>>, vector<8x2688xf32>
    %c8 = arith.constant 8 : index
    %c0_15 = arith.constant 0 : index
    %11 = vector.load %arg14[%c8, %c0_15] : memref<200x2688xf32, #tpu.memory_space<vmem>>, vector<8x2688xf32>
    tpu.vector_store %arg14[%c8, %c0_15], %10 {strides = array<i32>} : memref<200x2688xf32, #tpu.memory_space<vmem>>, vector<8x2688xf32>,
    %c0_16 = arith.constant 0 : index
    %c2 = arith.constant 2 : index
    %12 = vector.load %arg13[%c0_16, %c2] : memref<8x2944xf32, #tpu.memory_space<vmem>>, vector<8x2688xf32>
    %c16 = arith.constant 16 : index
    %c0_17 = arith.constant 0 : index
    %13 = vector.load %arg14[%c16, %c0_17] : memref<200x2688xf32, #tpu.memory_space<vmem>>, vector<8x2688xf32>
    tpu.vector_store %arg14[%c16, %c0_17], %12 {strides = array<i32>} : memref<200x2688xf32, #tpu.memory_space<vmem>>, vector<8x2688xf32>,
    %c0_18 = arith.constant 0 : index
    %c3 = arith.constant 3 : index
    %14 = vector.load %arg13[%c0_18, %c3] : memref<8x2944xf32, #tpu.memory_space<vmem>>, vector<8x2688xf32>
    %c24 = arith.constant 24 : index
    %c0_19 = arith.constant 0 : index
    %15 = vector.load %arg14[%c24, %c0_19] : memref<200x2688xf32, #tpu.memory_space<vmem>>, vector<8x2688xf32>
    tpu.vector_store %arg14[%c24, %c0_19], %14 {strides = array<i32>} : memref<200x2688xf32, #tpu.memory_space<vmem>>, vector<8x2688xf32>,
    %c0_20 = arith.constant 0 : index
    %c4 = arith.constant 4 : index
    %16 = vector.load %arg13[%c0_20, %c4] : memref<8x2944xf32, #tpu.memory_space<vmem>>, vector<8x2688xf32>
    %c32 = arith.constant 32 : index
    %c0_21 = arith.constant 0 : index
    %17 = vector.load %arg14[%c32, %c0_21] : memref<200x2688xf32, #tpu.memory_space<vmem>>, vector<8x2688xf32>
    tpu.vector_store %arg14[%c32, %c0_21], %16 {strides = array<i32>} : memref<200x2688xf32, #tpu.memory_space<vmem>>, vector<8x2688xf32>,
    %c0_22 = arith.constant 0 : index
    %c32_23 = arith.constant 32 : index
    %18 = vector.load %arg13[%c0_22, %c32_23] : memref<8x2944xf32, #tpu.memory_space<vmem>>, vector<8x2688xf32>
    %c40 = arith.constant 40 : index
    %c0_24 = arith.constant 0 : index
    %19 = vector.load %arg14[%c40, %c0_24] : memref<200x2688xf32, #tpu.memory_space<vmem>>, vector<8x2688xf32>
    tpu.vector_store %arg14[%c40, %c0_24], %18 {strides = array<i32>} : memref<200x2688xf32, #tpu.memory_space<vmem>>, vector<8x2688xf32>,
    %c0_25 = arith.constant 0 : index
    %c33 = arith.constant 33 : index
    %20 = vector.load %arg13[%c0_25, %c33] : memref<8x2944xf32, #tpu.memory_space<vmem>>, vector<8x2688xf32>
    %c48 = arith.constant 48 : index
    %c0_26 = arith.constant 0 : index
    %21 = vector.load %arg14[%c48, %c0_26] : memref<200x2688xf32, #tpu.memory_space<vmem>>, vector<8x2688xf32>
    tpu.vector_store %arg14[%c48, %c0_26], %20 {strides = array<i32>} : memref<200x2688xf32, #tpu.memory_space<vmem>>, vector<8x2688xf32>,
    %c0_27 = arith.constant 0 : index
    %c34 = arith.constant 34 : index
    %22 = vector.load %arg13[%c0_27, %c34] : memref<8x2944xf32, #tpu.memory_space<vmem>>, vector<8x2688xf32>
    %c56 = arith.constant 56 : index
    %c0_28 = arith.constant 0 : index
    %23 = vector.load %arg14[%c56, %c0_28] : memref<200x2688xf32, #tpu.memory_space<vmem>>, vector<8x2688xf32>
    tpu.vector_store %arg14[%c56, %c0_28], %22 {strides = array<i32>} : memref<200x2688xf32, #tpu.memory_space<vmem>>, vector<8x2688xf32>,
    %c0_29 = arith.constant 0 : index
    %c35 = arith.constant 35 : index
    %24 = vector.load %arg13[%c0_29, %c35] : memref<8x2944xf32, #tpu.memory_space<vmem>>, vector<8x2688xf32>
    %c64 = arith.constant 64 : index
    %c0_30 = arith.constant 0 : index
    %25 = vector.load %arg14[%c64, %c0_30] : memref<200x2688xf32, #tpu.memory_space<vmem>>, vector<8x2688xf32>
    tpu.vector_store %arg14[%c64, %c0_30], %24 {strides = array<i32>} : memref<200x2688xf32, #tpu.memory_space<vmem>>, vector<8x2688xf32>,
    %c0_31 = arith.constant 0 : index
    %c36 = arith.constant 36 : index
    %26 = vector.load %arg13[%c0_31, %c36] : memref<8x2944xf32, #tpu.memory_space<vmem>>, vector<8x2688xf32>
    %c72 = arith.constant 72 : index
    %c0_32 = arith.constant 0 : index
    %27 = vector.load %arg14[%c72, %c0_32] : memref<200x2688xf32, #tpu.memory_space<vmem>>, vector<8x2688xf32>
    tpu.vector_store %arg14[%c72, %c0_32], %26 {strides = array<i32>} : memref<200x2688xf32, #tpu.memory_space<vmem>>, vector<8x2688xf32>,
    %c0_33 = arith.constant 0 : index
    %c64_34 = arith.constant 64 : index
    %28 = vector.load %arg13[%c0_33, %c64_34] : memref<8x2944xf32, #tpu.memory_space<vmem>>, vector<8x2688xf32>
    %c80 = arith.constant 80 : index
    %c0_35 = arith.constant 0 : index
    %29 = vector.load %arg14[%c80, %c0_35] : memref<200x2688xf32, #tpu.memory_space<vmem>>, vector<8x2688xf32>
    tpu.vector_store %arg14[%c80, %c0_35], %28 {strides = array<i32>} : memref<200x2688xf32, #tpu.memory_space<vmem>>, vector<8x2688xf32>,
    %c0_36 = arith.constant 0 : index
    %c65 = arith.constant 65 : index
    %30 = vector.load %arg13[%c0_36, %c65] : memref<8x2944xf32, #tpu.memory_space<vmem>>, vector<8x2688xf32>
    %c88 = arith.constant 88 : index
    %c0_37 = arith.constant 0 : index
    %31 = vector.load %arg14[%c88, %c0_37] : memref<200x2688xf32, #tpu.memory_space<vmem>>, vector<8x2688xf32>
    tpu.vector_store %arg14[%c88, %c0_37], %30 {strides = array<i32>} : memref<200x2688xf32, #tpu.memory_space<vmem>>, vector<8x2688xf32>,
    %c0_38 = arith.constant 0 : index
    %c66 = arith.constant 66 : index
    %32 = vector.load %arg13[%c0_38, %c66] : memref<8x2944xf32, #tpu.memory_space<vmem>>, vector<8x2688xf32>
    %c96 = arith.constant 96 : index
    %c0_39 = arith.constant 0 : index
    %33 = vector.load %arg14[%c96, %c0_39] : memref<200x2688xf32, #tpu.memory_space<vmem>>, vector<8x2688xf32>
    tpu.vector_store %arg14[%c96, %c0_39], %32 {strides = array<i32>} : memref<200x2688xf32, #tpu.memory_space<vmem>>, vector<8x2688xf32>,
    %c0_40 = arith.constant 0 : index
    %c67 = arith.constant 67 : index
    %34 = vector.load %arg13[%c0_40, %c67] : memref<8x2944xf32, #tpu.memory_space<vmem>>, vector<8x2688xf32>
    %c104 = arith.constant 104 : index
    %c0_41 = arith.constant 0 : index
    %35 = vector.load %arg14[%c104, %c0_41] : memref<200x2688xf32, #tpu.memory_space<vmem>>, vector<8x2688xf32>
    tpu.vector_store %arg14[%c104, %c0_41], %34 {strides = array<i32>} : memref<200x2688xf32, #tpu.memory_space<vmem>>, vector<8x2688xf32>,
    %c0_42 = arith.constant 0 : index
    %c68 = arith.constant 68 : index
    %36 = vector.load %arg13[%c0_42, %c68] : memref<8x2944xf32, #tpu.memory_space<vmem>>, vector<8x2688xf32>
    %c112 = arith.constant 112 : index
    %c0_43 = arith.constant 0 : index
    %37 = vector.load %arg14[%c112, %c0_43] : memref<200x2688xf32, #tpu.memory_space<vmem>>, vector<8x2688xf32>
    tpu.vector_store %arg14[%c112, %c0_43], %36 {strides = array<i32>} : memref<200x2688xf32, #tpu.memory_space<vmem>>, vector<8x2688xf32>,
    %c0_44 = arith.constant 0 : index
    %c96_45 = arith.constant 96 : index
    %38 = vector.load %arg13[%c0_44, %c96_45] : memref<8x2944xf32, #tpu.memory_space<vmem>>, vector<8x2688xf32>
    %c120 = arith.constant 120 : index
    %c0_46 = arith.constant 0 : index
    %39 = vector.load %arg14[%c120, %c0_46] : memref<200x2688xf32, #tpu.memory_space<vmem>>, vector<8x2688xf32>
    tpu.vector_store %arg14[%c120, %c0_46], %38 {strides = array<i32>} : memref<200x2688xf32, #tpu.memory_space<vmem>>, vector<8x2688xf32>,
    %c0_47 = arith.constant 0 : index
    %c97 = arith.constant 97 : index
    %40 = vector.load %arg13[%c0_47, %c97] : memref<8x2944xf32, #tpu.memory_space<vmem>>, vector<8x2688xf32>
    %c128 = arith.constant 128 : index
    %c0_48 = arith.constant 0 : index
    %41 = vector.load %arg14[%c128, %c0_48] : memref<200x2688xf32, #tpu.memory_space<vmem>>, vector<8x2688xf32>
    tpu.vector_store %arg14[%c128, %c0_48], %40 {strides = array<i32>} : memref<200x2688xf32, #tpu.memory_space<vmem>>, vector<8x2688xf32>,
    %c0_49 = arith.constant 0 : index
    %c98 = arith.constant 98 : index
    %42 = vector.load %arg13[%c0_49, %c98] : memref<8x2944xf32, #tpu.memory_space<vmem>>, vector<8x2688xf32>
    %c136 = arith.constant 136 : index
    %c0_50 = arith.constant 0 : index
    %43 = vector.load %arg14[%c136, %c0_50] : memref<200x2688xf32, #tpu.memory_space<vmem>>, vector<8x2688xf32>
    tpu.vector_store %arg14[%c136, %c0_50], %42 {strides = array<i32>} : memref<200x2688xf32, #tpu.memory_space<vmem>>, vector<8x2688xf32>,
    %c0_51 = arith.constant 0 : index
    %c99 = arith.constant 99 : index
    %44 = vector.load %arg13[%c0_51, %c99] : memref<8x2944xf32, #tpu.memory_space<vmem>>, vector<8x2688xf32>
    %c144 = arith.constant 144 : index
    %c0_52 = arith.constant 0 : index
    %45 = vector.load %arg14[%c144, %c0_52] : memref<200x2688xf32, #tpu.memory_space<vmem>>, vector<8x2688xf32>
    tpu.vector_store %arg14[%c144, %c0_52], %44 {strides = array<i32>} : memref<200x2688xf32, #tpu.memory_space<vmem>>, vector<8x2688xf32>,
    %c0_53 = arith.constant 0 : index
    %c100 = arith.constant 100 : index
    %46 = vector.load %arg13[%c0_53, %c100] : memref<8x2944xf32, #tpu.memory_space<vmem>>, vector<8x2688xf32>
    %c152 = arith.constant 152 : index
    %c0_54 = arith.constant 0 : index
    %47 = vector.load %arg14[%c152, %c0_54] : memref<200x2688xf32, #tpu.memory_space<vmem>>, vector<8x2688xf32>
    tpu.vector_store %arg14[%c152, %c0_54], %46 {strides = array<i32>} : memref<200x2688xf32, #tpu.memory_space<vmem>>, vector<8x2688xf32>,
    %c0_55 = arith.constant 0 : index
    %c128_56 = arith.constant 128 : index
    %48 = vector.load %arg13[%c0_55, %c128_56] : memref<8x2944xf32, #tpu.memory_space<vmem>>, vector<8x2688xf32>
    %c160 = arith.constant 160 : index
    %c0_57 = arith.constant 0 : index
    %49 = vector.load %arg14[%c160, %c0_57] : memref<200x2688xf32, #tpu.memory_space<vmem>>, vector<8x2688xf32>
    tpu.vector_store %arg14[%c160, %c0_57], %48 {strides = array<i32>} : memref<200x2688xf32, #tpu.memory_space<vmem>>, vector<8x2688xf32>,
    %c0_58 = arith.constant 0 : index
    %c129 = arith.constant 129 : index
    %50 = vector.load %arg13[%c0_58, %c129] : memref<8x2944xf32, #tpu.memory_space<vmem>>, vector<8x2688xf32>
    %c168 = arith.constant 168 : index
    %c0_59 = arith.constant 0 : index
    %51 = vector.load %arg14[%c168, %c0_59] : memref<200x2688xf32, #tpu.memory_space<vmem>>, vector<8x2688xf32>
    tpu.vector_store %arg14[%c168, %c0_59], %50 {strides = array<i32>} : memref<200x2688xf32, #tpu.memory_space<vmem>>, vector<8x2688xf32>,
    %c0_60 = arith.constant 0 : index
    %c130 = arith.constant 130 : index
    %52 = vector.load %arg13[%c0_60, %c130] : memref<8x2944xf32, #tpu.memory_space<vmem>>, vector<8x2688xf32>
    %c176 = arith.constant 176 : index
    %c0_61 = arith.constant 0 : index
    %53 = vector.load %arg14[%c176, %c0_61] : memref<200x2688xf32, #tpu.memory_space<vmem>>, vector<8x2688xf32>
    tpu.vector_store %arg14[%c176, %c0_61], %52 {strides = array<i32>} : memref<200x2688xf32, #tpu.memory_space<vmem>>, vector<8x2688xf32>,
    %c0_62 = arith.constant 0 : index
    %c131 = arith.constant 131 : index
    %54 = vector.load %arg13[%c0_62, %c131] : memref<8x2944xf32, #tpu.memory_space<vmem>>, vector<8x2688xf32>
    %c184 = arith.constant 184 : index
    %c0_63 = arith.constant 0 : index
    %55 = vector.load %arg14[%c184, %c0_63] : memref<200x2688xf32, #tpu.memory_space<vmem>>, vector<8x2688xf32>
    tpu.vector_store %arg14[%c184, %c0_63], %54 {strides = array<i32>} : memref<200x2688xf32, #tpu.memory_space<vmem>>, vector<8x2688xf32>,
    %c0_64 = arith.constant 0 : index
    %c132 = arith.constant 132 : index
    %56 = vector.load %arg13[%c0_64, %c132] : memref<8x2944xf32, #tpu.memory_space<vmem>>, vector<8x2688xf32>
    %c192 = arith.constant 192 : index
    %c0_65 = arith.constant 0 : index
    %57 = vector.load %arg14[%c192, %c0_65] : memref<200x2688xf32, #tpu.memory_space<vmem>>, vector<8x2688xf32>
    tpu.vector_store %arg14[%c192, %c0_65], %56 {strides = array<i32>} : memref<200x2688xf32, #tpu.memory_space<vmem>>, vector<8x2688xf32>,
    %c0_66 = arith.constant 0 : index
    %c0_67 = arith.constant 0 : index
    %58 = vector.load %arg1[%c0_66, %c0_67] : memref<8x200xf32, #tpu.memory_space<vmem>>, vector<8x200xf32>
    %c0_68 = arith.constant 0 : index
    %c0_69 = arith.constant 0 : index
    %59 = vector.load %arg14[%c0_68, %c0_69] : memref<200x2688xf32, #tpu.memory_space<vmem>>, vector<200x2688xf32>
    %cst_70 = arith.constant dense<0.000000e+00> : vector<8x2688xf32>
    %60 = tpu.matmul %58, %59, %cst_70 {dimension_numbers = #tpu.dot_dimension_numbers<[1], [0], [0], [1], [0, 0, 1, 1], [], []>} : vector<8x200xf32>, vector<200x2688xf32>, vector<8x2688xf32> -> vector<8x2688xf32>
    %c0_71 = arith.constant 0 : index
    %c0_72 = arith.constant 0 : index
    %61 = vector.load %arg2[%c0_71, %c0_72] : memref<8x1xf32, #tpu.memory_space<vmem>>, vector<8x1xf32>
    %62 = vector.broadcast %61 : vector<8x1xf32> to vector<8x2688xf32>
    %63 = arith.addf %60, %62 : vector<8x2688xf32>
    %cst_73 = arith.constant 0.000000e+00 : f32
    %64 = vector.broadcast %cst_73 : f32 to vector<8x2688xf32>
    %65 = arith.maximumf %63, %64 : vector<8x2688xf32>
    %c0_74 = arith.constant 0 : index
    %c0_75 = arith.constant 0 : index
    %66 = vector.load %arg15[%c0_74, %c0_75] : memref<8x2688xf32, #tpu.memory_space<vmem>>, vector<8x2688xf32>
    tpu.vector_store %arg15[%c0_74, %c0_75], %65 {strides = array<i32>} : memref<8x2688xf32, #tpu.memory_space<vmem>>, vector<8x2688xf32>,
    %c0_76 = arith.constant 0 : index
    %c0_77 = arith.constant 0 : index
    %67 = vector.load %arg15[%c0_76, %c0_77] : memref<8x2688xf32, #tpu.memory_space<vmem>>, vector<8x2560xf32>
    %c0_78 = arith.constant 0 : index
    %c1_79 = arith.constant 1 : index
    %68 = vector.load %arg15[%c0_78, %c1_79] : memref<8x2688xf32, #tpu.memory_space<vmem>>, vector<8x2560xf32>
    %69 = arith.maximumf %67, %68 : vector<8x2560xf32>
    %c0_80 = arith.constant 0 : index
    %c32_81 = arith.constant 32 : index
    %70 = vector.load %arg15[%c0_80, %c32_81] : memref<8x2688xf32, #tpu.memory_space<vmem>>, vector<8x2560xf32>
    %c0_82 = arith.constant 0 : index
    %c33_83 = arith.constant 33 : index
    %71 = vector.load %arg15[%c0_82, %c33_83] : memref<8x2688xf32, #tpu.memory_space<vmem>>, vector<8x2560xf32>
    %72 = arith.maximumf %70, %71 : vector<8x2560xf32>
    %73 = arith.maximumf %69, %72 : vector<8x2560xf32>
    %c0_84 = arith.constant 0 : index
    %c0_85 = arith.constant 0 : index
    %74 = vector.load %arg16[%c0_84, %c0_85] : memref<8x2560xf32, #tpu.memory_space<vmem>>, vector<8x2560xf32>
    tpu.vector_store %arg16[%c0_84, %c0_85], %73 {strides = array<i32>} : memref<8x2560xf32, #tpu.memory_space<vmem>>, vector<8x2560xf32>,
    %c0_86 = arith.constant 0 : index
    %c0_87 = arith.constant 0 : index
    %75 = vector.load %arg16[%c0_86, %c0_87] : memref<8x2560xf32, #tpu.memory_space<vmem>>, vector<8x2176xf32>
    %c0_88 = arith.constant 0 : index
    %c0_89 = arith.constant 0 : index
    %76 = vector.load %arg14[%c0_88, %c0_89] : memref<200x2688xf32, #tpu.memory_space<vmem>>, vector<8x2176xf32>
    tpu.vector_store %arg14[%c0_88, %c0_89], %75 {strides = array<i32>} : memref<200x2688xf32, #tpu.memory_space<vmem>>, vector<8x2176xf32>,
    %c0_90 = arith.constant 0 : index
    %c2_91 = arith.constant 2 : index
    %77 = vector.load %arg16[%c0_90, %c2_91] : memref<8x2560xf32, #tpu.memory_space<vmem>>, vector<8x2176xf32>
    %c8_92 = arith.constant 8 : index
    %c0_93 = arith.constant 0 : index
    %78 = vector.load %arg14[%c8_92, %c0_93] : memref<200x2688xf32, #tpu.memory_space<vmem>>, vector<8x2176xf32>
    tpu.vector_store %arg14[%c8_92, %c0_93], %77 {strides = array<i32>} : memref<200x2688xf32, #tpu.memory_space<vmem>>, vector<8x2176xf32>,
    %c0_94 = arith.constant 0 : index
    %c4_95 = arith.constant 4 : index
    %79 = vector.load %arg16[%c0_94, %c4_95] : memref<8x2560xf32, #tpu.memory_space<vmem>>, vector<8x2176xf32>
    %c16_96 = arith.constant 16 : index
    %c0_97 = arith.constant 0 : index
    %80 = vector.load %arg14[%c16_96, %c0_97] : memref<200x2688xf32, #tpu.memory_space<vmem>>, vector<8x2176xf32>
    tpu.vector_store %arg14[%c16_96, %c0_97], %79 {strides = array<i32>} : memref<200x2688xf32, #tpu.memory_space<vmem>>, vector<8x2176xf32>,
    %c0_98 = arith.constant 0 : index
    %c6 = arith.constant 6 : index
    %81 = vector.load %arg16[%c0_98, %c6] : memref<8x2560xf32, #tpu.memory_space<vmem>>, vector<8x2176xf32>
    %c24_99 = arith.constant 24 : index
    %c0_100 = arith.constant 0 : index
    %82 = vector.load %arg14[%c24_99, %c0_100] : memref<200x2688xf32, #tpu.memory_space<vmem>>, vector<8x2176xf32>
    tpu.vector_store %arg14[%c24_99, %c0_100], %81 {strides = array<i32>} : memref<200x2688xf32, #tpu.memory_space<vmem>>, vector<8x2176xf32>,
    %c0_101 = arith.constant 0 : index
    %c8_102 = arith.constant 8 : index
    %83 = vector.load %arg16[%c0_101, %c8_102] : memref<8x2560xf32, #tpu.memory_space<vmem>>, vector<8x2176xf32>
    %c32_103 = arith.constant 32 : index
    %c0_104 = arith.constant 0 : index
    %84 = vector.load %arg14[%c32_103, %c0_104] : memref<200x2688xf32, #tpu.memory_space<vmem>>, vector<8x2176xf32>
    tpu.vector_store %arg14[%c32_103, %c0_104], %83 {strides = array<i32>} : memref<200x2688xf32, #tpu.memory_space<vmem>>, vector<8x2176xf32>,
    %c0_105 = arith.constant 0 : index
    %c64_106 = arith.constant 64 : index
    %85 = vector.load %arg16[%c0_105, %c64_106] : memref<8x2560xf32, #tpu.memory_space<vmem>>, vector<8x2176xf32>
    %c40_107 = arith.constant 40 : index
    %c0_108 = arith.constant 0 : index
    %86 = vector.load %arg14[%c40_107, %c0_108] : memref<200x2688xf32, #tpu.memory_space<vmem>>, vector<8x2176xf32>
    tpu.vector_store %arg14[%c40_107, %c0_108], %85 {strides = array<i32>} : memref<200x2688xf32, #tpu.memory_space<vmem>>, vector<8x2176xf32>,
    %c0_109 = arith.constant 0 : index
    %c66_110 = arith.constant 66 : index
    %87 = vector.load %arg16[%c0_109, %c66_110] : memref<8x2560xf32, #tpu.memory_space<vmem>>, vector<8x2176xf32>
    %c48_111 = arith.constant 48 : index
    %c0_112 = arith.constant 0 : index
    %88 = vector.load %arg14[%c48_111, %c0_112] : memref<200x2688xf32, #tpu.memory_space<vmem>>, vector<8x2176xf32>
    tpu.vector_store %arg14[%c48_111, %c0_112], %87 {strides = array<i32>} : memref<200x2688xf32, #tpu.memory_space<vmem>>, vector<8x2176xf32>,
    %c0_113 = arith.constant 0 : index
    %c68_114 = arith.constant 68 : index
    %89 = vector.load %arg16[%c0_113, %c68_114] : memref<8x2560xf32, #tpu.memory_space<vmem>>, vector<8x2176xf32>
    %c56_115 = arith.constant 56 : index
    %c0_116 = arith.constant 0 : index
    %90 = vector.load %arg14[%c56_115, %c0_116] : memref<200x2688xf32, #tpu.memory_space<vmem>>, vector<8x2176xf32>
    tpu.vector_store %arg14[%c56_115, %c0_116], %89 {strides = array<i32>} : memref<200x2688xf32, #tpu.memory_space<vmem>>, vector<8x2176xf32>,
    %c0_117 = arith.constant 0 : index
    %c70 = arith.constant 70 : index
    %91 = vector.load %arg16[%c0_117, %c70] : memref<8x2560xf32, #tpu.memory_space<vmem>>, vector<8x2176xf32>
    %c64_118 = arith.constant 64 : index
    %c0_119 = arith.constant 0 : index
    %92 = vector.load %arg14[%c64_118, %c0_119] : memref<200x2688xf32, #tpu.memory_space<vmem>>, vector<8x2176xf32>
    tpu.vector_store %arg14[%c64_118, %c0_119], %91 {strides = array<i32>} : memref<200x2688xf32, #tpu.memory_space<vmem>>, vector<8x2176xf32>,
    %c0_120 = arith.constant 0 : index
    %c72_121 = arith.constant 72 : index
    %93 = vector.load %arg16[%c0_120, %c72_121] : memref<8x2560xf32, #tpu.memory_space<vmem>>, vector<8x2176xf32>
    %c72_122 = arith.constant 72 : index
    %c0_123 = arith.constant 0 : index
    %94 = vector.load %arg14[%c72_122, %c0_123] : memref<200x2688xf32, #tpu.memory_space<vmem>>, vector<8x2176xf32>
    tpu.vector_store %arg14[%c72_122, %c0_123], %93 {strides = array<i32>} : memref<200x2688xf32, #tpu.memory_space<vmem>>, vector<8x2176xf32>,
    %c0_124 = arith.constant 0 : index
    %c128_125 = arith.constant 128 : index
    %95 = vector.load %arg16[%c0_124, %c128_125] : memref<8x2560xf32, #tpu.memory_space<vmem>>, vector<8x2176xf32>
    %c80_126 = arith.constant 80 : index
    %c0_127 = arith.constant 0 : index
    %96 = vector.load %arg14[%c80_126, %c0_127] : memref<200x2688xf32, #tpu.memory_space<vmem>>, vector<8x2176xf32>
    tpu.vector_store %arg14[%c80_126, %c0_127], %95 {strides = array<i32>} : memref<200x2688xf32, #tpu.memory_space<vmem>>, vector<8x2176xf32>,
    %c0_128 = arith.constant 0 : index
    %c130_129 = arith.constant 130 : index
    %97 = vector.load %arg16[%c0_128, %c130_129] : memref<8x2560xf32, #tpu.memory_space<vmem>>, vector<8x2176xf32>
    %c88_130 = arith.constant 88 : index
    %c0_131 = arith.constant 0 : index
    %98 = vector.load %arg14[%c88_130, %c0_131] : memref<200x2688xf32, #tpu.memory_space<vmem>>, vector<8x2176xf32>
    tpu.vector_store %arg14[%c88_130, %c0_131], %97 {strides = array<i32>} : memref<200x2688xf32, #tpu.memory_space<vmem>>, vector<8x2176xf32>,
    %c0_132 = arith.constant 0 : index
    %c132_133 = arith.constant 132 : index
    %99 = vector.load %arg16[%c0_132, %c132_133] : memref<8x2560xf32, #tpu.memory_space<vmem>>, vector<8x2176xf32>
    %c96_134 = arith.constant 96 : index
    %c0_135 = arith.constant 0 : index
    %100 = vector.load %arg14[%c96_134, %c0_135] : memref<200x2688xf32, #tpu.memory_space<vmem>>, vector<8x2176xf32>
    tpu.vector_store %arg14[%c96_134, %c0_135], %99 {strides = array<i32>} : memref<200x2688xf32, #tpu.memory_space<vmem>>, vector<8x2176xf32>,
    %c0_136 = arith.constant 0 : index
    %c134 = arith.constant 134 : index
    %101 = vector.load %arg16[%c0_136, %c134] : memref<8x2560xf32, #tpu.memory_space<vmem>>, vector<8x2176xf32>
    %c104_137 = arith.constant 104 : index
    %c0_138 = arith.constant 0 : index
    %102 = vector.load %arg14[%c104_137, %c0_138] : memref<200x2688xf32, #tpu.memory_space<vmem>>, vector<8x2176xf32>
    tpu.vector_store %arg14[%c104_137, %c0_138], %101 {strides = array<i32>} : memref<200x2688xf32, #tpu.memory_space<vmem>>, vector<8x2176xf32>,
    %c0_139 = arith.constant 0 : index
    %c136_140 = arith.constant 136 : index
    %103 = vector.load %arg16[%c0_139, %c136_140] : memref<8x2560xf32, #tpu.memory_space<vmem>>, vector<8x2176xf32>
    %c112_141 = arith.constant 112 : index
    %c0_142 = arith.constant 0 : index
    %104 = vector.load %arg14[%c112_141, %c0_142] : memref<200x2688xf32, #tpu.memory_space<vmem>>, vector<8x2176xf32>
    tpu.vector_store %arg14[%c112_141, %c0_142], %103 {strides = array<i32>} : memref<200x2688xf32, #tpu.memory_space<vmem>>, vector<8x2176xf32>,
    %c0_143 = arith.constant 0 : index
    %c192_144 = arith.constant 192 : index
    %105 = vector.load %arg16[%c0_143, %c192_144] : memref<8x2560xf32, #tpu.memory_space<vmem>>, vector<8x2176xf32>
    %c120_145 = arith.constant 120 : index
    %c0_146 = arith.constant 0 : index
    %106 = vector.load %arg14[%c120_145, %c0_146] : memref<200x2688xf32, #tpu.memory_space<vmem>>, vector<8x2176xf32>
    tpu.vector_store %arg14[%c120_145, %c0_146], %105 {strides = array<i32>} : memref<200x2688xf32, #tpu.memory_space<vmem>>, vector<8x2176xf32>,
    %c0_147 = arith.constant 0 : index
    %c194 = arith.constant 194 : index
    %107 = vector.load %arg16[%c0_147, %c194] : memref<8x2560xf32, #tpu.memory_space<vmem>>, vector<8x2176xf32>
    %c128_148 = arith.constant 128 : index
    %c0_149 = arith.constant 0 : index
    %108 = vector.load %arg14[%c128_148, %c0_149] : memref<200x2688xf32, #tpu.memory_space<vmem>>, vector<8x2176xf32>
    tpu.vector_store %arg14[%c128_148, %c0_149], %107 {strides = array<i32>} : memref<200x2688xf32, #tpu.memory_space<vmem>>, vector<8x2176xf32>,
    %c0_150 = arith.constant 0 : index
    %c196 = arith.constant 196 : index
    %109 = vector.load %arg16[%c0_150, %c196] : memref<8x2560xf32, #tpu.memory_space<vmem>>, vector<8x2176xf32>
    %c136_151 = arith.constant 136 : index
    %c0_152 = arith.constant 0 : index
    %110 = vector.load %arg14[%c136_151, %c0_152] : memref<200x2688xf32, #tpu.memory_space<vmem>>, vector<8x2176xf32>
    tpu.vector_store %arg14[%c136_151, %c0_152], %109 {strides = array<i32>} : memref<200x2688xf32, #tpu.memory_space<vmem>>, vector<8x2176xf32>,
    %c0_153 = arith.constant 0 : index
    %c198 = arith.constant 198 : index
    %111 = vector.load %arg16[%c0_153, %c198] : memref<8x2560xf32, #tpu.memory_space<vmem>>, vector<8x2176xf32>
    %c144_154 = arith.constant 144 : index
    %c0_155 = arith.constant 0 : index
    %112 = vector.load %arg14[%c144_154, %c0_155] : memref<200x2688xf32, #tpu.memory_space<vmem>>, vector<8x2176xf32>
    tpu.vector_store %arg14[%c144_154, %c0_155], %111 {strides = array<i32>} : memref<200x2688xf32, #tpu.memory_space<vmem>>, vector<8x2176xf32>,
    %c0_156 = arith.constant 0 : index
    %c200 = arith.constant 200 : index
    %113 = vector.load %arg16[%c0_156, %c200] : memref<8x2560xf32, #tpu.memory_space<vmem>>, vector<8x2176xf32>
    %c152_157 = arith.constant 152 : index
    %c0_158 = arith.constant 0 : index
    %114 = vector.load %arg14[%c152_157, %c0_158] : memref<200x2688xf32, #tpu.memory_space<vmem>>, vector<8x2176xf32>
    tpu.vector_store %arg14[%c152_157, %c0_158], %113 {strides = array<i32>} : memref<200x2688xf32, #tpu.memory_space<vmem>>, vector<8x2176xf32>,
    %c0_159 = arith.constant 0 : index
    %c256 = arith.constant 256 : index
    %115 = vector.load %arg16[%c0_159, %c256] : memref<8x2560xf32, #tpu.memory_space<vmem>>, vector<8x2176xf32>
    %c160_160 = arith.constant 160 : index
    %c0_161 = arith.constant 0 : index
    %116 = vector.load %arg14[%c160_160, %c0_161] : memref<200x2688xf32, #tpu.memory_space<vmem>>, vector<8x2176xf32>
    tpu.vector_store %arg14[%c160_160, %c0_161], %115 {strides = array<i32>} : memref<200x2688xf32, #tpu.memory_space<vmem>>, vector<8x2176xf32>,
    %c0_162 = arith.constant 0 : index
    %c258 = arith.constant 258 : index
    %117 = vector.load %arg16[%c0_162, %c258] : memref<8x2560xf32, #tpu.memory_space<vmem>>, vector<8x2176xf32>
    %c168_163 = arith.constant 168 : index
    %c0_164 = arith.constant 0 : index
    %118 = vector.load %arg14[%c168_163, %c0_164] : memref<200x2688xf32, #tpu.memory_space<vmem>>, vector<8x2176xf32>
    tpu.vector_store %arg14[%c168_163, %c0_164], %117 {strides = array<i32>} : memref<200x2688xf32, #tpu.memory_space<vmem>>, vector<8x2176xf32>,
    %c0_165 = arith.constant 0 : index
    %c260 = arith.constant 260 : index
    %119 = vector.load %arg16[%c0_165, %c260] : memref<8x2560xf32, #tpu.memory_space<vmem>>, vector<8x2176xf32>
    %c176_166 = arith.constant 176 : index
    %c0_167 = arith.constant 0 : index
    %120 = vector.load %arg14[%c176_166, %c0_167] : memref<200x2688xf32, #tpu.memory_space<vmem>>, vector<8x2176xf32>
    tpu.vector_store %arg14[%c176_166, %c0_167], %119 {strides = array<i32>} : memref<200x2688xf32, #tpu.memory_space<vmem>>, vector<8x2176xf32>,
    %c0_168 = arith.constant 0 : index
    %c262 = arith.constant 262 : index
    %121 = vector.load %arg16[%c0_168, %c262] : memref<8x2560xf32, #tpu.memory_space<vmem>>, vector<8x2176xf32>
    %c184_169 = arith.constant 184 : index
    %c0_170 = arith.constant 0 : index
    %122 = vector.load %arg14[%c184_169, %c0_170] : memref<200x2688xf32, #tpu.memory_space<vmem>>, vector<8x2176xf32>
    tpu.vector_store %arg14[%c184_169, %c0_170], %121 {strides = array<i32>} : memref<200x2688xf32, #tpu.memory_space<vmem>>, vector<8x2176xf32>,
    %c0_171 = arith.constant 0 : index
    %c264 = arith.constant 264 : index
    %123 = vector.load %arg16[%c0_171, %c264] : memref<8x2560xf32, #tpu.memory_space<vmem>>, vector<8x2176xf32>
    %c192_172 = arith.constant 192 : index
    %c0_173 = arith.constant 0 : index
    %124 = vector.load %arg14[%c192_172, %c0_173] : memref<200x2688xf32, #tpu.memory_space<vmem>>, vector<8x2176xf32>
    tpu.vector_store %arg14[%c192_172, %c0_173], %123 {strides = array<i32>} : memref<200x2688xf32, #tpu.memory_space<vmem>>, vector<8x2176xf32>,
    %c0_174 = arith.constant 0 : index
    %c0_175 = arith.constant 0 : index
    %125 = vector.load %arg3[%c0_174, %c0_175] : memref<16x200xf32, #tpu.memory_space<vmem>>, vector<16x200xf32>
    %c0_176 = arith.constant 0 : index
    %c0_177 = arith.constant 0 : index
    %126 = vector.load %arg14[%c0_176, %c0_177] : memref<200x2688xf32, #tpu.memory_space<vmem>>, vector<200x2176xf32>
    %cst_178 = arith.constant dense<0.000000e+00> : vector<16x2176xf32>
    %127 = tpu.matmul %125, %126, %cst_178 {dimension_numbers = #tpu.dot_dimension_numbers<[1], [0], [0], [1], [0, 0, 1, 1], [], []>} : vector<16x200xf32>, vector<200x2176xf32>, vector<16x2176xf32> -> vector<16x2176xf32>
    %c0_179 = arith.constant 0 : index
    %c0_180 = arith.constant 0 : index
    %128 = vector.load %arg4[%c0_179, %c0_180] : memref<16x1xf32, #tpu.memory_space<vmem>>, vector<16x1xf32>
    %129 = vector.broadcast %128 : vector<16x1xf32> to vector<16x2176xf32>
    %130 = arith.addf %127, %129 : vector<16x2176xf32>
    %cst_181 = arith.constant 0.000000e+00 : f32
    %131 = vector.broadcast %cst_181 : f32 to vector<16x2176xf32>
    %132 = arith.maximumf %130, %131 : vector<16x2176xf32>
    %c0_182 = arith.constant 0 : index
    %c0_183 = arith.constant 0 : index
    %133 = vector.load %arg17[%c0_182, %c0_183] : memref<16x2176xf32, #tpu.memory_space<vmem>>, vector<16x2176xf32>
    tpu.vector_store %arg17[%c0_182, %c0_183], %132 {strides = array<i32>} : memref<16x2176xf32, #tpu.memory_space<vmem>>, vector<16x2176xf32>,
    %c0_184 = arith.constant 0 : index
    %c0_185 = arith.constant 0 : index
    %134 = vector.load %arg17[%c0_184, %c0_185] : memref<16x2176xf32, #tpu.memory_space<vmem>>, vector<16x2048xf32>
    %c0_186 = arith.constant 0 : index
    %c2_187 = arith.constant 2 : index
    %135 = vector.load %arg17[%c0_186, %c2_187] : memref<16x2176xf32, #tpu.memory_space<vmem>>, vector<16x2048xf32>
    %136 = arith.maximumf %134, %135 : vector<16x2048xf32>
    %c0_188 = arith.constant 0 : index
    %c64_189 = arith.constant 64 : index
    %137 = vector.load %arg17[%c0_188, %c64_189] : memref<16x2176xf32, #tpu.memory_space<vmem>>, vector<16x2048xf32>
    %c0_190 = arith.constant 0 : index
    %c66_191 = arith.constant 66 : index
    %138 = vector.load %arg17[%c0_190, %c66_191] : memref<16x2176xf32, #tpu.memory_space<vmem>>, vector<16x2048xf32>
    %139 = arith.maximumf %137, %138 : vector<16x2048xf32>
    %140 = arith.maximumf %136, %139 : vector<16x2048xf32>
    %cst_192 = arith.constant 0.000000e+00 : f32
    %141 = vector.broadcast %cst_192 : f32 to vector<2x512xf32>
    %c0_193 = arith.constant 0 : index
    %c0_194 = arith.constant 0 : index
    %142 = vector.load %arg18[%c0_193, %c0_194] : memref<2x512xf32, #tpu.memory_space<vmem>>, vector<2x512xf32>
    tpu.vector_store %arg18[%c0_193, %c0_194], %141 {strides = array<i32>} : memref<2x512xf32, #tpu.memory_space<vmem>>, vector<2x512xf32>,
    %143 = vector.extract_strided_slice %140 {offsets = [0, 0], sizes = [16, 1024], strides = [1, 1]} : vector<16x2048xf32> to vector<16x1024xf32>
    %c0_195 = arith.constant 0 : index
    %c0_196 = arith.constant 0 : index
    %144 = vector.load %arg11[%c0_195, %c0_196] : memref<1024x25xf32, #tpu.memory_space<vmem>>, vector<1024x25xf32>
    %cst_197 = arith.constant dense<0.000000e+00> : vector<16x25xf32>
    %145 = tpu.matmul %143, %144, %cst_197 {dimension_numbers = #tpu.dot_dimension_numbers<[1], [0], [0], [1], [0, 0, 1, 1], [], []>} : vector<16x1024xf32>, vector<1024x25xf32>, vector<16x25xf32> -> vector<16x25xf32>
    %146 = vector.extract_strided_slice %145 {offsets = [0, 0], sizes = [1, 25], strides = [1, 1]} : vector<16x25xf32> to vector<1x25xf32>
    %c0_198 = arith.constant 0 : index
    %c0_199 = arith.constant 0 : index
    %147 = vector.load %arg18[%c0_198, %c0_199] : memref<2x512xf32, #tpu.memory_space<vmem>>, vector<1x25xf32>
    tpu.vector_store %arg18[%c0_198, %c0_199], %146 {strides = array<i32>} : memref<2x512xf32, #tpu.memory_space<vmem>>, vector<1x25xf32>,
    %148 = vector.extract_strided_slice %145 {offsets = [1, 0], sizes = [1, 25], strides = [1, 1]} : vector<16x25xf32> to vector<1x25xf32>
    %c0_200 = arith.constant 0 : index
    %c32_201 = arith.constant 32 : index
    %149 = vector.load %arg18[%c0_200, %c32_201] : memref<2x512xf32, #tpu.memory_space<vmem>>, vector<1x25xf32>
    tpu.vector_store %arg18[%c0_200, %c32_201], %148 {strides = array<i32>} : memref<2x512xf32, #tpu.memory_space<vmem>>, vector<1x25xf32>,
    %150 = vector.extract_strided_slice %145 {offsets = [2, 0], sizes = [1, 25], strides = [1, 1]} : vector<16x25xf32> to vector<1x25xf32>
    %c0_202 = arith.constant 0 : index
    %c64_203 = arith.constant 64 : index
    %151 = vector.load %arg18[%c0_202, %c64_203] : memref<2x512xf32, #tpu.memory_space<vmem>>, vector<1x25xf32>
    tpu.vector_store %arg18[%c0_202, %c64_203], %150 {strides = array<i32>} : memref<2x512xf32, #tpu.memory_space<vmem>>, vector<1x25xf32>,
    %152 = vector.extract_strided_slice %145 {offsets = [3, 0], sizes = [1, 25], strides = [1, 1]} : vector<16x25xf32> to vector<1x25xf32>
    %c0_204 = arith.constant 0 : index
    %c96_205 = arith.constant 96 : index
    %153 = vector.load %arg18[%c0_204, %c96_205] : memref<2x512xf32, #tpu.memory_space<vmem>>, vector<1x25xf32>
    tpu.vector_store %arg18[%c0_204, %c96_205], %152 {strides = array<i32>} : memref<2x512xf32, #tpu.memory_space<vmem>>, vector<1x25xf32>,
    %154 = vector.extract_strided_slice %145 {offsets = [4, 0], sizes = [1, 25], strides = [1, 1]} : vector<16x25xf32> to vector<1x25xf32>
    %c0_206 = arith.constant 0 : index
    %c128_207 = arith.constant 128 : index
    %155 = vector.load %arg18[%c0_206, %c128_207] : memref<2x512xf32, #tpu.memory_space<vmem>>, vector<1x25xf32>
    tpu.vector_store %arg18[%c0_206, %c128_207], %154 {strides = array<i32>} : memref<2x512xf32, #tpu.memory_space<vmem>>, vector<1x25xf32>,
    %156 = vector.extract_strided_slice %145 {offsets = [5, 0], sizes = [1, 25], strides = [1, 1]} : vector<16x25xf32> to vector<1x25xf32>
    %c0_208 = arith.constant 0 : index
    %c160_209 = arith.constant 160 : index
    %157 = vector.load %arg18[%c0_208, %c160_209] : memref<2x512xf32, #tpu.memory_space<vmem>>, vector<1x25xf32>
    tpu.vector_store %arg18[%c0_208, %c160_209], %156 {strides = array<i32>} : memref<2x512xf32, #tpu.memory_space<vmem>>, vector<1x25xf32>,
    %158 = vector.extract_strided_slice %145 {offsets = [6, 0], sizes = [1, 25], strides = [1, 1]} : vector<16x25xf32> to vector<1x25xf32>
    %c0_210 = arith.constant 0 : index
    %c192_211 = arith.constant 192 : index
    %159 = vector.load %arg18[%c0_210, %c192_211] : memref<2x512xf32, #tpu.memory_space<vmem>>, vector<1x25xf32>
    tpu.vector_store %arg18[%c0_210, %c192_211], %158 {strides = array<i32>} : memref<2x512xf32, #tpu.memory_space<vmem>>, vector<1x25xf32>,
    %160 = vector.extract_strided_slice %145 {offsets = [7, 0], sizes = [1, 25], strides = [1, 1]} : vector<16x25xf32> to vector<1x25xf32>
    %c0_212 = arith.constant 0 : index
    %c224 = arith.constant 224 : index
    %161 = vector.load %arg18[%c0_212, %c224] : memref<2x512xf32, #tpu.memory_space<vmem>>, vector<1x25xf32>
    tpu.vector_store %arg18[%c0_212, %c224], %160 {strides = array<i32>} : memref<2x512xf32, #tpu.memory_space<vmem>>, vector<1x25xf32>,
    %162 = vector.extract_strided_slice %145 {offsets = [8, 0], sizes = [1, 25], strides = [1, 1]} : vector<16x25xf32> to vector<1x25xf32>
    %c0_213 = arith.constant 0 : index
    %c256_214 = arith.constant 256 : index
    %163 = vector.load %arg18[%c0_213, %c256_214] : memref<2x512xf32, #tpu.memory_space<vmem>>, vector<1x25xf32>
    tpu.vector_store %arg18[%c0_213, %c256_214], %162 {strides = array<i32>} : memref<2x512xf32, #tpu.memory_space<vmem>>, vector<1x25xf32>,
    %164 = vector.extract_strided_slice %145 {offsets = [9, 0], sizes = [1, 25], strides = [1, 1]} : vector<16x25xf32> to vector<1x25xf32>
    %c0_215 = arith.constant 0 : index
    %c288 = arith.constant 288 : index
    %165 = vector.load %arg18[%c0_215, %c288] : memref<2x512xf32, #tpu.memory_space<vmem>>, vector<1x25xf32>
    tpu.vector_store %arg18[%c0_215, %c288], %164 {strides = array<i32>} : memref<2x512xf32, #tpu.memory_space<vmem>>, vector<1x25xf32>,
    %166 = vector.extract_strided_slice %145 {offsets = [10, 0], sizes = [1, 25], strides = [1, 1]} : vector<16x25xf32> to vector<1x25xf32>
    %c0_216 = arith.constant 0 : index
    %c320 = arith.constant 320 : index
    %167 = vector.load %arg18[%c0_216, %c320] : memref<2x512xf32, #tpu.memory_space<vmem>>, vector<1x25xf32>
    tpu.vector_store %arg18[%c0_216, %c320], %166 {strides = array<i32>} : memref<2x512xf32, #tpu.memory_space<vmem>>, vector<1x25xf32>,
    %168 = vector.extract_strided_slice %145 {offsets = [11, 0], sizes = [1, 25], strides = [1, 1]} : vector<16x25xf32> to vector<1x25xf32>
    %c0_217 = arith.constant 0 : index
    %c352 = arith.constant 352 : index
    %169 = vector.load %arg18[%c0_217, %c352] : memref<2x512xf32, #tpu.memory_space<vmem>>, vector<1x25xf32>
    tpu.vector_store %arg18[%c0_217, %c352], %168 {strides = array<i32>} : memref<2x512xf32, #tpu.memory_space<vmem>>, vector<1x25xf32>,
    %170 = vector.extract_strided_slice %145 {offsets = [12, 0], sizes = [1, 25], strides = [1, 1]} : vector<16x25xf32> to vector<1x25xf32>
    %c0_218 = arith.constant 0 : index
    %c384 = arith.constant 384 : index
    %171 = vector.load %arg18[%c0_218, %c384] : memref<2x512xf32, #tpu.memory_space<vmem>>, vector<1x25xf32>
    tpu.vector_store %arg18[%c0_218, %c384], %170 {strides = array<i32>} : memref<2x512xf32, #tpu.memory_space<vmem>>, vector<1x25xf32>,
    %172 = vector.extract_strided_slice %145 {offsets = [13, 0], sizes = [1, 25], strides = [1, 1]} : vector<16x25xf32> to vector<1x25xf32>
    %c0_219 = arith.constant 0 : index
    %c416 = arith.constant 416 : index
    %173 = vector.load %arg18[%c0_219, %c416] : memref<2x512xf32, #tpu.memory_space<vmem>>, vector<1x25xf32>
    tpu.vector_store %arg18[%c0_219, %c416], %172 {strides = array<i32>} : memref<2x512xf32, #tpu.memory_space<vmem>>, vector<1x25xf32>,
    %174 = vector.extract_strided_slice %145 {offsets = [14, 0], sizes = [1, 25], strides = [1, 1]} : vector<16x25xf32> to vector<1x25xf32>
    %c0_220 = arith.constant 0 : index
    %c448 = arith.constant 448 : index
    %175 = vector.load %arg18[%c0_220, %c448] : memref<2x512xf32, #tpu.memory_space<vmem>>, vector<1x25xf32>
    tpu.vector_store %arg18[%c0_220, %c448], %174 {strides = array<i32>} : memref<2x512xf32, #tpu.memory_space<vmem>>, vector<1x25xf32>,
    %176 = vector.extract_strided_slice %145 {offsets = [15, 0], sizes = [1, 25], strides = [1, 1]} : vector<16x25xf32> to vector<1x25xf32>
    %c0_221 = arith.constant 0 : index
    %c480 = arith.constant 480 : index
    %177 = vector.load %arg18[%c0_221, %c480] : memref<2x512xf32, #tpu.memory_space<vmem>>, vector<1x25xf32>
    tpu.vector_store %arg18[%c0_221, %c480], %176 {strides = array<i32>} : memref<2x512xf32, #tpu.memory_space<vmem>>, vector<1x25xf32>,
    %178 = vector.extract_strided_slice %140 {offsets = [0, 1024], sizes = [16, 1024], strides = [1, 1]} : vector<16x2048xf32> to vector<16x1024xf32>
    %c0_222 = arith.constant 0 : index
    %c0_223 = arith.constant 0 : index
    %179 = vector.load %arg11[%c0_222, %c0_223] : memref<1024x25xf32, #tpu.memory_space<vmem>>, vector<1024x25xf32>
    %cst_224 = arith.constant dense<0.000000e+00> : vector<16x25xf32>
    %180 = tpu.matmul %178, %179, %cst_224 {dimension_numbers = #tpu.dot_dimension_numbers<[1], [0], [0], [1], [0, 0, 1, 1], [], []>} : vector<16x1024xf32>, vector<1024x25xf32>, vector<16x25xf32> -> vector<16x25xf32>
    %181 = vector.extract_strided_slice %180 {offsets = [0, 0], sizes = [1, 25], strides = [1, 1]} : vector<16x25xf32> to vector<1x25xf32>
    %c1_225 = arith.constant 1 : index
    %c0_226 = arith.constant 0 : index
    %182 = vector.load %arg18[%c1_225, %c0_226] : memref<2x512xf32, #tpu.memory_space<vmem>>, vector<1x25xf32>
    tpu.vector_store %arg18[%c1_225, %c0_226], %181 {strides = array<i32>} : memref<2x512xf32, #tpu.memory_space<vmem>>, vector<1x25xf32>,
    %183 = vector.extract_strided_slice %180 {offsets = [1, 0], sizes = [1, 25], strides = [1, 1]} : vector<16x25xf32> to vector<1x25xf32>
    %c1_227 = arith.constant 1 : index
    %c32_228 = arith.constant 32 : index
    %184 = vector.load %arg18[%c1_227, %c32_228] : memref<2x512xf32, #tpu.memory_space<vmem>>, vector<1x25xf32>
    tpu.vector_store %arg18[%c1_227, %c32_228], %183 {strides = array<i32>} : memref<2x512xf32, #tpu.memory_space<vmem>>, vector<1x25xf32>,
    %185 = vector.extract_strided_slice %180 {offsets = [2, 0], sizes = [1, 25], strides = [1, 1]} : vector<16x25xf32> to vector<1x25xf32>
    %c1_229 = arith.constant 1 : index
    %c64_230 = arith.constant 64 : index
    %186 = vector.load %arg18[%c1_229, %c64_230] : memref<2x512xf32, #tpu.memory_space<vmem>>, vector<1x25xf32>
    tpu.vector_store %arg18[%c1_229, %c64_230], %185 {strides = array<i32>} : memref<2x512xf32, #tpu.memory_space<vmem>>, vector<1x25xf32>,
    %187 = vector.extract_strided_slice %180 {offsets = [3, 0], sizes = [1, 25], strides = [1, 1]} : vector<16x25xf32> to vector<1x25xf32>
    %c1_231 = arith.constant 1 : index
    %c96_232 = arith.constant 96 : index
    %188 = vector.load %arg18[%c1_231, %c96_232] : memref<2x512xf32, #tpu.memory_space<vmem>>, vector<1x25xf32>
    tpu.vector_store %arg18[%c1_231, %c96_232], %187 {strides = array<i32>} : memref<2x512xf32, #tpu.memory_space<vmem>>, vector<1x25xf32>,
    %189 = vector.extract_strided_slice %180 {offsets = [4, 0], sizes = [1, 25], strides = [1, 1]} : vector<16x25xf32> to vector<1x25xf32>
    %c1_233 = arith.constant 1 : index
    %c128_234 = arith.constant 128 : index
    %190 = vector.load %arg18[%c1_233, %c128_234] : memref<2x512xf32, #tpu.memory_space<vmem>>, vector<1x25xf32>
    tpu.vector_store %arg18[%c1_233, %c128_234], %189 {strides = array<i32>} : memref<2x512xf32, #tpu.memory_space<vmem>>, vector<1x25xf32>,
    %191 = vector.extract_strided_slice %180 {offsets = [5, 0], sizes = [1, 25], strides = [1, 1]} : vector<16x25xf32> to vector<1x25xf32>
    %c1_235 = arith.constant 1 : index
    %c160_236 = arith.constant 160 : index
    %192 = vector.load %arg18[%c1_235, %c160_236] : memref<2x512xf32, #tpu.memory_space<vmem>>, vector<1x25xf32>
    tpu.vector_store %arg18[%c1_235, %c160_236], %191 {strides = array<i32>} : memref<2x512xf32, #tpu.memory_space<vmem>>, vector<1x25xf32>,
    %193 = vector.extract_strided_slice %180 {offsets = [6, 0], sizes = [1, 25], strides = [1, 1]} : vector<16x25xf32> to vector<1x25xf32>
    %c1_237 = arith.constant 1 : index
    %c192_238 = arith.constant 192 : index
    %194 = vector.load %arg18[%c1_237, %c192_238] : memref<2x512xf32, #tpu.memory_space<vmem>>, vector<1x25xf32>
    tpu.vector_store %arg18[%c1_237, %c192_238], %193 {strides = array<i32>} : memref<2x512xf32, #tpu.memory_space<vmem>>, vector<1x25xf32>,
    %195 = vector.extract_strided_slice %180 {offsets = [7, 0], sizes = [1, 25], strides = [1, 1]} : vector<16x25xf32> to vector<1x25xf32>
    %c1_239 = arith.constant 1 : index
    %c224_240 = arith.constant 224 : index
    %196 = vector.load %arg18[%c1_239, %c224_240] : memref<2x512xf32, #tpu.memory_space<vmem>>, vector<1x25xf32>
    tpu.vector_store %arg18[%c1_239, %c224_240], %195 {strides = array<i32>} : memref<2x512xf32, #tpu.memory_space<vmem>>, vector<1x25xf32>,
    %197 = vector.extract_strided_slice %180 {offsets = [8, 0], sizes = [1, 25], strides = [1, 1]} : vector<16x25xf32> to vector<1x25xf32>
    %c1_241 = arith.constant 1 : index
    %c256_242 = arith.constant 256 : index
    %198 = vector.load %arg18[%c1_241, %c256_242] : memref<2x512xf32, #tpu.memory_space<vmem>>, vector<1x25xf32>
    tpu.vector_store %arg18[%c1_241, %c256_242], %197 {strides = array<i32>} : memref<2x512xf32, #tpu.memory_space<vmem>>, vector<1x25xf32>,
    %199 = vector.extract_strided_slice %180 {offsets = [9, 0], sizes = [1, 25], strides = [1, 1]} : vector<16x25xf32> to vector<1x25xf32>
    %c1_243 = arith.constant 1 : index
    %c288_244 = arith.constant 288 : index
    %200 = vector.load %arg18[%c1_243, %c288_244] : memref<2x512xf32, #tpu.memory_space<vmem>>, vector<1x25xf32>
    tpu.vector_store %arg18[%c1_243, %c288_244], %199 {strides = array<i32>} : memref<2x512xf32, #tpu.memory_space<vmem>>, vector<1x25xf32>,
    %201 = vector.extract_strided_slice %180 {offsets = [10, 0], sizes = [1, 25], strides = [1, 1]} : vector<16x25xf32> to vector<1x25xf32>
    %c1_245 = arith.constant 1 : index
    %c320_246 = arith.constant 320 : index
    %202 = vector.load %arg18[%c1_245, %c320_246] : memref<2x512xf32, #tpu.memory_space<vmem>>, vector<1x25xf32>
    tpu.vector_store %arg18[%c1_245, %c320_246], %201 {strides = array<i32>} : memref<2x512xf32, #tpu.memory_space<vmem>>, vector<1x25xf32>,
    %203 = vector.extract_strided_slice %180 {offsets = [11, 0], sizes = [1, 25], strides = [1, 1]} : vector<16x25xf32> to vector<1x25xf32>
    %c1_247 = arith.constant 1 : index
    %c352_248 = arith.constant 352 : index
    %204 = vector.load %arg18[%c1_247, %c352_248] : memref<2x512xf32, #tpu.memory_space<vmem>>, vector<1x25xf32>
    tpu.vector_store %arg18[%c1_247, %c352_248], %203 {strides = array<i32>} : memref<2x512xf32, #tpu.memory_space<vmem>>, vector<1x25xf32>,
    %205 = vector.extract_strided_slice %180 {offsets = [12, 0], sizes = [1, 25], strides = [1, 1]} : vector<16x25xf32> to vector<1x25xf32>
    %c1_249 = arith.constant 1 : index
    %c384_250 = arith.constant 384 : index
    %206 = vector.load %arg18[%c1_249, %c384_250] : memref<2x512xf32, #tpu.memory_space<vmem>>, vector<1x25xf32>
    tpu.vector_store %arg18[%c1_249, %c384_250], %205 {strides = array<i32>} : memref<2x512xf32, #tpu.memory_space<vmem>>, vector<1x25xf32>,
    %207 = vector.extract_strided_slice %180 {offsets = [13, 0], sizes = [1, 25], strides = [1, 1]} : vector<16x25xf32> to vector<1x25xf32>
    %c1_251 = arith.constant 1 : index
    %c416_252 = arith.constant 416 : index
    %208 = vector.load %arg18[%c1_251, %c416_252] : memref<2x512xf32, #tpu.memory_space<vmem>>, vector<1x25xf32>
    tpu.vector_store %arg18[%c1_251, %c416_252], %207 {strides = array<i32>} : memref<2x512xf32, #tpu.memory_space<vmem>>, vector<1x25xf32>,
    %209 = vector.extract_strided_slice %180 {offsets = [14, 0], sizes = [1, 25], strides = [1, 1]} : vector<16x25xf32> to vector<1x25xf32>
    %c1_253 = arith.constant 1 : index
    %c448_254 = arith.constant 448 : index
    %210 = vector.load %arg18[%c1_253, %c448_254] : memref<2x512xf32, #tpu.memory_space<vmem>>, vector<1x25xf32>
    tpu.vector_store %arg18[%c1_253, %c448_254], %209 {strides = array<i32>} : memref<2x512xf32, #tpu.memory_space<vmem>>, vector<1x25xf32>,
    %211 = vector.extract_strided_slice %180 {offsets = [15, 0], sizes = [1, 25], strides = [1, 1]} : vector<16x25xf32> to vector<1x25xf32>
    %c1_255 = arith.constant 1 : index
    %c480_256 = arith.constant 480 : index
    %212 = vector.load %arg18[%c1_255, %c480_256] : memref<2x512xf32, #tpu.memory_space<vmem>>, vector<1x25xf32>
    tpu.vector_store %arg18[%c1_255, %c480_256], %211 {strides = array<i32>} : memref<2x512xf32, #tpu.memory_space<vmem>>, vector<1x25xf32>,
    %c0_257 = arith.constant 0 : index
    %c0_258 = arith.constant 0 : index
    %213 = vector.load %arg18[%c0_257, %c0_258] : memref<2x512xf32, #tpu.memory_space<vmem>>, vector<2x512xf32>
    %c0_259 = arith.constant 0 : index
    %c0_260 = arith.constant 0 : index
    %214 = vector.load %arg5[%c0_259, %c0_260] : memref<512x300xf32, #tpu.memory_space<vmem>>, vector<512x300xf32>
    %cst_261 = arith.constant dense<0.000000e+00> : vector<2x300xf32>
    %215 = tpu.matmul %213, %214, %cst_261 {dimension_numbers = #tpu.dot_dimension_numbers<[1], [0], [0], [1], [0, 0, 1, 1], [], []>} : vector<2x512xf32>, vector<512x300xf32>, vector<2x300xf32> -> vector<2x300xf32>
    %c0_262 = arith.constant 0 : index
    %c0_263 = arith.constant 0 : index
    %216 = vector.load %arg6[%c0_262, %c0_263] : memref<1x300xf32, #tpu.memory_space<vmem>>, vector<1x300xf32>
    %217 = vector.broadcast %216 : vector<1x300xf32> to vector<2x300xf32>
    %218 = arith.addf %215, %217 : vector<2x300xf32>
    %cst_264 = arith.constant 0.000000e+00 : f32
    %219 = vector.broadcast %cst_264 : f32 to vector<2x300xf32>
    %220 = arith.maximumf %218, %219 : vector<2x300xf32>
    %c0_265 = arith.constant 0 : index
    %c0_266 = arith.constant 0 : index
    %221 = vector.load %arg7[%c0_265, %c0_266] : memref<300x100xf32, #tpu.memory_space<vmem>>, vector<300x100xf32>
    %cst_267 = arith.constant dense<0.000000e+00> : vector<2x100xf32>
    %222 = tpu.matmul %220, %221, %cst_267 {dimension_numbers = #tpu.dot_dimension_numbers<[1], [0], [0], [1], [0, 0, 1, 1], [], []>} : vector<2x300xf32>, vector<300x100xf32>, vector<2x100xf32> -> vector<2x100xf32>
    %c0_268 = arith.constant 0 : index
    %c0_269 = arith.constant 0 : index
    %223 = vector.load %arg8[%c0_268, %c0_269] : memref<1x100xf32, #tpu.memory_space<vmem>>, vector<1x100xf32>
    %224 = vector.broadcast %223 : vector<1x100xf32> to vector<2x100xf32>
    %225 = arith.addf %222, %224 : vector<2x100xf32>
    %cst_270 = arith.constant 0.000000e+00 : f32
    %226 = vector.broadcast %cst_270 : f32 to vector<2x100xf32>
    %227 = arith.maximumf %225, %226 : vector<2x100xf32>
    %c0_271 = arith.constant 0 : index
    %c0_272 = arith.constant 0 : index
    %228 = vector.load %arg9[%c0_271, %c0_272] : memref<100x10xf32, #tpu.memory_space<vmem>>, vector<100x10xf32>
    %cst_273 = arith.constant dense<0.000000e+00> : vector<2x10xf32>
    %229 = tpu.matmul %227, %228, %cst_273 {dimension_numbers = #tpu.dot_dimension_numbers<[1], [0], [0], [1], [0, 0, 1, 1], [], []>} : vector<2x100xf32>, vector<100x10xf32>, vector<2x10xf32> -> vector<2x10xf32>
    %c0_274 = arith.constant 0 : index
    %c0_275 = arith.constant 0 : index
    %230 = vector.load %arg10[%c0_274, %c0_275] : memref<1x10xf32, #tpu.memory_space<vmem>>, vector<1x10xf32>
    %231 = vector.broadcast %230 : vector<1x10xf32> to vector<2x10xf32>
    %232 = arith.addf %229, %231 : vector<2x10xf32>
    %cst_276 = arith.constant dense<0xFF800000> : vector<2xf32>
    %233 = vector.multi_reduction <maximumf>, %232, %cst_276 [1] : vector<2x10xf32> to vector<2xf32>
    %234 = vector.shape_cast %233 : vector<2xf32> to vector<2x1xf32>
    %235 = vector.broadcast %234 : vector<2x1xf32> to vector<2x10xf32>
    %236 = arith.subf %232, %235 : vector<2x10xf32>
    %237 = math.exp %236 : vector<2x10xf32>
    %cst_277 = arith.constant dense<0.000000e+00> : vector<2xf32>
    %238 = vector.multi_reduction <add>, %237, %cst_277 [1] : vector<2x10xf32> to vector<2xf32>
    %239 = vector.shape_cast %238 : vector<2xf32> to vector<2x1xf32>
    %240 = math.log %239 : vector<2x1xf32>
    %241 = vector.broadcast %240 : vector<2x1xf32> to vector<2x10xf32>
    %242 = arith.subf %236, %241 : vector<2x10xf32>
    %c0_278 = arith.constant 0 : index
    %c0_279 = arith.constant 0 : index
    %243 = vector.load %arg12[%c0_278, %c0_279] : memref<2x10xf32, #tpu.memory_space<vmem>>, vector<2x10xf32>
    tpu.vector_store %arg12[%c0_278, %c0_279], %242 {strides = array<i32>} : memref<2x10xf32, #tpu.memory_space<vmem>>, vector<2x10xf32>,
    return
  }
}

</mosaic_0001>

<bundles_post_ra>
// kernel: net_forward.1
= control target key start
LH: loop header
LB: loop body
LE: loop exit
PB: predicated region body
PF: predicated region fallthrough
CT: control target
= control target key end

     0   :  { %v16186_v2 = vmov 0.0   ;;  %s24274_s0 = inlined_call_operand.vmem [shape: f32[2,3,1024], index: 0, kind: input, shape index: {}]   ;;  %s24275_s1 = inlined_call_operand.vmem [shape: f32[8,200], index: 1, kind: input, shape index: {}]   ;;  %s24276_s2 = inlined_call_operand.vmem [shape: f32[8,1], index: 2, kind: input, shape index: {}]   ;;  %s24277_s3 = inlined_call_operand.vmem [shape: f32[16,200], index: 3, kind: input, shape index: {}]   ;;  %s24278_s4 = inlined_call_operand.vmem [shape: f32[16,1], index: 4, kind: input, shape index: {}]   ;;  %s24279_s5 = inlined_call_operand.vmem [shape: f32[512,300], index: 5, kind: input, shape index: {}]   ;;  %s24280_s6 = inlined_call_operand.vmem [shape: f32[1,300], index: 6, kind: input, shape index: {}]   ;;  %s24281_s7 = inlined_call_operand.vmem [shape: f32[300,100], index: 7, kind: input, shape index: {}]   ;;  %s24282_s8 = inlined_call_operand.vmem [shape: f32[1,100], index: 8, kind: input, shape index: {}]   ;;  %s24283_s9 = inlined_call_operand.vmem [shape: f32[100,10], index: 9, kind: input, shape index: {}]   ;;  %s24284_s10 = inlined_call_operand.vmem [shape: f32[1,10], index: 10, kind: input, shape index: {}]   ;;  %s24285_s11 = inlined_call_operand.vmem [shape: f32[1024,25], index: 11, kind: input, shape index: {}]   ;;  %s24286_s12 = inlined_call_operand.hbm [shape: f32[2,10], index: 12, kind: output, shape index: {}]  }
   0x1   :  { %v65_v0 = vld [vmem:[%s24274_s0] sm:$0x77]  ;;  %v66_v1 = vld [vmem:[%s24274_s0 + $0x8] sm:$0x77]  ;;  %43 = vst [vmem:[#allocation2 + $0x8] sm:$0xff] %v16186_v2  ;;  %44 = vst [vmem:[#allocation2 + $0x10] sm:$0xff] %v16186_v2 }
   0x2   :  { %v73_v3 = vcombine.high %v65_v0, %v65_v0  ;;  %v74_v4 = vcombine.high %v66_v1, %v66_v1  ;;  %42 = vst [vmem:[#allocation2] sm:$0xff] %v16186_v2  ;;  %45 = vst [vmem:[#allocation2 + $0x18] sm:$0xff] %v16186_v2  ;;  %v67_v5 = vld [vmem:[%s24274_s0 + $0x10] sm:$0x77]  ;;  %v68_v6 = vld [vmem:[%s24274_s0 + $0x18] sm:$0x77] }
   0x3   :  { %46 = vst [vmem:[#allocation2 + $0x20] sm:$0xff] %v16186_v2  ;;  %47 = vst [vmem:[#allocation2 + $0x28] sm:$0xff] %v16186_v2  ;;  %v75_v7 = vcombine.high %v67_v5, %v67_v5  ;;  %v76_v8 = vcombine.high %v68_v6, %v68_v6 }
   0x4   :  { %48 = vst [vmem:[#allocation2 + $0x30] sm:$0xff] %v16186_v2  ;;  %49 = vst [vmem:[#allocation2 + $0x38] sm:$0xff] %v16186_v2 }
   0x5   :  { %50 = vst [vmem:[#allocation2 + $0x40] sm:$0xff] %v16186_v2  ;;  %51 = vst [vmem:[#allocation2 + $0x48] sm:$0xff] %v16186_v2 }
   0x6   :  { %52 = vst [vmem:[#allocation2 + $0x50] sm:$0xff] %v16186_v2  ;;  %53 = vst [vmem:[#allocation2 + $0x58] sm:$0xff] %v16186_v2 }
   0x7   :  { %54 = vst [vmem:[#allocation2 + $0x60] sm:$0xff] %v16186_v2  ;;  %55 = vst [vmem:[#allocation2 + $0x68] sm:$0xff] %v16186_v2 }
   0x8   :  { %56 = vst [vmem:[#allocation2 + $0x70] sm:$0xff] %v16186_v2  ;;  %57 = vst [vmem:[#allocation2 + $0x78] sm:$0xff] %v16186_v2 }
   0x9   :  { %58 = vst [vmem:[#allocation2 + $0x80] sm:$0xff] %v16186_v2  ;;  %9894 = vst [vmem:[#allocation7] sm:$0xff] %v16186_v2 }
   0xa   :  { %83 = vst [vmem:[#allocation2 + $0x10] sm:$0x7] %v66_v1  ;;  %81 = vst [vmem:[#allocation2] sm:$0x7] %v65_v0 }
   0xb   :  { %85 = vst [vmem:[#allocation2 + $0x20] sm:$0x7] %v67_v5  ;;  %87 = vst [vmem:[#allocation2 + $0x30] sm:$0x7] %v68_v6 }
   0xc   :  { %17 = vsyncpa [#allocation9], 0  ;;  %82 = vst [vmem:[#allocation2 + $0x8] sm:$0x7] %v73_v3  ;;  %s24355_s29 = smov 126   ;;  %s24385_s30 = smov 127  }
   0xd   :  { %84 = vst [vmem:[#allocation2 + $0x18] sm:$0x7] %v74_v4  ;;  %86 = vst [vmem:[#allocation2 + $0x28] sm:$0x7] %v75_v7  ;;  %s24353_s13 = smov 125   ;;  %s16190_s14 = smov 96  }
   0xe   :  { %88 = vst [vmem:[#allocation2 + $0x38] sm:$0x7] %v76_v8  ;;  %s16191_s15 = smov 124   ;;  %s16192_s16 = smov 94   ;;  %v11803_v15 = vld [vmem:[%s24274_s0 + $0x20] sm:$0x77] }
   0xf   :  { %s16193_s17 = smov 95   ;;  %s16194_s18 = smov 92   ;;  %106 = vst [vmem:[#allocation2 + $0x40] sm:$0x7] %v11803_v15  ;;  %v98_v16 = vcombine.high %v11803_v15, %v11803_v15  ;;  %v11804_v17 = vld [vmem:[%s24274_s0 + $0x28] sm:$0x77] }
  0x10   :  { %s16195_s19 = smov 93   ;;  %s16196_s22 = smov 63   ;;  %108 = vst [vmem:[#allocation2 + $0x50] sm:$0x7] %v11804_v17  ;;  %v99_v18 = vcombine.high %v11804_v17, %v11804_v17  ;;  %v16393_v25 = vld [vmem:[%s24275_s1 + $0x8] sm:$0xff]  ;;  %vm24419_vm0 = vcmask 588800  }
  0x11   :  { %v16293_v9 = vld [vmem:[#allocation2 + $0x10] sm:$0xff]  ;;  %v16297_v11 = vld [vmem:[#allocation2] sm:$0xff]  ;;  %s24297_s23 = smov 64   ;;  %s24293_s24 = smov 61   ;;  %107 = vst [vmem:[#allocation2 + $0x48] sm:$0x7] %v98_v16  ;;  %11807 = vmatprep.mubr.msk.f32.mxu0 %vm24419_vm0, %v16393_v25  ;;  %11808 = vmatprep.mubr.msk.f32.mxu1 %vm24419_vm0, %v16393_v25 }
  0x12   :  { %s24295_s25 = smov 62   ;;  %s24287_s28 = smov 32   ;;  %109 = vst [vmem:[#allocation2 + $0x58] sm:$0x7] %v99_v18  ;;  %v16368_v19 = vld [vmem:[#allocation2 + $0x20] sm:$0xff]  ;;  %v16388_v24 = vld [vmem:[#allocation2 + $0x30] sm:$0xff] }
  0x13   :  { %v16295_v10 = vld [vmem:[#allocation2 + $0x8] sm:$0xff]  ;;  %s16201_s20 = smov 60   ;;  %s16202_s21 = smov 30   ;;  %v14000_v21 = vpack.i.bf16 %v16293_v9, %v16368_v19  ;;  %vm244_vm1 = vcmask 1039360   ;;  %vm396_vm2 = vcmask 1031168   ;;  %vm548_vm3 = vcmask 1022976  }
  0x14   :  { %v16299_v12 = vld [vmem:[#allocation2 + $0x18] sm:$0xff]  ;;  %v16303_v13 = vpack.i.bf16 %v16293_v9, %v16295_v10  ;;  %s24387_s26 = smov 31   ;;  %s24291_s27 = smov 28   ;;  %v16380_v22 = vld [vmem:[#allocation2 + $0x28] sm:$0xff]  ;;  %vm700_vm4 = vcmask 1014784   ;;  %vm852_vm5 = vcmask 785408  }
  0x15   :  { %v13815_v14 = vpack.i.bf16 %v16299_v12, %v16297_v11  ;;  %v14005_v20 = vpack.i.bf16 %v16295_v10, %v16299_v12  ;;  %v16386_v23 = vpack.i.bf16 %v16380_v22, %v16368_v19  ;;  %v14040_v26 = vpack.i.bf16 %v16388_v24, %v16380_v22  ;;  %v16418_v27 = vld [vmem:[#allocation2 + $0x38] sm:$0xff]  ;;  %v16482_v0 = vld [vmem:[%s24274_s0 + $0x30] sm:$0x77] }
  0x16   :  { %13821 = vrot.lane.b32.xlu1 %v16303_v13, %s24355_s29  ;;  %13811 = vrot.lane.b32.xlu0 %v16303_v13, %s24385_s30  ;;  %v16426_v28 = vpack.i.bf16 %v16418_v27, %v16388_v24  ;;  %110 = vst [vmem:[#allocation2 + $0x60] sm:$0x7] %v16482_v0  ;;  %vm24328_vm6 = vcmask 777216   ;;  %vm24329_vm7 = vcmask 769024   ;;  %vm1308_vm8 = vcmask 760832  }
  0x17   :  { %vm1460_vm9 = vcmask 752640   ;;  %vm24336_vm10 = vcmask 523264   ;;  %vm24337_vm11 = vcmask 515072   ;;  %vm24302_vm12 = vcmask 506880  }
  0x18   :  { %vm24303_vm13 = vcmask 498688   ;;  %vm24309_vm14 = vcmask 490496   ;;  %vm24310_vm15 = vcmask 261120  }
  0x1a   :  { %13826 = vrot.lane.b32.xlu1 %v16303_v13, %s24353_s13  ;;  %13816 = vrot.lane.b32.xlu0 %v13815_v14, %s24385_s30 }
  0x1e   :  { %13836 = vrot.lane.b32.xlu1 %v13815_v14, %s24353_s13  ;;  %13831 = vrot.lane.b32.xlu0 %v13815_v14, %s24355_s29 }
  0x22   :  { %13846 = vrot.lane.b32.xlu1 %v16303_v13, %s16190_s14  ;;  %13841 = vrot.lane.b32.xlu0 %v16303_v13, %s16191_s15 }
  0x26   :  { %13856 = vrot.lane.b32.xlu1 %v13815_v14, %s16190_s14  ;;  %13851 = vrot.lane.b32.xlu0 %v13815_v14, %s16191_s15 }
  0x2a   :  { %13866 = vrot.lane.b32.xlu1 %v16303_v13, %s16192_s16  ;;  %13861 = vrot.lane.b32.xlu0 %v16303_v13, %s16193_s17 }
  0x2e   :  { %13876 = vrot.lane.b32.xlu1 %v13815_v14, %s16192_s16  ;;  %13871 = vrot.lane.b32.xlu0 %v13815_v14, %s16193_s17 }
  0x32   :  { %13886 = vrot.lane.b32.xlu1 %v16303_v13, %s16194_s18  ;;  %13881 = vrot.lane.b32.xlu0 %v16303_v13, %s16195_s19 }
  0x36   :  { %13896 = vrot.lane.b32.xlu1 %v13815_v14, %s16194_s18  ;;  %13891 = vrot.lane.b32.xlu0 %v13815_v14, %s16195_s19 }
  0x3a   :  { %13906 = vrot.lane.b32.xlu1 %v16303_v13, %s16196_s22  ;;  %13901 = vrot.lane.b32.xlu0 %v16303_v13, %s24297_s23 }
  0x3e   :  { %13916 = vrot.lane.b32.xlu1 %v13815_v14, %s16196_s22  ;;  %13911 = vrot.lane.b32.xlu0 %v13815_v14, %s24297_s23 }
  0x42   :  { %13926 = vrot.lane.b32.xlu1 %v16303_v13, %s24293_s24  ;;  %13921 = vrot.lane.b32.xlu0 %v16303_v13, %s24295_s25 }
  0x46   :  { %13936 = vrot.lane.b32.xlu1 %v13815_v14, %s24293_s24  ;;  %13931 = vrot.lane.b32.xlu0 %v13815_v14, %s24295_s25 }
  0x4a   :  { %13946 = vrot.lane.b32.xlu1 %v16303_v13, %s24287_s28  ;;  %13941 = vrot.lane.b32.xlu0 %v16303_v13, %s16201_s20 }
  0x4e   :  { %13956 = vrot.lane.b32.xlu1 %v13815_v14, %s24287_s28  ;;  %13951 = vrot.lane.b32.xlu0 %v13815_v14, %s16201_s20  ;;  %s24289_s28 = smov 29  }
  0x52   :  { %13966 = vrot.lane.b32.xlu1 %v16303_v13, %s16202_s21  ;;  %13961 = vrot.lane.b32.xlu0 %v16303_v13, %s24387_s26 }
  0x56   :  { %13976 = vrot.lane.b32.xlu1 %v13815_v14, %s16202_s21  ;;  %13971 = vrot.lane.b32.xlu0 %v13815_v14, %s24387_s26 }
  0x5a   :  { %13986 = vrot.lane.b32.xlu1 %v16303_v13, %s24291_s27  ;;  %13981 = vrot.lane.b32.xlu0 %v16303_v13, %s24289_s28 }
  0x5e   :  { %13996 = vrot.lane.b32.xlu1 %v13815_v14, %s24291_s27  ;;  %13991 = vrot.lane.b32.xlu0 %v13815_v14, %s24289_s28  ;;  %s24621_s28 = smov 32   ;;  %s24629_s27 = smov 64  }
  0x62   :  { %14006 = vrot.lane.b32.xlu1 %v14005_v20, %s24385_s30  ;;  %14001 = vrot.lane.b32.xlu0 %v14000_v21, %s24385_s30 }
  0x66   :  { %14016 = vrot.lane.b32.xlu1 %v14000_v21, %s24353_s13  ;;  %14011 = vrot.lane.b32.xlu0 %v14000_v21, %s24355_s29 }
  0x6a   :  { %14026 = vrot.lane.b32.xlu1 %v14005_v20, %s24353_s13  ;;  %14021 = vrot.lane.b32.xlu0 %v14005_v20, %s24355_s29 }
  0x6e   :  { %14036 = vrot.lane.b32.xlu1 %v16386_v23, %s16190_s14  ;;  %14031 = vrot.lane.b32.xlu0 %v16386_v23, %s16191_s15 }
  0x72   :  { %3585 = vrot.lane.b32.xlu1 %v16293_v9, %s16191_s15  ;;  %14041 = vrot.lane.b32.xlu0 %v14040_v26, %s24385_s30 }
  0x76   :  { %3583 = vrot.lane.b32.xlu1 %v16295_v10, %s16191_s15  ;;  %3587 = vrot.lane.b32.xlu0 %v16299_v12, %s16191_s15 }
  0x7a   :  { %14051 = vrot.lane.b32.xlu1 %v16386_v23, %s16192_s16  ;;  %14046 = vrot.lane.b32.xlu0 %v16386_v23, %s16193_s17 }
  0x7e   :  { %14061 = vrot.lane.b32.xlu1 %v14040_v26, %s24353_s13  ;;  %14056 = vrot.lane.b32.xlu0 %v14040_v26, %s24355_s29 }
  0x82   :  { %14071 = vrot.lane.b32.xlu1 %v16386_v23, %s16194_s18  ;;  %14066 = vrot.lane.b32.xlu0 %v16386_v23, %s16195_s19 }
  0x86   :  { %14081 = vrot.lane.b32.xlu1 %v16426_v28, %s16190_s14  ;;  %14076 = vrot.lane.b32.xlu0 %v16426_v28, %s16191_s15 }
  0x88   :  { %v13822_v29 = vpop.permute.xlu1 %13821  ;;  %v16432_v30 = vpop.permute.xlu0 %13811 }
  0x89   :  { %v13824_v31 = vunpack.i.h.bf16 %v13822_v29  ;;  %v13823_v32 = vunpack.i.l.bf16 %v13822_v29  ;;  %v13814_v33 = vunpack.i.h.bf16 %v16432_v30  ;;  %v13813_v34 = vunpack.i.l.bf16 %v16432_v30 }
  0x8a   :  { %14091 = vrot.lane.b32.xlu1 %v16386_v23, %s16196_s22  ;;  %14086 = vrot.lane.b32.xlu0 %v16386_v23, %s24297_s23 }
  0x8b   :  { %v246_v35 = vsel %vm244_vm1, %v13813_v34, %v13814_v33  ;;  %v398_v42 = vsel %vm396_vm2, %v13823_v32, %v13824_v31 }
  0x8c   :  { %v13827_v36 = vpop.permute.xlu1 %13826  ;;  %v16443_v37 = vpop.permute.xlu0 %13816  ;;  %v12332_v38 = vpack.c.bf16 %v246_v35, %v16295_v10 }
  0x8d   :  { %v13829_v39 = vunpack.i.h.bf16 %v13827_v36  ;;  %v13828_v40 = vunpack.i.l.bf16 %v13827_v36  ;;  %v13818_v41 = vunpack.i.l.bf16 %v16443_v37 }
  0x8e   :  { %12333 = vmatprep.subr.bf16.mxu0 %v12332_v38  ;;  %14101 = vrot.lane.b32.xlu1 %v16426_v28, %s16192_s16 }
  0x8f   :  { %14096 = vrot.lane.b32.xlu0 %v16426_v28, %s16193_s17  ;;  %v245_v43 = vsel %vm244_vm1, %v13818_v41, %v13813_v34  ;;  %v550_v44 = vsel %vm548_vm3, %v13828_v40, %v13829_v39 }
  0x90   :  { %v16454_v45 = vpop.permute.xlu1 %13836  ;;  %v16456_v46 = vpop.permute.xlu0 %13831  ;;  %v12334_v47 = vpack.c.bf16 %v245_v43, %v16297_v11  ;;  %v12336_v48 = vpack.c.bf16 %v550_v44, %v398_v42 }
  0x91   :  { %v24320_v49 = vunpack.i.h.bf16 %v16454_v45  ;;  %v13838_v50 = vunpack.i.l.bf16 %v16454_v45  ;;  %v13834_v51 = vunpack.i.h.bf16 %v16456_v46  ;;  %v13833_v52 = vunpack.i.l.bf16 %v16456_v46 }
  0x92   :  { %14111 = vrot.lane.b32.xlu1 %v16386_v23, %s24293_s24  ;;  %12335 = vmatpush1.bf16.msra.mxu0 %v12334_v47 }
  0x93   :  { %14106 = vrot.lane.b32.xlu0 %v16386_v23, %s24295_s25  ;;  %12337 = vmatprep.subr.bf16.mxu0 %v12336_v48  ;;  %v397_v53 = vsel %vm396_vm2, %v13833_v52, %v13823_v32  ;;  %v549_v54 = vsel %vm548_vm3, %v13838_v50, %v13828_v40  ;;  %v16472_v55 = vsel %vm396_vm2, %v13824_v31, %v13834_v51 }
  0x94   :  { %v13847_v56 = vpop.permute.xlu1 %13846  ;;  %v13842_v57 = vpop.permute.xlu0 %13841  ;;  %v12338_v58 = vpack.c.bf16 %v549_v54, %v397_v53  ;;  %v16477_v59 = vsel %vm548_vm3, %v13829_v39, %v24320_v49  ;;  %v100_v54 = vcombine.high %v16482_v0, %v16482_v0 }
  0x95   :  { %v13849_v60 = vunpack.i.h.bf16 %v13847_v56  ;;  %v13848_v61 = vunpack.i.l.bf16 %v13847_v56  ;;  %v13844_v62 = vunpack.i.h.bf16 %v13842_v57  ;;  %v13843_v63 = vunpack.i.l.bf16 %v13842_v57 }
  0x96   :  { %14121 = vrot.lane.b32.xlu1 %v16426_v28, %s16194_s18  ;;  %12339 = vmatpush1.bf16.msra.mxu0 %v12338_v58  ;;  %111 = vst [vmem:[#allocation2 + $0x68] sm:$0x7] %v100_v54 }
  0x97   :  { %14116 = vrot.lane.b32.xlu0 %v16426_v28, %s16195_s19  ;;  %v702_v2 = vsel %vm700_vm4, %v13843_v63, %v13844_v62  ;;  %v854_v3 = vsel %vm852_vm5, %v13848_v61, %v13849_v60 }
  0x98   :  { %v16493_v4 = vpop.permute.xlu1 %13856  ;;  %v16495_v5 = vpop.permute.xlu0 %13851  ;;  %v12340_v6 = vpack.c.bf16 %v854_v3, %v702_v2 }
  0x99   :  { %v24317_v7 = vunpack.i.h.bf16 %v16493_v4  ;;  %v13858_v8 = vunpack.i.l.bf16 %v16493_v4  ;;  %v24318_v9 = vunpack.i.h.bf16 %v16495_v5  ;;  %v13853_v10 = vunpack.i.l.bf16 %v16495_v5 }
  0x9a   :  { %14131 = vrot.lane.b32.xlu1 %v16386_v23, %s24621_s28  ;;  %12341 = vmatprep.subr.bf16.mxu0 %v12340_v6 }
  0x9b   :  { %14126 = vrot.lane.b32.xlu0 %v16386_v23, %s16201_s20  ;;  %v701_v11 = vsel %vm700_vm4, %v13853_v10, %v13843_v63  ;;  %v853_v12 = vsel %vm852_vm5, %v13858_v8, %v13848_v61  ;;  %v16510_v13 = vsel %vm700_vm4, %v13844_v62, %v24318_v9  ;;  %v16515_v14 = vsel %vm852_vm5, %v13849_v60, %v24317_v7 }
  0x9c   :  { %v13867_v15 = vpop.permute.xlu1 %13866  ;;  %v13862_v16 = vpop.permute.xlu0 %13861  ;;  %v12342_v17 = vpack.c.bf16 %v853_v12, %v701_v11  ;;  %v16570_v11 = vld [vmem:[%s24274_s0 + $0x38] sm:$0x77]  ;;  %s24632_s0 = smov 61  }
  0x9d   :  { %v13869_v20 = vunpack.i.h.bf16 %v13867_v15  ;;  %v13868_v21 = vunpack.i.l.bf16 %v13867_v15  ;;  %v13864_v26 = vunpack.i.h.bf16 %v13862_v16  ;;  %v13863_v29 = vunpack.i.l.bf16 %v13862_v16  ;;  %112 = vst [vmem:[#allocation2 + $0x70] sm:$0x7] %v16570_v11 }
  0x9e   :  { %14141 = vrot.lane.b32.xlu1 %v16426_v28, %s16196_s22  ;;  %12343 = vmatpush1.bf16.msra.mxu0 %v12342_v17 }
  0x9f   :  { %14136 = vrot.lane.b32.xlu0 %v16426_v28, %s24297_s23  ;;  %v1006_v31 = vsel %vm24328_vm6, %v13863_v29, %v13864_v26  ;;  %v1158_v32 = vsel %vm24329_vm7, %v13868_v21, %v13869_v20  ;;  %s24623_s23 = smov 29  }
  0xa0   :  { %v16525_v34 = vpop.permute.xlu1 %13876  ;;  %v16527_v35 = vpop.permute.xlu0 %13871  ;;  %v12344_v36 = vpack.c.bf16 %v1158_v32, %v1006_v31 }
  0xa1   :  { %v24313_v38 = vunpack.i.h.bf16 %v16525_v34  ;;  %v13878_v39 = vunpack.i.l.bf16 %v16525_v34  ;;  %v24314_v40 = vunpack.i.h.bf16 %v16527_v35  ;;  %v13873_v41 = vunpack.i.l.bf16 %v16527_v35 }
  0xa2   :  { %14151 = vrot.lane.b32.xlu1 %v16386_v23, %s16202_s21  ;;  %12345 = vmatprep.subr.bf16.mxu0 %v12344_v36 }
  0xa3   :  { %14146 = vrot.lane.b32.xlu0 %v16386_v23, %s24387_s26  ;;  %v1005_v42 = vsel %vm24328_vm6, %v13873_v41, %v13863_v29  ;;  %v1157_v43 = vsel %vm24329_vm7, %v13878_v39, %v13868_v21  ;;  %v16542_v44 = vsel %vm24328_vm6, %v13864_v26, %v24314_v40  ;;  %v16547_v47 = vsel %vm24329_vm7, %v13869_v20, %v24313_v38  ;;  %v16721_v29 = vld [vmem:[#allocation2 + $0x50] sm:$0xff] }
  0xa4   :  { %v13887_v48 = vpop.permute.xlu1 %13886  ;;  %v13882_v50 = vpop.permute.xlu0 %13881  ;;  %v12346_v52 = vpack.c.bf16 %v1157_v43, %v1005_v42  ;;  %v13819_v38 = vunpack.i.h.bf16 %v16443_v37 }
  0xa5   :  { %v13889_v56 = vunpack.i.h.bf16 %v13887_v48  ;;  %v13888_v57 = vunpack.i.l.bf16 %v13887_v48  ;;  %v13884_v58 = vunpack.i.h.bf16 %v13882_v50  ;;  %v13883_v60 = vunpack.i.l.bf16 %v13882_v50 }
  0xa6   :  { %14161 = vrot.lane.b32.xlu1 %v16426_v28, %s24293_s24  ;;  %12347 = vmatpush1.bf16.msra.mxu0 %v12346_v52  ;;  %v247_v7 = vsel %vm244_vm1, %v13814_v33, %v13819_v38  ;;  %s24633_s24 = smov 62  }
  0xa7   :  { %14156 = vrot.lane.b32.xlu0 %v16426_v28, %s24295_s25  ;;  %v1310_v61 = vsel %vm1308_vm8, %v13883_v60, %v13884_v58  ;;  %v1462_v62 = vsel %vm1460_vm9, %v13888_v57, %v13889_v56  ;;  %s24622_s25 = smov 28  }
  0xa8   :  { %v16559_v63 = vpop.permute.xlu1 %13896  ;;  %v16561_v2 = vpop.permute.xlu0 %13891  ;;  %v12348_v0 = vpack.c.bf16 %v1462_v62, %v1310_v61 }
  0xa9   :  { %v24307_v3 = vunpack.i.h.bf16 %v16559_v63  ;;  %v13898_v6 = vunpack.i.l.bf16 %v16559_v63  ;;  %v24308_v8 = vunpack.i.h.bf16 %v16561_v2  ;;  %v13893_v10 = vunpack.i.l.bf16 %v16561_v2 }
  0xaa   :  { %14171 = vrot.lane.b32.xlu1 %v16386_v23, %s24622_s25  ;;  %12349 = vmatprep.subr.bf16.mxu0 %v12348_v0 }
  0xab   :  { %14166 = vrot.lane.b32.xlu0 %v16386_v23, %s24623_s23  ;;  %v1309_v12 = vsel %vm1308_vm8, %v13893_v10, %v13883_v60  ;;  %v1461_v15 = vsel %vm1460_vm9, %v13898_v6, %v13888_v57  ;;  %v16582_v16 = vsel %vm1308_vm8, %v13884_v58, %v24308_v8  ;;  %v16587_v17 = vsel %vm1460_vm9, %v13889_v56, %v24307_v3 }
  0xac   :  { %v13907_v20 = vpop.permute.xlu1 %13906  ;;  %v13902_v21 = vpop.permute.xlu0 %13901  ;;  %v12350_v26 = vpack.c.bf16 %v1461_v15, %v1309_v12 }
  0xad   :  { %v13909_v31 = vunpack.i.h.bf16 %v13907_v20  ;;  %v13908_v32 = vunpack.i.l.bf16 %v13907_v20  ;;  %v13904_v36 = vunpack.i.h.bf16 %v13902_v21  ;;  %v13903_v39 = vunpack.i.l.bf16 %v13902_v21 }
  0xae   :  { %14181 = vrot.lane.b32.xlu1 %v16426_v28, %s24621_s28  ;;  %12351 = vmatpush1.bf16.msra.mxu0 %v12350_v26 }
  0xaf   :  { %14176 = vrot.lane.b32.xlu0 %v16426_v28, %s16201_s20  ;;  %v1614_v41 = vsel %vm24336_vm10, %v13903_v39, %v13904_v36  ;;  %v1766_v42 = vsel %vm24337_vm11, %v13908_v32, %v13909_v31 }
  0xb0   :  { %v16597_v43 = vpop.permute.xlu1 %13916  ;;  %v16599_v48 = vpop.permute.xlu0 %13911  ;;  %v12352_v50 = vpack.c.bf16 %v1766_v42, %v1614_v41 }
  0xb1   :  { %v24301_v52 = vunpack.i.h.bf16 %v16597_v43  ;;  %v13918_v54 = vunpack.i.l.bf16 %v16597_v43  ;;  %v24304_v56 = vunpack.i.h.bf16 %v16599_v48  ;;  %v13913_v57 = vunpack.i.l.bf16 %v16599_v48 }
  0xb2   :  { %14191 = vrot.lane.b32.xlu1 %v16426_v28, %s24387_s26  ;;  %12353 = vmatprep.subr.bf16.mxu0 %v12352_v50 }
  0xb3   :  { %14186 = vrot.lane.b32.xlu0 %v16386_v23, %s24385_s30  ;;  %v1613_v58 = vsel %vm24336_vm10, %v13913_v57, %v13903_v39  ;;  %v1765_v60 = vsel %vm24337_vm11, %v13918_v54, %v13908_v32  ;;  %v16614_v61 = vsel %vm24336_vm10, %v13904_v36, %v24304_v56  ;;  %v16619_v62 = vsel %vm24337_vm11, %v13909_v31, %v24301_v52  ;;  %v16629_v36 = vld [vmem:[#allocation2 + $0x40] sm:$0xff] }
  0xb4   :  { %v13927_v0 = vpop.permute.xlu1 %13926  ;;  %v13922_v6 = vpop.permute.xlu0 %13921  ;;  %v12354_v10 = vpack.c.bf16 %v1765_v60, %v1613_v58  ;;  %v16643_v60 = vpack.i.bf16 %v16629_v36, %v16418_v27 }
  0xb5   :  { %v13929_v15 = vunpack.i.h.bf16 %v13927_v0  ;;  %v13928_v20 = vunpack.i.l.bf16 %v13927_v0  ;;  %v13924_v21 = vunpack.i.h.bf16 %v13922_v6  ;;  %v13923_v26 = vunpack.i.l.bf16 %v13922_v6 }
  0xb6   :  { %14201 = vrot.lane.b32.xlu1 %v16386_v23, %s24355_s29  ;;  %12355 = vmatpush1.bf16.msra.mxu0 %v12354_v10 }
  0xb7   :  { %14196 = vrot.lane.b32.xlu0 %v16426_v28, %s16202_s21  ;;  %v1918_v31 = vsel %vm24302_vm12, %v13923_v26, %v13924_v21  ;;  %v2070_v32 = vsel %vm24303_vm13, %v13928_v20, %v13929_v15 }
  0xb8   :  { %v16631_v39 = vpop.permute.xlu1 %13936  ;;  %v16633_v41 = vpop.permute.xlu0 %13931  ;;  %v12356_v42 = vpack.c.bf16 %v2070_v32, %v1918_v31 }
  0xb9   :  { %v24300_v50 = vunpack.i.h.bf16 %v16631_v39  ;;  %v13938_v54 = vunpack.i.l.bf16 %v16631_v39  ;;  %v24299_v57 = vunpack.i.h.bf16 %v16633_v41  ;;  %v13933_v58 = vunpack.i.l.bf16 %v16633_v41 }
  0xba   :  { %14211 = vrot.lane.b32.xlu1 %v16426_v28, %s24623_s23  ;;  %12357 = vmatprep.subr.bf16.mxu0 %v12356_v42 }
  0xbb   :  { %14206 = vrot.lane.b32.xlu0 %v16386_v23, %s24353_s13  ;;  %v1917_v0 = vsel %vm24302_vm12, %v13933_v58, %v13923_v26  ;;  %v2069_v6 = vsel %vm24303_vm13, %v13938_v54, %v13928_v20  ;;  %v16652_v10 = vsel %vm24302_vm12, %v13924_v21, %v24299_v57  ;;  %v16657_v31 = vsel %vm24303_vm13, %v13929_v15, %v24300_v50 }
  0xbc   :  { %v13947_v32 = vpop.permute.xlu1 %13946  ;;  %v13942_v42 = vpop.permute.xlu0 %13941  ;;  %v12358_v12 = vpack.c.bf16 %v2069_v6, %v1917_v0  ;;  %v101_v20 = vcombine.high %v16570_v11, %v16570_v11  ;;  %vm2524_vm12 = vcmask 252928   ;;  %vm2676_vm13 = vcmask 244736  }
  0xbd   :  { %v13949_v26 = vunpack.i.h.bf16 %v13947_v32  ;;  %v13948_v54 = vunpack.i.l.bf16 %v13947_v32  ;;  %v13944_v58 = vunpack.i.h.bf16 %v13942_v42  ;;  %v13943_v21 = vunpack.i.l.bf16 %v13942_v42 }
  0xbe   :  { %14221 = vrot.lane.b32.xlu1 %v16643_v60, %s24385_s30  ;;  %12359 = vmatpush1.bf16.msra.mxu0 %v12358_v12  ;;  %113 = vst [vmem:[#allocation2 + $0x78] sm:$0x7] %v101_v20 }
  0xbf   :  { %14216 = vrot.lane.b32.xlu0 %v16426_v28, %s24622_s25  ;;  %v2222_v15 = vsel %vm24309_vm14, %v13943_v21, %v13944_v58  ;;  %v2374_v0 = vsel %vm24310_vm15, %v13948_v54, %v13949_v26 }
  0xc0   :  { %v16669_v6 = vpop.permute.xlu1 %13956  ;;  %v16671_v23 = vpop.permute.xlu0 %13951  ;;  %v12360_v11 = vpack.c.bf16 %v2374_v0, %v2222_v15 }
  0xc1   :  { %v24306_v32 = vunpack.i.h.bf16 %v16669_v6  ;;  %v13958_v42 = vunpack.i.l.bf16 %v16669_v6  ;;  %v24305_v57 = vunpack.i.h.bf16 %v16671_v23  ;;  %v13953_v12 = vunpack.i.l.bf16 %v16671_v23 }
  0xc2   :  { %3589 = vrot.lane.b32.xlu1 %v16368_v19, %s16191_s15  ;;  %12361 = vmatprep.subr.bf16.mxu0 %v12360_v11 }
  0xc3   :  { %14226 = vrot.lane.b32.xlu0 %v16426_v28, %s24385_s30  ;;  %v2221_v20 = vsel %vm24309_vm14, %v13953_v12, %v13943_v21  ;;  %v2373_v50 = vsel %vm24310_vm15, %v13958_v42, %v13948_v54  ;;  %v16686_v15 = vsel %vm24309_vm14, %v13944_v58, %v24305_v57  ;;  %v16691_v0 = vsel %vm24310_vm15, %v13949_v26, %v24306_v32  ;;  %v16701_v58 = vld [vmem:[#allocation2 + $0x48] sm:$0xff] }
  0xc4   :  { %v13967_v52 = vpop.permute.xlu1 %13966  ;;  %v13962_v19 = vpop.permute.xlu0 %13961  ;;  %v12362_v11 = vpack.c.bf16 %v2373_v50, %v2221_v20  ;;  %vm2828_vm14 = vcmask 236544   ;;  %vm2980_vm15 = vcmask 228352  }
  0xc5   :  { %v13969_v12 = vunpack.i.h.bf16 %v13967_v52  ;;  %v13968_v54 = vunpack.i.l.bf16 %v13967_v52  ;;  %v13964_v42 = vunpack.i.h.bf16 %v13962_v19  ;;  %v13963_v56 = vunpack.i.l.bf16 %v13962_v19 }
  0xc6   :  { %14231 = vrot.lane.b32.xlu1 %v16643_v60, %s24355_s29  ;;  %12363 = vmatpush1.bf16.msra.mxu0 %v12362_v11 }
  0xc7   :  { %3591 = vrot.lane.b32.xlu0 %v16380_v22, %s16191_s15  ;;  %v2526_v26 = vsel %vm2524_vm12, %v13963_v56, %v13964_v42  ;;  %v2678_v50 = vsel %vm2676_vm13, %v13968_v54, %v13969_v12  ;;  %v16715_v22 = vpack.i.bf16 %v16701_v58, %v16629_v36 }
  0xc8   :  { %v16703_v20 = vpop.permute.xlu1 %13976  ;;  %v16705_v21 = vpop.permute.xlu0 %13971  ;;  %v12364_v52 = vpack.c.bf16 %v2678_v50, %v2526_v26 }
  0xc9   :  { %v24312_v19 = vunpack.i.h.bf16 %v16703_v20  ;;  %v13978_v57 = vunpack.i.l.bf16 %v16703_v20  ;;  %v24311_v11 = vunpack.i.h.bf16 %v16705_v21  ;;  %v13973_v32 = vunpack.i.l.bf16 %v16705_v21 }
  0xca   :  { %14241 = vrot.lane.b32.xlu1 %v16426_v28, %s24355_s29  ;;  %12365 = vmatprep.subr.bf16.mxu0 %v12364_v52 }
  0xcb   :  { %14236 = vrot.lane.b32.xlu0 %v16643_v60, %s24353_s13  ;;  %v2525_v26 = vsel %vm2524_vm12, %v13973_v32, %v13963_v56  ;;  %v2677_v50 = vsel %vm2676_vm13, %v13978_v57, %v13968_v54  ;;  %v16726_v3 = vsel %vm2524_vm12, %v13964_v42, %v24311_v11  ;;  %v16731_v52 = vsel %vm2676_vm13, %v13969_v12, %v24312_v19 }
  0xcc   :  { %v13987_v36 = vpop.permute.xlu1 %13986  ;;  %v13982_v8 = vpop.permute.xlu0 %13981  ;;  %v12366_v53 = vpack.c.bf16 %v2677_v50, %v2525_v26  ;;  %v16739_v12 = vpack.i.bf16 %v16721_v29, %v16701_v58 }
  0xcd   :  { %v13989_v57 = vunpack.i.h.bf16 %v13987_v36  ;;  %v13988_v60 = vunpack.i.l.bf16 %v13987_v36  ;;  %v13984_v32 = vunpack.i.h.bf16 %v13982_v8  ;;  %v13983_v54 = vunpack.i.l.bf16 %v13982_v8 }
  0xce   :  { %14251 = vrot.lane.b32.xlu1 %v16715_v22, %s16191_s15  ;;  %12367 = vmatpush1.bf16.msra.mxu0 %v12366_v53 }
  0xcf   :  { %14246 = vrot.lane.b32.xlu0 %v16426_v28, %s24353_s13  ;;  %v2830_v42 = vsel %vm2828_vm14, %v13983_v54, %v13984_v32  ;;  %v2982_v26 = vsel %vm2980_vm15, %v13988_v60, %v13989_v57 }
  0xd0   :  { %v16745_v50 = vpop.permute.xlu1 %13996  ;;  %v16747_v36 = vpop.permute.xlu0 %13991  ;;  %v12368_v8 = vpack.c.bf16 %v2982_v26, %v2830_v42 }
  0xd1   :  { %v24316_v56 = vunpack.i.h.bf16 %v16745_v50  ;;  %v13998_v53 = vunpack.i.l.bf16 %v16745_v50  ;;  %v24315_v11 = vunpack.i.h.bf16 %v16747_v36  ;;  %v13993_v19 = vunpack.i.l.bf16 %v16747_v36 }
  0xd2   :  { %14261 = vrot.lane.b32.xlu1 %v16739_v12, %s24385_s30  ;;  %12369 = vmatprep.subr.bf16.mxu0 %v12368_v8 }
  0xd3   :  { %14256 = vrot.lane.b32.xlu0 %v16715_v22, %s16190_s14  ;;  %v2829_v28 = vsel %vm2828_vm14, %v13993_v19, %v13983_v54  ;;  %v2981_v42 = vsel %vm2980_vm15, %v13998_v53, %v13988_v60  ;;  %v16763_v26 = vsel %vm2828_vm14, %v13984_v32, %v24315_v11  ;;  %v16768_v37 = vsel %vm2980_vm15, %v13989_v57, %v24316_v56  ;;  %v16780_v11 = vld [vmem:[#allocation2 + $0x18] sm:$0xff]  ;;  %v3044_v57 = vld [vmem:[#allocation2 + $0x8] sm:$0xff] }
  0xd4   :  { %v16770_v40 = vpop.permute.xlu1 %14006  ;;  %v16772_v8 = vpop.permute.xlu0 %14001  ;;  %v12370_v18 = vpack.c.bf16 %v2981_v42, %v2829_v28  ;;  %v3045_v28 = vld [vmem:[#allocation2 + $0x10] sm:$0xff] }
  0xd5   :  { %v14009_v60 = vunpack.i.h.bf16 %v16770_v40  ;;  %v24319_v54 = vunpack.i.l.bf16 %v16770_v40  ;;  %v14004_v32 = vunpack.i.h.bf16 %v16772_v8  ;;  %v14003_v53 = vunpack.i.l.bf16 %v16772_v8  ;;  %v16897_v8 = vld [vmem:[%s24275_s1] sm:$0xff] }
  0xd6   :  { %3595 = vrot.lane.b32.xlu1 %v16418_v27, %s16191_s15  ;;  %12371 = vmatpush1.bf16.msra.mxu0 %v12370_v18 }
  0xd7   :  { %3593 = vrot.lane.b32.xlu0 %v16388_v24, %s16191_s15  ;;  %v3175_v42 = vsel %vm244_vm1, %v14004_v32, %v24319_v54  ;;  %v248_v19 = vsel %vm244_vm1, %v13819_v38, %v14003_v53  ;;  %v3174_v56 = vsel %vm244_vm1, %v14009_v60, %v14004_v32  ;;  %v12382_v60 = vpack.c.bf16 %v247_v7, %v3045_v28 }
  0xd8   :  { %v16796_v27 = vpop.permute.xlu1 %14016  ;;  %v16798_v18 = vpop.permute.xlu0 %14011  ;;  %v12372_v24 = vpack.c.bf16 %v3175_v42, %v3045_v28  ;;  %v12380_v9 = vpack.c.bf16 %v248_v19, %v16780_v11  ;;  %v12374_v1 = vpack.c.bf16 %v3174_v56, %v3044_v57  ;;  %v24624_v38 = vunpack.i.h.bf16 %v16454_v45 }
  0xd9   :  { %v14018_v54 = vunpack.i.l.bf16 %v16796_v27  ;;  %v14013_v49 = vunpack.i.l.bf16 %v16798_v18  ;;  %v14019_v30 = vunpack.i.h.bf16 %v16796_v27  ;;  %v14014_v7 = vunpack.i.h.bf16 %v16798_v18 }
  0xda   :  { %14271 = vrot.lane.b32.xlu1 %v16715_v22, %s16192_s16  ;;  %12373 = vmatprep.subr.bf16.mxu0 %v12372_v24 }
  0xdb   :  { %14266 = vrot.lane.b32.xlu0 %v16715_v22, %s16193_s17  ;;  %12381 = vmatprep.subr.bf16.mxu1 %v12380_v9  ;;  %v400_v33 = vsel %vm396_vm2, %v13834_v51, %v14013_v49  ;;  %v552_v56 = vsel %vm548_vm3, %v24624_v38, %v14018_v54 }
  0xdc   :  { %12375 = vmatpush1.bf16.msra.mxu0 %v12374_v1  ;;  %12383 = vmatpush1.bf16.msra.mxu1 %v12382_v60  ;;  %v16819_v19 = vpop.permute.xlu1 %14026  ;;  %v16821_v32 = vpop.permute.xlu0 %14021  ;;  %v12384_v9 = vpack.c.bf16 %v552_v56, %v400_v33  ;;  %v16839_v60 = vld [vmem:[#allocation2 + $0x58] sm:$0xff]  ;;  %v24625_v33 = vpack.c.bf16 %v16477_v59, %v16472_v55  ;;  %v24626_v55 = vunpack.i.h.bf16 %v16495_v5  ;;  %v16876_v5 = vld [vmem:[#allocation2 + $0x28] sm:$0xff] }
  0xdd   :  { %v14029_v57 = vunpack.i.h.bf16 %v16819_v19  ;;  %v24322_v46 = vunpack.i.l.bf16 %v16819_v19  ;;  %v14024_v51 = vunpack.i.h.bf16 %v16821_v32  ;;  %v24321_v28 = vunpack.i.l.bf16 %v16821_v32 }
  0xde   :  { %14281 = vrot.lane.b32.xlu1 %v16739_v12, %s24353_s13  ;;  %12385 = vmatprep.subr.bf16.mxu1 %v12384_v9 }
  0xdf   :  { %14276 = vrot.lane.b32.xlu0 %v16739_v12, %s24355_s29  ;;  %v3326_v45 = vsel %vm396_vm2, %v14014_v7, %v24321_v28  ;;  %v3477_v1 = vsel %vm548_vm3, %v14019_v30, %v24322_v46  ;;  %v3325_v42 = vsel %vm396_vm2, %v14024_v51, %v14014_v7  ;;  %v3476_v24 = vsel %vm548_vm3, %v14029_v57, %v14019_v30 }
  0xe0   :  { %12387 = vmatpush1.bf16.msra.mxu1 %v24625_v33  ;;  %v16844_v38 = vpop.permute.xlu1 %14036  ;;  %v16846_v12 = vpop.permute.xlu0 %14031  ;;  %v12376_v56 = vpack.c.bf16 %v3477_v1, %v3326_v45  ;;  %v12378_v9 = vpack.c.bf16 %v3476_v24, %v3325_v42  ;;  %v16854_v30 = vpack.i.bf16 %v16839_v60, %v16721_v29  ;;  %v24627_v51 = vunpack.i.h.bf16 %v16493_v4 }
  0xe1   :  { %v14038_v28 = vunpack.i.l.bf16 %v16844_v38  ;;  %v14033_v46 = vunpack.i.l.bf16 %v16846_v12  ;;  %v24628_v33 = vpack.c.bf16 %v16515_v14, %v16510_v13 }
  0xe2   :  { %14291 = vrot.lane.b32.xlu1 %v16715_v22, %s16194_s18  ;;  %12377 = vmatprep.subr.bf16.mxu0 %v12376_v56 }
  0xe3   :  { %14286 = vrot.lane.b32.xlu0 %v16715_v22, %s16195_s19  ;;  %12379 = vmatpush1.bf16.msra.mxu0 %v12378_v9  ;;  %v704_v59 = vsel %vm700_vm4, %v24626_v55, %v14033_v46  ;;  %v856_v29 = vsel %vm852_vm5, %v24627_v51, %v14038_v28  ;;  %v16889_v55 = vld [vmem:[#allocation2 + $0x20] sm:$0xff] }
  0xe4   :  { %v3586_v7 = vpop.permute.xlu1 %3585  ;;  %v16863_v57 = vpop.permute.xlu0 %14041  ;;  %v12388_v42 = vpack.c.bf16 %v856_v29, %v704_v59 }
  0xe5   :  { %v24327_v45 = vunpack.i.h.bf16 %v16863_v57  ;;  %v14043_v1 = vunpack.i.l.bf16 %v16863_v57 }
  0xe6   :  { %14301 = vrot.lane.b32.xlu1 %v16854_v30, %s16190_s14  ;;  %12389 = vmatprep.subr.bf16.mxu1 %v12388_v42  ;;  %v24630_v42 = vunpack.i.h.bf16 %v16527_v35 }
  0xe7   :  { %14296 = vrot.lane.b32.xlu0 %v16854_v30, %s16191_s15  ;;  %v250_v4 = vsel %vm244_vm1, %v14043_v1, %v24327_v45  ;;  %v249_v24 = vsel %vm244_vm1, %v14003_v53, %v14043_v1  ;;  %12391 = vmatpush1.bf16.msra.mxu1 %v24628_v33 }
  0xe8   :  { %v3584_v56 = vpop.permute.xlu1 %3583  ;;  %v16887_v9 = vpop.permute.xlu0 %3587  ;;  %v12428_v13 = vpack.c.bf16 %v250_v4, %v16876_v5  ;;  %v12430_v14 = vpack.c.bf16 %v249_v24, %v16889_v55  ;;  %v24631_v24 = vunpack.i.h.bf16 %v16525_v34 }
  0xe9   :  { %v3628_v59 = vsel %vm700_vm4, %v3586_v7, %v16887_v9  ;;  %v3627_v51 = vsel %vm700_vm4, %v3584_v56, %v3586_v7 }
  0xea   :  { %14311 = vrot.lane.b32.xlu1 %v16715_v22, %s16196_s22  ;;  %4275 = vmatprep.subr.mxu0 %v3628_v59 }
  0xeb   :  { %14306 = vrot.lane.b32.xlu0 %v16715_v22, %s24629_s27  ;;  %4276 = vmatpush1.msra.mxu0 %v3627_v51 }
  0xec   :  { %v16905_v53 = vpop.permute.xlu1 %14051  ;;  %v16907_v7 = vpop.permute.xlu0 %14046  ;;  %12429 = vmatprep.subr.bf16.mxu0 %v12428_v13  ;;  %4292 = vmatmul.mubr.f32.vlgmr.msra.gmra.mrb[0].mxu0 %v16897_v8 }
  0xed   :  { %v14053_v29 = vunpack.i.l.bf16 %v16905_v53  ;;  %v14048_v1 = vunpack.i.l.bf16 %v16907_v7  ;;  %12431 = vmatpush1.bf16.msra.mxu0 %v12430_v14  ;;  %11809 = vmatprep.mubr.msk.f32.mxu0 %vm24419_vm0, %v16393_v25 }
  0xee   :  { %14321 = vrot.lane.b32.xlu1 %v16854_v30, %s16192_s16 }
  0xef   :  { %14316 = vrot.lane.b32.xlu0 %v16854_v30, %s16193_s17  ;;  %v1008_v4 = vsel %vm24328_vm6, %v24630_v42, %v14048_v1  ;;  %v1160_v33 = vsel %vm24329_vm7, %v24631_v24, %v14053_v29 }
  0xf0   :  { %v16928_v56 = vpop.permute.xlu1 %14061  ;;  %v16930_v25 = vpop.permute.xlu0 %14056  ;;  %v12392_v59 = vpack.c.bf16 %v1160_v33, %v1008_v4  ;;  %v24634_v4 = vpack.c.bf16 %v16547_v47, %v16542_v44  ;;  %v24635_v47 = vunpack.i.h.bf16 %v16561_v2 }
  0xf1   :  { %v24323_v51 = vunpack.i.h.bf16 %v16928_v56  ;;  %v14063_v13 = vunpack.i.l.bf16 %v16928_v56  ;;  %v24324_v14 = vunpack.i.h.bf16 %v16930_v25  ;;  %v14058_v35 = vunpack.i.l.bf16 %v16930_v25 }
  0xf2   :  { %14331 = vrot.lane.b32.xlu1 %v16715_v22, %s24632_s0  ;;  %12393 = vmatprep.subr.bf16.mxu1 %v12392_v59 }
  0xf3   :  { %v553_v34 = vsel %vm548_vm3, %v14018_v54, %v14063_v13  ;;  %v401_v42 = vsel %vm396_vm2, %v14013_v49, %v14058_v35  ;;  %14326 = vrot.lane.b32.xlu0 %v16715_v22, %s24633_s24  ;;  %12395 = vmatpush1.bf16.msra.mxu1 %v24634_v4  ;;  %v402_v24 = vsel %vm396_vm2, %v14058_v35, %v24324_v14 }
  0xf4   :  { %v16952_v33 = vpop.permute.xlu1 %14071  ;;  %v16954_v27 = vpop.permute.xlu0 %14066  ;;  %v554_v54 = vsel %vm548_vm3, %v14063_v13, %v24323_v51  ;;  %v12434_v59 = vpack.c.bf16 %v553_v34, %v401_v42  ;;  %v24636_v13 = vunpack.i.h.bf16 %v16559_v63  ;;  %v14039_v34 = vunpack.i.h.bf16 %v16844_v38 }
  0xf5   :  { %v14073_v49 = vunpack.i.l.bf16 %v16952_v33  ;;  %v14068_v18 = vunpack.i.l.bf16 %v16954_v27  ;;  %v12432_v44 = vpack.c.bf16 %v554_v54, %v402_v24  ;;  %v14034_v42 = vunpack.i.h.bf16 %v16846_v12 }
  0xf6   :  { %14341 = vrot.lane.b32.xlu1 %v16854_v30, %s16194_s18  ;;  %v14054_v38 = vunpack.i.h.bf16 %v16905_v53  ;;  %v24640_v53 = vpack.c.bf16 %v16619_v62, %v16614_v61  ;;  %v14074_v62 = vunpack.i.h.bf16 %v16952_v33 }
  0xf7   :  { %14336 = vrot.lane.b32.xlu0 %v16854_v30, %s16195_s19  ;;  %v1312_v35 = vsel %vm1308_vm8, %v24635_v47, %v14068_v18  ;;  %v1464_v4 = vsel %vm1460_vm9, %v24636_v13, %v14073_v49  ;;  %12433 = vmatprep.subr.bf16.mxu0 %v12432_v44 }
  0xf8   :  { %v16977_v24 = vpop.permute.xlu1 %14081  ;;  %v16979_v54 = vpop.permute.xlu0 %14076  ;;  %v12396_v51 = vpack.c.bf16 %v1464_v4, %v1312_v35  ;;  %12435 = vmatpush1.bf16.msra.mxu0 %v12434_v59  ;;  %v24637_v35 = vpack.c.bf16 %v16587_v17, %v16582_v16  ;;  %v705_v4 = vsel %vm700_vm4, %v14033_v46, %v14034_v42  ;;  %v14049_v46 = vunpack.i.h.bf16 %v16907_v7 }
  0xf9   :  { %v24325_v2 = vunpack.i.h.bf16 %v16977_v24  ;;  %v14083_v47 = vunpack.i.l.bf16 %v16977_v24  ;;  %v24326_v14 = vunpack.i.h.bf16 %v16979_v54  ;;  %v14078_v63 = vunpack.i.l.bf16 %v16979_v54 }
  0xfa   :  { %14351 = vrot.lane.b32.xlu1 %v16715_v22, %s24621_s28  ;;  %12397 = vmatprep.subr.bf16.mxu1 %v12396_v51  ;;  %v857_v51 = vsel %vm852_vm5, %v14038_v28, %v14039_v34 }
  0xfb   :  { %v16990_v44 = vsel %vm852_vm5, %v14083_v47, %v24325_v2  ;;  %v16995_v59 = vsel %vm700_vm4, %v14078_v63, %v24326_v14  ;;  %14346 = vrot.lane.b32.xlu0 %v16715_v22, %s16201_s20  ;;  %12399 = vmatpush1.bf16.msra.mxu1 %v24637_v35  ;;  %v706_v13 = vsel %vm700_vm4, %v14034_v42, %v14078_v63 }
  0xfc   :  { %v17009_v2 = vpop.permute.xlu1 %14091  ;;  %v17011_v14 = vpop.permute.xlu0 %14086  ;;  %v858_v45 = vsel %vm852_vm5, %v14039_v34, %v14083_v47  ;;  %v12438_v12 = vpack.c.bf16 %v857_v51, %v705_v4  ;;  %v24638_v34 = vunpack.i.h.bf16 %v16599_v48  ;;  %v24639_v47 = vunpack.i.h.bf16 %v16597_v43 }
  0xfd   :  { %v14093_v17 = vunpack.i.l.bf16 %v17009_v2  ;;  %v14088_v63 = vunpack.i.l.bf16 %v17011_v14  ;;  %v12436_v28 = vpack.c.bf16 %v858_v45, %v706_v13  ;;  %v1161_v48 = vsel %vm24329_vm7, %v14053_v29, %v14054_v38 }
  0xfe   :  { %14361 = vrot.lane.b32.xlu1 %v16854_v30, %s16196_s22 }
  0xff   :  { %14356 = vrot.lane.b32.xlu0 %v16854_v30, %s24629_s27  ;;  %v1616_v42 = vsel %vm24336_vm10, %v24638_v34, %v14088_v63  ;;  %v1768_v35 = vsel %vm24337_vm11, %v24639_v47, %v14093_v17  ;;  %12437 = vmatprep.subr.bf16.mxu0 %v12436_v28  ;;  %v1009_v28 = vsel %vm24328_vm6, %v14048_v1, %v14049_v46 }
 0x100   :  { %v17034_v45 = vpop.permute.xlu1 %14101  ;;  %v12400_v13 = vpack.c.bf16 %v1768_v35, %v1616_v42  ;;  %12439 = vmatpush1.bf16.msra.mxu0 %v12438_v12 }
 0x101   :  { %v24335_v16 = vunpack.i.h.bf16 %v17034_v45  ;;  %v14103_v51 = vunpack.i.l.bf16 %v17034_v45  ;;  %v17038_v4 = vpop.permute.xlu0 %14096 }
 0x102   :  { %v24330_v34 = vunpack.i.h.bf16 %v17038_v4  ;;  %v14098_v43 = vunpack.i.l.bf16 %v17038_v4  ;;  %14371 = vrot.lane.b32.xlu1 %v16715_v22, %s16202_s21  ;;  %12401 = vmatprep.subr.bf16.mxu1 %v12400_v13 }
 0x103   :  { %v17053_v12 = vsel %vm24329_vm7, %v14103_v51, %v24335_v16  ;;  %14366 = vrot.lane.b32.xlu0 %v16715_v22, %s24387_s26  ;;  %12403 = vmatpush1.bf16.msra.mxu1 %v24640_v53  ;;  %v1162_v29 = vsel %vm24329_vm7, %v14054_v38, %v14103_v51  ;;  %v12442_v51 = vpack.c.bf16 %v1161_v48, %v1009_v28  ;;  %v14069_v53 = vunpack.i.h.bf16 %v16954_v27 }
 0x104   :  { %v17064_v7 = vsel %vm24328_vm6, %v14098_v43, %v24330_v34  ;;  %v17066_v1 = vpop.permute.xlu1 %14111  ;;  %v1010_v42 = vsel %vm24328_vm6, %v14049_v46, %v14098_v43  ;;  %v24641_v46 = vunpack.i.h.bf16 %v16631_v39  ;;  %vm24642_vm6 = vcmask 498688  }
 0x105   :  { %v14113_v47 = vunpack.i.l.bf16 %v17066_v1  ;;  %v17070_v35 = vpop.permute.xlu0 %14106  ;;  %v12440_v13 = vpack.c.bf16 %v1162_v29, %v1010_v42  ;;  %v24643_v42 = vunpack.i.h.bf16 %v16633_v41  ;;  %vm24644_vm7 = vcmask 506880  }
 0x106   :  { %v14108_v38 = vunpack.i.l.bf16 %v17070_v35  ;;  %14381 = vrot.lane.b32.xlu1 %v16854_v30, %s24632_s0  ;;  %v1465_v39 = vsel %vm1460_vm9, %v14073_v49, %v14074_v62  ;;  %v1313_v41 = vsel %vm1308_vm8, %v14068_v18, %v14069_v53  ;;  %v24645_v27 = vpack.c.bf16 %v16657_v31, %v16652_v10 }
 0x107   :  { %14376 = vrot.lane.b32.xlu0 %v16854_v30, %s24633_s24  ;;  %12441 = vmatprep.subr.bf16.mxu0 %v12440_v13  ;;  %v2072_v43 = vsel %vm24642_vm6, %v24641_v46, %v14113_v47  ;;  %v12446_v10 = vpack.c.bf16 %v1465_v39, %v1313_v41  ;;  %v14089_v31 = vunpack.i.h.bf16 %v17011_v14  ;;  %vm24647_vm6 = vcmask 261120  }
 0x108   :  { %12443 = vmatpush1.bf16.msra.mxu0 %v12442_v51  ;;  %v17086_v29 = vpop.permute.xlu1 %14121  ;;  %v1920_v48 = vsel %vm24644_vm7, %v24643_v42, %v14108_v38  ;;  %vm24649_vm7 = vcmask 490496   ;;  %v24650_v14 = vpack.c.bf16 %v16691_v0, %v16686_v15  ;;  %v14109_v0 = vunpack.i.h.bf16 %v17070_v35 }
 0x109   :  { %v24331_v28 = vunpack.i.h.bf16 %v17086_v29  ;;  %v14123_v61 = vunpack.i.l.bf16 %v17086_v29  ;;  %v17095_v13 = vpop.permute.xlu0 %14116  ;;  %v12404_v34 = vpack.c.bf16 %v2072_v43, %v1920_v48  ;;  %v24657_v35 = vpack.c.bf16 %v16731_v52, %v16726_v3 }
 0x10a   :  { %v24332_v51 = vunpack.i.h.bf16 %v17095_v13  ;;  %v14118_v46 = vunpack.i.l.bf16 %v17095_v13  ;;  %14391 = vrot.lane.b32.xlu1 %v16715_v22, %s24622_s25 }
 0x10b   :  { %v17110_v42 = vsel %vm1460_vm9, %v14123_v61, %v24331_v28  ;;  %14386 = vrot.lane.b32.xlu0 %v16715_v22, %s24623_s23  ;;  %12405 = vmatprep.subr.bf16.mxu1 %v12404_v34  ;;  %v1466_v33 = vsel %vm1460_vm9, %v14074_v62, %v14123_v61  ;;  %v14094_v62 = vunpack.i.h.bf16 %v17009_v2 }
 0x10c   :  { %v17118_v49 = vsel %vm1308_vm8, %v14118_v46, %v24332_v51  ;;  %12407 = vmatpush1.bf16.msra.mxu1 %v24645_v27  ;;  %v17123_v18 = vpop.permute.xlu1 %14131  ;;  %v1314_v43 = vsel %vm1308_vm8, %v14069_v53, %v14118_v46  ;;  %v24646_v53 = vunpack.i.h.bf16 %v16669_v6  ;;  %v24648_v27 = vunpack.i.h.bf16 %v16671_v23 }
 0x10d   :  { %v14133_v48 = vunpack.i.l.bf16 %v17123_v18  ;;  %v17127_v28 = vpop.permute.xlu0 %14126  ;;  %v12444_v34 = vpack.c.bf16 %v1466_v33, %v1314_v43  ;;  %v1769_v6 = vsel %vm24337_vm11, %v14093_v17, %v14094_v62  ;;  %v1617_v23 = vsel %vm24336_vm10, %v14088_v63, %v14089_v31 }
 0x10e   :  { %v14128_v51 = vunpack.i.l.bf16 %v17127_v28  ;;  %14401 = vrot.lane.b32.xlu1 %v16854_v30, %s24621_s28  ;;  %v12450_v15 = vpack.c.bf16 %v1769_v6, %v1617_v23  ;;  %v24652_v6 = vunpack.i.h.bf16 %v16705_v21  ;;  %v14129_v52 = vunpack.i.h.bf16 %v17127_v28 }
 0x10f   :  { %14396 = vrot.lane.b32.xlu0 %v16854_v30, %s16201_s20  ;;  %12445 = vmatprep.subr.bf16.mxu0 %v12444_v34  ;;  %v2376_v46 = vsel %vm24647_vm6, %v24646_v53, %v14133_v48  ;;  %vm24653_vm6 = vcmask 498688   ;;  %v24665_v28 = vpack.c.bf16 %v16768_v37, %v16763_v26 }
 0x110   :  { %12447 = vmatpush1.bf16.msra.mxu0 %v12446_v10  ;;  %v17143_v33 = vpop.permute.xlu1 %14141  ;;  %v2224_v39 = vsel %vm24649_vm7, %v24648_v27, %v14128_v51  ;;  %vm24654_vm7 = vcmask 506880  }
 0x111   :  { %v24333_v41 = vunpack.i.h.bf16 %v17143_v33  ;;  %v14143_v43 = vunpack.i.l.bf16 %v17143_v33  ;;  %v17152_v34 = vpop.permute.xlu0 %14136  ;;  %v12408_v61 = vpack.c.bf16 %v2376_v46, %v2224_v39 }
 0x112   :  { %v24334_v10 = vunpack.i.h.bf16 %v17152_v34  ;;  %v14138_v53 = vunpack.i.l.bf16 %v17152_v34  ;;  %14411 = vrot.lane.b32.xlu1 %v16854_v30, %s24387_s26 }
 0x113   :  { %v17167_v27 = vsel %vm24337_vm11, %v14143_v43, %v24333_v41  ;;  %14406 = vrot.lane.b32.xlu0 %v16715_v22, %s24385_s30  ;;  %12409 = vmatprep.subr.bf16.mxu1 %v12408_v61  ;;  %v1770_v2 = vsel %vm24337_vm11, %v14094_v62, %v14143_v43  ;;  %v14114_v43 = vunpack.i.h.bf16 %v17066_v1  ;;  %vm24656_vm11 = vmmov %vm24654_vm7 }
 0x114   :  { %v17175_v17 = vsel %vm24336_vm10, %v14138_v53, %v24334_v10  ;;  %12411 = vmatpush1.bf16.msra.mxu1 %v24650_v14  ;;  %v17180_v63 = vpop.permute.xlu1 %14151  ;;  %v1618_v46 = vsel %vm24336_vm10, %v14089_v31, %v14138_v53  ;;  %v24651_v31 = vunpack.i.h.bf16 %v16703_v20  ;;  %vm24655_vm10 = vmmov %vm24653_vm6 }
 0x115   :  { %v14153_v39 = vunpack.i.l.bf16 %v17180_v63  ;;  %v17184_v41 = vpop.permute.xlu0 %14146  ;;  %v12448_v61 = vpack.c.bf16 %v1770_v2, %v1618_v46  ;;  %v17200_v2 = vld [vmem:[#allocation2 + $0x60] sm:$0xff] }
 0x116   :  { %v24339_v10 = vunpack.i.l.bf16 %v17184_v41  ;;  %14421 = vrot.lane.b32.xlu1 %v16715_v22, %s24355_s29  ;;  %v17222_v21 = vpack.i.bf16 %v17200_v2, %v16839_v60 }
 0x117   :  { %14416 = vrot.lane.b32.xlu0 %v16854_v30, %s16202_s21  ;;  %12449 = vmatprep.subr.bf16.mxu0 %v12448_v61  ;;  %v2680_v53 = vsel %vm2676_vm13, %v24651_v31, %v14153_v39  ;;  %v2073_v31 = vsel %vm24653_vm6, %v14113_v47, %v14114_v43 }
 0x118   :  { %12451 = vmatpush1.bf16.msra.mxu0 %v12450_v15  ;;  %v17202_v14 = vpop.permute.xlu1 %14161  ;;  %v2528_v23 = vsel %vm2524_vm12, %v24652_v6, %v24339_v10  ;;  %v1921_v6 = vsel %vm24654_vm7, %v14108_v38, %v14109_v0 }
 0x119   :  { %v24338_v46 = vunpack.i.h.bf16 %v17202_v14  ;;  %v14163_v61 = vunpack.i.l.bf16 %v17202_v14  ;;  %v17211_v62 = vpop.permute.xlu0 %14156  ;;  %v12412_v20 = vpack.c.bf16 %v2680_v53, %v2528_v23  ;;  %v12454_v3 = vpack.c.bf16 %v2073_v31, %v1921_v6 }
 0x11a   :  { %v24340_v15 = vunpack.i.h.bf16 %v17211_v62  ;;  %v14158_v16 = vunpack.i.l.bf16 %v17211_v62  ;;  %14431 = vrot.lane.b32.xlu1 %v16854_v30, %s24623_s23  ;;  %v24659_v31 = vunpack.i.h.bf16 %v16747_v36 }
 0x11b   :  { %v17230_v1 = vsel %vm24655_vm10, %v14163_v61, %v24338_v46  ;;  %14426 = vrot.lane.b32.xlu0 %v16715_v22, %s24353_s13  ;;  %12413 = vmatprep.subr.bf16.mxu1 %v12412_v20  ;;  %v2074_v47 = vsel %vm24653_vm6, %v14114_v43, %v14163_v61  ;;  %v14134_v61 = vunpack.i.h.bf16 %v17123_v18  ;;  %vm24660_vm10 = vcmask 261120  }
 0x11c   :  { %v17238_v53 = vsel %vm24656_vm11, %v14158_v16, %v24340_v15  ;;  %12415 = vmatpush1.bf16.msra.mxu1 %v24657_v35  ;;  %v17243_v38 = vpop.permute.xlu1 %14171  ;;  %v1922_v23 = vsel %vm24654_vm7, %v14109_v0, %v14158_v16  ;;  %v17258_v16 = vld [vmem:[#allocation2 + $0x40] sm:$0xff]  ;;  %v24658_v0 = vunpack.i.h.bf16 %v16745_v50  ;;  %vm24661_vm11 = vcmask 490496   ;;  %vm24662_vm6 = vmmov %vm24660_vm10 }
 0x11d   :  { %v24344_v46 = vunpack.i.l.bf16 %v17243_v38  ;;  %v17247_v10 = vpop.permute.xlu0 %14166  ;;  %v12452_v22 = vpack.c.bf16 %v2074_v47, %v1922_v23  ;;  %v2377_v50 = vsel %vm24660_vm10, %v14133_v48, %v14134_v61  ;;  %v2225_v36 = vsel %vm24661_vm11, %v14128_v51, %v14129_v52  ;;  %vm24663_vm7 = vmmov %vm24662_vm6 }
 0x11e   :  { %v24343_v20 = vunpack.i.l.bf16 %v17247_v10  ;;  %14441 = vrot.lane.b32.xlu1 %v17222_v21, %s24385_s30  ;;  %vm24664_vm10 = vmmov %vm24661_vm11 }
 0x11f   :  { %14436 = vrot.lane.b32.xlu0 %v16854_v30, %s24622_s25  ;;  %12453 = vmatprep.subr.bf16.mxu0 %v12452_v22  ;;  %v2984_v47 = vsel %vm2980_vm15, %v24658_v0, %v24344_v46  ;;  %vm24667_vm11 = vmmov %vm24664_vm10 }
 0x120   :  { %12455 = vmatpush1.bf16.msra.mxu0 %v12454_v3  ;;  %v17265_v35 = vpop.permute.xlu1 %14181  ;;  %v2832_v6 = vsel %vm2828_vm14, %v24659_v31, %v24343_v20 }
 0x121   :  { %v24341_v23 = vunpack.i.h.bf16 %v17265_v35  ;;  %v14183_v22 = vunpack.i.l.bf16 %v17265_v35  ;;  %v17274_v43 = vpop.permute.xlu0 %14176  ;;  %v12416_v15 = vpack.c.bf16 %v2984_v47, %v2832_v6  ;;  %v14154_v6 = vunpack.i.h.bf16 %v17180_v63 }
 0x122   :  { %v24342_v3 = vunpack.i.h.bf16 %v17274_v43  ;;  %v14178_v0 = vunpack.i.l.bf16 %v17274_v43  ;;  %3597 = vrot.lane.b32.xlu1 %v17258_v16, %s16191_s15 }
 0x123   :  { %v17289_v31 = vsel %vm24662_vm6, %v14183_v22, %v24341_v23  ;;  %14446 = vrot.lane.b32.xlu0 %v16854_v30, %s24385_s30  ;;  %12417 = vmatprep.subr.bf16.mxu1 %v12416_v15  ;;  %v2378_v18 = vsel %vm24663_vm7, %v14134_v61, %v14183_v22  ;;  %v14149_v23 = vunpack.i.h.bf16 %v17184_v41  ;;  %v17309_v22 = vld [vmem:[#allocation2 + $0x68] sm:$0xff]  ;;  %vm24689_vm6 = vcmask 769024  }
 0x124   :  { %v17297_v48 = vsel %vm24664_vm10, %v14178_v0, %v24342_v3  ;;  %12419 = vmatpush1.bf16.msra.mxu1 %v24665_v28  ;;  %v17302_v51 = vpop.permute.xlu1 %14191  ;;  %v2226_v47 = vsel %vm24667_vm11, %v14129_v52, %v14178_v0  ;;  %v12458_v52 = vpack.c.bf16 %v2377_v50, %v2225_v36  ;;  %v17331_v50 = vpack.i.bf16 %v17309_v22, %v17200_v2  ;;  %v17333_v36 = vld [vmem:[#allocation2 + $0x50] sm:$0xff] }
 0x125   :  { %24666 = vst [vmem:[#allocation11_spill] sm:$0xff] %v17302_v51  ;;  %v17307_v15 = vpop.permute.xlu0 %14186  ;;  %v12456_v61 = vpack.c.bf16 %v2378_v18, %v2226_v47  ;;  %v24345_v20 = vunpack.i.h.bf16 %v17302_v51  ;;  %v14193_v0 = vunpack.i.l.bf16 %v17302_v51  ;;  %v24668_v47 = vunpack.i.l.bf16 %v16770_v40 }
 0x126   :  { %v24346_v26 = vunpack.i.h.bf16 %v17307_v15  ;;  %v14188_v37 = vunpack.i.l.bf16 %v17307_v15  ;;  %14451 = vrot.lane.b32.xlu1 %v17222_v21, %s24355_s29  ;;  %vm24691_vm7 = vcmask 777216   ;;  %vm24697_vm10 = vcmask 515072  }
 0x127   :  { %3599 = vrot.lane.b32.xlu0 %v16701_v58, %s16191_s15  ;;  %12457 = vmatprep.subr.bf16.mxu0 %v12456_v61  ;;  %v2681_v58 = vsel %vm2676_vm13, %v14153_v39, %v14154_v6  ;;  %v24669_v61 = vunpack.i.l.bf16 %v17184_v41  ;;  %v17348_v2 = vsel %vm2524_vm12, %v14193_v0, %v24345_v20  ;;  %v17355_v41 = vld [vmem:[#allocation2 + $0x70] sm:$0xff]  ;;  %vm24699_vm11 = vcmask 523264  }
 0x128   :  { %12459 = vmatpush1.bf16.msra.mxu0 %v12458_v52  ;;  %v17321_v18 = vpop.permute.xlu1 %14201  ;;  %v3177_v28 = vsel %vm244_vm1, %v14188_v37, %v24346_v26  ;;  %v3176_v3 = vsel %vm244_vm1, %v24668_v47, %v14188_v37  ;;  %24671 = vst [vmem:[#allocation13_spill] sm:$0xff] %v17348_v2  ;;  %v17375_v26 = vpack.i.bf16 %v17355_v41, %v17309_v22  ;;  %v24675_v47 = vunpack.i.l.bf16 %v16819_v19 }
 0x129   :  { %v2529_v52 = vsel %vm2524_vm12, %v24669_v61, %v14149_v23  ;;  %v17341_v46 = vpop.permute.xlu0 %14196  ;;  %v12420_v40 = vpack.c.bf16 %v3177_v28, %v16889_v55  ;;  %v12422_v37 = vpack.c.bf16 %v3176_v3, %v16780_v11  ;;  %v14465_v11 = vpack.i.bf16 %v16839_v60, %v17333_v36 }
 0x12a   :  { %24670 = vst [vmem:[#allocation12_spill] sm:$0xff] %v17341_v46  ;;  %v24347_v63 = vunpack.i.h.bf16 %v17341_v46  ;;  %v14198_v39 = vunpack.i.l.bf16 %v17341_v46  ;;  %14461 = vrot.lane.b32.xlu1 %v16854_v30, %s24355_s29  ;;  %v14203_v55 = vunpack.i.l.bf16 %v17321_v18  ;;  %v2530_v30 = vsel %vm2524_vm12, %v14149_v23, %v14193_v0 }
 0x12b   :  { %14456 = vrot.lane.b32.xlu0 %v17222_v21, %s24353_s13  ;;  %12421 = vmatprep.subr.bf16.mxu1 %v12420_v40  ;;  %v12462_v40 = vpack.c.bf16 %v2681_v58, %v2529_v52  ;;  %v24673_v23 = vunpack.i.h.bf16 %v17321_v18  ;;  %v14174_v0 = vunpack.i.h.bf16 %v17243_v38  ;;  %v14169_v58 = vunpack.i.h.bf16 %v17247_v10 }
 0x12c   :  { %v17365_v3 = vsel %vm2676_vm13, %v14198_v39, %v24347_v63  ;;  %12423 = vmatpush1.bf16.msra.mxu1 %v12422_v37  ;;  %v17367_v28 = vpop.permute.xlu1 %14211  ;;  %v2682_v61 = vsel %vm2676_vm13, %v14154_v6, %v14198_v39  ;;  %v24677_v19 = vunpack.i.l.bf16 %v17243_v38 }
 0x12d   :  { %24672 = vst [vmem:[#allocation14_spill] sm:$0xff] %v17365_v3  ;;  %v17371_v20 = vpop.permute.xlu0 %14206  ;;  %v12460_v21 = vpack.c.bf16 %v2682_v61, %v2530_v30  ;;  %v3328_v6 = vsel %vm396_vm2, %v14203_v55, %v24673_v23  ;;  %v14213_v52 = vunpack.i.l.bf16 %v17367_v28  ;;  %v24674_v61 = vunpack.i.l.bf16 %v16821_v32 }
 0x12e   :  { %v24352_v37 = vunpack.i.h.bf16 %v17371_v20  ;;  %v14208_v51 = vunpack.i.l.bf16 %v17371_v20  ;;  %14471 = vrot.lane.b32.xlu1 %v17331_v50, %s16191_s15  ;;  %v2985_v32 = vsel %vm2980_vm15, %v24677_v19, %v14174_v0 }
 0x12f   :  { %14466 = vrot.lane.b32.xlu0 %v14465_v11, %s24353_s13  ;;  %12461 = vmatprep.subr.bf16.mxu0 %v12460_v21  ;;  %v3327_v23 = vsel %vm396_vm2, %v24674_v61, %v14203_v55  ;;  %v2834_v38 = vsel %vm2828_vm14, %v14169_v58, %v14213_v52 }
 0x130   :  { %12463 = vmatpush1.bf16.msra.mxu0 %v12462_v40  ;;  %v17391_v39 = vpop.permute.xlu1 %14221  ;;  %v3479_v30 = vsel %vm548_vm3, %v14208_v51, %v24352_v37  ;;  %v3478_v63 = vsel %vm548_vm3, %v24675_v47, %v14208_v51  ;;  %v24676_v40 = vunpack.i.h.bf16 %v17367_v28  ;;  %v24678_v51 = vunpack.i.l.bf16 %v17247_v10 }
 0x131   :  { %v17402_v2 = vpop.permute.xlu0 %14216  ;;  %v12424_v11 = vpack.c.bf16 %v3479_v30, %v3328_v6  ;;  %v12426_v21 = vpack.c.bf16 %v3478_v63, %v3327_v23  ;;  %v14224_v63 = vunpack.i.h.bf16 %v17391_v39 }
 0x132   :  { %v17407_v3 = vsel %vm2828_vm14, %v14213_v52, %v24676_v40  ;;  %v24359_v46 = vunpack.i.h.bf16 %v17402_v2  ;;  %v14218_v37 = vunpack.i.l.bf16 %v17402_v2  ;;  %14481 = vrot.lane.b32.xlu1 %v17375_v26, %s24385_s30  ;;  %v2833_v47 = vsel %vm2828_vm14, %v24678_v51, %v14169_v58  ;;  %v3049_v52 = vld [vmem:[#allocation2 + $0x30] sm:$0xff] }
 0x133   :  { %14476 = vrot.lane.b32.xlu0 %v17331_v50, %s16190_s14  ;;  %12425 = vmatprep.subr.bf16.mxu1 %v12424_v11  ;;  %v14223_v11 = vunpack.i.l.bf16 %v17391_v39  ;;  %v24687_v39 = vpack.c.bf16 %v16990_v44, %v16995_v59  ;;  %v24688_v44 = vunpack.i.h.bf16 %v17034_v45 }
 0x134   :  { %v17425_v55 = vsel %vm2980_vm15, %v14218_v37, %v24359_v46  ;;  %12427 = vmatpush1.bf16.msra.mxu1 %v12426_v21  ;;  %v3590_v6 = vpop.permute.xlu1 %3589  ;;  %v2986_v30 = vsel %vm2980_vm15, %v14174_v0, %v14218_v37  ;;  %v12466_v21 = vpack.c.bf16 %v2985_v32, %v2833_v47  ;;  %v24679_v37 = vunpack.i.h.bf16 %v17307_v15 }
 0x135   :  { %v17429_v10 = vpop.permute.xlu0 %14226  ;;  %v12464_v61 = vpack.c.bf16 %v2986_v30, %v2834_v38  ;;  %v17448_v38 = vld [vmem:[#allocation2 + $0x38] sm:$0xff]  ;;  %v24680_v47 = vunpack.i.h.bf16 %v16863_v57 }
 0x136   :  { %v24357_v40 = vunpack.i.h.bf16 %v17429_v10  ;;  %v14228_v19 = vunpack.i.l.bf16 %v17429_v10  ;;  %3603 = vrot.lane.b32.xlu1 %v16839_v60, %s16191_s15  ;;  %v252_v60 = vsel %vm244_vm1, %v14223_v11, %v14224_v63 }
 0x137   :  { %3601 = vrot.lane.b32.xlu0 %v17333_v36, %s16191_s15  ;;  %12465 = vmatprep.subr.bf16.mxu0 %v12464_v61  ;;  %v251_v30 = vsel %vm244_vm1, %v24680_v47, %v14223_v11 }
 0x138   :  { %v3178_v0 = vsel %vm244_vm1, %v24679_v37, %v14228_v19  ;;  %12467 = vmatpush1.bf16.msra.mxu0 %v12466_v21  ;;  %v17443_v58 = vpop.permute.xlu1 %14231  ;;  %v3179_v51 = vsel %vm244_vm1, %v14228_v19, %v24357_v40  ;;  %v3629_v21 = vsel %vm700_vm4, %v16887_v9, %v3590_v6 }
 0x139   :  { %v17453_v36 = vpop.permute.xlu0 %3591  ;;  %v12468_v32 = vpack.c.bf16 %v3179_v51, %v3049_v52  ;;  %v12470_v15 = vpack.c.bf16 %v3178_v0, %v16876_v5  ;;  %v14234_v61 = vunpack.i.h.bf16 %v17443_v58  ;;  %v12476_v5 = vpack.c.bf16 %v252_v60, %v17448_v38 }
 0x13a   :  { %14491 = vrot.lane.b32.xlu1 %v17331_v50, %s16192_s16  ;;  %v3630_v19 = vsel %vm700_vm4, %v3590_v6, %v17453_v36  ;;  %v14233_v57 = vunpack.i.l.bf16 %v17443_v58  ;;  %v12478_v0 = vpack.c.bf16 %v251_v30, %v3049_v52  ;;  %v17485_v6 = vld [vmem:[#allocation2 + $0x78] sm:$0xff]  ;;  %v24681_v52 = vunpack.i.h.bf16 %v16930_v25 }
 0x13b   :  { %14486 = vrot.lane.b32.xlu0 %v17331_v50, %s16193_s17  ;;  %4346 = vmatprep.subr.mxu1 %v3630_v19 }
 0x13c   :  { %12469 = vmatprep.subr.bf16.mxu0 %v12468_v32  ;;  %4347 = vmatpush1.msra.mxu1 %v3629_v21  ;;  %v17470_v11 = vpop.permute.xlu1 %14241  ;;  %v404_v9 = vsel %vm396_vm2, %v14233_v57, %v14234_v61  ;;  %v403_v60 = vsel %vm396_vm2, %v24681_v52, %v14233_v57 }
 0x13d   :  { %12471 = vmatpush1.bf16.msra.mxu0 %v12470_v15  ;;  %v17472_v37 = vpop.permute.xlu0 %14236  ;;  %12477 = vmatprep.subr.bf16.mxu1 %v12476_v5  ;;  %v24358_v51 = vunpack.i.h.bf16 %v17470_v11  ;;  %v14243_v32 = vunpack.i.l.bf16 %v17470_v11  ;;  %v24682_v15 = vunpack.i.h.bf16 %v16928_v56 }
 0x13e   :  { %v14239_v47 = vunpack.i.h.bf16 %v17472_v37  ;;  %v14238_v19 = vunpack.i.l.bf16 %v17472_v37  ;;  %4363 = vmatmul.mubr.f32.vlgmr.msra.gmra.mrb[0].mxu1 %v16897_v8  ;;  %14501 = vrot.lane.b32.xlu1 %v17375_v26, %s24353_s13  ;;  %s24729_s13 = smov 125  }
 0x13f   :  { %12479 = vmatpush1.bf16.msra.mxu1 %v12478_v0  ;;  %14496 = vrot.lane.b32.xlu0 %v17375_v26, %s24355_s29  ;;  %v17502_v26 = vld [vmem:[%s24275_s1 + $0x8] sm:$0xff]  ;;  %s24721_s29 = smov 126  }
 0x140   :  { %v555_v30 = vsel %vm548_vm3, %v24682_v15, %v14238_v19  ;;  %v17494_v21 = vpop.permute.xlu1 %14251  ;;  %v556_v5 = vsel %vm548_vm3, %v14238_v19, %v14239_v47  ;;  %11810 = vmatprep.mubr.msk.f32.mxu1 %vm24419_vm0, %v17502_v26  ;;  %v17514_v19 = vpack.i.bf16 %v17485_v6, %v17355_v41  ;;  %v3330_v15 = vsel %vm396_vm2, %v14243_v32, %v24358_v51 }
 0x141   :  { %v17506_v25 = vpop.permute.xlu0 %14246  ;;  %v12480_v57 = vpack.c.bf16 %v556_v5, %v404_v9  ;;  %v12482_v56 = vpack.c.bf16 %v555_v30, %v403_v60  ;;  %v24683_v9 = vunpack.i.h.bf16 %v17321_v18  ;;  %v14253_v30 = vunpack.i.l.bf16 %v17494_v21 }
 0x142   :  { %v24360_v0 = vunpack.i.h.bf16 %v17506_v25  ;;  %v14248_v52 = vunpack.i.l.bf16 %v17506_v25  ;;  %14511 = vrot.lane.b32.xlu1 %v17331_v50, %s16194_s18  ;;  %v24684_v5 = vunpack.i.h.bf16 %v17371_v20  ;;  %v17540_v20 = vld [vmem:[#allocation2 + $0x48] sm:$0xff]  ;;  %v14254_v58 = vunpack.i.h.bf16 %v17494_v21 }
 0x143   :  { %14506 = vrot.lane.b32.xlu0 %v17331_v50, %s16195_s19  ;;  %12481 = vmatprep.subr.bf16.mxu1 %v12480_v57  ;;  %v3329_v60 = vsel %vm396_vm2, %v24683_v9, %v14243_v32 }
 0x144   :  { %v3480_v40 = vsel %vm548_vm3, %v24684_v5, %v14248_v52  ;;  %12483 = vmatpush1.bf16.msra.mxu1 %v12482_v56  ;;  %v17528_v41 = vpop.permute.xlu1 %14261  ;;  %v3481_v51 = vsel %vm548_vm3, %v14248_v52, %v24360_v0 }
 0x145   :  { %v24371_v23 = vunpack.i.h.bf16 %v17528_v41  ;;  %v14263_v57 = vunpack.i.l.bf16 %v17528_v41  ;;  %v17535_v18 = vpop.permute.xlu0 %14256  ;;  %v12472_v32 = vpack.c.bf16 %v3481_v51, %v3330_v15  ;;  %v12474_v9 = vpack.c.bf16 %v3480_v40, %v3329_v60 }
 0x146   :  { %v14258_v46 = vunpack.i.l.bf16 %v17535_v18  ;;  %14521 = vrot.lane.b32.xlu1 %v17514_v19, %s16190_s14  ;;  %v24685_v40 = vunpack.i.h.bf16 %v16979_v54  ;;  %v24686_v15 = vunpack.i.h.bf16 %v16977_v24 }
 0x147   :  { %14516 = vrot.lane.b32.xlu0 %v17514_v19, %s16191_s15  ;;  %12473 = vmatprep.subr.bf16.mxu0 %v12472_v32  ;;  %v254_v56 = vsel %vm244_vm1, %v14263_v57, %v24371_v23 }
 0x148   :  { %12475 = vmatpush1.bf16.msra.mxu0 %v12474_v9  ;;  %v17547_v52 = vpop.permute.xlu1 %3595  ;;  %v708_v51 = vsel %vm700_vm4, %v24685_v40, %v14253_v30  ;;  %v860_v60 = vsel %vm852_vm5, %v24686_v15, %v14258_v46  ;;  %v12524_v0 = vpack.c.bf16 %v254_v56, %v17540_v20  ;;  %v253_v9 = vsel %vm244_vm1, %v14224_v63, %v14263_v57 }
 0x149   :  { %v3594_v5 = vpop.permute.xlu0 %3593  ;;  %v12484_v32 = vpack.c.bf16 %v860_v60, %v708_v51  ;;  %v12526_v56 = vpack.c.bf16 %v253_v9, %v17258_v16  ;;  %v24690_v16 = vunpack.i.h.bf16 %v17038_v4 }
 0x14a   :  { %14531 = vrot.lane.b32.xlu1 %v17331_v50, %s16196_s22  ;;  %v3632_v54 = vsel %vm700_vm4, %v3594_v5, %v17547_v52  ;;  %v3631_v40 = vsel %vm700_vm4, %v17453_v36, %v3594_v5 }
 0x14b   :  { %14526 = vrot.lane.b32.xlu0 %v17331_v50, %s24629_s27  ;;  %4417 = vmatprep.subr.mxu0 %v3632_v54 }
 0x14c   :  { %12485 = vmatprep.subr.bf16.mxu1 %v12484_v32  ;;  %4418 = vmatpush1.msra.mxu0 %v3631_v40  ;;  %v17571_v24 = vpop.permute.xlu1 %14271  ;;  %v24692_v40 = vpack.c.bf16 %v17053_v12, %v17064_v7  ;;  %v14259_v12 = vunpack.i.h.bf16 %v17535_v18  ;;  %v24693_v7 = vunpack.i.h.bf16 %v17086_v29  ;;  %v709_v29 = vsel %vm700_vm4, %v14253_v30, %v14254_v58 }
 0x14d   :  { %12487 = vmatpush1.bf16.msra.mxu1 %v24687_v39  ;;  %v14273_v63 = vunpack.i.l.bf16 %v17571_v24  ;;  %v17577_v57 = vpop.permute.xlu0 %14266  ;;  %12525 = vmatprep.subr.bf16.mxu0 %v12524_v0  ;;  %v24695_v18 = vpack.c.bf16 %v17110_v42, %v17118_v49 }
 0x14e   :  { %v14268_v36 = vunpack.i.l.bf16 %v17577_v57  ;;  %4434 = vmatmul.mubr.f32.vlgmr.msra.gmra.mrb[2].mxu0 %v16897_v8  ;;  %14541 = vrot.lane.b32.xlu1 %v17514_v19, %s16192_s16  ;;  %v14269_v49 = vunpack.i.h.bf16 %v17577_v57  ;;  %v24703_v57 = vpack.c.bf16 %v17167_v27, %v17175_v17 }
 0x14f   :  { %12527 = vmatpush1.bf16.msra.mxu0 %v12526_v56  ;;  %14536 = vrot.lane.b32.xlu0 %v17514_v19, %s16193_s17  ;;  %v1164_v59 = vsel %vm24689_vm6, %v24688_v44, %v14273_v63 }
 0x150   :  { %v17591_v0 = vpop.permute.xlu1 %14281  ;;  %v1012_v8 = vsel %vm24691_vm7, %v24690_v16, %v14268_v36  ;;  %11811 = vmatprep.mubr.msk.f32.mxu0 %vm24419_vm0, %v17502_v26 }
 0x151   :  { %v24369_v51 = vunpack.i.h.bf16 %v17591_v0  ;;  %v14283_v15 = vunpack.i.l.bf16 %v17591_v0  ;;  %v17602_v60 = vpop.permute.xlu0 %14276  ;;  %v12488_v45 = vpack.c.bf16 %v1164_v59, %v1012_v8 }
 0x152   :  { %v24370_v5 = vunpack.i.h.bf16 %v17602_v60  ;;  %v14278_v32 = vunpack.i.l.bf16 %v17602_v60  ;;  %14551 = vrot.lane.b32.xlu1 %v17331_v50, %s24632_s0 }
 0x153   :  { %v557_v4 = vsel %vm548_vm3, %v14239_v47, %v14283_v15  ;;  %14546 = vrot.lane.b32.xlu0 %v17331_v50, %s24633_s24  ;;  %12489 = vmatprep.subr.bf16.mxu1 %v12488_v45  ;;  %v558_v9 = vsel %vm548_vm3, %v14283_v15, %v24369_v51  ;;  %v24694_v15 = vunpack.i.h.bf16 %v17095_v13  ;;  %v861_v13 = vsel %vm852_vm5, %v14258_v46, %v14259_v12 }
 0x154   :  { %v405_v54 = vsel %vm396_vm2, %v14234_v61, %v14278_v32  ;;  %12491 = vmatpush1.bf16.msra.mxu1 %v24692_v40  ;;  %v17622_v39 = vpop.permute.xlu1 %14291  ;;  %v406_v37 = vsel %vm396_vm2, %v14278_v32, %v24370_v5  ;;  %v12534_v42 = vpack.c.bf16 %v861_v13, %v709_v29  ;;  %v24733_v5 = vld [vmem:[#allocation13_spill] sm:$0xff] }
 0x155   :  { %v14293_v47 = vunpack.i.l.bf16 %v17622_v39  ;;  %v17628_v56 = vpop.permute.xlu0 %14286  ;;  %v12528_v44 = vpack.c.bf16 %v558_v9, %v406_v37  ;;  %v12530_v59 = vpack.c.bf16 %v557_v4, %v405_v54 }
 0x156   :  { %v14288_v61 = vunpack.i.l.bf16 %v17628_v56  ;;  %14561 = vrot.lane.b32.xlu1 %v17514_v19, %s16194_s18  ;;  %v14289_v17 = vunpack.i.h.bf16 %v17628_v56  ;;  %v24709_v56 = vpack.c.bf16 %v17230_v1, %v17238_v53 }
 0x157   :  { %14556 = vrot.lane.b32.xlu0 %v17514_v19, %s16195_s19  ;;  %12529 = vmatprep.subr.bf16.mxu0 %v12528_v44  ;;  %v1468_v16 = vsel %vm1460_vm9, %v24693_v7, %v14293_v47 }
 0x158   :  { %12531 = vmatpush1.bf16.msra.mxu0 %v12530_v59  ;;  %v17642_v8 = vpop.permute.xlu1 %14301  ;;  %v1316_v45 = vsel %vm1308_vm8, %v24694_v15, %v14288_v61 }
 0x159   :  { %v24367_v32 = vunpack.i.h.bf16 %v17642_v8  ;;  %v14303_v4 = vunpack.i.l.bf16 %v17642_v8  ;;  %v17651_v9 = vpop.permute.xlu0 %14296  ;;  %v12492_v54 = vpack.c.bf16 %v1468_v16, %v1316_v45  ;;  %v14274_v45 = vunpack.i.h.bf16 %v17571_v24 }
 0x15a   :  { %v24368_v40 = vunpack.i.h.bf16 %v17651_v9  ;;  %v14298_v37 = vunpack.i.l.bf16 %v17651_v9  ;;  %14571 = vrot.lane.b32.xlu1 %v17331_v50, %s24621_s28 }
 0x15b   :  { %v17666_v44 = vsel %vm852_vm5, %v14303_v4, %v24367_v32  ;;  %14566 = vrot.lane.b32.xlu0 %v17331_v50, %s16201_s20  ;;  %12493 = vmatprep.subr.bf16.mxu1 %v12492_v54  ;;  %v862_v21 = vsel %vm852_vm5, %v14259_v12, %v14303_v4 }
 0x15c   :  { %v17674_v30 = vsel %vm700_vm4, %v14298_v37, %v24368_v40  ;;  %12495 = vmatpush1.bf16.msra.mxu1 %v24695_v18  ;;  %v17679_v46 = vpop.permute.xlu1 %14311  ;;  %v710_v59 = vsel %vm700_vm4, %v14254_v58, %v14298_v37  ;;  %v24696_v58 = vunpack.i.h.bf16 %v17143_v33  ;;  %v1165_v33 = vsel %vm24689_vm6, %v14273_v63, %v14274_v45 }
 0x15d   :  { %v14313_v7 = vunpack.i.l.bf16 %v17679_v46  ;;  %v17683_v16 = vpop.permute.xlu0 %14306  ;;  %v12532_v15 = vpack.c.bf16 %v862_v21, %v710_v59  ;;  %v24698_v21 = vunpack.i.h.bf16 %v17152_v34  ;;  %v1013_v34 = vsel %vm24691_vm7, %v14268_v36, %v14269_v49 }
 0x15e   :  { %v14308_v4 = vunpack.i.l.bf16 %v17683_v16  ;;  %14581 = vrot.lane.b32.xlu1 %v17514_v19, %s16196_s22  ;;  %v12538_v27 = vpack.c.bf16 %v1165_v33, %v1013_v34  ;;  %v14309_v53 = vunpack.i.h.bf16 %v17683_v16  ;;  %v24719_v16 = vpack.c.bf16 %v17289_v31, %v17297_v48 }
 0x15f   :  { %14576 = vrot.lane.b32.xlu0 %v17514_v19, %s24629_s27  ;;  %12533 = vmatprep.subr.bf16.mxu0 %v12532_v15  ;;  %v1772_v54 = vsel %vm24697_vm10, %v24696_v58, %v14313_v7  ;;  %vm24700_vm10 = vmmov %vm24689_vm6 }
 0x160   :  { %12535 = vmatpush1.bf16.msra.mxu0 %v12534_v42  ;;  %v17699_v37 = vpop.permute.xlu1 %14321  ;;  %v1620_v29 = vsel %vm24699_vm11, %v24698_v21, %v14308_v4  ;;  %vm24701_vm11 = vmmov %vm24689_vm6 }
 0x161   :  { %v24361_v13 = vunpack.i.h.bf16 %v17699_v37  ;;  %v14323_v18 = vunpack.i.l.bf16 %v17699_v37  ;;  %v17708_v59 = vpop.permute.xlu0 %14316  ;;  %v12496_v15 = vpack.c.bf16 %v1772_v54, %v1620_v29  ;;  %vm24702_vm6 = vmmov %vm24691_vm7 }
 0x162   :  { %v24362_v42 = vunpack.i.h.bf16 %v17708_v59  ;;  %v14318_v58 = vunpack.i.l.bf16 %v17708_v59  ;;  %14591 = vrot.lane.b32.xlu1 %v17331_v50, %s16202_s21  ;;  %vm24704_vm7 = vmmov %vm24702_vm6 }
 0x163   :  { %v17723_v21 = vsel %vm24700_vm10, %v14323_v18, %v24361_v13  ;;  %14586 = vrot.lane.b32.xlu0 %v17331_v50, %s24387_s26  ;;  %12497 = vmatprep.subr.bf16.mxu1 %v12496_v15  ;;  %v1166_v24 = vsel %vm24701_vm11, %v14274_v45, %v14323_v18  ;;  %v14294_v18 = vunpack.i.h.bf16 %v17622_v39  ;;  %vm24706_vm10 = vcmask 498688  }
 0x164   :  { %v17731_v63 = vsel %vm24702_vm6, %v14318_v58, %v24362_v42  ;;  %12499 = vmatpush1.bf16.msra.mxu1 %v24703_v57  ;;  %v17736_v36 = vpop.permute.xlu1 %14331  ;;  %v1014_v54 = vsel %vm24704_vm7, %v14269_v49, %v14318_v58  ;;  %v24705_v49 = vunpack.i.h.bf16 %v17202_v14  ;;  %v24707_v57 = vunpack.i.h.bf16 %v17211_v62 }
 0x165   :  { %v14333_v29 = vunpack.i.l.bf16 %v17736_v36  ;;  %v17740_v13 = vpop.permute.xlu0 %14326  ;;  %v12536_v15 = vpack.c.bf16 %v1166_v24, %v1014_v54  ;;  %vm24708_vm11 = vcmask 506880   ;;  %v1469_v14 = vsel %vm1460_vm9, %v14293_v47, %v14294_v18 }
 0x166   :  { %v14328_v42 = vunpack.i.l.bf16 %v17740_v13  ;;  %14601 = vrot.lane.b32.xlu1 %v17514_v19, %s24632_s0  ;;  %v1317_v62 = vsel %vm1308_vm8, %v14288_v61, %v14289_v17  ;;  %vm24711_vm6 = vcmask 261120   ;;  %vm24713_vm7 = vcmask 490496  }
 0x167   :  { %14596 = vrot.lane.b32.xlu0 %v17514_v19, %s24633_s24  ;;  %12537 = vmatprep.subr.bf16.mxu0 %v12536_v15  ;;  %v2076_v58 = vsel %vm24706_vm10, %v24705_v49, %v14333_v29  ;;  %v12542_v1 = vpack.c.bf16 %v1469_v14, %v1317_v62  ;;  %vm24714_vm10 = vcmask 515072   ;;  %v14329_v48 = vunpack.i.h.bf16 %v17740_v13 }
 0x168   :  { %12539 = vmatpush1.bf16.msra.mxu0 %v12538_v27  ;;  %v17756_v24 = vpop.permute.xlu1 %14341  ;;  %v1924_v33 = vsel %vm24708_vm11, %v24707_v57, %v14328_v42  ;;  %vm24715_vm11 = vcmask 523264  }
 0x169   :  { %v24363_v34 = vunpack.i.h.bf16 %v17756_v24  ;;  %v14343_v54 = vunpack.i.l.bf16 %v17756_v24  ;;  %v17765_v15 = vpop.permute.xlu0 %14336  ;;  %v12500_v45 = vpack.c.bf16 %v2076_v58, %v1924_v33 }
 0x16a   :  { %v24364_v27 = vunpack.i.h.bf16 %v17765_v15  ;;  %v14338_v49 = vunpack.i.l.bf16 %v17765_v15  ;;  %14611 = vrot.lane.b32.xlu1 %v17331_v50, %s24622_s25 }
 0x16b   :  { %v17780_v57 = vsel %vm1460_vm9, %v14343_v54, %v24363_v34  ;;  %14606 = vrot.lane.b32.xlu0 %v17331_v50, %s24623_s23  ;;  %12501 = vmatprep.subr.bf16.mxu1 %v12500_v45  ;;  %v1470_v39 = vsel %vm1460_vm9, %v14294_v18, %v14343_v54  ;;  %v14314_v54 = vunpack.i.h.bf16 %v17679_v46 }
 0x16c   :  { %v17788_v47 = vsel %vm1308_vm8, %v14338_v49, %v24364_v27  ;;  %12503 = vmatpush1.bf16.msra.mxu1 %v24709_v56  ;;  %v17793_v61 = vpop.permute.xlu1 %14351  ;;  %v1318_v58 = vsel %vm1308_vm8, %v14289_v17, %v14338_v49  ;;  %v24710_v17 = vunpack.i.h.bf16 %v17265_v35  ;;  %v24712_v56 = vunpack.i.h.bf16 %v17274_v43 }
 0x16d   :  { %v14353_v33 = vunpack.i.l.bf16 %v17793_v61  ;;  %v17797_v34 = vpop.permute.xlu0 %14346  ;;  %v12540_v45 = vpack.c.bf16 %v1470_v39, %v1318_v58  ;;  %v1773_v35 = vsel %vm24714_vm10, %v14313_v7, %v14314_v54  ;;  %v1621_v43 = vsel %vm24715_vm11, %v14308_v4, %v14309_v53 }
 0x16e   :  { %v14348_v27 = vunpack.i.l.bf16 %v17797_v34  ;;  %14621 = vrot.lane.b32.xlu1 %v17514_v19, %s24621_s28  ;;  %v12546_v31 = vpack.c.bf16 %v1773_v35, %v1621_v43 }
 0x16f   :  { %14616 = vrot.lane.b32.xlu0 %v17514_v19, %s16201_s20  ;;  %12541 = vmatprep.subr.bf16.mxu0 %v12540_v45  ;;  %v2380_v49 = vsel %vm24711_vm6, %v24710_v17, %v14353_v33  ;;  %vm24716_vm6 = vmmov %vm24714_vm10 }
 0x170   :  { %12543 = vmatpush1.bf16.msra.mxu0 %v12542_v1  ;;  %v17813_v39 = vpop.permute.xlu1 %14361  ;;  %v2228_v14 = vsel %vm24713_vm7, %v24712_v56, %v14348_v27  ;;  %vm24717_vm7 = vmmov %vm24716_vm6 }
 0x171   :  { %v24365_v62 = vunpack.i.h.bf16 %v17813_v39  ;;  %v14363_v58 = vunpack.i.l.bf16 %v17813_v39  ;;  %v17822_v45 = vpop.permute.xlu0 %14356  ;;  %v12504_v18 = vpack.c.bf16 %v2380_v49, %v2228_v14  ;;  %vm24718_vm10 = vmmov %vm24715_vm11  ;;  %v17853_v14 = vld [vmem:[#allocation2 + $0x60] sm:$0xff] }
 0x172   :  { %v24366_v1 = vunpack.i.h.bf16 %v17822_v45  ;;  %v14358_v17 = vunpack.i.l.bf16 %v17822_v45  ;;  %14631 = vrot.lane.b32.xlu1 %v17514_v19, %s24387_s26  ;;  %vm24720_vm11 = vmmov %vm24718_vm10  ;;  %s24789_s26 = smov 127  }
 0x173   :  { %v17837_v56 = vsel %vm24716_vm6, %v14363_v58, %v24365_v62  ;;  %14626 = vrot.lane.b32.xlu0 %v17331_v50, %s24385_s30  ;;  %12505 = vmatprep.subr.bf16.mxu1 %v12504_v18  ;;  %v1774_v46 = vsel %vm24717_vm7, %v14314_v54, %v14363_v58  ;;  %vm24726_vm6 = vcmask 498688   ;;  %vm24727_vm7 = vcmask 506880  }
 0x174   :  { %v17845_v7 = vsel %vm24718_vm10, %v14358_v17, %v24366_v1  ;;  %12507 = vmatpush1.bf16.msra.mxu1 %v24719_v16  ;;  %v17850_v4 = vpop.permute.xlu1 %14371  ;;  %v1622_v49 = vsel %vm24720_vm11, %v14309_v53, %v14358_v17  ;;  %v14334_v1 = vunpack.i.h.bf16 %v17736_v36  ;;  %v14645_v53 = vpack.i.bf16 %v17309_v22, %v17853_v14  ;;  %v24722_v17 = vld [vmem:[#allocation12_spill] sm:$0xff]  ;;  %vm24728_vm10 = vmmov %vm24726_vm6 }
 0x175   :  { %v14373_v62 = vunpack.i.l.bf16 %v17850_v4  ;;  %v17856_v18 = vpop.permute.xlu0 %14366  ;;  %v12544_v54 = vpack.c.bf16 %v1774_v46, %v1622_v49  ;;  %v24723_v46 = vunpack.i.h.bf16 %v24722_v17  ;;  %v1925_v51 = vsel %vm24727_vm7, %v14328_v42, %v14329_v48  ;;  %vm24730_vm11 = vmmov %vm24726_vm6 }
 0x176   :  { %v24373_v12 = vunpack.i.l.bf16 %v17856_v18  ;;  %14641 = vrot.lane.b32.xlu1 %v17331_v50, %s24721_s29  ;;  %v24724_v50 = vld [vmem:[#allocation11_spill] sm:$0xff]  ;;  %v2077_v17 = vsel %vm24726_vm6, %v14333_v29, %v14334_v1  ;;  %vm24731_vm6 = vmmov %vm24727_vm7 }
 0x177   :  { %14636 = vrot.lane.b32.xlu0 %v17514_v19, %s16202_s21  ;;  %12545 = vmatprep.subr.bf16.mxu0 %v12544_v54  ;;  %v2684_v16 = vsel %vm2676_vm13, %v24723_v46, %v14373_v62  ;;  %v24725_v35 = vunpack.i.h.bf16 %v24724_v50  ;;  %v16146_v50 = vld [vmem:[#allocation2 + $0x80] sm:$0xff]  ;;  %vm24735_vm7 = vmmov %vm24731_vm6 }
 0x178   :  { %12547 = vmatpush1.bf16.msra.mxu0 %v12546_v31  ;;  %v17874_v49 = vpop.permute.xlu1 %14381 }
 0x179   :  { %v2532_v43 = vsel %vm2524_vm12, %v24725_v35, %v24373_v12  ;;  %v24372_v54 = vunpack.i.h.bf16 %v17874_v49  ;;  %v14383_v58 = vunpack.i.l.bf16 %v17874_v49  ;;  %v17883_v32 = vpop.permute.xlu0 %14376  ;;  %v17893_v35 = vpack.i.bf16 %v16146_v50, %v17485_v6 }
 0x17a   :  { %v12508_v40 = vpack.c.bf16 %v2684_v16, %v2532_v43  ;;  %v24376_v31 = vunpack.i.h.bf16 %v17883_v32  ;;  %v14378_v46 = vunpack.i.l.bf16 %v17883_v32  ;;  %14651 = vrot.lane.b32.xlu1 %v17514_v19, %s24623_s23  ;;  %v24732_v43 = vld [vmem:[#allocation14_spill] sm:$0xff] }
 0x17b   :  { %v17901_v36 = vsel %vm24728_vm10, %v14383_v58, %v24372_v54  ;;  %14646 = vrot.lane.b32.xlu0 %v14645_v53, %s24729_s13  ;;  %v2078_v29 = vsel %vm24730_vm11, %v14334_v1, %v14383_v58  ;;  %v24734_v13 = vpack.c.bf16 %v24732_v43, %v24733_v5  ;;  %v14354_v58 = vunpack.i.h.bf16 %v17793_v61 }
 0x17c   :  { %12509 = vmatprep.subr.bf16.mxu1 %v12508_v40  ;;  %v17908_v16 = vsel %vm24731_vm6, %v14378_v46, %v24376_v31  ;;  %v17913_v42 = vpop.permute.xlu1 %14391  ;;  %v1926_v23 = vsel %vm24735_vm7, %v14329_v48, %v14378_v46  ;;  %v12550_v5 = vpack.c.bf16 %v2077_v17, %v1925_v51  ;;  %v14349_v43 = vunpack.i.h.bf16 %v17797_v34 }
 0x17d   :  { %12511 = vmatpush1.bf16.msra.mxu1 %v24734_v13  ;;  %v14393_v54 = vunpack.i.l.bf16 %v17913_v42  ;;  %v17917_v12 = vpop.permute.xlu0 %14386  ;;  %v12548_v40 = vpack.c.bf16 %v2078_v29, %v1926_v23  ;;  %v24736_v23 = vunpack.i.h.bf16 %v17402_v2  ;;  %v24737_v29 = vunpack.i.h.bf16 %v17367_v28 }
 0x17e   :  { %v24377_v53 = vunpack.i.l.bf16 %v17917_v12  ;;  %14661 = vrot.lane.b32.xlu1 %v17893_v35, %s24385_s30  ;;  %vm24738_vm10 = vcmask 261120   ;;  %vm24739_vm11 = vcmask 490496   ;;  %v24743_v34 = vpack.c.bf16 %v17425_v55, %v17407_v3 }
 0x17f   :  { %14656 = vrot.lane.b32.xlu0 %v17514_v19, %s24622_s25  ;;  %12549 = vmatprep.subr.bf16.mxu0 %v12548_v40  ;;  %v2988_v48 = vsel %vm2980_vm15, %v24736_v23, %v14393_v54  ;;  %v2381_v2 = vsel %vm24738_vm10, %v14353_v33, %v14354_v58  ;;  %v2229_v28 = vsel %vm24739_vm11, %v14348_v27, %v14349_v43  ;;  %vm24740_vm6 = vmmov %vm24738_vm10 }
 0x180   :  { %12551 = vmatpush1.bf16.msra.mxu0 %v12550_v5  ;;  %v17933_v46 = vpop.permute.xlu1 %14401  ;;  %v2836_v51 = vsel %vm2828_vm14, %v24737_v29, %v24377_v53  ;;  %vm24741_vm7 = vmmov %vm24740_vm6  ;;  %v12554_v55 = vpack.c.bf16 %v2381_v2, %v2229_v28  ;;  %v17995_v53 = vpack.i.bf16 %v16146_v50, %v16146_v50  ;;  %v24746_v2 = vunpack.i.l.bf16 %v17856_v18 }
 0x181   :  { %v24374_v17 = vunpack.i.h.bf16 %v17933_v46  ;;  %v14403_v13 = vunpack.i.l.bf16 %v17933_v46  ;;  %v17942_v40 = vpop.permute.xlu0 %14396  ;;  %v12512_v1 = vpack.c.bf16 %v2988_v48, %v2836_v51  ;;  %vm24742_vm10 = vmmov %vm24739_vm11  ;;  %v14374_v51 = vunpack.i.h.bf16 %v17850_v4 }
 0x182   :  { %v24375_v5 = vunpack.i.h.bf16 %v17942_v40  ;;  %v14398_v23 = vunpack.i.l.bf16 %v17942_v40  ;;  %3605 = vrot.lane.b32.xlu1 %v17853_v14, %s16191_s15  ;;  %vm24744_vm11 = vmmov %vm24742_vm10 }
 0x183   :  { %v17957_v29 = vsel %vm24740_vm6, %v14403_v13, %v24374_v17  ;;  %14666 = vrot.lane.b32.xlu0 %v17514_v19, %s24385_s30  ;;  %12513 = vmatprep.subr.bf16.mxu1 %v12512_v1  ;;  %v2382_v61 = vsel %vm24741_vm7, %v14354_v58, %v14403_v13  ;;  %v14369_v17 = vunpack.i.h.bf16 %v17856_v18  ;;  %vm24759_vm6 = vcmask 769024  }
 0x184   :  { %v17965_v33 = vsel %vm24742_vm10, %v14398_v23, %v24375_v5  ;;  %12515 = vmatpush1.bf16.msra.mxu1 %v24743_v34  ;;  %v17970_v27 = vpop.permute.xlu1 %14411  ;;  %v2230_v48 = vsel %vm24744_vm11, %v14349_v43, %v14398_v23  ;;  %v3051_v43 = vld [vmem:[#allocation2 + $0x40] sm:$0xff]  ;;  %vm24761_vm7 = vcmask 777216   ;;  %vm24768_vm10 = vcmask 515072  }
 0x185   :  { %v17975_v1 = vpop.permute.xlu0 %14406  ;;  %v12552_v58 = vpack.c.bf16 %v2382_v61, %v2230_v48  ;;  %v24378_v5 = vunpack.i.h.bf16 %v17970_v27  ;;  %v14413_v23 = vunpack.i.l.bf16 %v17970_v27  ;;  %v24745_v61 = vunpack.i.h.bf16 %v17429_v10 }
 0x186   :  { %v24379_v31 = vunpack.i.h.bf16 %v17975_v1  ;;  %v14408_v3 = vunpack.i.l.bf16 %v17975_v1  ;;  %14671 = vrot.lane.b32.xlu1 %v17893_v35, %s24721_s29  ;;  %v2533_v28 = vsel %vm2524_vm12, %v24746_v2, %v14369_v17  ;;  %vm24770_vm11 = vcmask 523264  }
 0x187   :  { %3607 = vrot.lane.b32.xlu0 %v17309_v22, %s16191_s15  ;;  %12553 = vmatprep.subr.bf16.mxu0 %v12552_v58  ;;  %v2685_v22 = vsel %vm2676_vm13, %v14373_v62, %v14374_v51 }
 0x188   :  { %v3180_v34 = vsel %vm244_vm1, %v24745_v61, %v14408_v3  ;;  %12555 = vmatpush1.bf16.msra.mxu0 %v12554_v55  ;;  %v17990_v48 = vpop.permute.xlu1 %14421  ;;  %v3181_v13 = vsel %vm244_vm1, %v14408_v3, %v24379_v31  ;;  %v18009_v61 = vsel %vm2524_vm12, %v14413_v23, %v24378_v5  ;;  %v2534_v3 = vsel %vm2524_vm12, %v14369_v17, %v14413_v23 }
 0x189   :  { %v18003_v10 = vpop.permute.xlu0 %14416  ;;  %v12516_v58 = vpack.c.bf16 %v3181_v13, %v3051_v43  ;;  %v12518_v55 = vpack.c.bf16 %v3180_v34, %v17448_v38  ;;  %v24381_v50 = vunpack.i.h.bf16 %v17990_v48  ;;  %v14423_v38 = vunpack.i.l.bf16 %v17990_v48 }
 0x18a   :  { %v24380_v4 = vunpack.i.h.bf16 %v18003_v10  ;;  %v14418_v62 = vunpack.i.l.bf16 %v18003_v10  ;;  %14681 = vrot.lane.b32.xlu1 %v17514_v19, %s24721_s29  ;;  %v12558_v5 = vpack.c.bf16 %v2685_v22, %v2533_v28  ;;  %v14389_v23 = vunpack.i.h.bf16 %v17917_v12 }
 0x18b   :  { %14676 = vrot.lane.b32.xlu0 %v17893_v35, %s24729_s13  ;;  %12517 = vmatprep.subr.bf16.mxu1 %v12516_v58  ;;  %v3332_v17 = vsel %vm396_vm2, %v14423_v38, %v24381_v50  ;;  %v24747_v22 = vunpack.i.h.bf16 %v17470_v11 }
 0x18c   :  { %v18022_v18 = vsel %vm2676_vm13, %v14418_v62, %v24380_v4  ;;  %12519 = vmatpush1.bf16.msra.mxu1 %v12518_v55  ;;  %v18024_v13 = vpop.permute.xlu1 %14431  ;;  %v2686_v43 = vsel %vm2676_vm13, %v14374_v51, %v14418_v62  ;;  %v14394_v51 = vunpack.i.h.bf16 %v17913_v42  ;;  %v24748_v62 = vunpack.i.h.bf16 %v17506_v25  ;;  %v3552_v42 = vld [vmem:[#allocation2 + $0x70] sm:$0xff] }
 0x18d   :  { %v18028_v34 = vpop.permute.xlu0 %14426  ;;  %v12556_v2 = vpack.c.bf16 %v2686_v43, %v2534_v3  ;;  %v24382_v58 = vunpack.i.h.bf16 %v18024_v13  ;;  %v3331_v28 = vsel %vm396_vm2, %v24747_v22, %v14423_v38  ;;  %v14433_v55 = vunpack.i.l.bf16 %v18024_v13 }
 0x18e   :  { %v14429_v31 = vunpack.i.h.bf16 %v18028_v34  ;;  %v14428_v4 = vunpack.i.l.bf16 %v18028_v34  ;;  %14691 = vrot.lane.b32.xlu1 %v17995_v53, %s16191_s15 }
 0x18f   :  { %14686 = vrot.lane.b32.xlu0 %v17514_v19, %s24729_s13  ;;  %12557 = vmatprep.subr.bf16.mxu0 %v12556_v2  ;;  %v18061_v11 = vsel %vm2828_vm14, %v14433_v55, %v24382_v58 }
 0x190   :  { %v3482_v3 = vsel %vm548_vm3, %v24748_v62, %v14428_v4  ;;  %12559 = vmatpush1.bf16.msra.mxu0 %v12558_v5  ;;  %v18051_v43 = vpop.permute.xlu1 %14441  ;;  %v3483_v35 = vsel %vm548_vm3, %v14428_v4, %v14429_v31  ;;  %v2989_v5 = vsel %vm2980_vm15, %v14393_v54, %v14394_v51  ;;  %v24749_v4 = vunpack.i.l.bf16 %v17917_v12 }
 0x191   :  { %v18056_v50 = vpop.permute.xlu0 %14436  ;;  %v12520_v19 = vpack.c.bf16 %v3483_v35, %v3332_v17  ;;  %v12522_v2 = vpack.c.bf16 %v3482_v3, %v3331_v28  ;;  %v14444_v17 = vunpack.i.h.bf16 %v18051_v43  ;;  %v2838_v54 = vsel %vm2828_vm14, %v14389_v23, %v14433_v55 }
 0x192   :  { %v24383_v25 = vunpack.i.h.bf16 %v18056_v50  ;;  %v14438_v38 = vunpack.i.l.bf16 %v18056_v50  ;;  %14701 = vrot.lane.b32.xlu1 %v17995_v53, %s24385_s30  ;;  %v2837_v35 = vsel %vm2828_vm14, %v24749_v4, %v14389_v23  ;;  %v14443_v4 = vunpack.i.l.bf16 %v18051_v43  ;;  %s24772_s30 = smov 31  }
 0x193   :  { %14696 = vrot.lane.b32.xlu0 %v17995_v53, %s16190_s14  ;;  %12521 = vmatprep.subr.bf16.mxu1 %v12520_v19  ;;  %v24754_v19 = vunpack.i.h.bf16 %v17990_v48  ;;  %v24757_v43 = vpack.c.bf16 %v17666_v44, %v17674_v30  ;;  %v24758_v44 = vunpack.i.h.bf16 %v17699_v37 }
 0x194   :  { %v18079_v22 = vsel %vm2980_vm15, %v14438_v38, %v24383_v25  ;;  %12523 = vmatpush1.bf16.msra.mxu1 %v12522_v2  ;;  %v3598_v28 = vpop.permute.xlu1 %3597  ;;  %v2990_v12 = vsel %vm2980_vm15, %v14394_v51, %v14438_v38  ;;  %v12562_v2 = vpack.c.bf16 %v2989_v5, %v2837_v35  ;;  %v24750_v51 = vunpack.i.h.bf16 %v17975_v1  ;;  %v3053_v38 = vld [vmem:[#allocation2 + $0x50] sm:$0xff] }
 0x195   :  { %v18083_v62 = vpop.permute.xlu0 %14446  ;;  %v12560_v3 = vpack.c.bf16 %v2990_v12, %v2838_v54  ;;  %v18101_v12 = vld [vmem:[#allocation2 + $0x58] sm:$0xff] }
 0x196   :  { %v24384_v58 = vunpack.i.h.bf16 %v18083_v62  ;;  %v14448_v25 = vunpack.i.l.bf16 %v18083_v62  ;;  %3611 = vrot.lane.b32.xlu1 %v17485_v6, %s16191_s15  ;;  %v256_v6 = vsel %vm244_vm1, %v14443_v4, %v14444_v17 }
 0x197   :  { %3609 = vrot.lane.b32.xlu0 %v3552_v42, %s16191_s15  ;;  %12561 = vmatprep.subr.bf16.mxu0 %v12560_v3  ;;  %v24751_v3 = vunpack.i.h.bf16 %v17528_v41 }
 0x198   :  { %v3182_v23 = vsel %vm244_vm1, %v24750_v51, %v14448_v25  ;;  %12563 = vmatpush1.bf16.msra.mxu0 %v12562_v2  ;;  %v18096_v55 = vpop.permute.xlu1 %14451  ;;  %v3183_v54 = vsel %vm244_vm1, %v14448_v25, %v24384_v58 }
 0x199   :  { %v24390_v5 = vunpack.i.h.bf16 %v18096_v55  ;;  %v18107_v35 = vpop.permute.xlu0 %3599  ;;  %v12564_v1 = vpack.c.bf16 %v3183_v54, %v3053_v38  ;;  %v12566_v42 = vpack.c.bf16 %v3182_v23, %v17540_v20  ;;  %v255_v2 = vsel %vm244_vm1, %v24751_v3, %v14443_v4 }
 0x19a   :  { %14711 = vrot.lane.b32.xlu1 %v17995_v53, %s16192_s16  ;;  %v3634_v25 = vsel %vm700_vm4, %v3598_v28, %v18107_v35  ;;  %v14453_v51 = vunpack.i.l.bf16 %v18096_v55  ;;  %v3633_v54 = vsel %vm700_vm4, %v17547_v52, %v3598_v28  ;;  %v12572_v20 = vpack.c.bf16 %v256_v6, %v18101_v12  ;;  %v18136_v28 = vld [vmem:[%s24275_s1] sm:$0xff] }
 0x19b   :  { %14706 = vrot.lane.b32.xlu0 %v17995_v53, %s16193_s17  ;;  %4488 = vmatprep.subr.mxu1 %v3634_v25  ;;  %v12574_v23 = vpack.c.bf16 %v255_v2, %v3053_v38  ;;  %v24752_v38 = vunpack.i.h.bf16 %v17602_v60 }
 0x19c   :  { %12565 = vmatprep.subr.bf16.mxu0 %v12564_v1  ;;  %4489 = vmatpush1.msra.mxu1 %v3633_v54  ;;  %v18123_v41 = vpop.permute.xlu1 %14461  ;;  %v408_v3 = vsel %vm396_vm2, %v14453_v51, %v24390_v5 }
 0x19d   :  { %12567 = vmatpush1.bf16.msra.mxu0 %v12566_v42  ;;  %v18125_v4 = vpop.permute.xlu0 %14456  ;;  %12573 = vmatprep.subr.bf16.mxu1 %v12572_v20  ;;  %v24389_v25 = vunpack.i.h.bf16 %v18123_v41  ;;  %v407_v6 = vsel %vm396_vm2, %v24752_v38, %v14453_v51  ;;  %v14463_v1 = vunpack.i.l.bf16 %v18123_v41  ;;  %v24753_v42 = vunpack.i.h.bf16 %v17591_v0 }
 0x19e   :  { %v14459_v58 = vunpack.i.h.bf16 %v18125_v4  ;;  %v14458_v52 = vunpack.i.l.bf16 %v18125_v4  ;;  %4505 = vmatmul.mubr.f32.vlgmr.msra.gmra.mrb[2].mxu1 %v18136_v28  ;;  %14721 = vrot.lane.b32.xlu1 %v17995_v53, %s24729_s13 }
 0x19f   :  { %12575 = vmatpush1.bf16.msra.mxu1 %v12574_v23  ;;  %14716 = vrot.lane.b32.xlu0 %v17995_v53, %s24721_s29  ;;  %v16206_v23 = vmov 0  }
 0x1a0   :  { %v559_v2 = vsel %vm548_vm3, %v24753_v42, %v14458_v52  ;;  %v18150_v54 = vpop.permute.xlu1 %14471  ;;  %v560_v20 = vsel %vm548_vm3, %v14458_v52, %v14459_v58  ;;  %11812 = vmatprep.mubr.msk.f32.mxu1 %vm24419_vm0, %v17502_v26  ;;  %15035 = vset.pattern.permute.xlu0 %v16206_v23  ;;  %v3334_v52 = vsel %vm396_vm2, %v14463_v1, %v24389_v25 }
 0x1a1   :  { %v18157_v60 = vpop.permute.xlu0 %14466  ;;  %v12576_v51 = vpack.c.bf16 %v560_v20, %v408_v3  ;;  %v12578_v38 = vpack.c.bf16 %v559_v2, %v407_v6  ;;  %15971 = vset.pattern.permute.xlu1 %v16206_v23  ;;  %v3333_v3 = vsel %vm396_vm2, %v24754_v19, %v14463_v1  ;;  %v14473_v6 = vunpack.i.l.bf16 %v18150_v54 }
 0x1a2   :  { %v24391_v0 = vunpack.i.h.bf16 %v18157_v60  ;;  %v14468_v42 = vunpack.i.l.bf16 %v18157_v60  ;;  %14731 = vrot.lane.b32.xlu1 %v17995_v53, %s16194_s18 }
 0x1a3   :  { %14726 = vrot.lane.b32.xlu0 %v17995_v53, %s16195_s19  ;;  %12577 = vmatprep.subr.bf16.mxu1 %v12576_v51 }
 0x1a4   :  { %v3484_v2 = vsel %vm548_vm3, %v14429_v31, %v14468_v42  ;;  %12579 = vmatpush1.bf16.msra.mxu1 %v12578_v38  ;;  %v18175_v20 = vpop.permute.xlu1 %14481  ;;  %v3485_v23 = vsel %vm548_vm3, %v14468_v42, %v24391_v0  ;;  %v18187_v31 = vld [vmem:[#allocation2 + $0x68] sm:$0xff]  ;;  %v24755_v42 = vunpack.i.h.bf16 %v17651_v9 }
 0x1a5   :  { %v24409_v25 = vunpack.i.h.bf16 %v18175_v20  ;;  %v14483_v51 = vunpack.i.l.bf16 %v18175_v20  ;;  %v18182_v48 = vpop.permute.xlu0 %14476  ;;  %v12568_v19 = vpack.c.bf16 %v3485_v23, %v3334_v52  ;;  %v12570_v1 = vpack.c.bf16 %v3484_v2, %v3333_v3 }
 0x1a6   :  { %v14478_v5 = vunpack.i.l.bf16 %v18182_v48  ;;  %14741 = vrot.lane.b32.xlu1 %v17995_v53, %s16190_s14  ;;  %v712_v52 = vsel %vm700_vm4, %v24755_v42, %v14473_v6  ;;  %v24756_v3 = vunpack.i.h.bf16 %v17642_v8 }
 0x1a7   :  { %14736 = vrot.lane.b32.xlu0 %v17995_v53, %s16191_s15  ;;  %12569 = vmatprep.subr.bf16.mxu0 %v12568_v19  ;;  %v258_v34 = vsel %vm244_vm1, %v14483_v51, %v24409_v25 }
 0x1a8   :  { %12571 = vmatpush1.bf16.msra.mxu0 %v12570_v1  ;;  %v18194_v38 = vpop.permute.xlu1 %3603  ;;  %v864_v2 = vsel %vm852_vm5, %v24756_v3, %v14478_v5  ;;  %v12620_v0 = vpack.c.bf16 %v258_v34, %v18187_v31  ;;  %v257_v1 = vsel %vm244_vm1, %v14444_v17, %v14483_v51 }
 0x1a9   :  { %v3602_v23 = vpop.permute.xlu0 %3601  ;;  %v12580_v19 = vpack.c.bf16 %v864_v2, %v712_v52  ;;  %v12622_v34 = vpack.c.bf16 %v257_v1, %v17853_v14  ;;  %v24760_v14 = vunpack.i.h.bf16 %v17708_v59 }
 0x1aa   :  { %14751 = vrot.lane.b32.xlu1 %v17995_v53, %s16196_s22  ;;  %v3636_v9 = vsel %vm700_vm4, %v3602_v23, %v18194_v38  ;;  %v3635_v42 = vsel %vm700_vm4, %v18107_v35, %v3602_v23 }
 0x1ab   :  { %14746 = vrot.lane.b32.xlu0 %v17995_v53, %s24629_s27  ;;  %4559 = vmatprep.subr.mxu0 %v3636_v9  ;;  %v24762_v9 = vunpack.i.h.bf16 %v18096_v55  ;;  %v14474_v55 = vunpack.i.h.bf16 %v18150_v54 }
 0x1ac   :  { %12581 = vmatprep.subr.bf16.mxu1 %v12580_v19  ;;  %4560 = vmatpush1.msra.mxu0 %v3635_v42  ;;  %v18218_v8 = vpop.permute.xlu1 %14491 }
 0x1ad   :  { %12583 = vmatpush1.bf16.msra.mxu1 %v24757_v43  ;;  %v14493_v17 = vunpack.i.l.bf16 %v18218_v8  ;;  %v18224_v51 = vpop.permute.xlu0 %14486  ;;  %12621 = vmatprep.subr.bf16.mxu0 %v12620_v0  ;;  %v24763_v43 = vpack.c.bf16 %v17723_v21, %v17731_v63  ;;  %v14479_v21 = vunpack.i.h.bf16 %v18182_v48  ;;  %v24764_v63 = vunpack.i.h.bf16 %v17756_v24 }
 0x1ae   :  { %v14488_v35 = vunpack.i.l.bf16 %v18224_v51  ;;  %4576 = vmatmul.mubr.f32.vlgmr.msra.gmra.mrb[4].mxu0 %v18136_v28  ;;  %14761 = vrot.lane.b32.xlu1 %v17995_v53, %s16192_s16  ;;  %v713_v24 = vsel %vm700_vm4, %v14473_v6, %v14474_v55  ;;  %v24766_v48 = vpack.c.bf16 %v17780_v57, %v17788_v47  ;;  %v14489_v47 = vunpack.i.h.bf16 %v18224_v51 }
 0x1af   :  { %12623 = vmatpush1.bf16.msra.mxu0 %v12622_v34  ;;  %14756 = vrot.lane.b32.xlu0 %v17995_v53, %s16193_s17  ;;  %v1168_v30 = vsel %vm24759_vm6, %v24758_v44, %v14493_v17  ;;  %v24775_v51 = vpack.c.bf16 %v17837_v56, %v17845_v7 }
 0x1b0   :  { %v18238_v0 = vpop.permute.xlu1 %14501  ;;  %v1016_v52 = vsel %vm24761_vm7, %v24760_v14, %v14488_v35  ;;  %11813 = vmatprep.mubr.msk.f32.mxu0 %vm24419_vm0, %v17502_v26 }
 0x1b1   :  { %v24405_v3 = vunpack.i.h.bf16 %v18238_v0  ;;  %v14503_v2 = vunpack.i.l.bf16 %v18238_v0  ;;  %v18249_v23 = vpop.permute.xlu0 %14496  ;;  %v12584_v37 = vpack.c.bf16 %v1168_v30, %v1016_v52 }
 0x1b2   :  { %v24406_v19 = vunpack.i.h.bf16 %v18249_v23  ;;  %v14498_v1 = vunpack.i.l.bf16 %v18249_v23  ;;  %14771 = vrot.lane.b32.xlu1 %v17995_v53, %s24632_s0 }
 0x1b3   :  { %v561_v59 = vsel %vm548_vm3, %v14459_v58, %v14503_v2  ;;  %14766 = vrot.lane.b32.xlu0 %v17995_v53, %s24633_s24  ;;  %12585 = vmatprep.subr.bf16.mxu1 %v12584_v37  ;;  %v562_v26 = vsel %vm548_vm3, %v14503_v2, %v24405_v3 }
 0x1b4   :  { %v409_v42 = vsel %vm396_vm2, %v24762_v9, %v14498_v1  ;;  %12587 = vmatpush1.bf16.msra.mxu1 %v24763_v43  ;;  %v18269_v34 = vpop.permute.xlu1 %14511  ;;  %v410_v58 = vsel %vm396_vm2, %v14498_v1, %v24406_v19  ;;  %v24765_v1 = vunpack.i.h.bf16 %v17765_v15  ;;  %v865_v15 = vsel %vm852_vm5, %v14478_v5, %v14479_v21 }
 0x1b5   :  { %v14513_v4 = vunpack.i.l.bf16 %v18269_v34  ;;  %v18275_v44 = vpop.permute.xlu0 %14506  ;;  %v12624_v30 = vpack.c.bf16 %v562_v26, %v410_v58  ;;  %v12626_v14 = vpack.c.bf16 %v561_v59, %v409_v42  ;;  %v12630_v57 = vpack.c.bf16 %v865_v15, %v713_v24 }
 0x1b6   :  { %v14508_v52 = vunpack.i.l.bf16 %v18275_v44  ;;  %14781 = vrot.lane.b32.xlu1 %v17995_v53, %s16194_s18  ;;  %v14509_v7 = vunpack.i.h.bf16 %v18275_v44  ;;  %v24781_v44 = vpack.c.bf16 %v17901_v36, %v17908_v16 }
 0x1b7   :  { %14776 = vrot.lane.b32.xlu0 %v17995_v53, %s16195_s19  ;;  %12625 = vmatprep.subr.bf16.mxu0 %v12624_v30  ;;  %v1472_v2 = vsel %vm1460_vm9, %v24764_v63, %v14513_v4 }
 0x1b8   :  { %12627 = vmatpush1.bf16.msra.mxu0 %v12626_v14  ;;  %v18289_v37 = vpop.permute.xlu1 %14521  ;;  %v1320_v59 = vsel %vm1308_vm8, %v24765_v1, %v14508_v52 }
 0x1b9   :  { %v24402_v26 = vunpack.i.h.bf16 %v18289_v37  ;;  %v14523_v9 = vunpack.i.l.bf16 %v18289_v37  ;;  %v18298_v42 = vpop.permute.xlu0 %14516  ;;  %v12588_v43 = vpack.c.bf16 %v1472_v2, %v1320_v59 }
 0x1ba   :  { %v24404_v58 = vunpack.i.h.bf16 %v18298_v42  ;;  %v14518_v30 = vunpack.i.l.bf16 %v18298_v42  ;;  %14791 = vrot.lane.b32.xlu1 %v17995_v53, %s24621_s28 }
 0x1bb   :  { %v18313_v14 = vsel %vm852_vm5, %v14523_v9, %v24402_v26  ;;  %14786 = vrot.lane.b32.xlu0 %v17995_v53, %s16201_s20  ;;  %12589 = vmatprep.subr.bf16.mxu1 %v12588_v43  ;;  %v866_v54 = vsel %vm852_vm5, %v14479_v21, %v14523_v9  ;;  %v14494_v9 = vunpack.i.h.bf16 %v18218_v8 }
 0x1bc   :  { %v18321_v6 = vsel %vm700_vm4, %v14518_v30, %v24404_v58  ;;  %12591 = vmatpush1.bf16.msra.mxu1 %v24766_v48  ;;  %v18326_v5 = vpop.permute.xlu1 %14531  ;;  %v714_v63 = vsel %vm700_vm4, %v14474_v55, %v14518_v30  ;;  %v24767_v55 = vunpack.i.h.bf16 %v17813_v39  ;;  %v24769_v48 = vunpack.i.h.bf16 %v17822_v45 }
 0x1bd   :  { %v14533_v2 = vunpack.i.l.bf16 %v18326_v5  ;;  %v18330_v1 = vpop.permute.xlu0 %14526  ;;  %v12628_v59 = vpack.c.bf16 %v866_v54, %v714_v63  ;;  %v1169_v39 = vsel %vm24759_vm6, %v14493_v17, %v14494_v9  ;;  %v1017_v45 = vsel %vm24761_vm7, %v14488_v35, %v14489_v47 }
 0x1be   :  { %v14528_v43 = vunpack.i.l.bf16 %v18330_v1  ;;  %14801 = vrot.lane.b32.xlu1 %v17995_v53, %s16196_s22  ;;  %v12634_v56 = vpack.c.bf16 %v1169_v39, %v1017_v45  ;;  %v14529_v16 = vunpack.i.h.bf16 %v18330_v1  ;;  %v24792_v1 = vpack.c.bf16 %v17957_v29, %v17965_v33 }
 0x1bf   :  { %14796 = vrot.lane.b32.xlu0 %v17995_v53, %s24629_s27  ;;  %12629 = vmatprep.subr.bf16.mxu0 %v12628_v59  ;;  %v1776_v30 = vsel %vm24768_vm10, %v24767_v55, %v14533_v2  ;;  %vm24771_vm10 = vmmov %vm24759_vm6 }
 0x1c0   :  { %12631 = vmatpush1.bf16.msra.mxu0 %v12630_v57  ;;  %v18346_v54 = vpop.permute.xlu1 %14541  ;;  %v1624_v24 = vsel %vm24770_vm11, %v24769_v48, %v14528_v43  ;;  %vm24773_vm11 = vmmov %vm24759_vm6 }
 0x1c1   :  { %v24392_v15 = vunpack.i.h.bf16 %v18346_v54  ;;  %v14543_v63 = vunpack.i.l.bf16 %v18346_v54  ;;  %v18355_v59 = vpop.permute.xlu0 %14536  ;;  %v12592_v21 = vpack.c.bf16 %v1776_v30, %v1624_v24  ;;  %vm24774_vm6 = vmmov %vm24761_vm7 }
 0x1c2   :  { %v24393_v57 = vunpack.i.h.bf16 %v18355_v59  ;;  %v14538_v55 = vunpack.i.l.bf16 %v18355_v59  ;;  %14811 = vrot.lane.b32.xlu1 %v17995_v53, %s16202_s21  ;;  %vm24776_vm7 = vmmov %vm24774_vm6 }
 0x1c3   :  { %v18370_v48 = vsel %vm24771_vm10, %v14543_v63, %v24392_v15  ;;  %14806 = vrot.lane.b32.xlu0 %v17995_v53, %s24772_s30  ;;  %12593 = vmatprep.subr.bf16.mxu1 %v12592_v21  ;;  %v1170_v8 = vsel %vm24773_vm11, %v14494_v9, %v14543_v63  ;;  %v14514_v63 = vunpack.i.h.bf16 %v18269_v34  ;;  %vm24778_vm10 = vcmask 498688  }
 0x1c4   :  { %v18378_v17 = vsel %vm24774_vm6, %v14538_v55, %v24393_v57  ;;  %12595 = vmatpush1.bf16.msra.mxu1 %v24775_v51  ;;  %v18383_v35 = vpop.permute.xlu1 %14551  ;;  %v1018_v30 = vsel %vm24776_vm7, %v14489_v47, %v14538_v55  ;;  %v24777_v47 = vunpack.i.h.bf16 %v17874_v49  ;;  %v24779_v51 = vunpack.i.h.bf16 %v17883_v32 }
 0x1c5   :  { %v14553_v24 = vunpack.i.l.bf16 %v18383_v35  ;;  %v18387_v15 = vpop.permute.xlu0 %14546  ;;  %v12632_v21 = vpack.c.bf16 %v1170_v8, %v1018_v30  ;;  %vm24780_vm11 = vcmask 506880   ;;  %v1473_v49 = vsel %vm1460_vm9, %v14513_v4, %v14514_v63 }
 0x1c6   :  { %v14548_v57 = vunpack.i.l.bf16 %v18387_v15  ;;  %14821 = vrot.lane.b32.xlu1 %v17995_v53, %s24632_s0  ;;  %v1321_v32 = vsel %vm1308_vm8, %v14508_v52, %v14509_v7  ;;  %vm24783_vm6 = vcmask 261120   ;;  %vm24785_vm7 = vcmask 490496  }
 0x1c7   :  { %14816 = vrot.lane.b32.xlu0 %v17995_v53, %s24633_s24  ;;  %12633 = vmatprep.subr.bf16.mxu0 %v12632_v21  ;;  %v2080_v55 = vsel %vm24778_vm10, %v24777_v47, %v14553_v24  ;;  %v12638_v36 = vpack.c.bf16 %v1473_v49, %v1321_v32  ;;  %vm24786_vm10 = vcmask 515072   ;;  %v14549_v33 = vunpack.i.h.bf16 %v18387_v15 }
 0x1c8   :  { %12635 = vmatpush1.bf16.msra.mxu0 %v12634_v56  ;;  %v18403_v8 = vpop.permute.xlu1 %14561  ;;  %v1928_v39 = vsel %vm24780_vm11, %v24779_v51, %v14548_v57  ;;  %vm24787_vm11 = vcmask 523264   ;;  %v24801_v15 = vpack.c.bf16 %v18022_v18, %v18009_v61 }
 0x1c9   :  { %v24394_v45 = vunpack.i.h.bf16 %v18403_v8  ;;  %v14563_v30 = vunpack.i.l.bf16 %v18403_v8  ;;  %v18412_v21 = vpop.permute.xlu0 %14556  ;;  %v12596_v9 = vpack.c.bf16 %v2080_v55, %v1928_v39 }
 0x1ca   :  { %v24395_v56 = vunpack.i.h.bf16 %v18412_v21  ;;  %v14558_v47 = vunpack.i.l.bf16 %v18412_v21  ;;  %14831 = vrot.lane.b32.xlu1 %v17995_v53, %s24622_s25 }
 0x1cb   :  { %v18427_v51 = vsel %vm1460_vm9, %v14563_v30, %v24394_v45  ;;  %14826 = vrot.lane.b32.xlu0 %v17995_v53, %s24623_s23  ;;  %12597 = vmatprep.subr.bf16.mxu1 %v12596_v9  ;;  %v1474_v34 = vsel %vm1460_vm9, %v14514_v63, %v14563_v30  ;;  %v14534_v30 = vunpack.i.h.bf16 %v18326_v5 }
 0x1cc   :  { %v18435_v4 = vsel %vm1308_vm8, %v14558_v47, %v24395_v56  ;;  %12599 = vmatpush1.bf16.msra.mxu1 %v24781_v44  ;;  %v18440_v52 = vpop.permute.xlu1 %14571  ;;  %v1322_v55 = vsel %vm1308_vm8, %v14509_v7, %v14558_v47  ;;  %v24782_v7 = vunpack.i.h.bf16 %v17933_v46  ;;  %v24784_v44 = vunpack.i.h.bf16 %v17942_v40 }
 0x1cd   :  { %v14573_v39 = vunpack.i.l.bf16 %v18440_v52  ;;  %v18444_v45 = vpop.permute.xlu0 %14566  ;;  %v12636_v9 = vpack.c.bf16 %v1474_v34, %v1322_v55  ;;  %v1777_v46 = vsel %vm24786_vm10, %v14533_v2, %v14534_v30  ;;  %v1625_v40 = vsel %vm24787_vm11, %v14528_v43, %v14529_v16 }
 0x1ce   :  { %v14568_v56 = vunpack.i.l.bf16 %v18444_v45  ;;  %14841 = vrot.lane.b32.xlu1 %v17995_v53, %s24621_s28  ;;  %v12642_v29 = vpack.c.bf16 %v1777_v46, %v1625_v40  ;;  %v14569_v18 = vunpack.i.h.bf16 %v18444_v45  ;;  %v24810_v45 = vpack.c.bf16 %v18079_v22, %v18061_v11 }
 0x1cf   :  { %14836 = vrot.lane.b32.xlu0 %v17995_v53, %s16201_s20  ;;  %12637 = vmatprep.subr.bf16.mxu0 %v12636_v9  ;;  %v2384_v47 = vsel %vm24783_vm6, %v24782_v7, %v14573_v39  ;;  %vm24788_vm6 = vmmov %vm24786_vm10 }
 0x1d0   :  { %12639 = vmatpush1.bf16.msra.mxu0 %v12638_v36  ;;  %v18460_v34 = vpop.permute.xlu1 %14581  ;;  %v2232_v49 = vsel %vm24785_vm7, %v24784_v44, %v14568_v56  ;;  %vm24790_vm7 = vmmov %vm24788_vm6 }
 0x1d1   :  { %v24396_v32 = vunpack.i.h.bf16 %v18460_v34  ;;  %v14583_v55 = vunpack.i.l.bf16 %v18460_v34  ;;  %v18469_v9 = vpop.permute.xlu0 %14576  ;;  %v12600_v63 = vpack.c.bf16 %v2384_v47, %v2232_v49  ;;  %vm24791_vm10 = vmmov %vm24787_vm11 }
 0x1d2   :  { %v24397_v36 = vunpack.i.h.bf16 %v18469_v9  ;;  %v14578_v7 = vunpack.i.l.bf16 %v18469_v9  ;;  %14851 = vrot.lane.b32.xlu1 %v17995_v53, %s24772_s30  ;;  %vm24793_vm11 = vmmov %vm24791_vm10 }
 0x1d3   :  { %v18484_v44 = vsel %vm24788_vm6, %v14583_v55, %v24396_v32  ;;  %14846 = vrot.lane.b32.xlu0 %v17995_v53, %s24789_s26  ;;  %12601 = vmatprep.subr.bf16.mxu1 %v12600_v63  ;;  %v1778_v5 = vsel %vm24790_vm7, %v14534_v30, %v14583_v55  ;;  %v14554_v55 = vunpack.i.h.bf16 %v18383_v35  ;;  %vm24796_vm6 = vcmask 498688  }
 0x1d4   :  { %v18492_v2 = vsel %vm24791_vm10, %v14578_v7, %v24397_v36  ;;  %12603 = vmatpush1.bf16.msra.mxu1 %v24792_v1  ;;  %v18497_v43 = vpop.permute.xlu1 %14591  ;;  %v1626_v47 = vsel %vm24793_vm11, %v14529_v16, %v14578_v7  ;;  %v24794_v16 = vunpack.i.h.bf16 %v18003_v10  ;;  %v24795_v1 = vunpack.i.h.bf16 %v17970_v27  ;;  %vm24798_vm10 = vmmov %vm24796_vm6 }
 0x1d5   :  { %v14593_v49 = vunpack.i.l.bf16 %v18497_v43  ;;  %v18501_v32 = vpop.permute.xlu0 %14586  ;;  %v12640_v63 = vpack.c.bf16 %v1778_v5, %v1626_v47  ;;  %v2081_v10 = vsel %vm24796_vm6, %v14553_v24, %v14554_v55  ;;  %vm24797_vm7 = vcmask 506880   ;;  %vm24799_vm11 = vmmov %vm24796_vm6 }
 0x1d6   :  { %v14588_v36 = vunpack.i.l.bf16 %v18501_v32  ;;  %14861 = vrot.lane.b32.xlu1 %v17995_v53, %s24721_s29  ;;  %v1929_v27 = vsel %vm24797_vm7, %v14548_v57, %v14549_v33  ;;  %vm24800_vm6 = vmmov %vm24797_vm7 }
 0x1d7   :  { %14856 = vrot.lane.b32.xlu0 %v17995_v53, %s16202_s21  ;;  %12641 = vmatprep.subr.bf16.mxu0 %v12640_v63  ;;  %v2688_v7 = vsel %vm2676_vm13, %v24794_v16, %v14593_v49  ;;  %vm24802_vm7 = vmmov %vm24800_vm6  ;;  %v12646_v61 = vpack.c.bf16 %v2081_v10, %v1929_v27 }
 0x1d8   :  { %12643 = vmatpush1.bf16.msra.mxu0 %v12642_v29  ;;  %v18517_v5 = vpop.permute.xlu1 %14601  ;;  %v2536_v46 = vsel %vm2524_vm12, %v24795_v1, %v14588_v36 }
 0x1d9   :  { %v24398_v40 = vunpack.i.h.bf16 %v18517_v5  ;;  %v14603_v47 = vunpack.i.l.bf16 %v18517_v5  ;;  %v18526_v63 = vpop.permute.xlu0 %14596  ;;  %v12604_v30 = vpack.c.bf16 %v2688_v7, %v2536_v46 }
 0x1da   :  { %v24399_v29 = vunpack.i.h.bf16 %v18526_v63  ;;  %v14598_v16 = vunpack.i.l.bf16 %v18526_v63  ;;  %14871 = vrot.lane.b32.xlu1 %v17995_v53, %s24623_s23 }
 0x1db   :  { %v18541_v1 = vsel %vm24798_vm10, %v14603_v47, %v24398_v40  ;;  %14866 = vrot.lane.b32.xlu0 %v17995_v53, %s24729_s13  ;;  %12605 = vmatprep.subr.bf16.mxu1 %v12604_v30  ;;  %v2082_v35 = vsel %vm24799_vm11, %v14554_v55, %v14603_v47  ;;  %v14574_v47 = vunpack.i.h.bf16 %v18440_v52  ;;  %vm24805_vm10 = vcmask 261120  }
 0x1dc   :  { %v18549_v24 = vsel %vm24800_vm6, %v14598_v16, %v24399_v29  ;;  %12607 = vmatpush1.bf16.msra.mxu1 %v24801_v15  ;;  %v18554_v57 = vpop.permute.xlu1 %14611  ;;  %v1930_v7 = vsel %vm24802_vm7, %v14549_v33, %v14598_v16  ;;  %v24803_v33 = vunpack.i.h.bf16 %v18056_v50  ;;  %v24804_v15 = vunpack.i.h.bf16 %v18024_v13  ;;  %vm24807_vm6 = vmmov %vm24805_vm10 }
 0x1dd   :  { %v14613_v46 = vunpack.i.l.bf16 %v18554_v57  ;;  %v18558_v40 = vpop.permute.xlu0 %14606  ;;  %v12644_v30 = vpack.c.bf16 %v2082_v35, %v1930_v7  ;;  %v2385_v50 = vsel %vm24805_vm10, %v14573_v39, %v14574_v47  ;;  %vm24806_vm11 = vcmask 490496   ;;  %vm24808_vm7 = vmmov %vm24807_vm6 }
 0x1de   :  { %v14608_v29 = vunpack.i.l.bf16 %v18558_v40  ;;  %14881 = vrot.lane.b32.xlu1 %v17995_v53, %s24789_s26  ;;  %v2233_v13 = vsel %vm24806_vm11, %v14568_v56, %v14569_v18  ;;  %vm24809_vm10 = vmmov %vm24806_vm11 }
 0x1df   :  { %14876 = vrot.lane.b32.xlu0 %v17995_v53, %s24622_s25  ;;  %12645 = vmatprep.subr.bf16.mxu0 %v12644_v30  ;;  %v2992_v16 = vsel %vm2980_vm15, %v24803_v33, %v14613_v46  ;;  %vm24811_vm11 = vmmov %vm24809_vm10  ;;  %v12650_v22 = vpack.c.bf16 %v2385_v50, %v2233_v13 }
 0x1e0   :  { %12647 = vmatpush1.bf16.msra.mxu0 %v12646_v61  ;;  %v18574_v35 = vpop.permute.xlu1 %14621  ;;  %v2840_v10 = vsel %vm2828_vm14, %v24804_v15, %v14608_v29 }
 0x1e1   :  { %v24400_v27 = vunpack.i.h.bf16 %v18574_v35  ;;  %v14623_v7 = vunpack.i.l.bf16 %v18574_v35  ;;  %v18583_v30 = vpop.permute.xlu0 %14616  ;;  %v12608_v55 = vpack.c.bf16 %v2992_v16, %v2840_v10  ;;  %v14594_v10 = vunpack.i.h.bf16 %v18497_v43 }
 0x1e2   :  { %v24401_v61 = vunpack.i.h.bf16 %v18583_v30  ;;  %v14618_v33 = vunpack.i.l.bf16 %v18583_v30  ;;  %14891 = vrot.lane.b32.xlu1 %v17995_v53, %s16191_s15 }
 0x1e3   :  { %v18598_v15 = vsel %vm24807_vm6, %v14623_v7, %v24400_v27  ;;  %14886 = vrot.lane.b32.xlu0 %v17995_v53, %s24789_s26  ;;  %12609 = vmatprep.subr.bf16.mxu1 %v12608_v55  ;;  %v2386_v52 = vsel %vm24808_vm7, %v14574_v47, %v14623_v7  ;;  %v14589_v27 = vunpack.i.h.bf16 %v18501_v32  ;;  %v2689_v50 = vsel %vm2676_vm13, %v14593_v49, %v14594_v10 }
 0x1e4   :  { %v18606_v39 = vsel %vm24809_vm10, %v14618_v33, %v24401_v61  ;;  %12611 = vmatpush1.bf16.msra.mxu1 %v24810_v45  ;;  %v18611_v56 = vpop.permute.xlu1 %14631  ;;  %v2234_v16 = vsel %vm24811_vm11, %v14569_v18, %v14618_v33  ;;  %v3055_v18 = vld [vmem:[#allocation2 + $0x60] sm:$0xff]  ;;  %vm24823_vm6 = vcmask 769024   ;;  %vm24825_vm7 = vcmask 777216  }
 0x1e5   :  { %v18616_v55 = vpop.permute.xlu0 %14626  ;;  %v12648_v47 = vpack.c.bf16 %v2386_v52, %v2234_v16  ;;  %v24403_v61 = vunpack.i.h.bf16 %v18611_v56  ;;  %v14633_v33 = vunpack.i.l.bf16 %v18611_v56  ;;  %v24812_v52 = vunpack.i.h.bf16 %v18083_v62 }
 0x1e6   :  { %v14629_v26 = vunpack.i.h.bf16 %v18616_v55  ;;  %v14628_v11 = vunpack.i.l.bf16 %v18616_v55  ;;  %14901 = vrot.lane.b32.xlu1 %v17995_v53, %s24729_s13  ;;  %v2537_v13 = vsel %vm2524_vm12, %v14588_v36, %v14589_v27  ;;  %vm24833_vm10 = vcmask 515072  }
 0x1e7   :  { %14896 = vrot.lane.b32.xlu0 %v17995_v53, %s24721_s29  ;;  %12649 = vmatprep.subr.bf16.mxu0 %v12648_v47  ;;  %v12654_v58 = vpack.c.bf16 %v2689_v50, %v2537_v13  ;;  %v24813_v50 = vunpack.i.h.bf16 %v18123_v41  ;;  %vm24835_vm11 = vcmask 523264  }
 0x1e8   :  { %v3184_v45 = vsel %vm244_vm1, %v24812_v52, %v14628_v11  ;;  %12651 = vmatpush1.bf16.msra.mxu0 %v12650_v22  ;;  %v18631_v16 = vpop.permute.xlu1 %14641  ;;  %v3185_v7 = vsel %vm244_vm1, %v14628_v11, %v14629_v26  ;;  %v18648_v22 = vsel %vm2524_vm12, %v14633_v33, %v24403_v61 }
 0x1e9   :  { %v18642_v47 = vpop.permute.xlu0 %14636  ;;  %v12612_v62 = vpack.c.bf16 %v3185_v7, %v3055_v18  ;;  %v12614_v52 = vpack.c.bf16 %v3184_v45, %v18101_v12  ;;  %v24408_v11 = vunpack.i.h.bf16 %v18631_v16  ;;  %v14643_v12 = vunpack.i.l.bf16 %v18631_v16 }
 0x1ea   :  { %v24407_v43 = vunpack.i.h.bf16 %v18642_v47  ;;  %v14638_v49 = vunpack.i.l.bf16 %v18642_v47  ;;  %14911 = vrot.lane.b32.xlu1 %v17995_v53, %s24729_s13  ;;  %v2538_v7 = vsel %vm2524_vm12, %v14589_v27, %v14633_v33  ;;  %v14609_v33 = vunpack.i.h.bf16 %v18558_v40 }
 0x1eb   :  { %14906 = vrot.lane.b32.xlu0 %v17995_v53, %s24721_s29  ;;  %12613 = vmatprep.subr.bf16.mxu1 %v12612_v62  ;;  %v3336_v27 = vsel %vm396_vm2, %v14643_v12, %v24408_v11  ;;  %v3335_v13 = vsel %vm396_vm2, %v24813_v50, %v14643_v12 }
 0x1ec   :  { %v18661_v32 = vsel %vm2676_vm13, %v14638_v49, %v24407_v43  ;;  %12615 = vmatpush1.bf16.msra.mxu1 %v12614_v52  ;;  %v18663_v36 = vpop.permute.xlu1 %14651  ;;  %v2690_v18 = vsel %vm2676_vm13, %v14594_v10, %v14638_v49  ;;  %v14614_v10 = vunpack.i.h.bf16 %v18554_v57  ;;  %v24814_v49 = vunpack.i.h.bf16 %v18157_v60 }
 0x1ed   :  { %v18667_v45 = vpop.permute.xlu0 %14646  ;;  %v12652_v61 = vpack.c.bf16 %v2690_v18, %v2538_v7  ;;  %v24411_v3 = vunpack.i.h.bf16 %v18663_v36  ;;  %v14653_v52 = vunpack.i.l.bf16 %v18663_v36 }
 0x1ee   :  { %v14649_v19 = vunpack.i.h.bf16 %v18667_v45  ;;  %v14648_v43 = vunpack.i.l.bf16 %v18667_v45  ;;  %14921 = vrot.lane.b32.xlu1 %v17995_v53, %s16190_s14 }
 0x1ef   :  { %14916 = vrot.lane.b32.xlu0 %v17995_v53, %s16191_s15  ;;  %12653 = vmatprep.subr.bf16.mxu0 %v12652_v61  ;;  %v18700_v41 = vsel %vm2828_vm14, %v14653_v52, %v24411_v3  ;;  %v2842_v50 = vsel %vm2828_vm14, %v14609_v33, %v14653_v52  ;;  %v3057_v52 = vld [vmem:[#allocation2 + $0x70] sm:$0xff] }
 0x1f0   :  { %v3486_v7 = vsel %vm548_vm3, %v24814_v49, %v14648_v43  ;;  %12655 = vmatpush1.bf16.msra.mxu0 %v12654_v58  ;;  %v18690_v18 = vpop.permute.xlu1 %14661  ;;  %v3487_v62 = vsel %vm548_vm3, %v14648_v43, %v14649_v19  ;;  %v2993_v58 = vsel %vm2980_vm15, %v14613_v46, %v14614_v10  ;;  %v2841_v43 = vsel %vm2828_vm14, %v14608_v29, %v14609_v33 }
 0x1f1   :  { %v18695_v11 = vpop.permute.xlu0 %14656  ;;  %v12616_v61 = vpack.c.bf16 %v3487_v62, %v3336_v27  ;;  %v12618_v25 = vpack.c.bf16 %v3486_v7, %v3335_v13  ;;  %v14664_v46 = vunpack.i.h.bf16 %v18690_v18  ;;  %v14663_v49 = vunpack.i.l.bf16 %v18690_v18  ;;  %v18806_v13 = vpop.f32.mrb[0].mxu0 }
 0x1f2   :  { %v24413_v60 = vunpack.i.h.bf16 %v18695_v11  ;;  %v14658_v12 = vunpack.i.l.bf16 %v18695_v11  ;;  %14931 = vrot.lane.b32.xlu1 %v17995_v53, %s16193_s17  ;;  %v18810_v3 = vpop.f32.mrb[1].mxu0 }
 0x1f3   :  { %14926 = vrot.lane.b32.xlu0 %v17995_v53, %s16191_s15  ;;  %12617 = vmatprep.subr.bf16.mxu1 %v12616_v61  ;;  %v260_v55 = vsel %vm244_vm1, %v14663_v49, %v14664_v46 }
 0x1f4   :  { %v18717_v62 = vsel %vm2980_vm15, %v14658_v12, %v24413_v60  ;;  %12619 = vmatpush1.bf16.msra.mxu1 %v12618_v25  ;;  %v3606_v27 = vpop.permute.xlu1 %3605  ;;  %v2994_v57 = vsel %vm2980_vm15, %v14614_v10, %v14658_v12  ;;  %v12658_v25 = vpack.c.bf16 %v2993_v58, %v2841_v43  ;;  %v18744_v43 = vld [vmem:[#allocation2 + $0x78] sm:$0xff] }
 0x1f5   :  { %v18722_v40 = vpop.permute.xlu0 %14666  ;;  %v12656_v29 = vpack.c.bf16 %v2994_v57, %v2842_v50 }
 0x1f6   :  { %v24410_v7 = vunpack.i.h.bf16 %v18722_v40  ;;  %v14668_v61 = vunpack.i.l.bf16 %v18722_v40  ;;  %14941 = vrot.lane.b32.xlu1 %v17995_v53, %s16195_s19 }
 0x1f7   :  { %14936 = vrot.lane.b32.xlu0 %v17995_v53, %s16192_s16  ;;  %12657 = vmatprep.subr.bf16.mxu0 %v12656_v29 }
 0x1f8   :  { %v3186_v10 = vsel %vm244_vm1, %v14629_v26, %v14668_v61  ;;  %12659 = vmatpush1.bf16.msra.mxu0 %v12658_v25  ;;  %v18736_v33 = vpop.permute.xlu1 %14671  ;;  %v3187_v12 = vsel %vm244_vm1, %v14668_v61, %v24410_v7  ;;  %v24815_v26 = vunpack.i.h.bf16 %v18175_v20 }
 0x1f9   :  { %v18741_v50 = vpop.permute.xlu0 %3607  ;;  %v12660_v57 = vpack.c.bf16 %v3187_v12, %v3057_v52  ;;  %v12662_v58 = vpack.c.bf16 %v3186_v10, %v18187_v31  ;;  %v24414_v25 = vunpack.i.h.bf16 %v18736_v33  ;;  %v3637_v31 = vsel %vm700_vm4, %v18194_v38, %v3606_v27 }
 0x1fa   :  { %v259_v29 = vsel %vm244_vm1, %v24815_v26, %v14663_v49  ;;  %14951 = vrot.lane.b32.xlu1 %v17995_v53, %s24629_s27  ;;  %v3638_v61 = vsel %vm700_vm4, %v3606_v27, %v18741_v50  ;;  %v14673_v10 = vunpack.i.l.bf16 %v18736_v33  ;;  %v12668_v49 = vpack.c.bf16 %v260_v55, %v18744_v43 }
 0x1fb   :  { %14946 = vrot.lane.b32.xlu0 %v17995_v53, %s16194_s18  ;;  %4630 = vmatprep.subr.mxu1 %v3638_v61  ;;  %v12670_v26 = vpack.c.bf16 %v259_v29, %v3057_v52  ;;  %v24816_v52 = vunpack.i.h.bf16 %v18249_v23  ;;  %v24817_v55 = vunpack.i.h.bf16 %v18238_v0 }
 0x1fc   :  { %12661 = vmatprep.subr.bf16.mxu0 %v12660_v57  ;;  %4631 = vmatpush1.msra.mxu1 %v3637_v31  ;;  %v18762_v20 = vpop.permute.xlu1 %14681  ;;  %v412_v27 = vsel %vm396_vm2, %v14673_v10, %v24414_v25 }
 0x1fd   :  { %12663 = vmatpush1.bf16.msra.mxu0 %v12662_v58  ;;  %v18765_v12 = vpop.permute.xlu0 %14676  ;;  %4647 = vmatmul.mubr.f32.vlgmr.msra.gmra.mrb[4].mxu1 %v18136_v28  ;;  %v24412_v7 = vunpack.i.h.bf16 %v18762_v20  ;;  %v411_v57 = vsel %vm396_vm2, %v24816_v52, %v14673_v10  ;;  %v14683_v58 = vunpack.i.l.bf16 %v18762_v20 }
 0x1fe   :  { %v24415_v61 = vunpack.i.h.bf16 %v18765_v12  ;;  %v14678_v38 = vunpack.i.l.bf16 %v18765_v12  ;;  %12669 = vmatprep.subr.bf16.mxu1 %v12668_v49  ;;  %14961 = vrot.lane.b32.xlu1 %v17995_v53, %s24633_s24 }
 0x1ff   :  { %12671 = vmatpush1.bf16.msra.mxu1 %v12670_v26  ;;  %14956 = vrot.lane.b32.xlu0 %v17995_v53, %s16196_s22  ;;  %v18793_v26 = vld [vmem:[%s24275_s1 + $0x8] sm:$0xff] }
 0x200   :  { %v563_v29 = vsel %vm548_vm3, %v24817_v55, %v14678_v38  ;;  %v18785_v31 = vpop.permute.xlu1 %14691  ;;  %v564_v49 = vsel %vm548_vm3, %v14678_v38, %v24415_v61  ;;  %11814 = vmatprep.mubr.msk.f32.mxu1 %vm24419_vm0, %v18793_v26  ;;  %v3338_v38 = vsel %vm396_vm2, %v14683_v58, %v24412_v7 }
 0x201   :  { %v18797_v23 = vpop.permute.xlu0 %14686  ;;  %v12672_v10 = vpack.c.bf16 %v564_v49, %v412_v27  ;;  %v12674_v0 = vpack.c.bf16 %v563_v29, %v411_v57  ;;  %v24818_v27 = vunpack.i.h.bf16 %v18631_v16  ;;  %v14693_v29 = vunpack.i.l.bf16 %v18785_v31 }
 0x202   :  { %v24417_v52 = vunpack.i.h.bf16 %v18797_v23  ;;  %v14688_v55 = vunpack.i.l.bf16 %v18797_v23  ;;  %14971 = vrot.lane.b32.xlu1 %v17995_v53, %s16201_s20 }
 0x203   :  { %14966 = vrot.lane.b32.xlu0 %v17995_v53, %s24632_s0  ;;  %12673 = vmatprep.subr.bf16.mxu1 %v12672_v10  ;;  %v3337_v57 = vsel %vm396_vm2, %v24818_v27, %v14683_v58 }
 0x204   :  { %v3488_v49 = vsel %vm548_vm3, %v14649_v19, %v14688_v55  ;;  %12675 = vmatpush1.bf16.msra.mxu1 %v12674_v0  ;;  %v18819_v7 = vpop.permute.xlu1 %14701  ;;  %v3489_v60 = vsel %vm548_vm3, %v14688_v55, %v24417_v52  ;;  %v24820_v55 = vunpack.i.h.bf16 %v18289_v37 }
 0x205   :  { %v24416_v10 = vunpack.i.h.bf16 %v18819_v7  ;;  %v14703_v25 = vunpack.i.l.bf16 %v18819_v7  ;;  %v18826_v16 = vpop.permute.xlu0 %14696  ;;  %v12664_v58 = vpack.c.bf16 %v3489_v60, %v3338_v38  ;;  %v12666_v27 = vpack.c.bf16 %v3488_v49, %v3337_v57 }
 0x206   :  { %v14698_v61 = vunpack.i.l.bf16 %v18826_v16  ;;  %14981 = vrot.lane.b32.xlu1 %v17995_v53, %s24789_s26  ;;  %v24819_v60 = vunpack.i.h.bf16 %v18298_v42 }
 0x207   :  { %14976 = vrot.lane.b32.xlu0 %v17995_v53, %s24621_s28  ;;  %12665 = vmatprep.subr.bf16.mxu0 %v12664_v58  ;;  %v262_v19 = vsel %vm244_vm1, %v14703_v25, %v24416_v10  ;;  %v261_v58 = vsel %vm244_vm1, %v14664_v46, %v14703_v25  ;;  %v24821_v46 = vpack.c.bf16 %v18313_v14, %v18321_v6  ;;  %v24822_v14 = vunpack.i.h.bf16 %v18346_v54 }
 0x208   :  { %12667 = vmatpush1.bf16.msra.mxu0 %v12666_v27  ;;  %v18836_v45 = vpop.permute.xlu1 %3611  ;;  %v716_v0 = vsel %vm700_vm4, %v24819_v60, %v14693_v29  ;;  %v868_v38 = vsel %vm852_vm5, %v24820_v55, %v14698_v61  ;;  %v18857_v60 = vld [vmem:[#allocation2 + $0x80] sm:$0xff] }
 0x209   :  { %v3610_v57 = vpop.permute.xlu0 %3609  ;;  %v12676_v49 = vpack.c.bf16 %v868_v38, %v716_v0  ;;  %v12716_v37 = vpack.c.bf16 %v262_v19, %v18857_v60 }
 0x20a   :  { %14991 = vrot.lane.b32.xlu1 %v17995_v53, %s16202_s21  ;;  %v3640_v42 = vsel %vm700_vm4, %v3610_v57, %v18836_v45  ;;  %v3639_v27 = vsel %vm700_vm4, %v18741_v50, %v3610_v57  ;;  %v12718_v50 = vpack.c.bf16 %v261_v58, %v18857_v60  ;;  %s16211_s21 = smov 58  }
 0x20b   :  { %14986 = vrot.lane.b32.xlu0 %v17995_v53, %s24772_s30  ;;  %4701 = vmatprep.subr.mxu0 %v3640_v42 }
 0x20c   :  { %12677 = vmatprep.subr.bf16.mxu1 %v12676_v49  ;;  %4702 = vmatpush1.msra.mxu0 %v3639_v27  ;;  %v18862_v18 = vpop.permute.xlu1 %14711 }
 0x20d   :  { %12679 = vmatpush1.bf16.msra.mxu1 %v24821_v46  ;;  %v14713_v25 = vunpack.i.l.bf16 %v18862_v18  ;;  %v18868_v0 = vpop.permute.xlu0 %14706  ;;  %4718 = vmatmul.mubr.f32.vlgmr.msra.gmra.mrb[6].mxu0 %v18136_v28  ;;  %v24824_v28 = vunpack.i.h.bf16 %v18355_v59  ;;  %v24826_v46 = vunpack.i.h.bf16 %v18765_v12 }
 0x20e   :  { %v14708_v19 = vunpack.i.l.bf16 %v18868_v0  ;;  %12717 = vmatprep.subr.bf16.mxu0 %v12716_v37  ;;  %15001 = vrot.lane.b32.xlu1 %v17995_v53, %s24729_s13 }
 0x20f   :  { %12719 = vmatpush1.bf16.msra.mxu0 %v12718_v50  ;;  %14996 = vrot.lane.b32.xlu0 %v17995_v53, %s24721_s29  ;;  %v1172_v6 = vsel %vm24823_vm6, %v24822_v14, %v14713_v25 }
 0x210   :  { %v18882_v55 = vpop.permute.xlu1 %14721  ;;  %v1020_v38 = vsel %vm24825_vm7, %v24824_v28, %v14708_v19  ;;  %11815 = vmatprep.mubr.msk.f32.mxu0 %vm24419_vm0, %v18793_v26  ;;  %vm24838_vm0 = vmmov %vm24825_vm7 }
 0x211   :  { %v24420_v57 = vunpack.i.h.bf16 %v18882_v55  ;;  %v14723_v49 = vunpack.i.l.bf16 %v18882_v55  ;;  %v18893_v58 = vpop.permute.xlu0 %14716  ;;  %v12680_v54 = vpack.c.bf16 %v1172_v6, %v1020_v38  ;;  %v18895_v42 = vpop.f32.mrb[0].mxu1  ;;  %v24827_v6 = vunpack.i.h.bf16 %v18736_v33 }
 0x212   :  { %v24418_v27 = vunpack.i.h.bf16 %v18893_v58  ;;  %v14718_v37 = vunpack.i.l.bf16 %v18893_v58  ;;  %15011 = vrot.lane.b32.xlu1 %v17995_v53, %s24622_s25  ;;  %v18901_v59 = vpop.f32.mrb[1].mxu1  ;;  %v24828_v38 = vpack.c.bf16 %v18370_v48, %v18378_v17  ;;  %v14694_v48 = vunpack.i.h.bf16 %v18785_v31  ;;  %v4217_v31 = vld [vmem:[%s24276_s2] sm:$0xff]  ;;  %s16210_s25 = smov 56  }
 0x213   :  { %v565_v50 = vsel %vm548_vm3, %v24826_v46, %v14723_v49  ;;  %15006 = vrot.lane.b32.xlu0 %v17995_v53, %s24623_s23  ;;  %12681 = vmatprep.subr.bf16.mxu1 %v12680_v54  ;;  %v566_v14 = vsel %vm548_vm3, %v14723_v49, %v24420_v57  ;;  %v14699_v17 = vunpack.i.h.bf16 %v18826_v16  ;;  %s16209_s23 = smov 122  }
 0x214   :  { %v413_v28 = vsel %vm396_vm2, %v24827_v6, %v14718_v37  ;;  %12683 = vmatpush1.bf16.msra.mxu1 %v24828_v38  ;;  %v18917_v10 = vpop.permute.xlu1 %14731  ;;  %v414_v12 = vsel %vm396_vm2, %v14718_v37, %v24418_v27  ;;  %v24829_v37 = vunpack.i.h.bf16 %v18403_v8  ;;  %v24830_v6 = vunpack.i.h.bf16 %v18412_v21 }
 0x215   :  { %v14733_v54 = vunpack.i.l.bf16 %v18917_v10  ;;  %v18923_v46 = vpop.permute.xlu0 %14726  ;;  %v12720_v52 = vpack.c.bf16 %v566_v14, %v414_v12  ;;  %v12722_v49 = vpack.c.bf16 %v565_v50, %v413_v28  ;;  %v717_v8 = vsel %vm700_vm4, %v14693_v29, %v14694_v48 }
 0x216   :  { %v14728_v33 = vunpack.i.l.bf16 %v18923_v46  ;;  %15021 = vrot.lane.b32.xlu1 %v17995_v53, %s24721_s29  ;;  %v869_v21 = vsel %vm852_vm5, %v14698_v61, %v14699_v17 }
 0x217   :  { %15016 = vrot.lane.b32.xlu0 %v17995_v53, %s24789_s26  ;;  %12721 = vmatprep.subr.bf16.mxu0 %v12720_v52  ;;  %v1476_v14 = vsel %vm1460_vm9, %v24829_v37, %v14733_v54  ;;  %v24831_v37 = vpack.c.bf16 %v18427_v51, %v18435_v4  ;;  %v14714_v51 = vunpack.i.h.bf16 %v18862_v18  ;;  %v14709_v4 = vunpack.i.h.bf16 %v18868_v0 }
 0x218   :  { %12723 = vmatpush1.bf16.msra.mxu0 %v12722_v49  ;;  %v18937_v50 = vpop.permute.xlu1 %14741  ;;  %v1324_v28 = vsel %vm1308_vm8, %v24830_v6, %v14728_v33  ;;  %v12726_v6 = vpack.c.bf16 %v869_v21, %v717_v8  ;;  %v24834_v8 = vunpack.i.h.bf16 %v18469_v9  ;;  %v24839_v18 = vpack.c.bf16 %v18484_v44, %v18492_v2 }
 0x219   :  { %v14743_v38 = vunpack.i.l.bf16 %v18937_v50  ;;  %v18945_v12 = vpop.permute.xlu0 %14736  ;;  %v12684_v52 = vpack.c.bf16 %v1476_v14, %v1324_v28  ;;  %v1173_v9 = vsel %vm24823_vm6, %v14713_v25, %v14714_v51  ;;  %v14729_v44 = vunpack.i.h.bf16 %v18923_v46 }
 0x21a   :  { %v24423_v27 = vunpack.i.l.bf16 %v18945_v12  ;;  %15031 = vrot.lane.b32.xlu1 %v17995_v53, %s16191_s15  ;;  %v24841_v2 = vunpack.i.h.bf16 %v18517_v5 }
 0x21b   :  { %15026 = vrot.lane.b32.xlu0 %v17995_v53, %s24729_s13  ;;  %12685 = vmatprep.subr.bf16.mxu1 %v12684_v52  ;;  %v870_v49 = vsel %vm852_vm5, %v14699_v17, %v14743_v38 }
 0x21c   :  { %12687 = vmatpush1.bf16.msra.mxu1 %v24831_v37  ;;  %v18964_v14 = vpop.permute.xlu1 %14751  ;;  %v718_v61 = vsel %vm700_vm4, %v14694_v48, %v24423_v27  ;;  %v24832_v48 = vunpack.i.h.bf16 %v18460_v34  ;;  %v14734_v27 = vunpack.i.h.bf16 %v18917_v10  ;;  %v24845_v10 = vpack.c.bf16 %v18541_v1, %v18549_v24 }
 0x21d   :  { %v14753_v53 = vunpack.i.l.bf16 %v18964_v14  ;;  %v18973_v29 = vpop.permute.xlu0 %14746  ;;  %v12724_v16 = vpack.c.bf16 %v870_v49, %v718_v61  ;;  %v24846_v24 = vunpack.i.h.bf16 %v18574_v35 }
 0x21e   :  { %v14748_v17 = vunpack.i.l.bf16 %v18973_v29  ;;  %3625 = vrot.lane.b32.xlu1 %v18857_v60, %s16191_s15  ;;  %v14749_v1 = vunpack.i.h.bf16 %v18973_v29 }
 0x21f   :  { %4220 = vperm.xlu0 %15035, %v4217_v31   ;;  %12725 = vmatprep.subr.bf16.mxu0 %v12724_v16  ;;  %v1780_v28 = vsel %vm24833_vm10, %v24832_v48, %v14753_v53  ;;  %vm24836_vm10 = vmmov %vm24823_vm6 }
 0x220   :  { %12727 = vmatpush1.bf16.msra.mxu0 %v12726_v6  ;;  %v18985_v52 = vpop.permute.xlu1 %14761  ;;  %v1628_v21 = vsel %vm24835_vm11, %v24834_v8, %v14748_v17  ;;  %v1021_v8 = vsel %vm24825_vm7, %v14708_v19, %v14709_v4  ;;  %vm24837_vm11 = vmmov %vm24823_vm6  ;;  %vm24844_vm7 = vcmask 506880  }
 0x221   :  { %v24421_v49 = vunpack.i.h.bf16 %v18985_v52  ;;  %v14763_v37 = vunpack.i.l.bf16 %v18985_v52  ;;  %v18994_v31 = vpop.permute.xlu0 %14756  ;;  %v12688_v61 = vpack.c.bf16 %v1780_v28, %v1628_v21  ;;  %v18996_v16 = vpop.f32.mrb[2].mxu0  ;;  %vm24840_vm6 = vmmov %vm24838_vm0 }
 0x222   :  { %v24422_v34 = vunpack.i.h.bf16 %v18994_v31  ;;  %v14758_v6 = vunpack.i.l.bf16 %v18994_v31  ;;  %v19000_v48 = vpop.f32.mrb[3].mxu0 }
 0x223   :  { %v19011_v28 = vsel %vm24836_vm10, %v14763_v37, %v24421_v49  ;;  %12689 = vmatprep.subr.bf16.mxu1 %v12688_v61  ;;  %v1174_v21 = vsel %vm24837_vm11, %v14714_v51, %v14763_v37  ;;  %v14754_v51 = vunpack.i.h.bf16 %v18964_v14  ;;  %vm24847_vm10 = vcmask 261120  }
 0x224   :  { %v19017_v57 = vsel %vm24838_vm0, %v14758_v6, %v24422_v34  ;;  %12691 = vmatpush1.bf16.msra.mxu1 %v24839_v18  ;;  %v19022_v25 = vpop.permute.xlu1 %14771  ;;  %v1022_v0 = vsel %vm24840_vm6, %v14709_v4, %v14758_v6  ;;  %v12730_v34 = vpack.c.bf16 %v1173_v9, %v1021_v8  ;;  %vm24842_vm0 = vcmask 498688  }
 0x225   :  { %v14773_v19 = vunpack.i.l.bf16 %v19022_v25  ;;  %v19026_v49 = vpop.permute.xlu0 %14766  ;;  %v12728_v61 = vpack.c.bf16 %v1174_v21, %v1022_v0  ;;  %v24843_v21 = vunpack.i.h.bf16 %v18526_v63  ;;  %v1325_v63 = vsel %vm1308_vm8, %v14728_v33, %v14729_v44 }
 0x226   :  { %v14768_v37 = vunpack.i.l.bf16 %v19026_v49  ;;  %vm24849_vm11 = vcmask 490496   ;;  %vm24850_vm6 = vcmask 515072   ;;  %v24855_v14 = vpack.c.bf16 %v18598_v15, %v18606_v39 }
 0x227   :  { %12729 = vmatprep.subr.bf16.mxu0 %v12728_v61  ;;  %v2084_v4 = vsel %vm24842_vm0, %v24841_v2, %v14773_v19  ;;  %vm24851_vm0 = vcmask 523264   ;;  %v14769_v15 = vunpack.i.h.bf16 %v19026_v49  ;;  %v24857_v39 = vunpack.i.h.bf16 %v18642_v47 }
 0x228   :  { %12731 = vmatpush1.bf16.msra.mxu0 %v12730_v34  ;;  %v19038_v6 = vpop.permute.xlu1 %14781  ;;  %v1932_v9 = vsel %vm24844_vm7, %v24843_v21, %v14768_v37  ;;  %v1477_v34 = vsel %vm1460_vm9, %v14733_v54, %v14734_v27  ;;  %vm24852_vm7 = vmmov %vm24850_vm6 }
 0x229   :  { %v24424_v8 = vunpack.i.h.bf16 %v19038_v6  ;;  %v14783_v18 = vunpack.i.l.bf16 %v19038_v6  ;;  %v19047_v0 = vpop.permute.xlu0 %14776  ;;  %v12692_v61 = vpack.c.bf16 %v2084_v4, %v1932_v9 }
 0x22a   :  { %v24425_v5 = vunpack.i.h.bf16 %v19047_v0  ;;  %v14778_v2 = vunpack.i.l.bf16 %v19047_v0 }
 0x22b   :  { %v19060_v21 = vsel %vm1460_vm9, %v14783_v18, %v24424_v8  ;;  %12693 = vmatprep.subr.bf16.mxu1 %v12692_v61  ;;  %v1478_v4 = vsel %vm1460_vm9, %v14734_v27, %v14783_v18  ;;  %v14774_v27 = vunpack.i.h.bf16 %v19022_v25 }
 0x22c   :  { %v19066_v9 = vsel %vm1308_vm8, %v14778_v2, %v24425_v5  ;;  %12695 = vmatpush1.bf16.msra.mxu1 %v24845_v10  ;;  %v19071_v54 = vpop.permute.xlu1 %14791  ;;  %v1326_v46 = vsel %vm1308_vm8, %v14729_v44, %v14778_v2  ;;  %v12734_v5 = vpack.c.bf16 %v1477_v34, %v1325_v63 }
 0x22d   :  { %v14793_v33 = vunpack.i.l.bf16 %v19071_v54  ;;  %v19075_v8 = vpop.permute.xlu0 %14786  ;;  %v12732_v61 = vpack.c.bf16 %v1478_v4, %v1326_v46  ;;  %v24848_v4 = vunpack.i.h.bf16 %v18583_v30  ;;  %v1629_v30 = vsel %vm24851_vm0, %v14748_v17, %v14749_v1 }
 0x22e   :  { %v14788_v18 = vunpack.i.l.bf16 %v19075_v8 }
 0x22f   :  { %12733 = vmatprep.subr.bf16.mxu0 %v12732_v61  ;;  %v2388_v44 = vsel %vm24847_vm10, %v24846_v24, %v14793_v33  ;;  %vm24853_vm10 = vmmov %vm24850_vm6 }
 0x230   :  { %12735 = vmatpush1.bf16.msra.mxu0 %v12734_v5  ;;  %v19087_v2 = vpop.permute.xlu1 %14801  ;;  %v2236_v34 = vsel %vm24849_vm11, %v24848_v4, %v14788_v18  ;;  %v1781_v5 = vsel %vm24850_vm6, %v14753_v53, %v14754_v51  ;;  %vm24854_vm11 = vmmov %vm24851_vm0 }
 0x231   :  { %v24426_v63 = vunpack.i.h.bf16 %v19087_v2  ;;  %v14803_v10 = vunpack.i.l.bf16 %v19087_v2  ;;  %v19096_v46 = vpop.permute.xlu0 %14796  ;;  %v12696_v61 = vpack.c.bf16 %v2388_v44, %v2236_v34  ;;  %vm24856_vm6 = vmmov %vm24851_vm0  ;;  %vm24859_vm0 = vcmask 498688  }
 0x232   :  { %v24427_v35 = vunpack.i.h.bf16 %v19096_v46  ;;  %v14798_v24 = vunpack.i.l.bf16 %v19096_v46  ;;  %v2085_v47 = vsel %vm24859_vm0, %v14773_v19, %v14774_v27 }
 0x233   :  { %v19109_v4 = vsel %vm24852_vm7, %v14803_v10, %v24426_v63  ;;  %12697 = vmatprep.subr.bf16.mxu1 %v12696_v61  ;;  %v1782_v44 = vsel %vm24853_vm10, %v14754_v51, %v14803_v10  ;;  %vm24860_vm7 = vcmask 506880   ;;  %vm24861_vm10 = vmmov %vm24859_vm0  ;;  %vm24867_vm0 = vcmask 490496  }
 0x234   :  { %v19115_v34 = vsel %vm24854_vm11, %v14798_v24, %v24427_v35  ;;  %12699 = vmatpush1.bf16.msra.mxu1 %v24855_v14  ;;  %v19120_v53 = vpop.permute.xlu1 %14811  ;;  %v1630_v29 = vsel %vm24856_vm6, %v14749_v1, %v14798_v24  ;;  %v12738_v35 = vpack.c.bf16 %v1781_v5, %v1629_v30  ;;  %vm24863_vm11 = vmmov %vm24860_vm7  ;;  %vm24866_vm6 = vcmask 261120  }
 0x235   :  { %v14813_v17 = vunpack.i.l.bf16 %v19120_v53  ;;  %v19124_v63 = vpop.permute.xlu0 %14806  ;;  %v12736_v61 = vpack.c.bf16 %v1782_v44, %v1630_v29  ;;  %v24858_v44 = vunpack.i.h.bf16 %v18611_v56 }
 0x236   :  { %v14808_v10 = vunpack.i.l.bf16 %v19124_v63 }
 0x237   :  { %12737 = vmatprep.subr.bf16.mxu0 %v12736_v61  ;;  %v2692_v1 = vsel %vm2676_vm13, %v24857_v39, %v14813_v17  ;;  %v24862_v39 = vpack.c.bf16 %v18661_v32, %v18648_v22  ;;  %v24864_v22 = vunpack.i.h.bf16 %v18695_v11 }
 0x238   :  { %12739 = vmatpush1.bf16.msra.mxu0 %v12738_v35  ;;  %v19136_v24 = vpop.permute.xlu1 %14821  ;;  %v2540_v5 = vsel %vm2524_vm12, %v24858_v44, %v14808_v10  ;;  %v1933_v35 = vsel %vm24860_vm7, %v14768_v37, %v14769_v15  ;;  %vm24868_vm7 = vmmov %vm24866_vm6 }
 0x239   :  { %v14823_v30 = vunpack.i.l.bf16 %v19136_v24  ;;  %v19144_v14 = vpop.permute.xlu0 %14816  ;;  %v12700_v29 = vpack.c.bf16 %v2692_v1, %v2540_v5  ;;  %v12742_v5 = vpack.c.bf16 %v2085_v47, %v1933_v35 }
 0x23a   :  { %v24432_v61 = vunpack.i.l.bf16 %v19144_v14 }
 0x23b   :  { %12701 = vmatprep.subr.bf16.mxu1 %v12700_v29  ;;  %v2086_v56 = vsel %vm24861_vm10, %v14774_v27, %v14823_v30  ;;  %v14794_v27 = vunpack.i.h.bf16 %v19071_v54  ;;  %v14789_v29 = vunpack.i.h.bf16 %v19075_v8  ;;  %vm24870_vm10 = vmmov %vm24867_vm0 }
 0x23c   :  { %12703 = vmatpush1.bf16.msra.mxu1 %v24862_v39  ;;  %v19159_v1 = vpop.permute.xlu1 %14831  ;;  %v1934_v25 = vsel %vm24863_vm11, %v14769_v15, %v24432_v61  ;;  %vm24878_vm11 = vcmask 588800  }
 0x23d   :  { %v14833_v19 = vunpack.i.l.bf16 %v19159_v1  ;;  %v19165_v49 = vpop.permute.xlu0 %14826  ;;  %v12740_v37 = vpack.c.bf16 %v2086_v56, %v1934_v25  ;;  %v24865_v56 = vunpack.i.h.bf16 %v18663_v36  ;;  %v2389_v11 = vsel %vm24866_vm6, %v14793_v33, %v14794_v27 }
 0x23e   :  { %v14828_v44 = vunpack.i.l.bf16 %v19165_v49  ;;  %vm24880_vm6 = vcmask 777216  }
 0x23f   :  { %12741 = vmatprep.subr.bf16.mxu0 %v12740_v37  ;;  %v2996_v32 = vsel %vm2980_vm15, %v24864_v22, %v14833_v19  ;;  %v24869_v22 = vpack.c.bf16 %v18717_v62, %v18700_v41  ;;  %v24871_v62 = vunpack.i.h.bf16 %v18722_v40 }
 0x240   :  { %12743 = vmatpush1.bf16.msra.mxu0 %v12742_v5  ;;  %v19175_v15 = vpop.permute.xlu1 %14841  ;;  %v2844_v47 = vsel %vm2828_vm14, %v24865_v56, %v14828_v44  ;;  %v2237_v5 = vsel %vm24867_vm0, %v14788_v18, %v14789_v29  ;;  %vm24882_vm0 = vcmask 769024  }
 0x241   :  { %v24431_v35 = vunpack.i.l.bf16 %v19175_v15  ;;  %v19183_v39 = vpop.permute.xlu0 %14836  ;;  %v12704_v25 = vpack.c.bf16 %v2996_v32, %v2844_v47  ;;  %v12746_v47 = vpack.c.bf16 %v2389_v11, %v2237_v5 }
 0x242   :  { %v24428_v37 = vunpack.i.l.bf16 %v19183_v39 }
 0x243   :  { %12705 = vmatprep.subr.bf16.mxu1 %v12704_v25  ;;  %v2390_v36 = vsel %vm24868_vm7, %v14794_v27, %v24431_v35  ;;  %v14814_v27 = vunpack.i.h.bf16 %v19120_v53  ;;  %v14809_v25 = vunpack.i.h.bf16 %v19124_v63  ;;  %vm24883_vm7 = vmmov %vm24878_vm11 }
 0x244   :  { %12707 = vmatpush1.bf16.msra.mxu1 %v24869_v22  ;;  %v19198_v32 = vpop.permute.xlu1 %14851  ;;  %v2238_v54 = vsel %vm24870_vm10, %v14789_v29, %v24428_v37  ;;  %vm24889_vm10 = vcmask 523264  }
 0x245   :  { %v19203_v33 = vpop.permute.xlu0 %14846  ;;  %v12744_v8 = vpack.c.bf16 %v2390_v36, %v2238_v54  ;;  %v24429_v41 = vunpack.i.l.bf16 %v19198_v32  ;;  %v2693_v40 = vsel %vm2676_vm13, %v14813_v17, %v14814_v27 }
 0x246   :  { %v14849_v18 = vunpack.i.h.bf16 %v19203_v33  ;;  %v14848_v56 = vunpack.i.l.bf16 %v19203_v33 }
 0x247   :  { %12745 = vmatprep.subr.bf16.mxu0 %v12744_v8 }
 0x248   :  { %v3188_v22 = vsel %vm244_vm1, %v24871_v62, %v14848_v56  ;;  %12747 = vmatpush1.bf16.msra.mxu0 %v12746_v47  ;;  %v19213_v29 = vpop.permute.xlu1 %14861  ;;  %v3189_v36 = vsel %vm244_vm1, %v14848_v56, %v14849_v18  ;;  %v2541_v47 = vsel %vm2524_vm12, %v14808_v10, %v14809_v25 }
 0x249   :  { %v19218_v54 = vpop.permute.xlu0 %14856  ;;  %v12708_v11 = vpack.c.bf16 %v3189_v36, %v18857_v60  ;;  %v12710_v5 = vpack.c.bf16 %v3188_v22, %v18744_v43  ;;  %v14864_v8 = vunpack.i.h.bf16 %v19213_v29  ;;  %v14863_v56 = vunpack.i.l.bf16 %v19213_v29 }
 0x24a   :  { %v24430_v37 = vunpack.i.l.bf16 %v19218_v54  ;;  %v2542_v43 = vsel %vm2524_vm12, %v14809_v25, %v24429_v41  ;;  %v12750_v36 = vpack.c.bf16 %v2693_v40, %v2541_v47  ;;  %v14834_v25 = vunpack.i.h.bf16 %v19159_v1 }
 0x24b   :  { %12709 = vmatprep.subr.bf16.mxu1 %v12708_v11  ;;  %v3340_v11 = vsel %vm396_vm2, %v14863_v56, %v14864_v8  ;;  %v14829_v41 = vunpack.i.h.bf16 %v19165_v49 }
 0x24c   :  { %12711 = vmatpush1.bf16.msra.mxu1 %v12710_v5  ;;  %v19231_v62 = vpop.permute.xlu1 %14871  ;;  %v2694_v53 = vsel %vm2676_vm13, %v14814_v27, %v24430_v37  ;;  %v14744_v5 = vunpack.i.h.bf16 %v18937_v50  ;;  %v24872_v27 = vunpack.i.h.bf16 %v18762_v20  ;;  %v24873_v37 = vunpack.i.h.bf16 %v18797_v23 }
 0x24d   :  { %v19239_v22 = vpop.permute.xlu0 %14866  ;;  %v12748_v17 = vpack.c.bf16 %v2694_v53, %v2542_v43  ;;  %v14873_v53 = vunpack.i.l.bf16 %v19231_v62  ;;  %v14739_v23 = vunpack.i.h.bf16 %v18945_v12 }
 0x24e   :  { %v14869_v63 = vunpack.i.h.bf16 %v19239_v22  ;;  %v14868_v10 = vunpack.i.l.bf16 %v19239_v22  ;;  %v3339_v43 = vsel %vm396_vm2, %v24872_v27, %v14863_v56  ;;  %v19292_v49 = vsel %vm852_vm5, %v14743_v38, %v14744_v5 }
 0x24f   :  { %12749 = vmatprep.subr.bf16.mxu0 %v12748_v17  ;;  %v2846_v1 = vsel %vm2828_vm14, %v14829_v41, %v14873_v53 }
 0x250   :  { %v3490_v40 = vsel %vm548_vm3, %v24873_v37, %v14868_v10  ;;  %12751 = vmatpush1.bf16.msra.mxu0 %v12750_v36  ;;  %v19256_v47 = vpop.permute.xlu1 %14881  ;;  %v3491_v35 = vsel %vm548_vm3, %v14868_v10, %v14869_v63  ;;  %v2997_v37 = vsel %vm2980_vm15, %v14833_v19, %v14834_v25  ;;  %v2845_v10 = vsel %vm2828_vm14, %v14828_v44, %v14829_v41 }
 0x251   :  { %v14884_v51 = vunpack.i.h.bf16 %v19256_v47  ;;  %v14883_v17 = vunpack.i.l.bf16 %v19256_v47  ;;  %v19263_v20 = vpop.permute.xlu0 %14876  ;;  %v12712_v56 = vpack.c.bf16 %v3491_v35, %v3340_v11  ;;  %v12714_v27 = vpack.c.bf16 %v3490_v40, %v3339_v43 }
 0x252   :  { %v24433_v61 = vunpack.i.l.bf16 %v19263_v20  ;;  %v24874_v35 = vunpack.i.h.bf16 %v18819_v7 }
 0x253   :  { %12713 = vmatprep.subr.bf16.mxu1 %v12712_v56  ;;  %v264_v36 = vsel %vm244_vm1, %v14883_v17, %v14884_v51 }
 0x254   :  { %v263_v11 = vsel %vm244_vm1, %v24874_v35, %v14883_v17  ;;  %12715 = vmatpush1.bf16.msra.mxu1 %v12714_v27  ;;  %v19279_v43 = vpop.permute.xlu1 %14891  ;;  %v2998_v19 = vsel %vm2980_vm15, %v14834_v25, %v24433_v61  ;;  %v12754_v27 = vpack.c.bf16 %v2997_v37, %v2845_v10  ;;  %v12764_v25 = vpack.c.bf16 %v264_v36, %v18857_v60 }
 0x255   :  { %v14894_v7 = vunpack.i.h.bf16 %v19279_v43  ;;  %v14893_v44 = vunpack.i.l.bf16 %v19279_v43  ;;  %v19296_v40 = vpop.permute.xlu0 %14886  ;;  %v12752_v17 = vpack.c.bf16 %v2998_v19, %v2846_v1  ;;  %v24875_v35 = vunpack.i.l.bf16 %v18945_v12 }
 0x256   :  { %v14889_v41 = vunpack.i.h.bf16 %v19296_v40  ;;  %v14888_v56 = vunpack.i.l.bf16 %v19296_v40  ;;  %v3641_v1 = vsel %vm700_vm4, %v18836_v45, %v14739_v23  ;;  %v12766_v19 = vpack.c.bf16 %v263_v11, %v18857_v60 }
 0x257   :  { %v719_v38 = vsel %vm700_vm4, %v24875_v35, %v14894_v7  ;;  %12753 = vmatprep.subr.bf16.mxu0 %v12752_v17  ;;  %v3642_v61 = vsel %vm700_vm4, %v14739_v23, %v14893_v44 }
 0x258   :  { %v3190_v37 = vsel %vm244_vm1, %v14849_v18, %v14888_v56  ;;  %12755 = vmatpush1.bf16.msra.mxu0 %v12754_v27  ;;  %v19315_v10 = vpop.permute.xlu1 %14901  ;;  %4772 = vmatprep.subr.mxu1 %v3642_v61  ;;  %v3191_v12 = vsel %vm244_vm1, %v14888_v56, %v14889_v41  ;;  %v12774_v36 = vpack.c.bf16 %v19292_v49, %v719_v38  ;;  %v19332_v56 = vld [vmem:[%s24275_s1] sm:$0xff]  ;;  %v24876_v49 = vunpack.i.h.bf16 %v18882_v55  ;;  %s16208_s1 = smov 120  }
 0x259   :  { %v14904_v17 = vunpack.i.h.bf16 %v19315_v10  ;;  %v14903_v45 = vunpack.i.l.bf16 %v19315_v10  ;;  %v19323_v23 = vpop.permute.xlu0 %14896  ;;  %4773 = vmatpush1.msra.mxu1 %v3641_v1  ;;  %v12756_v33 = vpack.c.bf16 %v3191_v12, %v18857_v60  ;;  %v12758_v18 = vpack.c.bf16 %v3190_v37, %v18857_v60 }
 0x25a   :  { %v14899_v11 = vunpack.i.h.bf16 %v19323_v23  ;;  %v14898_v61 = vunpack.i.l.bf16 %v19323_v23  ;;  %4789 = vmatmul.mubr.f32.vlgmr.msra.gmra.mrb[6].mxu1 %v19332_v56  ;;  %12765 = vmatprep.subr.bf16.mxu1 %v12764_v25  ;;  %v24877_v38 = vunpack.i.h.bf16 %v18893_v58 }
 0x25b   :  { %v567_v27 = vsel %vm548_vm3, %v24876_v49, %v14903_v45  ;;  %12757 = vmatprep.subr.bf16.mxu0 %v12756_v33  ;;  %12767 = vmatpush1.bf16.msra.mxu1 %v12766_v19  ;;  %v568_v35 = vsel %vm548_vm3, %v14903_v45, %v14904_v17 }
 0x25c   :  { %v415_v1 = vsel %vm396_vm2, %v24877_v38, %v14898_v61  ;;  %12759 = vmatpush1.bf16.msra.mxu0 %v12758_v18  ;;  %v19344_v37 = vpop.permute.xlu1 %14911  ;;  %v416_v25 = vsel %vm396_vm2, %v14898_v61, %v14899_v11  ;;  %11816 = vmatprep.mubr.msk.f32.mxu1 %vm24878_vm11, %v18793_v26  ;;  %vm24891_vm11 = vcmask 515072  }
 0x25d   :  { %v24436_v55 = vunpack.i.h.bf16 %v19344_v37  ;;  %v14913_v19 = vunpack.i.l.bf16 %v19344_v37  ;;  %v19353_v12 = vpop.permute.xlu0 %14906  ;;  %v12768_v45 = vpack.c.bf16 %v568_v35, %v416_v25  ;;  %v12770_v58 = vpack.c.bf16 %v567_v27, %v415_v1 }
 0x25e   :  { %v24435_v33 = vunpack.i.h.bf16 %v19353_v12  ;;  %v14908_v18 = vunpack.i.l.bf16 %v19353_v12 }
 0x25f   :  { %v3492_v49 = vsel %vm548_vm3, %v14869_v63, %v14913_v19  ;;  %12769 = vmatprep.subr.bf16.mxu1 %v12768_v45  ;;  %v3493_v61 = vsel %vm548_vm3, %v14913_v19, %v24436_v55  ;;  %v24890_v55 = vunpack.i.h.bf16 %v19087_v2 }
 0x260   :  { %v3341_v38 = vsel %vm396_vm2, %v14864_v8, %v14908_v18  ;;  %12771 = vmatpush1.bf16.msra.mxu1 %v12770_v58  ;;  %v19366_v35 = vpop.permute.xlu1 %14921  ;;  %v3342_v27 = vsel %vm396_vm2, %v14908_v18, %v24435_v33 }
 0x261   :  { %v14923_v22 = vunpack.i.l.bf16 %v19366_v35  ;;  %v19372_v1 = vpop.permute.xlu0 %14916  ;;  %v12760_v63 = vpack.c.bf16 %v3493_v61, %v3342_v27  ;;  %v12762_v25 = vpack.c.bf16 %v3492_v49, %v3341_v38 }
 0x262   :  { %v14918_v45 = vunpack.i.l.bf16 %v19372_v1  ;;  %v14919_v58 = vunpack.i.h.bf16 %v19372_v1 }
 0x263   :  { %12761 = vmatprep.subr.bf16.mxu0 %v12760_v63  ;;  %v872_v29 = vsel %vm852_vm5, %v14744_v5, %v14923_v22 }
 0x264   :  { %12763 = vmatpush1.bf16.msra.mxu0 %v12762_v25  ;;  %v19380_v8 = vpop.permute.xlu1 %14931  ;;  %v720_v19 = vsel %vm700_vm4, %v14894_v7, %v14918_v45  ;;  %v3643_v7 = vsel %vm700_vm4, %v14893_v44, %v14919_v58  ;;  %v24444_v25 = vmov 0.0|0.0   ;;  %v24881_v44 = vunpack.i.h.bf16 %v18985_v52 }
 0x265   :  { %v19388_v18 = vpop.permute.xlu0 %14926  ;;  %v12772_v49 = vpack.c.bf16 %v872_v29, %v720_v19  ;;  %v14933_v50 = vunpack.i.l.bf16 %v19380_v8  ;;  %v24879_v19 = vunpack.i.h.bf16 %v18994_v31  ;;  %v24884_v31 = vpack.c.bf16 %v19011_v28, %v19017_v57 }
 0x266   :  { %v24434_v61 = vunpack.i.l.bf16 %v19388_v18  ;;  %v24885_v52 = vunpack.i.h.bf16 %v19047_v0  ;;  %v14819_v0 = vunpack.i.h.bf16 %v19144_v14  ;;  %v14934_v10 = vunpack.i.h.bf16 %v19380_v8 }
 0x267   :  { %12773 = vmatprep.subr.bf16.mxu1 %v12772_v49  ;;  %v1024_v43 = vsel %vm24880_vm6, %v24879_v19, %v14933_v50  ;;  %vm24892_vm6 = vcmask 498688  }
 0x268   :  { %12775 = vmatpush1.bf16.msra.mxu1 %v12774_v36  ;;  %v19392_v5 = vpop.permute.xlu1 %14941  ;;  %v3644_v38 = vsel %vm700_vm4, %v14919_v58, %v24434_v61 }
 0x269   :  { %v19397_v27 = vpop.permute.xlu0 %14936  ;;  %4843 = vmatprep.subr.mxu0 %v3644_v38  ;;  %v24438_v36 = vunpack.i.l.bf16 %v19392_v5  ;;  %v24909_v8 = vunpack.i.l.bf16 %v19392_v5 }
 0x26a   :  { %v14938_v63 = vunpack.i.l.bf16 %v19397_v27  ;;  %4844 = vmatpush1.msra.mxu0 %v3643_v7  ;;  %v14939_v23 = vunpack.i.h.bf16 %v19397_v27 }
 0x26b   :  { %4860 = vmatmul.mubr.f32.vlgmr.msra.gmra.mrb[8].mxu0 %v19332_v56  ;;  %12812 = vmatprep.subr.bf16.mxu0 %v24444_v25 }
 0x26c   :  { %v19406_v29 = vpop.permute.xlu1 %14951  ;;  %v1176_v58 = vsel %vm24882_vm0, %v24881_v44, %v14938_v63  ;;  %11817 = vmatprep.mubr.msk.f32.mxu0 %vm24883_vm7, %v18793_v26  ;;  %v1328_v26 = vsel %vm1308_vm8, %v24885_v52, %v24438_v36  ;;  %vm24894_vm0 = vcmask 506880  }
 0x26d   :  { %v19420_v49 = vpop.permute.xlu0 %14946  ;;  %v12776_v38 = vpack.c.bf16 %v1176_v58, %v1024_v43  ;;  %v24439_v61 = vunpack.i.l.bf16 %v19406_v29  ;;  %v24886_v43 = vunpack.i.h.bf16 %v19038_v6  ;;  %v24887_v6 = vpack.c.bf16 %v19060_v21, %v19066_v9  ;;  %vm24896_vm7 = vmmov %vm24894_vm0 }
 0x26e   :  { %v24437_v7 = vunpack.i.l.bf16 %v19420_v49  ;;  %v14844_v21 = vunpack.i.h.bf16 %v19175_v15 }
 0x26f   :  { %12777 = vmatprep.subr.bf16.mxu1 %v12776_v38 }
 0x270   :  { %12779 = vmatpush1.bf16.msra.mxu1 %v24884_v31  ;;  %v19427_v19 = vpop.permute.xlu1 %14961  ;;  %v1480_v44 = vsel %vm1460_vm9, %v24886_v43, %v24437_v7  ;;  %v14824_v31 = vunpack.i.h.bf16 %v19136_v24 }
 0x271   :  { %v19439_v58 = vpop.permute.xlu0 %14956  ;;  %v12780_v38 = vpack.c.bf16 %v1480_v44, %v1328_v26  ;;  %v19441_v33 = vpop.f32.mrb[2].mxu1  ;;  %v24441_v52 = vunpack.i.l.bf16 %v19427_v19  ;;  %v24888_v26 = vunpack.i.h.bf16 %v19096_v46  ;;  %v24893_v46 = vunpack.i.l.bf16 %v19144_v14 }
 0x272   :  { %v24440_v57 = vunpack.i.l.bf16 %v19439_v58  ;;  %v19444_v28 = vpop.f32.mrb[3].mxu1 }
 0x273   :  { %12781 = vmatprep.subr.bf16.mxu1 %v12780_v38  ;;  %v1632_v44 = vsel %vm24889_vm10, %v24888_v26, %v24439_v61  ;;  %v1935_v26 = vsel %vm24894_vm0, %v24893_v46, %v14819_v0  ;;  %v14839_v61 = vunpack.i.h.bf16 %v19183_v39  ;;  %v1936_v24 = vsel %vm24896_vm7, %v14819_v0, %v24441_v52  ;;  %vm24897_vm10 = vmmov %vm24892_vm6 }
 0x274   :  { %12783 = vmatpush1.bf16.msra.mxu1 %v24887_v6  ;;  %v19452_v43 = vpop.permute.xlu1 %14971  ;;  %v1784_v38 = vsel %vm24891_vm11, %v24890_v55, %v24440_v57  ;;  %v2087_v6 = vsel %vm24892_vm6, %v14823_v30, %v14824_v31  ;;  %v24895_v55 = vpack.c.bf16 %v19109_v4, %v19115_v34  ;;  %v24898_v46 = vunpack.i.l.bf16 %v19175_v15 }
 0x275   :  { %v19464_v7 = vpop.permute.xlu0 %14966  ;;  %v12784_v36 = vpack.c.bf16 %v1784_v38, %v1632_v44  ;;  %v14973_v2 = vunpack.i.l.bf16 %v19452_v43  ;;  %vm24899_vm11 = vcmask 261120   ;;  %v24900_v57 = vunpack.i.l.bf16 %v19183_v39 }
 0x276   :  { %v24442_v9 = vunpack.i.l.bf16 %v19464_v7  ;;  %v2391_v4 = vsel %vm24899_vm11, %v24898_v46, %v14844_v21  ;;  %vm24901_vm6 = vcmask 490496   ;;  %v14854_v52 = vunpack.i.h.bf16 %v19198_v32  ;;  %vm24903_vm7 = vmmov %vm24899_vm11 }
 0x277   :  { %12785 = vmatprep.subr.bf16.mxu1 %v12784_v36  ;;  %v2239_v0 = vsel %vm24901_vm6, %v24900_v57, %v14839_v61  ;;  %vm24902_vm0 = vmmov %vm24901_vm6  ;;  %vm24908_vm11 = vcmask 769024   ;;  %vm24918_vm6 = vcmask 506880  }
 0x278   :  { %12787 = vmatpush1.bf16.msra.mxu1 %v24895_v55  ;;  %v19479_v44 = vpop.permute.xlu1 %14981  ;;  %v2088_v30 = vsel %vm24897_vm10, %v14824_v31, %v24442_v9  ;;  %v12790_v55 = vpack.c.bf16 %v2087_v6, %v1935_v26  ;;  %v14859_v31 = vunpack.i.h.bf16 %v19218_v54  ;;  %v2240_v6 = vsel %vm24902_vm0, %v14839_v61, %v14973_v2 }
 0x279   :  { %v14983_v14 = vunpack.i.l.bf16 %v19479_v44  ;;  %v19488_v38 = vpop.permute.xlu0 %14976  ;;  %v12788_v36 = vpack.c.bf16 %v2088_v30, %v1936_v24  ;;  %v12794_v30 = vpack.c.bf16 %v2391_v4, %v2239_v0  ;;  %v24905_v61 = vunpack.i.l.bf16 %v19218_v54 }
 0x27a   :  { %v14978_v34 = vunpack.i.l.bf16 %v19488_v38  ;;  %v14924_v4 = vunpack.i.h.bf16 %v19366_v35  ;;  %vm24907_vm10 = vcmask 777216   ;;  %vm24920_vm0 = vcmask 498688  }
 0x27b   :  { %v265_v9 = vsel %vm244_vm1, %v14884_v51, %v14983_v14  ;;  %12789 = vmatprep.subr.bf16.mxu1 %v12788_v36  ;;  %v24904_v14 = vunpack.i.l.bf16 %v19198_v32  ;;  %v2695_v46 = vsel %vm2676_vm13, %v24905_v61, %v14859_v31 }
 0x27c   :  { %12791 = vmatpush1.bf16.msra.mxu1 %v12790_v55  ;;  %v19502_v15 = vpop.permute.xlu1 %14991  ;;  %v2392_v39 = vsel %vm24903_vm7, %v14844_v21, %v14978_v34  ;;  %v12813_v57 = vpack.c.bf16 %v265_v9, %v18857_v60  ;;  %vm24922_vm7 = vcmask 490496  }
 0x27d   :  { %v14993_v26 = vunpack.i.l.bf16 %v19502_v15  ;;  %v19512_v24 = vpop.permute.xlu0 %14986  ;;  %v12792_v47 = vpack.c.bf16 %v2392_v39, %v2240_v6  ;;  %v2543_v36 = vsel %vm2524_vm12, %v24904_v14, %v14854_v52 }
 0x27e   :  { %v24443_v51 = vunpack.i.l.bf16 %v19512_v24  ;;  %12814 = vmatpush1.bf16.msra.mxu0 %v12813_v57  ;;  %v12798_v57 = vpack.c.bf16 %v2695_v46, %v2543_v36  ;;  %v873_v36 = vsel %vm852_vm5, %v14923_v22, %v14924_v4  ;;  %v24906_v22 = vunpack.i.l.bf16 %v19263_v20 }
 0x27f   :  { %12793 = vmatprep.subr.bf16.mxu1 %v12792_v47  ;;  %v2696_v21 = vsel %vm2676_vm13, %v14859_v31, %v14993_v26  ;;  %12815 = vmatprep.subr.bf16.mxu0 %v24444_v25  ;;  %v14929_v31 = vunpack.i.h.bf16 %v19388_v18 }
 0x280   :  { %12795 = vmatpush1.bf16.msra.mxu1 %v12794_v30  ;;  %v19525_v9 = vpop.permute.xlu1 %15001  ;;  %v2544_v32 = vsel %vm2524_vm12, %v14854_v52, %v24443_v51  ;;  %v14874_v30 = vunpack.i.h.bf16 %v19231_v62  ;;  %v14879_v52 = vunpack.i.h.bf16 %v19263_v20 }
 0x281   :  { %v15003_v54 = vunpack.i.l.bf16 %v19525_v9  ;;  %v19532_v55 = vpop.permute.xlu0 %14996  ;;  %v12796_v0 = vpack.c.bf16 %v2696_v21, %v2544_v32  ;;  %v19534_v6 = vpop.f32.mrb[4].mxu0 }
 0x282   :  { %v14998_v39 = vunpack.i.l.bf16 %v19532_v55  ;;  %v19538_v47 = vpop.f32.mrb[5].mxu0  ;;  %v2847_v35 = vsel %vm2828_vm14, %v14873_v53, %v14874_v30  ;;  %v2999_v4 = vsel %vm2980_vm15, %v24906_v22, %v14879_v52  ;;  %v14949_v53 = vunpack.i.h.bf16 %v19420_v49 }
 0x283   :  { %v569_v14 = vsel %vm548_vm3, %v14904_v17, %v15003_v54  ;;  %12797 = vmatprep.subr.bf16.mxu1 %v12796_v0  ;;  %v721_v17 = vsel %vm700_vm4, %v14918_v45, %v14929_v31  ;;  %v14984_v54 = vunpack.i.h.bf16 %v19479_v44  ;;  %v14944_v45 = vunpack.i.h.bf16 %v19392_v5 }
 0x284   :  { %v417_v61 = vsel %vm396_vm2, %v14899_v11, %v14998_v39  ;;  %12799 = vmatpush1.bf16.msra.mxu1 %v12798_v57  ;;  %v19548_v21 = vpop.permute.xlu1 %15011  ;;  %v1025_v31 = vsel %vm24907_vm10, %v14933_v50, %v14934_v10  ;;  %v1177_v39 = vsel %vm24908_vm11, %v14938_v63, %v14939_v23  ;;  %v24910_v63 = vunpack.i.l.bf16 %v19420_v49 }
 0x285   :  { %v15013_v46 = vunpack.i.l.bf16 %v19548_v21  ;;  %v19554_v32 = vpop.permute.xlu0 %15006  ;;  %v12816_v51 = vpack.c.bf16 %v569_v14, %v417_v61  ;;  %v15004_v14 = vunpack.i.h.bf16 %v19525_v9  ;;  %v14999_v61 = vunpack.i.h.bf16 %v19532_v55 }
 0x286   :  { %v15008_v11 = vunpack.i.l.bf16 %v19554_v32  ;;  %v1329_v50 = vsel %vm1308_vm8, %v24909_v8, %v14944_v45  ;;  %v1481_v9 = vsel %vm1460_vm9, %v24910_v63, %v14949_v53  ;;  %v12822_v10 = vpack.c.bf16 %v1177_v39, %v1025_v31 }
 0x287   :  { %12817 = vmatpush1.bf16.msra.mxu0 %v12816_v51  ;;  %v3000_v1 = vsel %vm2980_vm15, %v14879_v52, %v15013_v46  ;;  %v12819_v51 = vpack.c.bf16 %v873_v36, %v721_v17  ;;  %v12802_v52 = vpack.c.bf16 %v2999_v4, %v2847_v35  ;;  %v14959_v17 = vunpack.i.h.bf16 %v19439_v58 }
 0x288   :  { %v19573_v0 = vpop.permute.xlu1 %15021  ;;  %12818 = vmatprep.subr.bf16.mxu0 %v24444_v25  ;;  %v2848_v62 = vsel %vm2828_vm14, %v14874_v30, %v15008_v11  ;;  %v3192_v30 = vsel %vm244_vm1, %v14889_v41, %v14984_v54  ;;  %v14954_v41 = vunpack.i.h.bf16 %v19406_v29  ;;  %v24911_v4 = vunpack.i.h.bf16 %v19344_v37 }
 0x289   :  { %v19580_v20 = vpop.permute.xlu0 %15016  ;;  %v12800_v44 = vpack.c.bf16 %v3000_v1, %v2848_v62  ;;  %v15023_v27 = vunpack.i.l.bf16 %v19573_v0  ;;  %v12806_v22 = vpack.c.bf16 %v3192_v30, %v18857_v60  ;;  %v24913_v37 = vunpack.i.l.bf16 %v19406_v29 }
 0x28a   :  { %v15018_v57 = vunpack.i.l.bf16 %v19580_v20  ;;  %v3494_v49 = vsel %vm548_vm3, %v24911_v4, %v15004_v14  ;;  %vm24914_vm8 = vcmask 523264   ;;  %v14964_v53 = vunpack.i.h.bf16 %v19427_v19 }
 0x28b   :  { %12801 = vmatprep.subr.bf16.mxu1 %v12800_v44  ;;  %12820 = vmatpush1.bf16.msra.mxu0 %v12819_v51  ;;  %v3344_v62 = vsel %vm396_vm2, %v14999_v61, %v15023_v27  ;;  %v12825_v51 = vpack.c.bf16 %v1481_v9, %v1329_v50  ;;  %v24915_v31 = vunpack.i.l.bf16 %v19439_v58  ;;  %vm24916_vm9 = vcmask 515072   ;;  %vm24931_vm11 = vmmov %vm24914_vm8 }
 0x28c   :  { %12803 = vmatpush1.bf16.msra.mxu1 %v12802_v52  ;;  %12821 = vmatprep.subr.bf16.mxu0 %v24444_v25  ;;  %v3193_v40 = vsel %vm244_vm1, %v14984_v54, %v15018_v57  ;;  %v19606_v55 = vpop.permute.xlu1 %15031  ;;  %v24912_v54 = vunpack.i.h.bf16 %v19353_v12  ;;  %v1633_v12 = vsel %vm24914_vm8, %v24913_v37, %v14954_v41  ;;  %v14969_v52 = vunpack.i.h.bf16 %v19464_v7 }
 0x28d   :  { %v19608_v5 = vpop.permute.xlu0 %15026  ;;  %v12804_v36 = vpack.c.bf16 %v3193_v40, %v18857_v60  ;;  %v15034_v23 = vunpack.i.h.bf16 %v19606_v55  ;;  %v15033_v45 = vunpack.i.l.bf16 %v19606_v55  ;;  %v1785_v39 = vsel %vm24916_vm9, %v24915_v31, %v14959_v17  ;;  %vm24933_vm9 = vmmov %vm24922_vm7 }
 0x28e   :  { %v15028_v35 = vunpack.i.l.bf16 %v19608_v5  ;;  %v3343_v1 = vsel %vm396_vm2, %v24912_v54, %v14999_v61  ;;  %v12828_v29 = vpack.c.bf16 %v1785_v39, %v1633_v12  ;;  %v14974_v8 = vunpack.i.h.bf16 %v19452_v43 }
 0x28f   :  { %12805 = vmatprep.subr.bf16.mxu1 %v12804_v36  ;;  %12823 = vmatpush1.bf16.msra.mxu0 %v12822_v10  ;;  %v12810_v30 = vpack.c.bf16 %v3494_v49, %v3343_v1  ;;  %v3646_v61 = vsel %vm700_vm4, %v15033_v45, %v15034_v23  ;;  %v24919_v50 = vunpack.i.l.bf16 %v19464_v7  ;;  %v14979_v41 = vunpack.i.h.bf16 %v19488_v38 }
 0x290   :  { %12807 = vmatpush1.bf16.msra.mxu1 %v12806_v22  ;;  %12824 = vmatprep.subr.bf16.mxu0 %v24444_v25  ;;  %v3495_v60 = vsel %vm548_vm3, %v15004_v14, %v15028_v35  ;;  %v24917_v14 = vunpack.i.l.bf16 %v19427_v19  ;;  %v24921_v63 = vunpack.i.l.bf16 %v19388_v18  ;;  %v2241_v36 = vsel %vm24922_vm7, %v14973_v2, %v14974_v8 }
 0x291   :  { %v12808_v44 = vpack.c.bf16 %v3495_v60, %v3344_v62  ;;  %v2089_v40 = vsel %vm24920_vm0, %v24919_v50, %v14969_v52  ;;  %vm24923_vm10 = vcmask 261120   ;;  %v14994_v10 = vunpack.i.h.bf16 %v19502_v15  ;;  %vm24935_vm0 = vmmov %vm24922_vm7 }
 0x292   :  { %v1937_v58 = vsel %vm24918_vm6, %v24917_v14, %v14964_v53  ;;  %v3645_v9 = vsel %vm700_vm4, %v24921_v63, %v15033_v45  ;;  %v2393_v7 = vsel %vm24923_vm10, %v14978_v34, %v14979_v41  ;;  %v14989_v18 = vunpack.i.h.bf16 %v19512_v24 }
 0x293   :  { %12809 = vmatprep.subr.bf16.mxu1 %v12808_v44  ;;  %12826 = vmatpush1.bf16.msra.mxu0 %v12825_v51  ;;  %v12831_v19 = vpack.c.bf16 %v2089_v40, %v1937_v58  ;;  %v12834_v17 = vpack.c.bf16 %v2393_v7, %v2241_v36  ;;  %v2697_v22 = vsel %vm2676_vm13, %v14993_v26, %v14994_v10  ;;  %v24924_v43 = vunpack.i.l.bf16 %v19512_v24 }
 0x294   :  { %12811 = vmatpush1.bf16.msra.mxu1 %v12810_v30  ;;  %12827 = vmatprep.subr.bf16.mxu0 %v24444_v25  ;;  %v15014_v38 = vunpack.i.h.bf16 %v19548_v21  ;;  %v15009_v34 = vunpack.i.h.bf16 %v19554_v32  ;;  %v15019_v62 = vunpack.i.h.bf16 %v19580_v20  ;;  %v15029_v12 = vunpack.i.h.bf16 %v19608_v5  ;;  %v16151_v20 = vld [vmem:[#allocation2 + $0x80] sm:$0xff]  ;;  %v3626_v5 = vpop.permute.xlu1 %3625 }
 0x295   :  { %4914 = vmatprep.subr.mxu1 %v3646_v61  ;;  %v2545_v2 = vsel %vm2524_vm12, %v24924_v43, %v14989_v18  ;;  %vm5730_vm13 = vcmask 998400   ;;  %vm6347_vm10 = vcmask 474112  }
 0x296   :  { %v12837_v54 = vpack.c.bf16 %v2697_v22, %v2545_v2  ;;  %v3194_v37 = vsel %vm244_vm1, %v15018_v57, %v15019_v62  ;;  %v3496_v31 = vsel %vm548_vm3, %v15028_v35, %v15029_v12  ;;  %vm24927_vm3 = vcmask 588800  }
 0x297   :  { %12829 = vmatpush1.bf16.msra.mxu0 %v12828_v29  ;;  %v12843_v53 = vpack.c.bf16 %v3194_v37, %v16151_v20  ;;  %vm24928_vm12 = vmmov %vm24927_vm3 }
 0x298   :  { %4915 = vmatpush1.msra.mxu1 %v3645_v9  ;;  %12830 = vmatprep.subr.bf16.mxu0 %v24444_v25 }
 0x299   :  { %4931 = vmatmul.mubr.f32.vlgmr.msra.gmra.mrb[8].mxu1 %v19332_v56 }
 0x29b   :  { %12832 = vmatpush1.bf16.msra.mxu0 %v12831_v19 }
 0x29c   :  { %12833 = vmatprep.subr.bf16.mxu0 %v24444_v25 }
 0x29e   :  { %v19671_v4 = vpop.permute.xlu0 %4220 }
 0x29f   :  { %12835 = vmatpush1.bf16.msra.mxu0 %v12834_v17  ;;  %v19675_v49 = vadd.f32 %v18895_v42, %v19671_v4  ;;  %v19679_v15 = vadd.f32 %v18806_v13, %v19671_v4  ;;  %v4296_v26 = vadd.f32 %v18810_v3, %v19671_v4  ;;  %v19688_v45 = vadd.f32 %v18996_v16, %v19671_v4 }
 0x2a0   :  { %12836 = vmatprep.subr.bf16.mxu0 %v24444_v25  ;;  %v3001_v42 = vsel %vm2980_vm15, %v15013_v46, %v15014_v38  ;;  %v2849_v13 = vsel %vm2828_vm14, %v15008_v11, %v15009_v34  ;;  %v19703_v16 = vadd.f32 %v18901_v59, %v19671_v4  ;;  %v19708_v32 = vadd.f32 %v19441_v33, %v19671_v4  ;;  %vm24930_vm15 = vmmov %vm24914_vm8 }
 0x2a1   :  { %v5009_v24 = vmax.f32 %v19675_v49, 0.0  ;;  %v5007_v1 = vmax.f32 %v19679_v15, 0.0  ;;  %v5008_v3 = vmax.f32 %v4296_v26, 0.0  ;;  %v12840_v21 = vpack.c.bf16 %v3001_v42, %v2849_v13  ;;  %vm24932_vm8 = vmmov %vm24918_vm6 }
 0x2a2   :  { %v5011_v46 = vmax.f32 %v19688_v45, 0.0  ;;  %v15024_v11 = vunpack.i.h.bf16 %v19573_v0  ;;  %v5010_v59 = vmax.f32 %v19703_v16, 0.0  ;;  %v19723_v33 = vadd.f32 %v19000_v48, %v19671_v4  ;;  %vm24936_vm7 = vmmov %vm24932_vm8 }
 0x2a3   :  { %5115 = vrot.lane.b32.xlu0 %v5009_v24, %s24789_s26  ;;  %12838 = vmatpush1.bf16.msra.mxu0 %v12837_v54  ;;  %v15036_v60 = vpack.i.bf16 %v5007_v1, %v5008_v3  ;;  %v5013_v57 = vmax.f32 %v19708_v32, 0.0  ;;  %v19728_v44 = vadd.f32 %v19534_v6, %v19671_v4  ;;  %v19742_v48 = vadd.f32 %v19444_v28, %v19671_v4 }
 0x2a4   :  { %12839 = vmatprep.subr.bf16.mxu0 %v24444_v25  ;;  %v3345_v51 = vsel %vm396_vm2, %v15023_v27, %v15024_v11  ;;  %v5012_v6 = vmax.f32 %v19723_v33, 0.0  ;;  %v3647_v28 = vsel %vm700_vm4, %v15034_v23, %v3626_v5  ;;  %vm5854_vm14 = vcmask 982016  }
 0x2a5   :  { %15037 = vrot.lane.b32.xlu1 %v15036_v60, %s24789_s26  ;;  %v12846_v0 = vpack.c.bf16 %v3496_v31, %v3345_v51  ;;  %v5015_v27 = vmax.f32 %v19728_v44, 0.0  ;;  %v5014_v35 = vmax.f32 %v19742_v48, 0.0  ;;  %vm6471_vm6 = vcmask 457728  }
 0x2a7   :  { %12841 = vmatpush1.bf16.msra.mxu0 %v12840_v21  ;;  %5119 = vrot.lane.b32.xlu0 %v5011_v46, %s24789_s26 }
 0x2a8   :  { %12842 = vmatprep.subr.bf16.mxu0 %v24444_v25 }
 0x2a9   :  { %5117 = vrot.lane.b32.xlu1 %v5010_v59, %s24789_s26 }
 0x2ab   :  { %12844 = vmatpush1.bf16.msra.mxu0 %v12843_v53  ;;  %5123 = vrot.lane.b32.xlu0 %v5013_v57, %s24789_s26 }
 0x2ac   :  { %12845 = vmatprep.subr.bf16.mxu0 %v24444_v25 }
 0x2ad   :  { %5121 = vrot.lane.b32.xlu1 %v5012_v6, %s24789_s26 }
 0x2af   :  { %12847 = vmatpush1.bf16.msra.mxu0 %v12846_v0  ;;  %5127 = vrot.lane.b32.xlu0 %v5015_v27, %s24789_s26 }
 0x2b0   :  { %4985 = vmatprep.subr.mxu0 %v16151_v20 }
 0x2b1   :  { %5125 = vrot.lane.b32.xlu1 %v5014_v35, %s24789_s26 }
 0x2b3   :  { %4986 = vmatpush1.msra.mxu0 %v3647_v28 }
 0x2b4   :  { %5002 = vmatmul.mubr.f32.vlgmr.msra.gmra.mrb[10].mxu0 %v19332_v56  ;;  %v19768_v56 = vadd.f32 %v19538_v47, %v19671_v4 }
 0x2b6   :  { %v5016_v7 = vmax.f32 %v19768_v56, 0.0 }
 0x2d0   :  { %v4648_v39 = vpop.f32.mrb[4].mxu1 }
 0x2d1   :  { %v4650_v52 = vpop.f32.mrb[5].mxu1  ;;  %v19784_v47 = vadd.f32 %v4648_v39, %v19671_v4 }
 0x2d2   :  { %v19771_v9 = vadd.f32 %v4650_v52, %v19671_v4 }
 0x2d3   :  { %v5017_v43 = vmax.f32 %v19784_v47, 0.0 }
 0x2d4   :  { %v5018_v10 = vmax.f32 %v19771_v9, 0.0 }
 0x2e0   :  { %v4719_v30 = vpop.f32.mrb[6].mxu0 }
 0x2e1   :  { %v4721_v61 = vpop.f32.mrb[7].mxu0  ;;  %v19796_v2 = vadd.f32 %v4719_v30, %v19671_v4 }
 0x2e2   :  { %v19806_v15 = vadd.f32 %v4721_v61, %v19671_v4 }
 0x2e3   :  { %v5019_v49 = vmax.f32 %v19796_v2, 0.0 }
 0x2e4   :  { %v5020_v13 = vmax.f32 %v19806_v15, 0.0 }
 0x315   :  { %v5116_v8 = vpop.permute.xlu0 %5115 }
 0x317   :  { %v15038_v29 = vpop.permute.xlu1 %15037 }
 0x318   :  { %v15040_v14 = vunpack.i.h.bf16 %v15038_v29  ;;  %v15039_v58 = vunpack.i.l.bf16 %v15038_v29 }
 0x319   :  { %v5120_v18 = vpop.permute.xlu0 %5119 }
 0x31a   :  { %v5153_v55 = vsel %vm244_vm1, %v15040_v14, %v15039_v58  ;;  %v5154_v23 = vsel %vm244_vm1, %v15039_v58, %v5116_v8 }
 0x31b   :  { %v19761_v50 = vmax.f32 %v5007_v1, %v5153_v55  ;;  %v19763_v40 = vmax.f32 %v5008_v3, %v5154_v23  ;;  %v5118_v41 = vpop.permute.xlu1 %5117 }
 0x31c   :  { %v5155_v63 = vsel %vm244_vm1, %v5116_v8, %v5118_v41  ;;  %v5156_v17 = vsel %vm244_vm1, %v5118_v41, %v5120_v18 }
 0x31d   :  { %v19775_v19 = vmax.f32 %v5009_v24, %v5155_v63  ;;  %v15041_v36 = vpack.i.bf16 %v19761_v50, %v19763_v40  ;;  %v19798_v38 = vmax.f32 %v5010_v59, %v5156_v17  ;;  %v5124_v26 = vpop.permute.xlu0 %5123 }
 0x31f   :  { %5260 = vrot.lane.b32.xlu0 %v19775_v19, %s16190_s14  ;;  %15042 = vrot.lane.b32.xlu1 %v15041_v36, %s16190_s14  ;;  %v5122_v22 = vpop.permute.xlu1 %5121 }
 0x320   :  { %v5157_v34 = vsel %vm244_vm1, %v5120_v18, %v5122_v22  ;;  %v5158_v54 = vsel %vm244_vm1, %v5122_v22, %v5124_v26 }
 0x321   :  { %v19810_v24 = vmax.f32 %v5011_v46, %v5157_v34  ;;  %v19819_v62 = vmax.f32 %v5012_v6, %v5158_v54  ;;  %v5128_v0 = vpop.permute.xlu0 %5127 }
 0x323   :  { %5129 = vrot.lane.b32.xlu0 %v5016_v7, %s24789_s26  ;;  %5133 = vrot.lane.b32.xlu1 %v5018_v10, %s24789_s26  ;;  %v5126_v1 = vpop.permute.xlu1 %5125 }
 0x324   :  { %v5159_v45 = vsel %vm244_vm1, %v5124_v26, %v5126_v1  ;;  %v5160_v28 = vsel %vm244_vm1, %v5126_v1, %v5128_v0 }
 0x325   :  { %v19829_v60 = vmax.f32 %v5013_v57, %v5159_v45  ;;  %v19878_v39 = vmax.f32 %v5014_v35, %v5160_v28 }
 0x327   :  { %5131 = vrot.lane.b32.xlu0 %v5017_v43, %s24789_s26  ;;  %5262 = vrot.lane.b32.xlu1 %v19798_v38, %s16190_s14 }
 0x32b   :  { %5135 = vrot.lane.b32.xlu0 %v5019_v49, %s24789_s26  ;;  %5264 = vrot.lane.b32.xlu1 %v19810_v24, %s16190_s14 }
 0x32d   :  { %v4790_v42 = vpop.f32.mrb[6].mxu1 }
 0x32e   :  { %v4792_v3 = vpop.f32.mrb[7].mxu1  ;;  %v19832_v16 = vadd.f32 %v4790_v42, %v19671_v4 }
 0x32f   :  { %5137 = vrot.lane.b32.xlu0 %v5020_v13, %s24789_s26  ;;  %5266 = vrot.lane.b32.xlu1 %v19819_v62, %s16190_s14  ;;  %v19838_v46 = vadd.f32 %v4792_v3, %v19671_v4 }
 0x330   :  { %v24455_v21 = vmax.f32 %v19832_v16, 0.0 }
 0x331   :  { %v5022_v11 = vmax.f32 %v19838_v46, 0.0 }
 0x333   :  { %5268 = vrot.lane.b32.xlu0 %v19829_v60, %s16190_s14 }
 0x337   :  { %5139 = vrot.lane.b32.xlu0 %v24455_v21, %s24789_s26 }
 0x33b   :  { %5141 = vrot.lane.b32.xlu0 %v5022_v11, %s24789_s26 }
 0x33e   :  { %v4861_v32 = vpop.f32.mrb[8].mxu0 }
 0x33f   :  { %v19848_v37 = vadd.f32 %v4861_v32, %v19671_v4  ;;  %v4863_v12 = vpop.f32.mrb[9].mxu0 }
 0x340   :  { %v19851_v59 = vadd.f32 %v4863_v12, %v19671_v4 }
 0x341   :  { %v24453_v33 = vmax.f32 %v19848_v37, 0.0 }
 0x342   :  { %v24448_v20 = vmax.f32 %v19851_v59, 0.0 }
 0x343   :  { %5143 = vrot.lane.b32.xlu1 %v24453_v33, %s24789_s26 }
 0x344   :  { %5145 = vrot.lane.b32.xlu0 %v24448_v20, %s24789_s26 }
 0x36c   :  { %v4932_v53 = vpop.f32.mrb[8].mxu1 }
 0x36d   :  { %v19862_v57 = vadd.f32 %v4932_v53, %v19671_v4  ;;  %v4934_v51 = vpop.f32.mrb[9].mxu1 }
 0x36e   :  { %v19866_v6 = vadd.f32 %v4934_v51, %v19671_v4 }
 0x36f   :  { %v24447_v31 = vmax.f32 %v19862_v57, 0.0 }
 0x370   :  { %24925 = vst [vmem:[#allocation12_spill] sm:$0xff] %v19866_v6  ;;  %v24446_v5 = vmax.f32 %v19866_v6, 0.0 }
 0x371   :  { %5147 = vrot.lane.b32.xlu1 %v24447_v31, %s24789_s26 }
 0x375   :  { %5149 = vrot.lane.b32.xlu1 %v24446_v5, %s24789_s26 }
 0x379   :  { %5270 = vrot.lane.b32.xlu1 %v19878_v39, %s16190_s14 }
 0x387   :  { %v19882_v52 = vpop.f32.mrb[10].mxu0 }
 0x388   :  { %v5005_v30 = vpop.f32.mrb[11].mxu0 }
 0x391   :  { %v5261_v61 = vpop.permute.xlu0 %5260  ;;  %v15043_v29 = vpop.permute.xlu1 %15042 }
 0x392   :  { %v15044_v44 = vunpack.i.l.bf16 %v15043_v29  ;;  %v15045_v26 = vunpack.i.h.bf16 %v15043_v29 }
 0x394   :  { %v5299_v17 = vsel %vm852_vm5, %v15044_v44, %v5261_v61 }
 0x395   :  { %v5130_v14 = vpop.permute.xlu0 %5129  ;;  %v5134_v55 = vpop.permute.xlu1 %5133  ;;  %v19921_v9 = vmax.f32 %v19763_v40, %v5299_v17 }
 0x396   :  { %v5161_v58 = vsel %vm244_vm1, %v5128_v0, %v5130_v14 }
 0x397   :  { %v19887_v8 = vmax.f32 %v5015_v27, %v5161_v58 }
 0x399   :  { %v5132_v23 = vpop.permute.xlu0 %5131  ;;  %5272 = vrot.lane.b32.xlu1 %v19887_v8, %s16190_s14  ;;  %v5263_v36 = vpop.permute.xlu1 %5262 }
 0x39a   :  { %v5162_v48 = vsel %vm244_vm1, %v5130_v14, %v5132_v23  ;;  %v5163_v35 = vsel %vm244_vm1, %v5132_v23, %v5134_v55  ;;  %v5300_v56 = vsel %vm852_vm5, %v5261_v61, %v5263_v36  ;;  %v20028_v14 = vld [vmem:[%s24277_s3 + $0x8] sm:$0xff] }
 0x39b   :  { %v19895_v41 = vmax.f32 %v5016_v7, %v5162_v48  ;;  %v19897_v63 = vmax.f32 %v5017_v43, %v5163_v35  ;;  %v19914_v43 = vmax.f32 %v19775_v19, %v5300_v56  ;;  %v5298_v19 = vsel %vm852_vm5, %v15045_v26, %v15044_v44  ;;  %11818 = vmatprep.mubr.msk.f32.mxu1 %vm24927_vm3, %v20028_v14  ;;  %vm24942_vm3 = vmmov %vm24931_vm11 }
 0x39c   :  { %11820 = vmatprep.mubr.msk.f32.mxu0 %vm24928_vm12, %v20028_v14  ;;  %vm24944_vm12 = vmmov %vm24942_vm3 }
 0x39d   :  { %v5136_v47 = vpop.permute.xlu0 %5135  ;;  %5274 = vrot.lane.b32.xlu0 %v19895_v41, %s16190_s14  ;;  %5276 = vrot.lane.b32.xlu1 %v19897_v63, %s16190_s14  ;;  %v15046_v54 = vpack.i.bf16 %v19914_v43, %v19921_v9 }
 0x39e   :  { %v5164_v27 = vsel %vm244_vm1, %v5134_v55, %v5136_v47 }
 0x39f   :  { %v19906_v18 = vmax.f32 %v5018_v10, %v5164_v27 }
 0x3a1   :  { %v5138_v7 = vpop.permute.xlu0 %5137  ;;  %5278 = vrot.lane.b32.xlu0 %v19906_v18, %s16190_s14 }
 0x3a2   :  { %v5165_v22 = vsel %vm244_vm1, %v5136_v47, %v5138_v7 }
 0x3a3   :  { %v19918_v34 = vmax.f32 %v5019_v49, %v5165_v22  ;;  %v19940_v49 = vmax.f32 %v19761_v50, %v5298_v19  ;;  %v5265_v50 = vpop.permute.xlu1 %5264 }
 0x3a4   :  { %v5301_v15 = vsel %vm852_vm5, %v5263_v36, %v5265_v50 }
 0x3a5   :  { %v19923_v10 = vpop.permute.xlu0 %5268  ;;  %5280 = vrot.lane.b32.xlu1 %v19918_v34, %s16190_s14  ;;  %v15066_v42 = vpack.i.bf16 %v19914_v43, %v19940_v49 }
 0x3a7   :  { %v5267_v45 = vpop.permute.xlu1 %5266 }
 0x3a8   :  { %v5303_v53 = vsel %vm852_vm5, %v5267_v45, %v19923_v10 }
 0x3a9   :  { %v19929_v1 = vpop.permute.xlu0 %5139  ;;  %15047 = vrot.lane.b32.xlu1 %v15046_v54, %s24721_s29 }
 0x3aa   :  { %v5166_v2 = vsel %vm244_vm1, %v5138_v7, %v19929_v1 }
 0x3ab   :  { %v19937_v40 = vmax.f32 %v5020_v13, %v5166_v2  ;;  %v19961_v13 = vmax.f32 %v19798_v38, %v5301_v15  ;;  %v5302_v38 = vsel %vm852_vm5, %v5265_v50, %v5267_v45 }
 0x3ac   :  { %v19978_v32 = vmax.f32 %v19810_v24, %v5302_v38  ;;  %v19991_v24 = vmax.f32 %v19819_v62, %v5303_v53 }
 0x3ad   :  { %24926 = vst [vmem:[#allocation11_spill] sm:$0xff] %v19937_v40  ;;  %5282 = vrot.lane.b32.xlu0 %v19937_v40, %s16190_s14  ;;  %15057 = vrot.lane.b32.xlu1 %v15046_v54, %s16191_s15  ;;  %v15136_v3 = vpack.i.bf16 %v19921_v9, %v19961_v13  ;;  %v15201_v51 = vpack.i.bf16 %v19961_v13, %v19914_v43  ;;  %v20037_v55 = vpop.permute.xlu0 %5141 }
 0x3ae   :  { %v15181_v12 = vpack.i.bf16 %v19978_v32, %v19961_v13  ;;  %v15211_v0 = vpack.i.bf16 %v19991_v24, %v19978_v32 }
 0x3b1   :  { %15067 = vrot.lane.b32.xlu1 %v15066_v42, %s16191_s15  ;;  %15052 = vrot.lane.b32.xlu0 %v15066_v42, %s24721_s29 }
 0x3b5   :  { %15077 = vrot.lane.b32.xlu1 %v15046_v54, %s16208_s1  ;;  %15062 = vrot.lane.b32.xlu0 %v15046_v54, %s16209_s23  ;;  %v20004_v62 = vpop.permute.xlu1 %5143 }
 0x3b6   :  { %v20045_v35 = vpop.permute.xlu0 %5145 }
 0x3b9   :  { %15092 = vrot.lane.b32.xlu1 %v15066_v42, %s24629_s27  ;;  %15072 = vrot.lane.b32.xlu0 %v15066_v42, %s16209_s23 }
 0x3bd   :  { %15102 = vrot.lane.b32.xlu1 %v15046_v54, %s16201_s20  ;;  %15082 = vrot.lane.b32.xlu0 %v15046_v54, %s24629_s27 }
 0x3c1   :  { %15112 = vrot.lane.b32.xlu1 %v15066_v42, %s16201_s20  ;;  %15087 = vrot.lane.b32.xlu0 %v15066_v42, %s16208_s1 }
 0x3c5   :  { %15122 = vrot.lane.b32.xlu1 %v15046_v54, %s16210_s25  ;;  %15097 = vrot.lane.b32.xlu0 %v15046_v54, %s24633_s24 }
 0x3c9   :  { %15132 = vrot.lane.b32.xlu1 %v15066_v42, %s16210_s25  ;;  %15107 = vrot.lane.b32.xlu0 %v15066_v42, %s24633_s24 }
 0x3cd   :  { %15137 = vrot.lane.b32.xlu1 %v15136_v3, %s24721_s29  ;;  %15117 = vrot.lane.b32.xlu0 %v15046_v54, %s16211_s21 }
 0x3d1   :  { %15147 = vrot.lane.b32.xlu1 %v15136_v3, %s16209_s23  ;;  %15127 = vrot.lane.b32.xlu0 %v15066_v42, %s16211_s21 }
 0x3d5   :  { %15157 = vrot.lane.b32.xlu1 %v15136_v3, %s24629_s27  ;;  %8103 = vrot.lane.b32.xlu0 %v19914_v43, %s16208_s1 }
 0x3d9   :  { %15162 = vrot.lane.b32.xlu1 %v15136_v3, %s24633_s24  ;;  %15142 = vrot.lane.b32.xlu0 %v15136_v3, %s16191_s15 }
 0x3dd   :  { %15172 = vrot.lane.b32.xlu1 %v15136_v3, %s16211_s21  ;;  %15152 = vrot.lane.b32.xlu0 %v15136_v3, %s16208_s1 }
 0x3e1   :  { %15182 = vrot.lane.b32.xlu1 %v15181_v12, %s24721_s29  ;;  %15167 = vrot.lane.b32.xlu0 %v15136_v3, %s16201_s20 }
 0x3e3   :  { %v20009_v28 = vpop.permute.xlu1 %5147 }
 0x3e5   :  { %15192 = vrot.lane.b32.xlu1 %v15181_v12, %s16191_s15  ;;  %15177 = vrot.lane.b32.xlu0 %v15136_v3, %s16210_s25 }
 0x3e7   :  { %v20015_v30 = vpop.permute.xlu1 %5149 }
 0x3e9   :  { %15202 = vrot.lane.b32.xlu1 %v15201_v51, %s16191_s15  ;;  %15187 = vrot.lane.b32.xlu0 %v15201_v51, %s24721_s29 }
 0x3eb   :  { %v5271_v61 = vpop.permute.xlu1 %5270 }
 0x3ec   :  { %v5304_v29 = vsel %vm852_vm5, %v19923_v10, %v5271_v61 }
 0x3ed   :  { %15212 = vrot.lane.b32.xlu1 %v15211_v0, %s24721_s29  ;;  %15197 = vrot.lane.b32.xlu0 %v15181_v12, %s16209_s23  ;;  %v20031_v58 = vmax.f32 %v19829_v60, %v5304_v29 }
 0x3ef   :  { %v15286_v48 = vpack.i.bf16 %v19978_v32, %v20031_v58  ;;  %v15301_v44 = vpack.i.bf16 %v20031_v58, %v19991_v24 }
 0x3f1   :  { %8107 = vrot.lane.b32.xlu1 %v19978_v32, %s16208_s1  ;;  %15207 = vrot.lane.b32.xlu0 %v15201_v51, %s16209_s23 }
 0x3f5   :  { %15222 = vrot.lane.b32.xlu1 %v15211_v0, %s16209_s23  ;;  %8105 = vrot.lane.b32.xlu0 %v19961_v13, %s16208_s1 }
 0x3f9   :  { %15227 = vrot.lane.b32.xlu1 %v15181_v12, %s16208_s1  ;;  %15217 = vrot.lane.b32.xlu0 %v15211_v0, %s16191_s15 }
 0x3fd   :  { %15242 = vrot.lane.b32.xlu1 %v15181_v12, %s16201_s20  ;;  %15232 = vrot.lane.b32.xlu0 %v15181_v12, %s24629_s27 }
 0x401   :  { %15252 = vrot.lane.b32.xlu1 %v15181_v12, %s16210_s25  ;;  %15237 = vrot.lane.b32.xlu0 %v15181_v12, %s24633_s24 }
 0x405   :  { %15257 = vrot.lane.b32.xlu1 %v15211_v0, %s16208_s1  ;;  %15247 = vrot.lane.b32.xlu0 %v15181_v12, %s16211_s21 }
 0x409   :  { %15267 = vrot.lane.b32.xlu1 %v15211_v0, %s24633_s24  ;;  %15262 = vrot.lane.b32.xlu0 %v15211_v0, %s24629_s27 }
 0x40b   :  { %v20039_v23 = vpop.permute.xlu1 %5272 }
 0x40c   :  { %v5305_v19 = vsel %vm852_vm5, %v5271_v61, %v20039_v23 }
 0x40d   :  { %15277 = vrot.lane.b32.xlu1 %v15211_v0, %s16211_s21  ;;  %15272 = vrot.lane.b32.xlu0 %v15211_v0, %s16201_s20  ;;  %v20082_v2 = vmax.f32 %v19878_v39, %v5305_v19 }
 0x40f   :  { %v20049_v60 = vpop.permute.xlu1 %5276  ;;  %v20051_v36 = vpop.permute.xlu0 %5274  ;;  %24929 = vst [vmem:[#allocation14_spill] sm:$0xff] %v20082_v2  ;;  %v15351_v53 = vpack.i.bf16 %v19991_v24, %v20082_v2 }
 0x411   :  { %15287 = vrot.lane.b32.xlu1 %v15286_v48, %s24721_s29  ;;  %15282 = vrot.lane.b32.xlu0 %v15211_v0, %s16210_s25 }
 0x413   :  { %v20061_v27 = vpop.permute.xlu0 %5278 }
 0x415   :  { %15292 = vrot.lane.b32.xlu1 %v15286_v48, %s16191_s15  ;;  %15297 = vrot.lane.b32.xlu0 %v15286_v48, %s16209_s23 }
 0x417   :  { %v20055_v47 = vpop.permute.xlu1 %5280 }
 0x419   :  { %15302 = vrot.lane.b32.xlu1 %v15301_v44, %s16208_s1  ;;  %15307 = vrot.lane.b32.xlu0 %v15301_v44, %s24629_s27 }
 0x41b   :  { %v20063_v56 = vpop.permute.xlu1 %15047 }
 0x41c   :  { %v24454_v7 = vunpack.i.h.bf16 %v20063_v56  ;;  %v15049_v17 = vunpack.i.l.bf16 %v20063_v56 }
 0x41d   :  { %15317 = vrot.lane.b32.xlu1 %v15301_v44, %s16201_s20  ;;  %15312 = vrot.lane.b32.xlu0 %v15301_v44, %s24633_s24 }
 0x41e   :  { %v5485_v22 = vsel %vm396_vm2, %v15049_v17, %v24454_v7  ;;  %v5306_v7 = vsel %vm852_vm5, %v20039_v23, %v20051_v36 }
 0x41f   :  { %v20072_v10 = vpop.permute.xlu0 %5282  ;;  %v20074_v26 = vpop.permute.xlu1 %15057  ;;  %v12848_v54 = vpack.c.bf16 %v5485_v22, %v19921_v9  ;;  %v20201_v23 = vmax.f32 %v19887_v8, %v5306_v7 }
 0x420   :  { %v24452_v3 = vunpack.i.h.bf16 %v20074_v26  ;;  %v15059_v45 = vunpack.i.l.bf16 %v20074_v26 }
 0x421   :  { %12849 = vmatprep.subr.bf16.mxu1 %v12848_v54  ;;  %15327 = vrot.lane.b32.xlu1 %v15301_v44, %s16210_s25  ;;  %v20118_v54 = vpack.i.bf16 %v20082_v2, %v20031_v58  ;;  %24937 = vst [vmem:[#allocation15_spill] sm:$0xff] %v20201_v23 }
 0x422   :  { %15322 = vrot.lane.b32.xlu0 %v15301_v44, %s16211_s21  ;;  %v5608_v48 = vsel %vm700_vm4, %v15059_v45, %v24452_v3 }
 0x423   :  { %v20084_v42 = vpop.permute.xlu1 %15067  ;;  %v20086_v50 = vpop.permute.xlu0 %15052 }
 0x424   :  { %v15054_v15 = vunpack.i.l.bf16 %v20086_v50  ;;  %v15069_v29 = vunpack.i.l.bf16 %v20084_v42 }
 0x425   :  { %15337 = vrot.lane.b32.xlu1 %v15301_v44, %s16191_s15 }
 0x426   :  { %v5484_v38 = vsel %vm396_vm2, %v15054_v15, %v15049_v17  ;;  %15332 = vrot.lane.b32.xlu0 %v15301_v44, %s24721_s29 }
 0x427   :  { %v20094_v12 = vpop.permute.xlu1 %15077  ;;  %v20096_v39 = vpop.permute.xlu0 %15062  ;;  %v12850_v51 = vpack.c.bf16 %v5484_v38, %v19940_v49 }
 0x428   :  { %v24451_v0 = vunpack.i.h.bf16 %v20096_v39  ;;  %v15064_v61 = vunpack.i.l.bf16 %v20096_v39  ;;  %v24449_v38 = vunpack.i.h.bf16 %v20094_v12 }
 0x429   :  { %15352 = vrot.lane.b32.xlu1 %v15351_v53, %s16191_s15  ;;  %12851 = vmatpush1.bf16.msra.mxu1 %v12850_v51  ;;  %v15079_v51 = vunpack.i.l.bf16 %v20094_v12 }
 0x42a   :  { %15342 = vrot.lane.b32.xlu0 %v15301_v44, %s16209_s23  ;;  %v5732_v49 = vsel %vm5730_vm13, %v15064_v61, %v24451_v0  ;;  %v5607_v44 = vsel %vm700_vm4, %v15069_v29, %v15059_v45 }
 0x42b   :  { %v20112_v17 = vpop.permute.xlu1 %15092  ;;  %v20114_v22 = vpop.permute.xlu0 %15072  ;;  %v12852_v19 = vpack.c.bf16 %v5732_v49, %v5608_v48  ;;  %v5856_v45 = vsel %vm5854_vm14, %v15079_v51, %v24449_v38 }
 0x42c   :  { %v15074_v15 = vunpack.i.l.bf16 %v20114_v22 }
 0x42d   :  { %15362 = vrot.lane.b32.xlu1 %v20118_v54, %s16208_s1  ;;  %12853 = vmatprep.subr.bf16.mxu1 %v12852_v19 }
 0x42e   :  { %v5731_v25 = vsel %vm5730_vm13, %v15074_v15, %v15064_v61  ;;  %15347 = vrot.lane.b32.xlu0 %v15351_v53, %s24721_s29 }
 0x42f   :  { %v20128_v5 = vpop.permute.xlu1 %15102  ;;  %v20130_v31 = vpop.permute.xlu0 %15082  ;;  %v12854_v48 = vpack.c.bf16 %v5731_v25, %v5607_v44  ;;  %v15094_v44 = vunpack.i.l.bf16 %v20112_v17 }
 0x430   :  { %v24450_v49 = vunpack.i.h.bf16 %v20130_v31  ;;  %v15084_v19 = vunpack.i.l.bf16 %v20130_v31 }
 0x431   :  { %15372 = vrot.lane.b32.xlu1 %v20118_v54, %s24633_s24  ;;  %12855 = vmatpush1.bf16.msra.mxu1 %v12854_v48  ;;  %v15104_v48 = vunpack.i.l.bf16 %v20128_v5 }
 0x432   :  { %15357 = vrot.lane.b32.xlu0 %v15351_v53, %s16209_s23  ;;  %v5979_v61 = vsel %vm24930_vm15, %v15084_v19, %v24450_v49  ;;  %v24457_v53 = vunpack.i.h.bf16 %v20128_v5  ;;  %v5978_v38 = vsel %vm24931_vm11, %v15094_v44, %v15084_v19  ;;  %vm24945_vm15 = vmmov %vm24936_vm7 }
 0x433   :  { %v20143_v25 = vpop.permute.xlu1 %15112  ;;  %v20145_v29 = vpop.permute.xlu0 %15087  ;;  %v12856_v15 = vpack.c.bf16 %v5979_v61, %v5856_v45  ;;  %vm24946_vm11 = vmmov %vm24935_vm0 }
 0x434   :  { %v15089_v20 = vunpack.i.l.bf16 %v20145_v29 }
 0x435   :  { %15382 = vrot.lane.b32.xlu1 %v20118_v54, %s16211_s21  ;;  %12857 = vmatprep.subr.bf16.mxu1 %v12856_v15  ;;  %v5168_v15 = vsel %vm244_vm1, %v20037_v55, %v20004_v62 }
 0x436   :  { %v5855_v49 = vsel %vm5854_vm14, %v15089_v20, %v15079_v51  ;;  %15367 = vrot.lane.b32.xlu0 %v20118_v54, %s24629_s27  ;;  %v15114_v20 = vunpack.i.l.bf16 %v20143_v25  ;;  %v6225_v51 = vsel %vm24933_vm9, %v15104_v48, %v24457_v53  ;;  %vm24949_vm9 = vmmov %vm24935_vm0 }
 0x437   :  { %v20157_v45 = vpop.permute.xlu1 %15122  ;;  %v20159_v61 = vpop.permute.xlu0 %15097  ;;  %v12858_v0 = vpack.c.bf16 %v5978_v38, %v5855_v49  ;;  %v20179_v49 = vmax.f32 %v5022_v11, %v5168_v15 }
 0x438   :  { %v24456_v3 = vunpack.i.h.bf16 %v20159_v61  ;;  %v15099_v33 = vunpack.i.l.bf16 %v20159_v61  ;;  %v6224_v46 = vsel %vm24935_vm0, %v15114_v20, %v15104_v48  ;;  %v24459_v11 = vunpack.i.h.bf16 %v20157_v45 }
 0x439   :  { %15392 = vrot.lane.b32.xlu1 %v20118_v54, %s24721_s29  ;;  %12859 = vmatpush1.bf16.msra.mxu1 %v12858_v0  ;;  %24934 = vst [vmem:[#allocation13_spill] sm:$0xff] %v20179_v49  ;;  %v15124_v15 = vunpack.i.l.bf16 %v20157_v45  ;;  %v24938_v48 = vmax.f32 %v19832_v16, 0.0  ;;  %vm24957_vm0 = vcmask 588800  }
 0x43a   :  { %15377 = vrot.lane.b32.xlu0 %v20118_v54, %s16201_s20  ;;  %v6102_v38 = vsel %vm24932_vm8, %v15099_v33, %v24456_v3  ;;  %v5167_v3 = vsel %vm244_vm1, %v19929_v1, %v20037_v55  ;;  %vm24948_vm8 = vmmov %vm24936_vm7 }
 0x43b   :  { %v20181_v19 = vpop.permute.xlu1 %15132  ;;  %v20183_v0 = vpop.permute.xlu0 %15107  ;;  %v12860_v44 = vpack.c.bf16 %v6225_v51, %v6102_v38  ;;  %v20209_v20 = vmax.f32 %v24938_v48, %v5167_v3  ;;  %v15411_v48 = vpack.i.bf16 %v20082_v2, %v20201_v23 }
 0x43c   :  { %v15109_v21 = vunpack.i.l.bf16 %v20183_v0  ;;  %v15134_v7 = vunpack.i.l.bf16 %v20181_v19 }
 0x43d   :  { %5286 = vrot.lane.b32.xlu1 %v20179_v49, %s16190_s14  ;;  %12861 = vmatprep.subr.bf16.mxu1 %v12860_v44  ;;  %24939 = vst [vmem:[#allocation16_spill] sm:$0xff] %v20209_v20 }
 0x43e   :  { %v6101_v38 = vsel %vm24936_vm7, %v15109_v21, %v15099_v33  ;;  %15387 = vrot.lane.b32.xlu0 %v20118_v54, %s16210_s25  ;;  %v5307_v21 = vsel %vm852_vm5, %v20051_v36, %v20049_v60  ;;  %v6473_v36 = vsel %vm6471_vm6, %v15124_v15, %v24459_v11  ;;  %vm24960_vm7 = vmmov %vm24942_vm3 }
 0x43f   :  { %v20203_v1 = vpop.permute.xlu1 %15137  ;;  %v20205_v55 = vpop.permute.xlu0 %15117  ;;  %v12862_v51 = vpack.c.bf16 %v6224_v46, %v6101_v38  ;;  %v20229_v3 = vmax.f32 %v19895_v41, %v5307_v21  ;;  %v15055_v46 = vunpack.i.h.bf16 %v20086_v50  ;;  %v6472_v50 = vsel %vm6471_vm6, %v15134_v7, %v15124_v15 }
 0x440   :  { %v24458_v33 = vunpack.i.h.bf16 %v20205_v55  ;;  %v15119_v44 = vunpack.i.l.bf16 %v20205_v55  ;;  %v15140_v8 = vunpack.i.h.bf16 %v20203_v1  ;;  %v24940_v41 = vunpack.i.l.bf16 %v20203_v1 }
 0x441   :  { %15402 = vrot.lane.b32.xlu1 %v20118_v54, %s16191_s15  ;;  %12863 = vmatpush1.bf16.msra.mxu1 %v12862_v51  ;;  %v15070_v7 = vunpack.i.h.bf16 %v20084_v42 }
 0x442   :  { %5284 = vrot.lane.b32.xlu0 %v20209_v20, %s16190_s14  ;;  %v6349_v16 = vsel %vm6347_vm10, %v15119_v44, %v24458_v33  ;;  %v6630_v21 = vsel %vm396_vm2, %v15055_v46, %v24940_v41 }
 0x443   :  { %v20232_v38 = vpop.permute.xlu1 %15147  ;;  %v20234_v51 = vpop.permute.xlu0 %15127  ;;  %v12864_v53 = vpack.c.bf16 %v6473_v36, %v6349_v16  ;;  %v20253_v36 = vpack.i.bf16 %v20229_v3, %v20201_v23  ;;  %v12868_v20 = vpack.c.bf16 %v6630_v21, %v19914_v43  ;;  %v20274_v21 = vadd.f32 %v19882_v52, %v19671_v4 }
 0x444   :  { %v15129_v33 = vunpack.i.l.bf16 %v20234_v51  ;;  %v15150_v41 = vunpack.i.h.bf16 %v20232_v38  ;;  %v24464_v15 = vunpack.i.l.bf16 %v20232_v38  ;;  %v15095_v52 = vunpack.i.h.bf16 %v20112_v17 }
 0x445   :  { %15412 = vrot.lane.b32.xlu1 %v15411_v48, %s16191_s15  ;;  %12865 = vmatprep.subr.bf16.mxu1 %v12864_v53  ;;  %v6629_v53 = vsel %vm396_vm2, %v15140_v8, %v15055_v46  ;;  %24941 = vst [vmem:[#allocation17_spill] sm:$0xff] %v20274_v21  ;;  %v15115_v17 = vunpack.i.h.bf16 %v20143_v25 }
 0x446   :  { %v6348_v11 = vsel %vm6347_vm10, %v15129_v33, %v15119_v44  ;;  %15397 = vrot.lane.b32.xlu0 %v15411_v48, %s24721_s29  ;;  %v15075_v33 = vunpack.i.h.bf16 %v20114_v22  ;;  %v12870_v8 = vpack.c.bf16 %v6629_v53, %v19921_v9 }
 0x447   :  { %v20247_v49 = vpop.permute.xlu1 %15157  ;;  %v20249_v16 = vpop.permute.xlu0 %8103  ;;  %v12866_v6 = vpack.c.bf16 %v6472_v50, %v6348_v11 }
 0x448   :  { %v15160_v22 = vunpack.i.h.bf16 %v20247_v49  ;;  %v6876_v4 = vsel %vm5730_vm13, %v15075_v33, %v24464_v15 }
 0x449   :  { %15422 = vrot.lane.b32.xlu1 %v20253_v36, %s24721_s29  ;;  %12867 = vmatpush1.bf16.msra.mxu1 %v12866_v6 }
 0x44a   :  { %15407 = vrot.lane.b32.xlu0 %v20118_v54, %s16209_s23  ;;  %12869 = vmatprep.subr.bf16.mxu1 %v12868_v20  ;;  %v6875_v54 = vsel %vm5730_vm13, %v15150_v41, %v15075_v33 }
 0x44b   :  { %v20264_v44 = vpop.permute.xlu1 %15162  ;;  %v20266_v11 = vpop.permute.xlu0 %15142 }
 0x44c   :  { %v15145_v46 = vunpack.i.h.bf16 %v20266_v11  ;;  %v24463_v6 = vunpack.i.l.bf16 %v20266_v11  ;;  %v15165_v33 = vunpack.i.h.bf16 %v20264_v44 }
 0x44d   :  { %8111 = vrot.lane.b32.xlu1 %v20031_v58, %s16208_s1  ;;  %12871 = vmatpush1.bf16.msra.mxu1 %v12870_v8 }
 0x44e   :  { %v6752_v42 = vsel %vm700_vm4, %v15145_v46, %v15070_v7  ;;  %15417 = vrot.lane.b32.xlu0 %v15411_v48, %s16209_s23  ;;  %v6753_v20 = vsel %vm700_vm4, %v15070_v7, %v24463_v6  ;;  %v15090_v46 = vunpack.i.h.bf16 %v20145_v29  ;;  %v24467_v7 = vmax.f32 %v20274_v21, 0.0 }
 0x44f   :  { %v20290_v50 = vpop.permute.xlu1 %15172  ;;  %v20292_v53 = vpop.permute.xlu0 %15152  ;;  %v12872_v41 = vpack.c.bf16 %v6876_v4, %v6753_v20  ;;  %v12874_v8 = vpack.c.bf16 %v6875_v54, %v6752_v42  ;;  %v7121_v6 = vsel %vm24942_vm3, %v15160_v22, %v15095_v52  ;;  %v24943_v22 = vunpack.i.l.bf16 %v20247_v49 }
 0x450   :  { %v15155_v48 = vunpack.i.h.bf16 %v20292_v53  ;;  %v24465_v9 = vunpack.i.l.bf16 %v20292_v53  ;;  %v15110_v20 = vunpack.i.h.bf16 %v20183_v0 }
 0x451   :  { %8115 = vrot.lane.b32.xlu1 %v20201_v23, %s16208_s1  ;;  %12873 = vmatprep.subr.bf16.mxu1 %v12872_v41  ;;  %v7122_v42 = vsel %vm24944_vm12, %v15095_v52, %v24943_v22  ;;  %v15130_v52 = vunpack.i.h.bf16 %v20234_v51  ;;  %v15175_v22 = vunpack.i.h.bf16 %v20290_v50  ;;  %v24947_v51 = vunpack.i.l.bf16 %v20264_v44  ;;  %vm24961_vm12 = vmmov %vm24957_vm0 }
 0x452   :  { %v6998_v54 = vsel %vm5854_vm14, %v15155_v48, %v15090_v46  ;;  %8109 = vrot.lane.b32.xlu0 %v19991_v24, %s16208_s1  ;;  %12875 = vmatpush1.bf16.msra.mxu1 %v12874_v8  ;;  %v6999_v29 = vsel %vm5854_vm14, %v15090_v46, %v24465_v9  ;;  %v5308_v8 = vsel %vm852_vm5, %v20049_v60, %v20061_v27 }
 0x453   :  { %v20313_v4 = vpop.permute.xlu1 %15182  ;;  %v20315_v41 = vpop.permute.xlu0 %15167  ;;  %v12876_v15 = vpack.c.bf16 %v7122_v42, %v6999_v29  ;;  %v12878_v48 = vpack.c.bf16 %v7121_v6, %v6998_v54  ;;  %v7244_v0 = vsel %vm24945_vm15, %v15165_v33, %v15110_v20  ;;  %v20330_v6 = vpack.i.bf16 %v20201_v23, %v20082_v2  ;;  %vm24963_vm15 = vmmov %vm24949_vm9 }
 0x454   :  { %v15170_v46 = vunpack.i.h.bf16 %v20315_v41  ;;  %v24468_v9 = vunpack.i.l.bf16 %v20315_v41  ;;  %v7245_v33 = vsel %vm24948_vm8, %v15110_v20, %v24947_v51  ;;  %v24469_v54 = vunpack.i.h.bf16 %v20313_v4 }
 0x455   :  { %15432 = vrot.lane.b32.xlu1 %v20253_v36, %s16209_s23  ;;  %12877 = vmatprep.subr.bf16.mxu1 %v12876_v15  ;;  %v15184_v29 = vunpack.i.l.bf16 %v20313_v4  ;;  %v20353_v51 = vmax.f32 %v19897_v63, %v5308_v8 }
 0x456   :  { %v7367_v25 = vsel %vm24946_vm11, %v15170_v46, %v15115_v17  ;;  %5151 = vrot.lane.b32.xlu0 %v24467_v7, %s24789_s26  ;;  %12879 = vmatpush1.bf16.msra.mxu1 %v12878_v48  ;;  %v7368_v15 = vsel %vm24949_vm9, %v15115_v17, %v24468_v9  ;;  %v15135_v48 = vunpack.i.h.bf16 %v20181_v19  ;;  %v7490_v17 = vsel %vm6347_vm10, %v15175_v22, %v15130_v52  ;;  %vm24965_vm11 = vmmov %vm24948_vm8 }
 0x457   :  { %v20345_v42 = vpop.permute.xlu1 %15192  ;;  %v20347_v46 = vpop.permute.xlu0 %15177  ;;  %v12880_v60 = vpack.c.bf16 %v7368_v15, %v7245_v33  ;;  %v12882_v21 = vpack.c.bf16 %v7367_v25, %v7244_v0  ;;  %v24951_v19 = vunpack.i.l.bf16 %v20290_v50 }
 0x458   :  { %24950 = vst [vmem:[#allocation18_spill] sm:$0xff] %v20345_v42  ;;  %v15180_v7 = vunpack.i.h.bf16 %v20347_v46  ;;  %v24470_v20 = vunpack.i.l.bf16 %v20347_v46  ;;  %v15194_v15 = vunpack.i.l.bf16 %v20345_v42 }
 0x459   :  { %15442 = vrot.lane.b32.xlu1 %v20330_v6, %s24629_s27  ;;  %12881 = vmatprep.subr.bf16.mxu1 %v12880_v60  ;;  %v7491_v0 = vsel %vm6347_vm10, %v15130_v52, %v24951_v19 }
 0x45a   :  { %v7613_v9 = vsel %vm6471_vm6, %v15180_v7, %v15135_v48  ;;  %8113 = vrot.lane.b32.xlu0 %v20082_v2, %s16208_s1  ;;  %12883 = vmatpush1.bf16.msra.mxu1 %v12882_v21  ;;  %v7614_v63 = vsel %vm6471_vm6, %v15135_v48, %v24470_v20  ;;  %v7771_v7 = vsel %vm396_vm2, %v15184_v29, %v24469_v54  ;;  %v24473_v21 = vunpack.i.h.bf16 %v20345_v42 }
 0x45b   :  { %v20367_v8 = vpop.permute.xlu1 %15202  ;;  %v15188_v22 = vpop.permute.xlu0 %15187  ;;  %v12884_v25 = vpack.c.bf16 %v7614_v63, %v7491_v0  ;;  %v12886_v33 = vpack.c.bf16 %v7613_v9, %v7490_v17  ;;  %v12888_v9 = vpack.c.bf16 %v7771_v7, %v19961_v13  ;;  %v15451_v0 = vpack.i.bf16 %v20201_v23, %v20353_v51 }
 0x45c   :  { %v15189_v60 = vunpack.i.l.bf16 %v15188_v22  ;;  %v15190_v52 = vunpack.i.h.bf16 %v15188_v22  ;;  %v15205_v7 = vunpack.i.h.bf16 %v20367_v8  ;;  %v24953_v54 = vunpack.i.h.bf16 %v20063_v56 }
 0x45d   :  { %15447 = vrot.lane.b32.xlu1 %v20330_v6, %s24633_s24  ;;  %12885 = vmatprep.subr.bf16.mxu1 %v12884_v25 }
 0x45e   :  { %v7770_v48 = vsel %vm396_vm2, %v15189_v60, %v15184_v29  ;;  %15427 = vrot.lane.b32.xlu0 %v20253_v36, %s16191_s15  ;;  %12887 = vmatpush1.bf16.msra.mxu1 %v12886_v33  ;;  %v5169_v33 = vsel %vm244_vm1, %v20004_v62, %v20045_v35  ;;  %v7894_v60 = vsel %vm700_vm4, %v15194_v15, %v24473_v21 }
 0x45f   :  { %v20380_v17 = vpop.permute.xlu1 %15212  ;;  %v20382_v19 = vpop.permute.xlu0 %15197  ;;  %v12890_v63 = vpack.c.bf16 %v7770_v48, %v19914_v43  ;;  %12889 = vmatprep.subr.bf16.mxu1 %v12888_v9  ;;  %v15204_v48 = vunpack.i.l.bf16 %v20367_v8  ;;  %v5486_v20 = vsel %vm396_vm2, %v24953_v54, %v15190_v52  ;;  %v24954_v54 = vmax.f32 %v19848_v37, 0.0 }
 0x460   :  { %24952 = vst [vmem:[#allocation19_spill] sm:$0xff] %v20382_v19  ;;  %v15214_v25 = vunpack.i.l.bf16 %v20380_v17  ;;  %v24479_v22 = vunpack.i.h.bf16 %v20382_v19  ;;  %v15199_v29 = vunpack.i.l.bf16 %v20382_v19  ;;  %v24955_v19 = vunpack.i.h.bf16 %v20074_v26 }
 0x461   :  { %15452 = vrot.lane.b32.xlu1 %v15451_v0, %s24721_s29  ;;  %v20415_v42 = vmax.f32 %v24954_v54, %v5169_v33 }
 0x462   :  { %15437 = vrot.lane.b32.xlu0 %v20330_v6, %s16208_s1  ;;  %v8017_v62 = vsel %vm5730_vm13, %v15199_v29, %v24479_v22  ;;  %v5487_v9 = vsel %vm396_vm2, %v15190_v52, %v15214_v25  ;;  %12891 = vmatpush1.bf16.msra.mxu1 %v12890_v63  ;;  %v5609_v22 = vsel %vm700_vm4, %v24955_v19, %v15205_v7 }
 0x463   :  { %v20410_v23 = vpop.permute.xlu1 %8107  ;;  %v15208_v21 = vpop.permute.xlu0 %15207  ;;  %v12892_v8 = vpack.c.bf16 %v8017_v62, %v7894_v60  ;;  %v12896_v56 = vpack.c.bf16 %v5487_v9, %v19961_v13  ;;  %v12898_v52 = vpack.c.bf16 %v5486_v20, %v19914_v43  ;;  %v7893_v63 = vsel %vm700_vm4, %v15204_v48, %v15194_v15  ;;  %v20451_v48 = vld [vmem:[%s24277_s3] sm:$0xff] }
 0x464   :  { %v15210_v2 = vunpack.i.h.bf16 %v15208_v21  ;;  %v15209_v40 = vunpack.i.l.bf16 %v15208_v21  ;;  %v24956_v60 = vunpack.i.h.bf16 %v20096_v39  ;;  %v20433_v19 = vpack.i.bf16 %v20353_v51, %v20229_v3 }
 0x465   :  { %15462 = vrot.lane.b32.xlu1 %v15451_v0, %s16209_s23  ;;  %12893 = vmatprep.subr.bf16.mxu1 %v12892_v8 }
 0x466   :  { %v5733_v62 = vsel %vm5730_vm13, %v24956_v60, %v15210_v2  ;;  %v8016_v37 = vsel %vm5730_vm13, %v15209_v40, %v15199_v29  ;;  %5288 = vrot.lane.b32.xlu0 %v20415_v42, %s16190_s14  ;;  %12897 = vmatprep.subr.bf16.mxu0 %v12896_v56 }
 0x467   :  { %12899 = vmatpush1.bf16.msra.mxu0 %v12898_v52  ;;  %v20429_v26 = vpop.permute.xlu1 %15222  ;;  %v8106_v21 = vpop.permute.xlu0 %8105  ;;  %v12894_v43 = vpack.c.bf16 %v8016_v37, %v7893_v63  ;;  %v12902_v20 = vpack.c.bf16 %v5733_v62, %v5609_v22 }
 0x468   :  { %v8140_v39 = vsel %vm5854_vm14, %v8106_v21, %v20410_v23  ;;  %v15224_v40 = vunpack.i.l.bf16 %v20429_v26  ;;  %v8139_v22 = vsel %vm5854_vm14, %v20249_v16, %v8106_v21 }
 0x469   :  { %15477 = vrot.lane.b32.xlu1 %v20433_v19, %s24629_s27  ;;  %12895 = vmatpush1.bf16.msra.mxu1 %v12894_v43 }
 0x46a   :  { %15457 = vrot.lane.b32.xlu0 %v15451_v0, %s16191_s15  ;;  %8685 = vmatprep.subr.mxu1 %v8140_v39  ;;  %v20459_v0 = vld [vmem:[%s24277_s3 + $0x18] sm:$0xff]  ;;  %v5734_v56 = vsel %vm5730_vm13, %v15210_v2, %v15224_v40  ;;  %v24958_v2 = vunpack.i.h.bf16 %v20094_v12  ;;  %v24959_v39 = vunpack.i.h.bf16 %v20130_v31 }
 0x46b   :  { %v20441_v15 = vpop.permute.xlu1 %15227  ;;  %v20443_v29 = vpop.permute.xlu0 %15217 }
 0x46c   :  { %v15219_v33 = vunpack.i.l.bf16 %v20443_v29  ;;  %v15229_v9 = vunpack.i.l.bf16 %v20441_v15  ;;  %v24480_v8 = vunpack.i.h.bf16 %v20441_v15 }
 0x46d   :  { %15482 = vrot.lane.b32.xlu1 %v20433_v19, %s24633_s24  ;;  %8686 = vmatpush1.msra.mxu1 %v8139_v22 }
 0x46e   :  { %15467 = vrot.lane.b32.xlu0 %v20433_v19, %s16208_s1  ;;  %v5610_v16 = vsel %vm700_vm4, %v15205_v7, %v15219_v33  ;;  %8702 = vmatmul.mubr.f32.vlgmr.msra.gmra.mrb[10].mxu1 %v20451_v48  ;;  %v20482_v7 = vld [vmem:[%s24277_s3 + $0x10] sm:$0xff]  ;;  %v5857_v37 = vsel %vm5854_vm14, %v24958_v2, %v15229_v9  ;;  %v5858_v12 = vsel %vm5854_vm14, %v15229_v9, %v24480_v8  ;;  %v24962_v9 = vunpack.i.h.bf16 %v20128_v5 }
 0x46f   :  { %v20470_v54 = vpop.permute.xlu1 %15242  ;;  %v20472_v52 = vpop.permute.xlu0 %15232  ;;  %v12900_v63 = vpack.c.bf16 %v5734_v56, %v5610_v16  ;;  %11819 = vmatprep.mubr.msk.f32.mxu1 %vm24957_vm0, %v20459_v0  ;;  %vm24970_vm0 = vmmov %vm24942_vm3 }
 0x470   :  { %v24481_v60 = vunpack.i.h.bf16 %v20472_v52  ;;  %v15234_v62 = vunpack.i.l.bf16 %v20472_v52  ;;  %v15244_v21 = vunpack.i.l.bf16 %v20470_v54  ;;  %v15245_v43 = vunpack.i.h.bf16 %v20470_v54 }
 0x471   :  { %15492 = vrot.lane.b32.xlu1 %v20330_v6, %s16211_s21  ;;  %12901 = vmatprep.subr.bf16.mxu0 %v12900_v63 }
 0x472   :  { %v5980_v22 = vsel %vm24960_vm7, %v24959_v39, %v15234_v62  ;;  %15472 = vrot.lane.b32.xlu0 %v20330_v6, %s16201_s20  ;;  %12903 = vmatpush1.bf16.msra.mxu0 %v12902_v20  ;;  %v5981_v16 = vsel %vm24942_vm3, %v15234_v62, %v24481_v60  ;;  %v6226_v8 = vsel %vm24963_vm15, %v24962_v9, %v15244_v21  ;;  %vm24972_vm7 = vmmov %vm24948_vm8 }
 0x473   :  { %v20502_v56 = vpop.permute.xlu1 %15252  ;;  %v20504_v63 = vpop.permute.xlu0 %15237  ;;  %v12904_v2 = vpack.c.bf16 %v5981_v16, %v5858_v12  ;;  %v12906_v31 = vpack.c.bf16 %v5980_v22, %v5857_v37  ;;  %8708 = vmatmul.mubr.f32.gmra.mrb[12].mxu1 %v20482_v7  ;;  %v24964_v22 = vunpack.i.h.bf16 %v20159_v61  ;;  %vm24974_vm3 = vmmov %vm24949_vm9 }
 0x474   :  { %v24482_v39 = vunpack.i.h.bf16 %v20504_v63  ;;  %v15239_v20 = vunpack.i.l.bf16 %v20504_v63  ;;  %11822 = vmatprep.mubr.msk.f32.mxu1 %vm24961_vm12, %v20028_v14  ;;  %v15254_v62 = vunpack.i.l.bf16 %v20502_v56  ;;  %v24491_v37 = vunpack.i.h.bf16 %v20502_v56  ;;  %vm24980_vm12 = vmmov %vm24970_vm0 }
 0x475   :  { %15502 = vrot.lane.b32.xlu1 %v20433_v19, %s16211_s21  ;;  %12905 = vmatprep.subr.bf16.mxu0 %v12904_v2  ;;  %v6227_v14 = vsel %vm24949_vm9, %v15244_v21, %v15245_v43  ;;  %vm24981_vm15 = vmmov %vm24970_vm0 }
 0x476   :  { %v6103_v12 = vsel %vm24965_vm11, %v24964_v22, %v15239_v20  ;;  %15487 = vrot.lane.b32.xlu0 %v20433_v19, %s16201_s20  ;;  %12907 = vmatpush1.bf16.msra.mxu0 %v12906_v31  ;;  %v6104_v5 = vsel %vm24948_vm8, %v15239_v20, %v24482_v39  ;;  %v5309_v22 = vsel %vm852_vm5, %v20061_v27, %v20055_v47  ;;  %v24966_v20 = vunpack.i.h.bf16 %v20157_v45  ;;  %vm24982_vm11 = vmmov %vm24974_vm3 }
 0x477   :  { %v20529_v16 = vpop.permute.xlu1 %15257  ;;  %v20531_v2 = vpop.permute.xlu0 %15247  ;;  %v12908_v9 = vpack.c.bf16 %v6227_v14, %v6104_v5  ;;  %v12910_v61 = vpack.c.bf16 %v6226_v8, %v6103_v12  ;;  %v24967_v8 = vunpack.i.h.bf16 %v20205_v55  ;;  %v6475_v45 = vsel %vm6471_vm6, %v15254_v62, %v24491_v37  ;;  %vm24984_vm8 = vmmov %vm24972_vm7 }
 0x478   :  { %v24487_v31 = vunpack.i.h.bf16 %v20531_v2  ;;  %v15249_v60 = vunpack.i.l.bf16 %v20531_v2  ;;  %v6474_v39 = vsel %vm6471_vm6, %v24966_v20, %v15254_v62  ;;  %v24483_v21 = vunpack.i.l.bf16 %v20529_v16  ;;  %vm24985_vm9 = vmmov %vm24972_vm7 }
 0x479   :  { %15512 = vrot.lane.b32.xlu1 %v20433_v19, %s24721_s29  ;;  %12909 = vmatprep.subr.bf16.mxu0 %v12908_v9  ;;  %v20556_v5 = vmax.f32 %v19906_v18, %v5309_v22 }
 0x47a   :  { %v6350_v12 = vsel %vm6347_vm10, %v24967_v8, %v15249_v60  ;;  %15497 = vrot.lane.b32.xlu0 %v20330_v6, %s16210_s25  ;;  %12911 = vmatpush1.bf16.msra.mxu0 %v12910_v61  ;;  %v6351_v27 = vsel %vm6347_vm10, %v15249_v60, %v24487_v31  ;;  %v24968_v60 = vunpack.i.l.bf16 %v20292_v53  ;;  %v24969_v61 = vunpack.i.l.bf16 %v20247_v49 }
 0x47b   :  { %v20558_v14 = vpop.permute.xlu1 %15267  ;;  %v20560_v55 = vpop.permute.xlu0 %15262  ;;  %v12912_v9 = vpack.c.bf16 %v6475_v45, %v6351_v27  ;;  %v12914_v20 = vpack.c.bf16 %v6474_v39, %v6350_v12  ;;  %v15531_v53 = vpack.i.bf16 %v20229_v3, %v20556_v5  ;;  %v15215_v49 = vunpack.i.h.bf16 %v20380_v17 }
 0x47c   :  { %v24486_v6 = vunpack.i.l.bf16 %v20560_v55  ;;  %v20570_v62 = vsel %vm5854_vm14, %v24968_v60, %v24483_v21  ;;  %v24484_v18 = vunpack.i.l.bf16 %v20558_v14  ;;  %v24971_v45 = vunpack.i.l.bf16 %v20264_v44 }
 0x47d   :  { %15522 = vrot.lane.b32.xlu1 %v20433_v19, %s16191_s15  ;;  %12913 = vmatprep.subr.bf16.mxu0 %v12912_v9  ;;  %v24973_v60 = vunpack.i.l.bf16 %v20315_v41  ;;  %v5170_v41 = vsel %vm244_vm1, %v20045_v35, %v20009_v28  ;;  %v24975_v44 = vunpack.i.l.bf16 %v20290_v50  ;;  %v24976_v35 = vunpack.i.l.bf16 %v20347_v46 }
 0x47e   :  { %v20578_v39 = vsel %vm24970_vm0, %v24969_v61, %v24486_v6  ;;  %15507 = vrot.lane.b32.xlu0 %v20433_v19, %s16210_s25  ;;  %12915 = vmatpush1.bf16.msra.mxu0 %v12914_v20  ;;  %v20598_v9 = vsel %vm24972_vm7, %v24971_v45, %v24484_v18  ;;  %v15225_v31 = vunpack.i.h.bf16 %v20429_v26  ;;  %vm24986_vm0 = vmmov %vm24974_vm3 }
 0x47f   :  { %v20582_v22 = vpop.permute.xlu1 %15277  ;;  %v20584_v8 = vpop.permute.xlu0 %15272  ;;  %vm24994_vm7 = vmmov %vm24980_vm12 }
 0x480   :  { %v24485_v27 = vunpack.i.l.bf16 %v20584_v8  ;;  %v24488_v20 = vunpack.i.l.bf16 %v20582_v22 }
 0x481   :  { %15532 = vrot.lane.b32.xlu1 %v15531_v53, %s16191_s15 }
 0x482   :  { %v20606_v61 = vsel %vm24974_vm3, %v24973_v60, %v24485_v27  ;;  %15517 = vrot.lane.b32.xlu0 %v15531_v53, %s24721_s29  ;;  %v5488_v60 = vsel %vm396_vm2, %v15214_v25, %v15215_v49  ;;  %v15220_v27 = vunpack.i.h.bf16 %v20443_v29  ;;  %v20631_v6 = vsel %vm6347_vm10, %v24975_v44, %v24488_v20  ;;  %vm24998_vm3 = vmmov %vm24986_vm0 }
 0x483   :  { %v20609_v12 = vpop.permute.xlu1 %15287  ;;  %v20611_v21 = vpop.permute.xlu0 %15282  ;;  %v20652_v20 = vpack.i.bf16 %v20556_v5, %v20353_v51 }
 0x484   :  { %v24490_v45 = vunpack.i.l.bf16 %v20609_v12  ;;  %v24489_v18 = vunpack.i.l.bf16 %v20611_v21 }
 0x485   :  { %15542 = vrot.lane.b32.xlu1 %v20253_v36, %s16208_s1 }
 0x486   :  { %v20638_v17 = vsel %vm6471_vm6, %v24976_v35, %v24489_v18  ;;  %15527 = vrot.lane.b32.xlu0 %v20433_v19, %s16209_s23  ;;  %v5489_v25 = vsel %vm396_vm2, %v15215_v49, %v24490_v45  ;;  %v12946_v49 = vpack.c.bf16 %v5488_v60, %v19978_v32  ;;  %v5611_v45 = vsel %vm700_vm4, %v15219_v33, %v15220_v27 }
 0x487   :  { %v20646_v50 = vpop.permute.xlu1 %15292  ;;  %v20648_v44 = vpop.permute.xlu0 %15297  ;;  %v12944_v46 = vpack.c.bf16 %v5489_v25, %v19991_v24  ;;  %v24977_v35 = vmax.f32 %v19851_v59, 0.0  ;;  %v5735_v60 = vsel %vm5730_vm13, %v15224_v40, %v15225_v31 }
 0x488   :  { %v24492_v19 = vunpack.i.l.bf16 %v20646_v50  ;;  %v24493_v18 = vunpack.i.l.bf16 %v20648_v44  ;;  %v12950_v40 = vpack.c.bf16 %v5735_v60, %v5611_v45 }
 0x489   :  { %15552 = vrot.lane.b32.xlu1 %v20652_v20, %s16208_s1  ;;  %12945 = vmatprep.subr.bf16.mxu1 %v12944_v46  ;;  %v20671_v37 = vmax.f32 %v24977_v35, %v5170_v41  ;;  %v24978_v35 = vunpack.i.h.bf16 %v20441_v15 }
 0x48a   :  { %15537 = vrot.lane.b32.xlu0 %v15531_v53, %s16209_s23  ;;  %12947 = vmatpush1.bf16.msra.mxu1 %v12946_v49  ;;  %v5612_v25 = vsel %vm700_vm4, %v15220_v27, %v24492_v19  ;;  %v5736_v33 = vsel %vm5730_vm13, %v15225_v31, %v24493_v18  ;;  %v24979_v19 = vunpack.i.h.bf16 %v20472_v52 }
 0x48b   :  { %v20676_v46 = vpop.permute.xlu1 %15302  ;;  %v20678_v29 = vpop.permute.xlu0 %15307  ;;  %v12948_v26 = vpack.c.bf16 %v5736_v33, %v5612_v25 }
 0x48c   :  { %v24494_v53 = vunpack.i.h.bf16 %v20676_v46  ;;  %v15304_v27 = vunpack.i.l.bf16 %v20676_v46  ;;  %v24499_v59 = vunpack.i.h.bf16 %v20678_v29  ;;  %v15309_v41 = vunpack.i.l.bf16 %v20678_v29 }
 0x48d   :  { %5290 = vrot.lane.b32.xlu1 %v20671_v37, %s16190_s14  ;;  %12949 = vmatprep.subr.bf16.mxu1 %v12948_v26 }
 0x48e   :  { %v5859_v49 = vsel %vm5854_vm14, %v24978_v35, %v15304_v27  ;;  %v5982_v31 = vsel %vm24980_vm12, %v24979_v19, %v15309_v41  ;;  %15547 = vrot.lane.b32.xlu0 %v20253_v36, %s24629_s27  ;;  %v5860_v18 = vsel %vm5854_vm14, %v15304_v27, %v24494_v53  ;;  %v5983_v25 = vsel %vm24981_vm15, %v15309_v41, %v24499_v59  ;;  %vm25000_vm12 = vmmov %vm24984_vm8 }
 0x48f   :  { %v20703_v45 = vpop.permute.xlu1 %15317  ;;  %v20705_v15 = vpop.permute.xlu0 %15312  ;;  %v12952_v60 = vpack.c.bf16 %v5983_v25, %v5860_v18  ;;  %v12954_v52 = vpack.c.bf16 %v5982_v31, %v5859_v49  ;;  %12951 = vmatpush1.bf16.msra.mxu1 %v12950_v40  ;;  %v24983_v18 = vunpack.i.h.bf16 %v20504_v63  ;;  %vm25007_vm15 = vmmov %vm24994_vm7 }
 0x490   :  { %v24495_v19 = vunpack.i.h.bf16 %v20703_v45  ;;  %v15319_v33 = vunpack.i.l.bf16 %v20703_v45  ;;  %v24496_v35 = vunpack.i.h.bf16 %v20705_v15  ;;  %v15314_v27 = vunpack.i.l.bf16 %v20705_v15 }
 0x491   :  { %15567 = vrot.lane.b32.xlu1 %v20253_v36, %s16201_s20  ;;  %12953 = vmatprep.subr.bf16.mxu1 %v12952_v60 }
 0x492   :  { %v6228_v41 = vsel %vm24982_vm11, %v15245_v43, %v15319_v33  ;;  %v6105_v26 = vsel %vm24984_vm8, %v24983_v18, %v15314_v27  ;;  %15557 = vrot.lane.b32.xlu0 %v20652_v20, %s24629_s27  ;;  %v6106_v40 = vsel %vm24985_vm9, %v15314_v27, %v24496_v35  ;;  %v6229_v49 = vsel %vm24986_vm0, %v15319_v33, %v24495_v19  ;;  %vm25009_vm11 = vmmov %vm24994_vm7 }
 0x493   :  { %v20727_v31 = vpop.permute.xlu1 %15327  ;;  %v12956_v54 = vpack.c.bf16 %v6229_v49, %v6106_v40  ;;  %12955 = vmatpush1.bf16.msra.mxu1 %v12954_v52  ;;  %v12958_v60 = vpack.c.bf16 %v6228_v41, %v6105_v26  ;;  %v15290_v33 = vunpack.i.h.bf16 %v20609_v12  ;;  %v24987_v27 = vunpack.i.h.bf16 %v20502_v56  ;;  %vm25012_vm9 = vmmov %vm24984_vm8 }
 0x494   :  { %v24497_v43 = vunpack.i.h.bf16 %v20727_v31  ;;  %v15329_v63 = vunpack.i.l.bf16 %v20727_v31  ;;  %v20731_v25 = vpop.permute.xlu0 %15322  ;;  %v24988_v26 = vunpack.i.h.bf16 %v20531_v2  ;;  %v5171_v2 = vsel %vm244_vm1, %v20009_v28, %v20015_v30 }
 0x495   :  { %v24498_v18 = vunpack.i.h.bf16 %v20731_v25  ;;  %v15324_v53 = vunpack.i.l.bf16 %v20731_v25  ;;  %15577 = vrot.lane.b32.xlu1 %v20652_v20, %s16201_s20  ;;  %12957 = vmatprep.subr.bf16.mxu1 %v12956_v54 }
 0x496   :  { %v6476_v52 = vsel %vm6471_vm6, %v24987_v27, %v15329_v63  ;;  %15562 = vrot.lane.b32.xlu0 %v20253_v36, %s24633_s24  ;;  %v6477_v41 = vsel %vm6471_vm6, %v15329_v63, %v24497_v43  ;;  %v24989_v63 = vunpack.i.l.bf16 %v20203_v1  ;;  %v15295_v43 = vunpack.i.h.bf16 %v20646_v50 }
 0x497   :  { %v6352_v40 = vsel %vm6347_vm10, %v24988_v26, %v15324_v53  ;;  %v20749_v49 = vpop.permute.xlu1 %15337  ;;  %v6353_v54 = vsel %vm6347_vm10, %v15324_v53, %v24498_v18  ;;  %12959 = vmatpush1.bf16.msra.mxu1 %v12958_v60  ;;  %v15300_v53 = vunpack.i.h.bf16 %v20648_v44  ;;  %v24501_v60 = vunpack.i.h.bf16 %v20560_v55 }
 0x498   :  { %v15333_v56 = vpop.permute.xlu0 %15332  ;;  %v12960_v27 = vpack.c.bf16 %v6477_v41, %v6353_v54  ;;  %v12962_v19 = vpack.c.bf16 %v6476_v52, %v6352_v40  ;;  %v6631_v26 = vsel %vm396_vm2, %v24989_v63, %v15290_v33  ;;  %v24500_v52 = vunpack.i.l.bf16 %v20749_v49 }
 0x499   :  { %v15334_v35 = vunpack.i.l.bf16 %v15333_v56  ;;  %15587 = vrot.lane.b32.xlu1 %v20253_v36, %s16210_s25  ;;  %v24990_v54 = vmax.f32 %v19862_v57, 0.0  ;;  %v24992_v57 = vunpack.i.l.bf16 %v20232_v38  ;;  %v24503_v18 = vunpack.i.h.bf16 %v20584_v8 }
 0x49a   :  { %15572 = vrot.lane.b32.xlu0 %v20652_v20, %s24633_s24  ;;  %12961 = vmatprep.subr.bf16.mxu1 %v12960_v27  ;;  %v12918_v27 = vpack.c.bf16 %v6631_v26, %v19961_v13  ;;  %v24993_v38 = vunpack.i.l.bf16 %v20560_v55 }
 0x49b   :  { %v20768_v41 = vpop.permute.xlu1 %15352  ;;  %v6632_v28 = vsel %vm396_vm2, %v15290_v33, %v15334_v35  ;;  %12963 = vmatpush1.bf16.msra.mxu1 %v12962_v19  ;;  %v20774_v63 = vmax.f32 %v24990_v54, %v5171_v2  ;;  %v5310_v33 = vsel %vm852_vm5, %v20055_v47, %v20072_v10  ;;  %v24991_v19 = vunpack.i.l.bf16 %v20266_v11 }
 0x49c   :  { %v15343_v1 = vpop.permute.xlu0 %15342  ;;  %v12916_v40 = vpack.c.bf16 %v6632_v28, %v19978_v32  ;;  %v6877_v2 = vsel %vm5730_vm13, %v24992_v57, %v15300_v53  ;;  %v15335_v54 = vunpack.i.h.bf16 %v15333_v56  ;;  %v6755_v47 = vsel %vm700_vm4, %v15295_v43, %v24500_v52 }
 0x49d   :  { %v15344_v59 = vunpack.i.l.bf16 %v15343_v1  ;;  %15597 = vrot.lane.b32.xlu1 %v20652_v20, %s16210_s25  ;;  %v6754_v28 = vsel %vm700_vm4, %v24991_v19, %v15295_v43  ;;  %v7124_v56 = vsel %vm24994_vm7, %v24993_v38, %v24501_v60  ;;  %v24995_v43 = vunpack.i.h.bf16 %v20529_v16  ;;  %vm25015_vm7 = vmmov %vm24986_vm0 }
 0x49e   :  { %15582 = vrot.lane.b32.xlu0 %v20253_v36, %s16211_s21  ;;  %12917 = vmatprep.subr.bf16.mxu0 %v12916_v40  ;;  %v24506_v40 = vunpack.i.h.bf16 %v20558_v14  ;;  %v12922_v19 = vpack.c.bf16 %v6877_v2, %v6754_v28  ;;  %v20815_v52 = vmax.f32 %v19918_v34, %v5310_v33  ;;  %v6633_v38 = vsel %vm396_vm2, %v15334_v35, %v15335_v54 }
 0x49f   :  { %12919 = vmatpush1.bf16.msra.mxu0 %v12918_v27  ;;  %v20792_v13 = vpop.permute.xlu1 %15362  ;;  %v6878_v11 = vsel %vm5730_vm13, %v15300_v53, %v15344_v59  ;;  %v24996_v53 = vunpack.i.l.bf16 %v20529_v16  ;;  %v24507_v60 = vunpack.i.h.bf16 %v20611_v21  ;;  %v24504_v28 = vunpack.i.l.bf16 %v20768_v41 }
 0x4a0   :  { %v20803_v26 = vpop.permute.xlu0 %15347  ;;  %v12920_v36 = vpack.c.bf16 %v6878_v11, %v6755_v47  ;;  %v15345_v47 = vunpack.i.h.bf16 %v15343_v1  ;;  %v24997_v35 = vunpack.i.l.bf16 %v20584_v8  ;;  %v24508_v33 = vunpack.i.h.bf16 %v20582_v22 }
 0x4a1   :  { %v24502_v27 = vunpack.i.l.bf16 %v20803_v26  ;;  %5292 = vrot.lane.b32.xlu1 %v20774_v63, %s16190_s14  ;;  %v7001_v57 = vsel %vm5854_vm14, %v24996_v53, %v24995_v43  ;;  %v24999_v53 = vunpack.i.l.bf16 %v20558_v14 }
 0x4a2   :  { %15592 = vrot.lane.b32.xlu0 %v20652_v20, %s16211_s21  ;;  %12921 = vmatprep.subr.bf16.mxu0 %v12920_v36  ;;  %v12924_v11 = vpack.c.bf16 %v7124_v56, %v7001_v57  ;;  %v7370_v1 = vsel %vm24998_vm3, %v24997_v35, %v24503_v18  ;;  %v15340_v56 = vunpack.i.h.bf16 %v20749_v49  ;;  %v6879_v35 = vsel %vm5730_vm13, %v15344_v59, %v15345_v47 }
 0x4a3   :  { %12923 = vmatpush1.bf16.msra.mxu0 %v12922_v19  ;;  %v20822_v2 = vpop.permute.xlu1 %15372  ;;  %v6634_v34 = vsel %vm396_vm2, %v15335_v54, %v24502_v27  ;;  %v12966_v54 = vpack.c.bf16 %v6633_v38, %v19991_v24  ;;  %v7247_v57 = vsel %vm25000_vm12, %v24999_v53, %v24506_v40  ;;  %v15364_v27 = vunpack.i.l.bf16 %v20792_v13 }
 0x4a4   :  { %v20834_v36 = vpop.permute.xlu0 %15357  ;;  %12925 = vmatprep.subr.bf16.mxu0 %v12924_v11  ;;  %v12964_v19 = vpack.c.bf16 %v6634_v34, %v20031_v58  ;;  %v12928_v11 = vpack.c.bf16 %v7370_v1, %v7247_v57  ;;  %v15621_v34 = vpack.i.bf16 %v20556_v5, %v20815_v52  ;;  %v24515_v38 = vunpack.i.h.bf16 %v20792_v13 }
 0x4a5   :  { %v24505_v43 = vunpack.i.l.bf16 %v20834_v36  ;;  %15612 = vrot.lane.b32.xlu1 %v20652_v20, %s16191_s15  ;;  %v25001_v18 = vpack.c.bf16 %v20578_v39, %v20570_v62  ;;  %v6757_v59 = vsel %vm700_vm4, %v15340_v56, %v24504_v28  ;;  %v25003_v62 = vunpack.i.l.bf16 %v20749_v49 }
 0x4a6   :  { %15602 = vrot.lane.b32.xlu0 %v20652_v20, %s24721_s29  ;;  %12965 = vmatprep.subr.bf16.mxu1 %v12964_v19  ;;  %v25002_v19 = vunpack.i.l.bf16 %v20611_v21  ;;  %v25004_v28 = vunpack.i.l.bf16 %v20582_v22  ;;  %vm25028_vm3 = vcmask 588800  }
 0x4a7   :  { %12927 = vmatpush1.bf16.msra.mxu0 %v25001_v18  ;;  %12967 = vmatpush1.bf16.msra.mxu1 %v12966_v54  ;;  %v20856_v53 = vpop.permute.xlu1 %15382  ;;  %v6880_v1 = vsel %vm5730_vm13, %v15345_v47, %v24505_v43  ;;  %v6756_v39 = vsel %vm700_vm4, %v25003_v62, %v15340_v56  ;;  %v15350_v43 = vunpack.i.h.bf16 %v20803_v26  ;;  %v25005_v56 = vunpack.i.h.bf16 %v20529_v16  ;;  %vm25029_vm12 = vmmov %vm25028_vm3 }
 0x4a8   :  { %v7616_v57 = vsel %vm6471_vm6, %v25002_v19, %v24507_v60  ;;  %v20872_v18 = vpop.permute.xlu0 %15367  ;;  %12929 = vmatprep.subr.bf16.mxu0 %v12928_v11  ;;  %v12968_v54 = vpack.c.bf16 %v6880_v1, %v6757_v59  ;;  %v7493_v47 = vsel %vm6347_vm10, %v25004_v28, %v24508_v33  ;;  %v12970_v49 = vpack.c.bf16 %v6879_v35, %v6756_v39 }
 0x4a9   :  { %v24514_v40 = vunpack.i.h.bf16 %v20872_v18  ;;  %v15369_v19 = vunpack.i.l.bf16 %v20872_v18  ;;  %15622 = vrot.lane.b32.xlu1 %v15621_v34, %s16191_s15  ;;  %v7002_v11 = vsel %vm5854_vm14, %v25005_v56, %v15364_v27  ;;  %v24512_v59 = vunpack.i.h.bf16 %v20822_v2 }
 0x4aa   :  { %v15374_v1 = vunpack.i.l.bf16 %v20822_v2  ;;  %15607 = vrot.lane.b32.xlu0 %v15621_v34, %s24721_s29  ;;  %12969 = vmatprep.subr.bf16.mxu1 %v12968_v54  ;;  %v12932_v28 = vpack.c.bf16 %v7616_v57, %v7493_v47  ;;  %v25006_v62 = vunpack.i.h.bf16 %v20560_v55  ;;  %v25008_v33 = vpack.c.bf16 %v20606_v61, %v20598_v9 }
 0x4ab   :  { %12971 = vmatpush1.bf16.msra.mxu1 %v12970_v49  ;;  %v20895_v16 = vpop.permute.xlu1 %15392  ;;  %v7003_v35 = vsel %vm5854_vm14, %v15364_v27, %v24515_v38  ;;  %v7126_v39 = vsel %vm25009_vm11, %v15369_v19, %v24514_v40  ;;  %v25010_v9 = vunpack.i.h.bf16 %v20313_v4  ;;  %v25011_v27 = vunpack.i.h.bf16 %v20558_v14  ;;  %vm25031_vm11 = vmmov %vm25028_vm3 }
 0x4ac   :  { %v7125_v60 = vsel %vm25007_vm15, %v25006_v62, %v15369_v19  ;;  %12931 = vmatpush1.bf16.msra.mxu0 %v25008_v33  ;;  %v15394_v57 = vunpack.i.l.bf16 %v20895_v16  ;;  %v20904_v55 = vpop.permute.xlu0 %15377  ;;  %v12972_v54 = vpack.c.bf16 %v7126_v39, %v7003_v35  ;;  %v15384_v19 = vunpack.i.l.bf16 %v20856_v53  ;;  %vm25030_vm15 = vmmov %vm25028_vm3 }
 0x4ad   :  { %12933 = vmatprep.subr.bf16.mxu0 %v12932_v28  ;;  %v12974_v47 = vpack.c.bf16 %v7125_v60, %v7002_v11  ;;  %v7772_v61 = vsel %vm396_vm2, %v25010_v9, %v15350_v43  ;;  %v24513_v33 = vunpack.i.h.bf16 %v20904_v55  ;;  %v15379_v49 = vunpack.i.l.bf16 %v20904_v55 }
 0x4ae   :  { %v7248_v56 = vsel %vm24984_vm8, %v25011_v27, %v15374_v1  ;;  %15617 = vrot.lane.b32.xlu0 %v20652_v20, %s16209_s23  ;;  %12973 = vmatprep.subr.bf16.mxu1 %v12972_v54  ;;  %v7773_v60 = vsel %vm396_vm2, %v15350_v43, %v15394_v57  ;;  %v7249_v4 = vsel %vm25012_vm9, %v15374_v1, %v24512_v59  ;;  %v24510_v11 = vunpack.i.h.bf16 %v20856_v53 }
 0x4af   :  { %v25013_v28 = vunpack.i.h.bf16 %v20584_v8  ;;  %v25014_v62 = vpack.c.bf16 %v20638_v17, %v20631_v6  ;;  %12975 = vmatpush1.bf16.msra.mxu1 %v12974_v47  ;;  %v20928_v35 = vpop.permute.xlu1 %5286  ;;  %v12936_v20 = vpack.c.bf16 %v7773_v60, %v19991_v24  ;;  %v7372_v43 = vsel %vm25015_vm7, %v15379_v49, %v24513_v33 }
 0x4b0   :  { %v20934_v1 = vpop.permute.xlu0 %15387  ;;  %v12976_v39 = vpack.c.bf16 %v7372_v43, %v7249_v4  ;;  %v12938_v6 = vpack.c.bf16 %v7772_v61, %v19978_v32  ;;  %v25016_v17 = vunpack.i.h.bf16 %v20582_v22  ;;  %v25017_v24 = vunpack.i.h.bf16 %v20611_v21  ;;  %v25018_v4 = vld [vmem:[#allocation11_spill] sm:$0xff] }
 0x4b1   :  { %v7371_v14 = vsel %vm24986_vm0, %v25013_v28, %v15379_v49  ;;  %12935 = vmatpush1.bf16.msra.mxu0 %v25014_v62  ;;  %v24511_v8 = vunpack.i.h.bf16 %v20934_v1  ;;  %v15389_v9 = vunpack.i.l.bf16 %v20934_v1  ;;  %vm25033_vm8 = vcmask 523264  }
 0x4b2   :  { %v12978_v54 = vpack.c.bf16 %v7371_v14, %v7248_v56  ;;  %12937 = vmatprep.subr.bf16.mxu0 %v12936_v20  ;;  %v7494_v47 = vsel %vm6347_vm10, %v25016_v17, %v15384_v19  ;;  %15627 = vrot.lane.b32.xlu0 %v15621_v34, %s16209_s23  ;;  %v7495_v56 = vsel %vm6347_vm10, %v15384_v19, %v24510_v11  ;;  %v25019_v14 = vld [vmem:[#allocation16_spill] sm:$0xff]  ;;  %v15395_v19 = vunpack.i.h.bf16 %v20895_v16  ;;  %vm25034_vm9 = vmmov %vm25033_vm8 }
 0x4b3   :  { %12977 = vmatprep.subr.bf16.mxu1 %v12976_v39  ;;  %v7617_v49 = vsel %vm6471_vm6, %v25017_v24, %v15389_v9  ;;  %v20946_v27 = vpop.permute.xlu1 %15402  ;;  %v7618_v32 = vsel %vm6471_vm6, %v15389_v9, %v24511_v8  ;;  %v15360_v9 = vunpack.i.h.bf16 %v20834_v36  ;;  %v15355_v24 = vunpack.i.h.bf16 %v20768_v41 }
 0x4b4   :  { %12979 = vmatpush1.bf16.msra.mxu1 %v12978_v54  ;;  %v5285_v22 = vpop.permute.xlu0 %5284  ;;  %v12980_v61 = vpack.c.bf16 %v7618_v32, %v7495_v56  ;;  %v12982_v34 = vpack.c.bf16 %v7617_v49, %v7494_v47  ;;  %v7774_v16 = vsel %vm396_vm2, %v15394_v57, %v15395_v19  ;;  %v25020_v56 = vld [vmem:[#allocation14_spill] sm:$0xff]  ;;  %vm25043_vm7 = vcmask 506880  }
 0x4b5   :  { %12939 = vmatpush1.bf16.msra.mxu0 %v12938_v6  ;;  %v5311_v21 = vsel %vm852_vm5, %v20072_v10, %v5285_v22  ;;  %v5312_v60 = vsel %vm852_vm5, %v5285_v22, %v20928_v35  ;;  %v15404_v6 = vunpack.i.l.bf16 %v20946_v27 }
 0x4b6   :  { %v20959_v28 = vmax.f32 %v25018_v4, %v5311_v21  ;;  %v20962_v62 = vmax.f32 %v25019_v14, %v5312_v60  ;;  %8117 = vrot.lane.b32.xlu0 %v20229_v3, %s16208_s1  ;;  %12981 = vmatprep.subr.bf16.mxu1 %v12980_v61  ;;  %v25021_v61 = vld [vmem:[#allocation19_spill] sm:$0xff]  ;;  %v12986_v60 = vpack.c.bf16 %v7774_v16, %v20031_v58  ;;  %v15405_v16 = vunpack.i.h.bf16 %v20946_v27 }
 0x4b7   :  { %v20967_v20 = vpop.permute.xlu1 %15412 }
 0x4b8   :  { %12983 = vmatpush1.bf16.msra.mxu1 %v12982_v34  ;;  %v20969_v43 = vpop.permute.xlu0 %15397  ;;  %v20973_v10 = vpack.i.bf16 %v20815_v52, %v20962_v62  ;;  %v20977_v39 = vpack.i.bf16 %v20959_v28, %v20815_v52  ;;  %v25022_v34 = vunpack.i.h.bf16 %v25021_v61  ;;  %v15415_v57 = vunpack.i.h.bf16 %v20967_v20 }
 0x4b9   :  { %v24509_v54 = vunpack.i.l.bf16 %v20969_v43  ;;  %v15414_v4 = vunpack.i.l.bf16 %v20967_v20 }
 0x4ba   :  { %15637 = vrot.lane.b32.xlu0 %v20973_v10, %s24721_s29  ;;  %15632 = vrot.lane.b32.xlu1 %v20977_v39, %s24721_s29  ;;  %v8018_v21 = vsel %vm5730_vm13, %v25022_v34, %v15360_v9  ;;  %v25023_v34 = vld [vmem:[#allocation18_spill] sm:$0xff] }
 0x4bb   :  { %v20987_v17 = vpop.permute.xlu1 %15422  ;;  %v7775_v47 = vsel %vm396_vm2, %v15395_v19, %v24509_v54  ;;  %v25024_v54 = vunpack.i.h.bf16 %v25023_v34  ;;  %v7897_v34 = vsel %vm700_vm4, %v15404_v6, %v15405_v16 }
 0x4bc   :  { %v15408_v49 = vpop.permute.xlu0 %15407  ;;  %v12984_v32 = vpack.c.bf16 %v7775_v47, %v25020_v56  ;;  %v7896_v47 = vsel %vm700_vm4, %v15355_v24, %v15404_v6  ;;  %v15424_v8 = vunpack.i.l.bf16 %v20987_v17 }
 0x4bd   :  { %v15409_v22 = vunpack.i.l.bf16 %v15408_v49  ;;  %v15410_v14 = vunpack.i.h.bf16 %v15408_v49  ;;  %v7895_v11 = vsel %vm700_vm4, %v25024_v54, %v15355_v24  ;;  %v15400_v49 = vunpack.i.h.bf16 %v20969_v43 }
 0x4be   :  { %8123 = vrot.lane.b32.xlu0 %v20815_v52, %s16208_s1  ;;  %8119 = vrot.lane.b32.xlu1 %v20353_v51, %s16208_s1  ;;  %v12942_v27 = vpack.c.bf16 %v8018_v21, %v7895_v11 }
 0x4bf   :  { %12985 = vmatprep.subr.bf16.mxu1 %v12984_v32  ;;  %v8112_v19 = vpop.permute.xlu1 %8111  ;;  %v8019_v61 = vsel %vm5730_vm13, %v15360_v9, %v15409_v22  ;;  %v25025_v9 = vunpack.i.l.bf16 %v20646_v50  ;;  %v8020_v24 = vsel %vm5730_vm13, %v15409_v22, %v15410_v14 }
 0x4c0   :  { %12987 = vmatpush1.bf16.msra.mxu1 %v12986_v60  ;;  %v21010_v59 = vpop.permute.xlu0 %15417  ;;  %v12940_v33 = vpack.c.bf16 %v8019_v61, %v7896_v47  ;;  %v25026_v60 = vunpack.i.l.bf16 %v20648_v44  ;;  %v7898_v61 = vsel %vm700_vm4, %v15405_v16, %v15414_v4  ;;  %v5491_v44 = vsel %vm396_vm2, %v15400_v49, %v15424_v8 }
 0x4c1   :  { %v15420_v32 = vunpack.i.h.bf16 %v21010_v59  ;;  %v24521_v40 = vunpack.i.l.bf16 %v21010_v59  ;;  %v21021_v54 = vsel %vm700_vm4, %v25025_v9, %v15415_v57  ;;  %v25027_v9 = vunpack.i.l.bf16 %v20609_v12 }
 0x4c2   :  { %15647 = vrot.lane.b32.xlu0 %v20977_v39, %s16209_s23  ;;  %8121 = vrot.lane.b32.xlu1 %v20556_v5, %s16208_s1  ;;  %v12992_v12 = vpack.c.bf16 %v5491_v44, %v25020_v56  ;;  %v15425_v44 = vunpack.i.h.bf16 %v20987_v17 }
 0x4c3   :  { %v21033_v47 = vsel %vm5730_vm13, %v25026_v60, %v15420_v32  ;;  %12941 = vmatprep.subr.bf16.mxu0 %v12940_v33  ;;  %v21035_v50 = vpop.permute.xlu1 %8115  ;;  %v8021_v11 = vsel %vm5730_vm13, %v15410_v14, %v24521_v40  ;;  %v5490_v60 = vsel %vm396_vm2, %v25027_v9, %v15400_v49  ;;  %v21080_v49 = vpack.i.bf16 %v20962_v62, %v20959_v28 }
 0x4c4   :  { %12943 = vmatpush1.bf16.msra.mxu0 %v12942_v27  ;;  %v8110_v22 = vpop.permute.xlu0 %8109  ;;  %v12988_v21 = vpack.c.bf16 %v8021_v11, %v7898_v61  ;;  %v12998_v33 = vpack.c.bf16 %v21033_v47, %v21021_v54  ;;  %v12990_v27 = vpack.c.bf16 %v8020_v24, %v7897_v34  ;;  %v12994_v16 = vpack.c.bf16 %v5490_v60, %v20031_v58  ;;  %v25038_v54 = vld [vmem:[#allocation15_spill] sm:$0xff] }
 0x4c5   :  { %v8142_v38 = vsel %vm5854_vm14, %v8110_v22, %v8112_v19  ;;  %v8141_v14 = vsel %vm5854_vm14, %v20410_v23, %v8110_v22  ;;  %v21067_v23 = vpack.i.bf16 %v20815_v52, %v20556_v5 }
 0x4c6   :  { %15657 = vrot.lane.b32.xlu0 %v20973_v10, %s16209_s23  ;;  %15642 = vrot.lane.b32.xlu1 %v20977_v39, %s16191_s15 }
 0x4c7   :  { %8762 = vmatprep.subr.mxu0 %v8142_v38  ;;  %12989 = vmatprep.subr.bf16.mxu1 %v12988_v21  ;;  %v21059_v61 = vpop.permute.xlu1 %15432 }
 0x4c8   :  { %8763 = vmatpush1.msra.mxu0 %v8141_v14  ;;  %12991 = vmatpush1.bf16.msra.mxu1 %v12990_v27  ;;  %v21062_v6 = vpop.permute.xlu0 %5151 }
 0x4c9   :  { %12993 = vmatprep.subr.bf16.mxu0 %v12992_v12  ;;  %8779 = vmatmul.mubr.f32.vlgmr.msra.gmra.mrb[12].mxu0 %v20451_v48 }
 0x4ca   :  { %12995 = vmatpush1.bf16.msra.mxu0 %v12994_v16  ;;  %15667 = vrot.lane.b32.xlu0 %v21067_v23, %s24629_s27 }
 0x4cb   :  { %15652 = vrot.lane.b32.xlu1 %v20973_v10, %s16191_s15  ;;  %v21074_v38 = vpop.permute.xlu1 %15442  ;;  %11821 = vmatprep.mubr.msk.f32.mxu0 %vm25028_vm3, %v20459_v0  ;;  %v15434_v10 = vunpack.i.l.bf16 %v21059_v61  ;;  %vm25045_vm3 = vcmask 490496  }
 0x4cc   :  { %v8114_v58 = vpop.permute.xlu0 %8113  ;;  %v15445_v9 = vunpack.i.h.bf16 %v21074_v38  ;;  %v15444_v60 = vunpack.i.l.bf16 %v21074_v38  ;;  %v5492_v38 = vsel %vm396_vm2, %v15424_v8, %v15425_v44 }
 0x4cd   :  { %v8144_v24 = vsel %vm5854_vm14, %v8114_v58, %v21035_v50  ;;  %v8143_v11 = vsel %vm5854_vm14, %v8112_v19, %v8114_v58  ;;  %8785 = vmatmul.mubr.f32.gmra.mrb[14].mxu0 %v20482_v7  ;;  %v21097_v19 = vld [vmem:[%s24277_s3 + $0x8] sm:$0xff]  ;;  %v13042_v47 = vpack.c.bf16 %v5492_v38, %v25038_v54 }
 0x4ce   :  { %15677 = vrot.lane.b32.xlu0 %v21080_v49, %s24629_s27  ;;  %8839 = vmatprep.subr.mxu1 %v8144_v24 }
 0x4cf   :  { %15662 = vrot.lane.b32.xlu1 %v21067_v23, %s16208_s1  ;;  %8840 = vmatpush1.msra.mxu1 %v8143_v11  ;;  %v21091_v22 = vpop.permute.xlu1 %15447 }
 0x4d0   :  { %v15428_v21 = vpop.permute.xlu0 %15427  ;;  %8856 = vmatmul.mubr.f32.vlgmr.msra.gmra.mrb[14].mxu1 %v20451_v48  ;;  %11824 = vmatprep.mubr.msk.f32.mxu0 %vm25029_vm12, %v21097_v19  ;;  %vm25046_vm12 = vmmov %vm25043_vm7 }
 0x4d1   :  { %v15429_v34 = vunpack.i.l.bf16 %v15428_v21  ;;  %11823 = vmatprep.mubr.msk.f32.mxu1 %vm25030_vm15, %v20459_v0  ;;  %v5738_v0 = vsel %vm5730_vm13, %v15420_v32, %v15434_v10  ;;  %v25032_v32 = vunpack.i.h.bf16 %v20678_v29  ;;  %vm25047_vm15 = vmmov %vm25045_vm3 }
 0x4d2   :  { %15687 = vrot.lane.b32.xlu0 %v21067_v23, %s16201_s20 }
 0x4d3   :  { %15672 = vrot.lane.b32.xlu1 %v21080_v49, %s16208_s1  ;;  %v21110_v48 = vpop.permute.xlu1 %15452  ;;  %v5614_v14 = vsel %vm700_vm4, %v15415_v57, %v15429_v34  ;;  %v5172_v57 = vsel %vm244_vm1, %v20015_v30, %v21062_v6  ;;  %v5984_v11 = vsel %vm25033_vm8, %v25032_v32, %v15444_v60  ;;  %v25035_v30 = vunpack.i.h.bf16 %v20676_v46  ;;  %v25036_v46 = vld [vmem:[#allocation12_spill] sm:$0xff]  ;;  %vm25039_vm1 = vmmov %vm25033_vm8 }
 0x4d4   :  { %v24518_v27 = vunpack.i.l.bf16 %v21110_v48  ;;  %v15438_v12 = vpop.permute.xlu0 %15437  ;;  %v12996_v16 = vpack.c.bf16 %v5738_v0, %v5614_v14  ;;  %8862 = vmatmul.mubr.f32.gmra.mrb[16].mxu1 %v20482_v7  ;;  %v5985_v7 = vsel %vm25034_vm9, %v15444_v60, %v15445_v9  ;;  %vm25040_vm0 = vmmov %vm25039_vm1 }
 0x4d5   :  { %v15440_v58 = vunpack.i.h.bf16 %v15438_v12  ;;  %v15439_v24 = vunpack.i.l.bf16 %v15438_v12  ;;  %11826 = vmatprep.mubr.msk.f32.mxu1 %vm25031_vm11, %v21097_v19  ;;  %vm25048_vm11 = vmmov %vm25043_vm7 }
 0x4d6   :  { %15692 = vrot.lane.b32.xlu0 %v21080_v49, %s24633_s24  ;;  %12997 = vmatprep.subr.bf16.mxu0 %v12996_v16  ;;  %v5493_v8 = vsel %vm396_vm2, %v15425_v44, %v24518_v27  ;;  %v25037_v16 = vmax.f32 %v25036_v46, 0.0  ;;  %vm25049_vm8 = vmmov %vm25045_vm3 }
 0x4d7   :  { %v5861_v17 = vsel %vm5854_vm14, %v25035_v30, %v15439_v24  ;;  %15682 = vrot.lane.b32.xlu1 %v21067_v23, %s24633_s24  ;;  %12999 = vmatpush1.bf16.msra.mxu0 %v12998_v33  ;;  %v21147_v29 = vpop.permute.xlu1 %15462  ;;  %v5862_v14 = vsel %vm5854_vm14, %v15439_v24, %v15440_v58  ;;  %v13040_v60 = vpack.c.bf16 %v5493_v8, %v20229_v3  ;;  %v15430_v30 = vunpack.i.h.bf16 %v15428_v21  ;;  %vm25050_vm9 = vmmov %vm25043_vm7 }
 0x4d8   :  { %v21151_v0 = vpop.permute.xlu0 %5288  ;;  %v13000_v44 = vpack.c.bf16 %v5985_v7, %v5862_v14  ;;  %v13002_v12 = vpack.c.bf16 %v5984_v11, %v5861_v17  ;;  %v21155_v32 = vmax.f32 %v25037_v16, %v5172_v57  ;;  %v24517_v33 = vunpack.i.l.bf16 %v21147_v29 }
 0x4d9   :  { %13041 = vmatprep.subr.bf16.mxu1 %v13040_v60  ;;  %v15435_v11 = vunpack.i.h.bf16 %v21059_v61  ;;  %v5615_v7 = vsel %vm700_vm4, %v15429_v34, %v15430_v30  ;;  %v5313_v46 = vsel %vm852_vm5, %v20928_v35, %v21151_v0  ;;  %v15450_v61 = vunpack.i.h.bf16 %v21091_v22 }
 0x4da   :  { %15702 = vrot.lane.b32.xlu0 %v21067_v23, %s16211_s21  ;;  %13001 = vmatprep.subr.bf16.mxu0 %v13000_v44 }
 0x4db   :  { %5294 = vrot.lane.b32.xlu1 %v21155_v32, %s16190_s14  ;;  %13003 = vmatpush1.bf16.msra.mxu0 %v13002_v12  ;;  %v21163_v24 = vpop.permute.xlu1 %15477  ;;  %v5740_v34 = vsel %vm5730_vm13, %v15435_v11, %v24517_v33  ;;  %v5739_v60 = vsel %vm5730_vm13, %v15434_v10, %v15435_v11 }
 0x4dc   :  { %13043 = vmatpush1.bf16.msra.mxu1 %v13042_v47  ;;  %v21166_v57 = vpop.permute.xlu0 %15457  ;;  %v15479_v8 = vunpack.i.l.bf16 %v21163_v24  ;;  %v24520_v38 = vunpack.i.h.bf16 %v21163_v24 }
 0x4dd   :  { %v24516_v21 = vunpack.i.l.bf16 %v21166_v57 }
 0x4de   :  { %15712 = vrot.lane.b32.xlu0 %v21080_v49, %s16211_s21  ;;  %v5986_v33 = vsel %vm25039_vm1, %v15445_v9, %v15479_v8  ;;  %v5987_v9 = vsel %vm25040_vm0, %v15479_v8, %v24520_v38  ;;  %vm25051_vm1 = vmmov %vm25045_vm3  ;;  %v25052_v38 = vunpack.i.h.bf16 %v20731_v25 }
 0x4df   :  { %15697 = vrot.lane.b32.xlu1 %v21080_v49, %s16201_s20  ;;  %v21176_v17 = vpop.permute.xlu1 %15482  ;;  %v5616_v14 = vsel %vm700_vm4, %v15430_v30, %v24516_v21  ;;  %v13046_v30 = vpack.c.bf16 %v5739_v60, %v5615_v7  ;;  %v15449_v21 = vunpack.i.l.bf16 %v21091_v22  ;;  %v25041_v7 = vld [vmem:[#allocation13_spill] sm:$0xff] }
 0x4e0   :  { %v21187_v44 = vpop.permute.xlu0 %15467  ;;  %v13044_v12 = vpack.c.bf16 %v5740_v34, %v5616_v14  ;;  %v21211_v14 = vmax.f32 %v25041_v7, %v5313_v46  ;;  %v15484_v27 = vunpack.i.l.bf16 %v21176_v17  ;;  %v24522_v8 = vunpack.i.h.bf16 %v21176_v17 }
 0x4e1   :  { %v24519_v16 = vunpack.i.h.bf16 %v21187_v44  ;;  %v15469_v47 = vunpack.i.l.bf16 %v21187_v44  ;;  %v25044_v46 = vunpack.i.h.bf16 %v20703_v45 }
 0x4e2   :  { %15722 = vrot.lane.b32.xlu0 %v21080_v49, %s24721_s29  ;;  %13045 = vmatprep.subr.bf16.mxu1 %v13044_v12 }
 0x4e3   :  { %v5863_v10 = vsel %vm5854_vm14, %v15440_v58, %v15469_v47  ;;  %15707 = vrot.lane.b32.xlu1 %v21067_v23, %s16210_s25  ;;  %13047 = vmatpush1.bf16.msra.mxu1 %v13046_v30  ;;  %v21202_v35 = vpop.permute.xlu1 %15492  ;;  %v5864_v11 = vsel %vm5854_vm14, %v15469_v47, %v24519_v16  ;;  %v25042_v23 = vunpack.i.h.bf16 %v20705_v15  ;;  %v6108_v15 = vsel %vm25046_vm12, %v15449_v21, %v15450_v61  ;;  %vm25064_vm12 = vmmov %vm25040_vm0 }
 0x4e4   :  { %v15473_v22 = vpop.permute.xlu0 %15472  ;;  %v13048_v34 = vpack.c.bf16 %v5987_v9, %v5864_v11  ;;  %v13050_v58 = vpack.c.bf16 %v5986_v33, %v5863_v10  ;;  %v15741_v9 = vpack.i.bf16 %v20959_v28, %v21211_v14 }
 0x4e5   :  { %v15475_v60 = vunpack.i.h.bf16 %v15473_v22  ;;  %v15474_v12 = vunpack.i.l.bf16 %v15473_v22  ;;  %v6107_v30 = vsel %vm25043_vm7, %v25042_v23, %v15449_v21  ;;  %v6109_v23 = vsel %vm25048_vm11, %v15450_v61, %v15484_v27  ;;  %vm25062_vm7 = vmmov %vm25040_vm0 }
 0x4e6   :  { %15732 = vrot.lane.b32.xlu0 %v21080_v49, %s16191_s15  ;;  %13049 = vmatprep.subr.bf16.mxu1 %v13048_v34  ;;  %vm25068_vm11 = vmmov %vm25050_vm9 }
 0x4e7   :  { %v6230_v47 = vsel %vm25045_vm3, %v25044_v46, %v15474_v12  ;;  %15717 = vrot.lane.b32.xlu1 %v21080_v49, %s16210_s25  ;;  %13051 = vmatpush1.bf16.msra.mxu1 %v13050_v58  ;;  %v21225_v33 = vpop.permute.xlu1 %15502  ;;  %v6231_v10 = vsel %vm25047_vm15, %v15474_v12, %v15475_v60  ;;  %v15495_v58 = vunpack.i.h.bf16 %v21202_v35  ;;  %v15494_v46 = vunpack.i.l.bf16 %v21202_v35  ;;  %vm25063_vm3 = vmmov %vm25040_vm0 }
 0x4e8   :  { %v21229_v11 = vpop.permute.xlu0 %15487  ;;  %v13004_v7 = vpack.c.bf16 %v6231_v10, %v6108_v15  ;;  %v13006_v22 = vpack.c.bf16 %v6230_v47, %v6107_v30  ;;  %v6110_v30 = vsel %vm25050_vm9, %v15484_v27, %v24522_v8  ;;  %v15504_v40 = vunpack.i.l.bf16 %v21225_v33  ;;  %vm25066_vm15 = vmmov %vm25051_vm1 }
 0x4e9   :  { %v24523_v45 = vunpack.i.h.bf16 %v21229_v11  ;;  %v15489_v34 = vunpack.i.l.bf16 %v21229_v11  ;;  %v6355_v27 = vsel %vm6347_vm10, %v15494_v46, %v15495_v58 }
 0x4ea   :  { %15742 = vrot.lane.b32.xlu0 %v15741_v9, %s16191_s15  ;;  %13005 = vmatprep.subr.bf16.mxu0 %v13004_v7  ;;  %v15455_v7 = vunpack.i.h.bf16 %v21110_v48 }
 0x4eb   :  { %v6232_v21 = vsel %vm25049_vm8, %v15475_v60, %v15489_v34  ;;  %15727 = vrot.lane.b32.xlu1 %v15741_v9, %s24721_s29  ;;  %13007 = vmatpush1.bf16.msra.mxu0 %v13006_v22  ;;  %v15513_v12 = vpop.permute.xlu1 %15512  ;;  %v6233_v61 = vsel %vm25051_vm1, %v15489_v34, %v24523_v45  ;;  %v6354_v22 = vsel %vm6347_vm10, %v25052_v38, %v15494_v46  ;;  %v15505_v34 = vunpack.i.h.bf16 %v21225_v33  ;;  %vm25069_vm8 = vmmov %vm25050_vm9 }
 0x4ec   :  { %v15514_v47 = vunpack.i.l.bf16 %v15513_v12  ;;  %v15498_v15 = vpop.permute.xlu0 %15497  ;;  %v13052_v35 = vpack.c.bf16 %v6233_v61, %v6110_v30  ;;  %v13054_v10 = vpack.c.bf16 %v6232_v21, %v6109_v23  ;;  %v25053_v23 = vunpack.i.h.bf16 %v20727_v31  ;;  %vm25070_vm9 = vmmov %vm25051_vm1 }
 0x4ed   :  { %v15500_v16 = vunpack.i.h.bf16 %v15498_v15  ;;  %v15499_v60 = vunpack.i.l.bf16 %v15498_v15  ;;  %v21269_v46 = vpack.i.bf16 %v21211_v14, %v20962_v62  ;;  %v15515_v45 = vunpack.i.h.bf16 %v15513_v12 }
 0x4ee   :  { %15752 = vrot.lane.b32.xlu0 %v20977_v39, %s16208_s1  ;;  %13053 = vmatprep.subr.bf16.mxu1 %v13052_v35  ;;  %v6636_v30 = vsel %vm396_vm2, %v15455_v7, %v15514_v47 }
 0x4ef   :  { %v6478_v21 = vsel %vm6471_vm6, %v25053_v23, %v15499_v60  ;;  %15737 = vrot.lane.b32.xlu1 %v21080_v49, %s16209_s23  ;;  %13055 = vmatpush1.bf16.msra.mxu1 %v13054_v10  ;;  %v21261_v25 = vpop.permute.xlu1 %15522  ;;  %v6479_v38 = vsel %vm6471_vm6, %v15499_v60, %v15500_v16  ;;  %v25054_v49 = vunpack.i.l.bf16 %v20803_v26  ;;  %v6356_v60 = vsel %vm6347_vm10, %v15495_v58, %v15504_v40 }
 0x4f0   :  { %v21265_v61 = vpop.permute.xlu0 %15507  ;;  %v13008_v15 = vpack.c.bf16 %v6479_v38, %v6355_v27  ;;  %v13010_v31 = vpack.c.bf16 %v6478_v21, %v6354_v22  ;;  %v13012_v8 = vpack.c.bf16 %v6636_v30, %v25038_v54  ;;  %v6357_v26 = vsel %vm6347_vm10, %v15504_v40, %v15505_v34 }
 0x4f1   :  { %v15510_v35 = vunpack.i.h.bf16 %v21265_v61  ;;  %v15509_v23 = vunpack.i.l.bf16 %v21265_v61  ;;  %v6635_v10 = vsel %vm396_vm2, %v25054_v49, %v15455_v7  ;;  %v15460_v38 = vunpack.i.h.bf16 %v21166_v57 }
 0x4f2   :  { %15762 = vrot.lane.b32.xlu0 %v21269_v46, %s16208_s1  ;;  %13009 = vmatprep.subr.bf16.mxu0 %v13008_v15  ;;  %v6637_v40 = vsel %vm396_vm2, %v15514_v47, %v15515_v45  ;;  %v15524_v30 = vunpack.i.l.bf16 %v21261_v25  ;;  %v25055_v15 = vld [vmem:[#allocation17_spill] sm:$0xff]  ;;  %v15465_v49 = vunpack.i.h.bf16 %v21147_v29 }
 0x4f3   :  { %v6480_v27 = vsel %vm6471_vm6, %v15500_v16, %v15509_v23  ;;  %15747 = vrot.lane.b32.xlu1 %v15741_v9, %s16209_s23  ;;  %13011 = vmatpush1.bf16.msra.mxu0 %v13010_v31  ;;  %v21282_v22 = vpop.permute.xlu1 %15532  ;;  %v6481_v58 = vsel %vm6471_vm6, %v15509_v23, %v15510_v35  ;;  %v13014_v9 = vpack.c.bf16 %v6635_v10, %v25020_v56  ;;  %v25056_v31 = vmax.f32 %v25055_v15, 0.0 }
 0x4f4   :  { %v21290_v7 = vpop.permute.xlu0 %15517  ;;  %13013 = vmatprep.subr.bf16.mxu0 %v13012_v8  ;;  %v13056_v21 = vpack.c.bf16 %v6481_v58, %v6357_v26  ;;  %v13058_v12 = vpack.c.bf16 %v6480_v27, %v6356_v60  ;;  %v25057_v27 = vunpack.i.l.bf16 %v20768_v41  ;;  %v15535_v58 = vunpack.i.h.bf16 %v21282_v22 }
 0x4f5   :  { %v15519_v16 = vunpack.i.l.bf16 %v21290_v7  ;;  %v5234_v23 = vmax.f32 %v25056_v31, %v21062_v6  ;;  %v24524_v6 = vunpack.i.l.bf16 %v21282_v22  ;;  %v15525_v31 = vunpack.i.h.bf16 %v21261_v25 }
 0x4f6   :  { %15772 = vrot.lane.b32.xlu0 %v20977_v39, %s24633_s24  ;;  %13057 = vmatprep.subr.bf16.mxu1 %v13056_v21  ;;  %v6758_v26 = vsel %vm700_vm4, %v25057_v27, %v15460_v38 }
 0x4f7   :  { %15757 = vrot.lane.b32.xlu1 %v20977_v39, %s24629_s27  ;;  %13015 = vmatpush1.bf16.msra.mxu0 %v13014_v9  ;;  %v21301_v8 = vpop.permute.xlu1 %15542  ;;  %v6638_v56 = vsel %vm396_vm2, %v15515_v45, %v15519_v16  ;;  %v13062_v45 = vpack.c.bf16 %v6637_v40, %v20229_v3  ;;  %v6759_v9 = vsel %vm700_vm4, %v15460_v38, %v15524_v30 }
 0x4f8   :  { %13059 = vmatpush1.bf16.msra.mxu1 %v13058_v12  ;;  %v15528_v47 = vpop.permute.xlu0 %15527  ;;  %v13060_v10 = vpack.c.bf16 %v6638_v56, %v20353_v51  ;;  %v25058_v56 = vunpack.i.l.bf16 %v20834_v36  ;;  %v21337_v38 = vsel %vm700_vm4, %v15414_v4, %v15535_v58  ;;  %v15544_v36 = vunpack.i.l.bf16 %v21301_v8 }
 0x4f9   :  { %v15529_v60 = vunpack.i.l.bf16 %v15528_v47  ;;  %v15530_v21 = vunpack.i.h.bf16 %v15528_v47  ;;  %v6761_v4 = vsel %vm700_vm4, %v15525_v31, %v24524_v6 }
 0x4fa   :  { %5296 = vrot.lane.b32.xlu0 %v5234_v23, %s16190_s14  ;;  %13061 = vmatprep.subr.bf16.mxu1 %v13060_v10  ;;  %v6881_v15 = vsel %vm5730_vm13, %v25058_v56, %v15465_v49 }
 0x4fb   :  { %15767 = vrot.lane.b32.xlu1 %v21269_v46, %s24629_s27  ;;  %v21320_v12 = vpop.permute.xlu1 %15552  ;;  %v6882_v41 = vsel %vm5730_vm13, %v15465_v49, %v15529_v60  ;;  %v13018_v27 = vpack.c.bf16 %v6881_v15, %v6758_v26  ;;  %v6883_v25 = vsel %vm5730_vm13, %v15529_v60, %v15530_v21  ;;  %v15545_v49 = vunpack.i.h.bf16 %v21301_v8 }
 0x4fc   :  { %13063 = vmatpush1.bf16.msra.mxu1 %v13062_v45  ;;  %v21328_v23 = vpop.permute.xlu0 %15537  ;;  %v13016_v40 = vpack.c.bf16 %v6882_v41, %v6759_v9  ;;  %v25059_v26 = vunpack.i.l.bf16 %v21010_v59  ;;  %v6760_v60 = vsel %vm700_vm4, %v15524_v30, %v15525_v31  ;;  %v24527_v30 = vunpack.i.h.bf16 %v21320_v12 }
 0x4fd   :  { %v15540_v47 = vunpack.i.h.bf16 %v21328_v23  ;;  %v24525_v10 = vunpack.i.l.bf16 %v21328_v23  ;;  %v25061_v31 = vunpack.i.h.bf16 %v20872_v18 }
 0x4fe   :  { %15787 = vrot.lane.b32.xlu0 %v21269_v46, %s16201_s20  ;;  %13017 = vmatprep.subr.bf16.mxu0 %v13016_v40 }
 0x4ff   :  { %v21349_v45 = vsel %vm5730_vm13, %v25059_v26, %v15540_v47  ;;  %15777 = vrot.lane.b32.xlu1 %v20977_v39, %s16201_s20  ;;  %13019 = vmatpush1.bf16.msra.mxu0 %v13018_v27  ;;  %v21353_v20 = vpop.permute.xlu1 %5290  ;;  %v6884_v8 = vsel %vm5730_vm13, %v15530_v21, %v24525_v10  ;;  %v13066_v27 = vpack.c.bf16 %v6883_v25, %v6760_v60  ;;  %v25060_v26 = vunpack.i.h.bf16 %v20792_v13 }
 0x500   :  { %v15548_v59 = vpop.permute.xlu0 %15547  ;;  %v13064_v9 = vpack.c.bf16 %v6884_v8, %v6761_v4  ;;  %v13038_v41 = vpack.c.bf16 %v21349_v45, %v21337_v38  ;;  %v5314_v56 = vsel %vm852_vm5, %v21151_v0, %v21353_v20  ;;  %v15554_v21 = vunpack.i.l.bf16 %v21320_v12 }
 0x501   :  { %v15550_v15 = vunpack.i.h.bf16 %v15548_v59  ;;  %v15549_v40 = vunpack.i.l.bf16 %v15548_v59  ;;  %v7004_v6 = vsel %vm5854_vm14, %v25060_v26, %v15544_v36  ;;  %v7005_v13 = vsel %vm5854_vm14, %v15544_v36, %v15545_v49 }
 0x502   :  { %15797 = vrot.lane.b32.xlu0 %v20977_v39, %s16210_s25  ;;  %13065 = vmatprep.subr.bf16.mxu1 %v13064_v9  ;;  %v21382_v8 = vmax.f32 %v20415_v42, %v5314_v56 }
 0x503   :  { %v7127_v4 = vsel %vm25040_vm0, %v25061_v31, %v15549_v40  ;;  %15782 = vrot.lane.b32.xlu1 %v21269_v46, %s24633_s24  ;;  %13067 = vmatpush1.bf16.msra.mxu1 %v13066_v27  ;;  %v15568_v0 = vpop.permute.xlu1 %15567  ;;  %v7128_v25 = vsel %vm25062_vm7, %v15549_v40, %v15550_v15  ;;  %v7006_v31 = vsel %vm5854_vm14, %v15545_v49, %v15554_v21  ;;  %vm25071_vm0 = vmmov %vm25069_vm8 }
 0x504   :  { %v21384_v60 = vpop.permute.xlu0 %15557  ;;  %v13020_v59 = vpack.c.bf16 %v7128_v25, %v7005_v13  ;;  %v13022_v9 = vpack.c.bf16 %v7127_v4, %v7004_v6  ;;  %v15569_v10 = vunpack.i.l.bf16 %v15568_v0  ;;  %v15570_v36 = vunpack.i.h.bf16 %v15568_v0  ;;  %vm25072_vm7 = vmmov %vm25071_vm0 }
 0x505   :  { %v24526_v18 = vunpack.i.h.bf16 %v21384_v60  ;;  %v15559_v26 = vunpack.i.l.bf16 %v21384_v60  ;;  %v7007_v6 = vsel %vm5854_vm14, %v15554_v21, %v24527_v30  ;;  %v15816_v27 = vpack.i.bf16 %v21211_v14, %v21382_v8 }
 0x506   :  { %15807 = vrot.lane.b32.xlu0 %v21269_v46, %s16210_s25  ;;  %13021 = vmatprep.subr.bf16.mxu0 %v13020_v59 }
 0x507   :  { %v7129_v40 = vsel %vm25063_vm3, %v15550_v15, %v15559_v26  ;;  %15792 = vrot.lane.b32.xlu1 %v20977_v39, %s16211_s21  ;;  %13023 = vmatpush1.bf16.msra.mxu0 %v13022_v9  ;;  %v21394_v42 = vpop.permute.xlu1 %15577  ;;  %v7130_v49 = vsel %vm25064_vm12, %v15559_v26, %v24526_v18  ;;  %v25065_v39 = vunpack.i.h.bf16 %v20904_v55  ;;  %v25067_v9 = vunpack.i.h.bf16 %v20822_v2  ;;  %vm25073_vm3 = vmmov %vm25051_vm1 }
 0x508   :  { %v15563_v56 = vpop.permute.xlu0 %15562  ;;  %v13068_v4 = vpack.c.bf16 %v7130_v49, %v7007_v6  ;;  %v13070_v15 = vpack.c.bf16 %v7129_v40, %v7006_v31  ;;  %v15579_v59 = vunpack.i.l.bf16 %v21394_v42  ;;  %v15580_v21 = vunpack.i.h.bf16 %v21394_v42 }
 0x509   :  { %v15565_v0 = vunpack.i.h.bf16 %v15563_v56  ;;  %v15564_v13 = vunpack.i.l.bf16 %v15563_v56  ;;  %v7373_v25 = vsel %vm25066_vm15, %v25065_v39, %v15569_v10  ;;  %v7374_v40 = vsel %vm25070_vm9, %v15569_v10, %v15570_v36 }
 0x50a   :  { %15817 = vrot.lane.b32.xlu0 %v15816_v27, %s24721_s29  ;;  %13069 = vmatprep.subr.bf16.mxu1 %v13068_v4  ;;  %v7375_v2 = vsel %vm25051_vm1, %v15570_v36, %v15579_v59  ;;  %v7376_v36 = vsel %vm25073_vm3, %v15579_v59, %v15580_v21  ;;  %vm25078_vm12 = vcmask 588800   ;;  %vm25085_vm9 = vcmask 523264  }
 0x50b   :  { %v7250_v26 = vsel %vm25068_vm11, %v25067_v9, %v15564_v13  ;;  %15802 = vrot.lane.b32.xlu1 %v21269_v46, %s16211_s21  ;;  %13071 = vmatpush1.bf16.msra.mxu1 %v13070_v15  ;;  %v15588_v31 = vpop.permute.xlu1 %15587  ;;  %v7251_v55 = vsel %vm25069_vm8, %v15564_v13, %v15565_v0  ;;  %vm25080_vm15 = vmmov %vm25078_vm12 }
 0x50c   :  { %v21417_v6 = vpop.permute.xlu0 %15572  ;;  %v13024_v49 = vpack.c.bf16 %v7374_v40, %v7251_v55  ;;  %v13026_v56 = vpack.c.bf16 %v7373_v25, %v7250_v26  ;;  %v15589_v9 = vunpack.i.l.bf16 %v15588_v31  ;;  %v15590_v15 = vunpack.i.h.bf16 %v15588_v31  ;;  %vm25082_vm11 = vmmov %vm25078_vm12 }
 0x50d   :  { %v15575_v4 = vunpack.i.h.bf16 %v21417_v6  ;;  %v15574_v39 = vunpack.i.l.bf16 %v21417_v6  ;;  %vm25083_vm8 = vmmov %vm25082_vm11 }
 0x50e   :  { %15827 = vrot.lane.b32.xlu0 %v21269_v46, %s16209_s23  ;;  %13025 = vmatprep.subr.bf16.mxu0 %v13024_v49  ;;  %vm25087_vm1 = vmmov %vm25085_vm9 }
 0x50f   :  { %v7252_v13 = vsel %vm25071_vm0, %v15565_v0, %v15574_v39  ;;  %15812 = vrot.lane.b32.xlu1 %v21269_v46, %s24721_s29  ;;  %13027 = vmatpush1.bf16.msra.mxu0 %v13026_v56  ;;  %v21427_v10 = vpop.permute.xlu1 %15597  ;;  %v7253_v25 = vsel %vm25072_vm7, %v15574_v39, %v15575_v4  ;;  %v25074_v0 = vunpack.i.h.bf16 %v20934_v1  ;;  %v25075_v39 = vunpack.i.h.bf16 %v20856_v53  ;;  %vm25088_vm0 = vmmov %vm25087_vm1 }
 0x510   :  { %v15583_v26 = vpop.permute.xlu0 %15582  ;;  %v13072_v55 = vpack.c.bf16 %v7376_v36, %v7253_v25  ;;  %v13074_v40 = vpack.c.bf16 %v7375_v2, %v7252_v13  ;;  %v15600_v56 = vunpack.i.h.bf16 %v21427_v10  ;;  %v15599_v30 = vunpack.i.l.bf16 %v21427_v10  ;;  %vm25089_vm7 = vmmov %vm25088_vm0 }
 0x511   :  { %v15585_v31 = vunpack.i.h.bf16 %v15583_v26  ;;  %v15584_v49 = vunpack.i.l.bf16 %v15583_v26  ;;  %v7619_v18 = vsel %vm6471_vm6, %v25074_v0, %v15589_v9  ;;  %v7620_v13 = vsel %vm6471_vm6, %v15589_v9, %v15590_v15 }
 0x512   :  { %15837 = vrot.lane.b32.xlu0 %v15816_v27, %s16209_s23  ;;  %13073 = vmatprep.subr.bf16.mxu1 %v13072_v55  ;;  %v15520_v0 = vunpack.i.h.bf16 %v21290_v7 }
 0x513   :  { %v7496_v59 = vsel %vm6347_vm10, %v25075_v39, %v15584_v49  ;;  %15822 = vrot.lane.b32.xlu1 %v21269_v46, %s16191_s15  ;;  %13075 = vmatpush1.bf16.msra.mxu1 %v13074_v40  ;;  %v21446_v2 = vpop.permute.xlu1 %5292  ;;  %v7497_v1 = vsel %vm6347_vm10, %v15584_v49, %v15585_v31  ;;  %v7621_v49 = vsel %vm6471_vm6, %v15590_v15, %v15599_v30 }
 0x514   :  { %v5315_v25 = vsel %vm852_vm5, %v21353_v20, %v21446_v2  ;;  %v21453_v36 = vpop.permute.xlu0 %15592  ;;  %v13028_v26 = vpack.c.bf16 %v7620_v13, %v7497_v1  ;;  %v13030_v53 = vpack.c.bf16 %v7619_v18, %v7496_v59  ;;  %v7622_v20 = vsel %vm6471_vm6, %v15599_v30, %v15600_v56 }
 0x515   :  { %v21456_v55 = vmax.f32 %v20671_v37, %v5315_v25  ;;  %v15595_v46 = vunpack.i.h.bf16 %v21453_v36  ;;  %v15594_v40 = vunpack.i.l.bf16 %v21453_v36  ;;  %v25076_v13 = vunpack.i.l.bf16 %v20969_v43  ;;  %v8619_v36 = vld [vmem:[%s24278_s4] sm:$0xff] }
 0x516   :  { %8125 = vrot.lane.b32.xlu0 %v20959_v28, %s16208_s1  ;;  %13029 = vmatprep.subr.bf16.mxu0 %v13028_v26 }
 0x517   :  { %v7498_v18 = vsel %vm6347_vm10, %v15585_v31, %v15594_v40  ;;  %15832 = vrot.lane.b32.xlu1 %v15816_v27, %s16191_s15  ;;  %13031 = vmatpush1.bf16.msra.mxu0 %v13030_v53  ;;  %v21471_v37 = vpack.i.bf16 %v21456_v55, %v21382_v8  ;;  %v7499_v9 = vsel %vm6347_vm10, %v15594_v40, %v15595_v46  ;;  %v15613_v31 = vpop.permute.xlu1 %15612 }
 0x518   :  { %v15603_v15 = vpop.permute.xlu0 %15602  ;;  %v13076_v39 = vpack.c.bf16 %v7622_v20, %v7499_v9  ;;  %v13078_v59 = vpack.c.bf16 %v7621_v49, %v7498_v18  ;;  %v7776_v30 = vsel %vm396_vm2, %v25076_v13, %v15520_v0  ;;  %v15614_v20 = vunpack.i.l.bf16 %v15613_v31 }
 0x519   :  { %v15604_v1 = vunpack.i.l.bf16 %v15603_v15  ;;  %v15605_v25 = vunpack.i.h.bf16 %v15603_v15  ;;  %v13034_v40 = vpack.c.bf16 %v7776_v30, %v25038_v54  ;;  %v21501_v54 = vpack.i.bf16 %v21382_v8, %v21211_v14 }
 0x51a   :  { %8129 = vrot.lane.b32.xlu0 %v21211_v14, %s16208_s1  ;;  %13077 = vmatprep.subr.bf16.mxu1 %v13076_v39  ;;  %v7900_v13 = vsel %vm700_vm4, %v15535_v58, %v15614_v20 }
 0x51b   :  { %15842 = vrot.lane.b32.xlu1 %v21471_v37, %s24721_s29  ;;  %13079 = vmatpush1.bf16.msra.mxu1 %v13078_v59  ;;  %v7777_v27 = vsel %vm396_vm2, %v15520_v0, %v15604_v1  ;;  %v7778_v49 = vsel %vm396_vm2, %v15604_v1, %v15605_v25 }
 0x51c   :  { %v21484_v26 = vpop.permute.xlu0 %15607  ;;  %v13032_v53 = vpack.c.bf16 %v7777_v27, %v20229_v3  ;;  %v21497_v3 = vpop.permute.xlu1 %15622  ;;  %v13082_v39 = vpack.c.bf16 %v7778_v49, %v20353_v51 }
 0x51d   :  { %v24537_v43 = vunpack.i.l.bf16 %v21484_v26  ;;  %v24529_v1 = vunpack.i.l.bf16 %v21497_v3  ;;  %v15610_v38 = vunpack.i.h.bf16 %v21484_v26 }
 0x51e   :  { %15847 = vrot.lane.b32.xlu0 %v21471_v37, %s16191_s15  ;;  %13033 = vmatprep.subr.bf16.mxu0 %v13032_v53  ;;  %v15866_v53 = vpack.i.bf16 %v21382_v8, %v21456_v55 }
 0x51f   :  { %8127 = vrot.lane.b32.xlu1 %v20962_v62, %s16208_s1  ;;  %13035 = vmatpush1.bf16.msra.mxu0 %v13034_v40  ;;  %v7779_v0 = vsel %vm396_vm2, %v15605_v25, %v24537_v43  ;;  %v15615_v25 = vunpack.i.h.bf16 %v15613_v31 }
 0x520   :  { %v15618_v18 = vpop.permute.xlu0 %15617  ;;  %v13080_v9 = vpack.c.bf16 %v7779_v0, %v20556_v5 }
 0x521   :  { %v15619_v15 = vunpack.i.l.bf16 %v15618_v18  ;;  %v15620_v59 = vunpack.i.h.bf16 %v15618_v18  ;;  %v7902_v58 = vsel %vm700_vm4, %v15615_v25, %v24529_v1  ;;  %v7901_v31 = vsel %vm700_vm4, %v15614_v20, %v15615_v25 }
 0x522   :  { %15857 = vrot.lane.b32.xlu0 %v21501_v54, %s16208_s1  ;;  %13081 = vmatprep.subr.bf16.mxu1 %v13080_v9 }
 0x523   :  { %8131 = vrot.lane.b32.xlu1 %v21382_v8, %s16208_s1  ;;  %13083 = vmatpush1.bf16.msra.mxu1 %v13082_v39  ;;  %v8023_v30 = vsel %vm5730_vm13, %v15540_v47, %v15619_v15  ;;  %v8024_v0 = vsel %vm5730_vm13, %v15619_v15, %v15620_v59 }
 0x524   :  { %v21516_v27 = vpop.permute.xlu0 %15627  ;;  %v13036_v40 = vpack.c.bf16 %v8023_v30, %v7900_v13  ;;  %v13086_v15 = vpack.c.bf16 %v8024_v0, %v7901_v31  ;;  %v25077_v30 = vunpack.i.l.bf16 %v21110_v48 }
 0x525   :  { %v24530_v49 = vunpack.i.l.bf16 %v21516_v27 }
 0x526   :  { %15867 = vrot.lane.b32.xlu0 %v15866_v53, %s16208_s1  ;;  %13037 = vmatprep.subr.bf16.mxu0 %v13036_v40  ;;  %v5494_v25 = vsel %vm396_vm2, %v25077_v30, %v15610_v38 }
 0x527   :  { %15852 = vrot.lane.b32.xlu1 %v21471_v37, %s16209_s23  ;;  %13039 = vmatpush1.bf16.msra.mxu0 %v13038_v41  ;;  %v8025_v47 = vsel %vm5730_vm13, %v15620_v59, %v24530_v49  ;;  %v13090_v48 = vpack.c.bf16 %v5494_v25, %v20353_v51  ;;  %v25084_v49 = vunpack.i.h.bf16 %v21163_v24 }
 0x528   :  { %v8118_v18 = vpop.permute.xlu0 %8117  ;;  %v13084_v9 = vpack.c.bf16 %v8025_v47, %v7902_v58 }
 0x529   :  { %v8145_v47 = vsel %vm5854_vm14, %v21035_v50, %v8118_v18  ;;  %v21567_v50 = vld [vmem:[%s24277_s3] sm:$0xff] }
 0x52a   :  { %15877 = vrot.lane.b32.xlu0 %v21501_v54, %s24633_s24  ;;  %13085 = vmatprep.subr.bf16.mxu1 %v13084_v9 }
 0x52b   :  { %15862 = vrot.lane.b32.xlu1 %v21501_v54, %s24629_s27  ;;  %13087 = vmatpush1.bf16.msra.mxu1 %v13086_v15 }
 0x52c   :  { %v15633_v45 = vpop.permute.xlu1 %15632  ;;  %v21540_v41 = vpop.permute.xlu0 %15637 }
 0x52d   :  { %v15634_v39 = vunpack.i.l.bf16 %v15633_v45  ;;  %v15635_v20 = vunpack.i.h.bf16 %v15633_v45  ;;  %v24528_v59 = vunpack.i.l.bf16 %v21540_v41 }
 0x52e   :  { %15887 = vrot.lane.b32.xlu0 %v15866_v53, %s24633_s24 }
 0x52f   :  { %15872 = vrot.lane.b32.xlu1 %v15866_v53, %s24629_s27  ;;  %v5495_v13 = vsel %vm396_vm2, %v15610_v38, %v15634_v39  ;;  %v5497_v9 = vsel %vm396_vm2, %v15635_v20, %v24528_v59  ;;  %v5496_v15 = vsel %vm396_vm2, %v15634_v39, %v15635_v20  ;;  %v21576_v39 = vld [vmem:[%s24277_s3 + $0x18] sm:$0xff]  ;;  %v15630_v20 = vunpack.i.h.bf16 %v21516_v27 }
 0x530   :  { %v8120_v40 = vpop.permute.xlu1 %8119  ;;  %v21549_v0 = vpop.permute.xlu0 %8123  ;;  %v13088_v31 = vpack.c.bf16 %v5495_v13, %v20556_v5  ;;  %v13136_v13 = vpack.c.bf16 %v5497_v9, %v20959_v28  ;;  %v13138_v25 = vpack.c.bf16 %v5496_v15, %v20815_v52 }
 0x531   :  { %v8146_v58 = vsel %vm5854_vm14, %v8118_v18, %v8120_v40 }
 0x532   :  { %15897 = vrot.lane.b32.xlu0 %v21501_v54, %s16211_s21  ;;  %8916 = vmatprep.subr.mxu0 %v8146_v58 }
 0x533   :  { %15882 = vrot.lane.b32.xlu1 %v21501_v54, %s16201_s20  ;;  %8917 = vmatpush1.msra.mxu0 %v8145_v47 }
 0x534   :  { %v8122_v38 = vpop.permute.xlu1 %8121  ;;  %v15648_v45 = vpop.permute.xlu0 %15647  ;;  %8933 = vmatmul.mubr.f32.vlgmr.msra.gmra.mrb[16].mxu0 %v21567_v50  ;;  %13089 = vmatprep.subr.bf16.mxu0 %v13088_v31 }
 0x535   :  { %13091 = vmatpush1.bf16.msra.mxu0 %v13090_v48  ;;  %v8148_v51 = vsel %vm5854_vm14, %v8122_v38, %v21549_v0  ;;  %v8147_v18 = vsel %vm5854_vm14, %v8120_v40, %v8122_v38  ;;  %11825 = vmatprep.mubr.msk.f32.mxu0 %vm25078_vm12, %v21576_v39  ;;  %v15649_v30 = vunpack.i.l.bf16 %v15648_v45  ;;  %v15625_v40 = vunpack.i.h.bf16 %v21497_v3  ;;  %v21592_v48 = vld [vmem:[%s24277_s3 + $0x10] sm:$0xff] }
 0x536   :  { %15907 = vrot.lane.b32.xlu0 %v15866_v53, %s16211_s21  ;;  %8993 = vmatprep.subr.mxu1 %v8148_v51  ;;  %vm25092_vm12 = vcmask 506880  }
 0x537   :  { %15892 = vrot.lane.b32.xlu1 %v15866_v53, %s16201_s20  ;;  %8994 = vmatpush1.msra.mxu1 %v8147_v18  ;;  %v25079_v53 = vunpack.i.l.bf16 %v21147_v29  ;;  %v5742_v51 = vsel %vm5730_vm13, %v15630_v20, %v15649_v30  ;;  %v25081_v18 = vunpack.i.l.bf16 %v21166_v57 }
 0x538   :  { %v15643_v58 = vpop.permute.xlu1 %15642  ;;  %v21586_v47 = vpop.permute.xlu0 %15657  ;;  %9010 = vmatmul.mubr.f32.vlgmr.msra.gmra.mrb[18].mxu1 %v21567_v50  ;;  %13137 = vmatprep.subr.bf16.mxu1 %v13136_v13 }
 0x539   :  { %v15644_v31 = vunpack.i.l.bf16 %v15643_v58  ;;  %13139 = vmatpush1.bf16.msra.mxu1 %v13138_v25  ;;  %8939 = vmatmul.mubr.f32.gmra.mrb[18].mxu0 %v21592_v48  ;;  %v5741_v9 = vsel %vm5730_vm13, %v25079_v53, %v15630_v20  ;;  %v15645_v15 = vunpack.i.h.bf16 %v15643_v58  ;;  %v5617_v29 = vsel %vm700_vm4, %v25081_v18, %v15625_v40 }
 0x53a   :  { %15912 = vrot.lane.b32.xlu0 %v21471_v37, %s24721_s29  ;;  %11827 = vmatprep.mubr.msk.f32.mxu1 %vm25080_vm15, %v21576_v39  ;;  %v24532_v13 = vunpack.i.l.bf16 %v21586_v47  ;;  %v15650_v58 = vunpack.i.h.bf16 %v15648_v45  ;;  %vm25093_vm15 = vmmov %vm25092_vm12 }
 0x53b   :  { %15902 = vrot.lane.b32.xlu1 %v21501_v54, %s16210_s25  ;;  %v5618_v38 = vsel %vm700_vm4, %v15625_v40, %v15644_v31  ;;  %11828 = vmatprep.mubr.msk.f32.mxu0 %vm25082_vm11, %v21097_v19  ;;  %v13094_v54 = vpack.c.bf16 %v5741_v9, %v5617_v29  ;;  %v5619_v20 = vsel %vm700_vm4, %v15644_v31, %v15645_v15  ;;  %vm25094_vm11 = vmmov %vm25073_vm3 }
 0x53c   :  { %v15668_v25 = vpop.permute.xlu0 %15667  ;;  %v13092_v53 = vpack.c.bf16 %v5742_v51, %v5618_v38  ;;  %9016 = vmatmul.mubr.f32.gmra.mrb[20].mxu1 %v21592_v48  ;;  %v5744_v9 = vsel %vm5730_vm13, %v15650_v58, %v24532_v13  ;;  %v5743_v51 = vsel %vm5730_vm13, %v15649_v30, %v15650_v58 }
 0x53d   :  { %v21613_v59 = vpop.permute.xlu1 %15652  ;;  %11830 = vmatprep.mubr.msk.f32.mxu1 %vm25083_vm8, %v21097_v19  ;;  %v15670_v40 = vunpack.i.h.bf16 %v15668_v25  ;;  %v15669_v45 = vunpack.i.l.bf16 %v15668_v25  ;;  %v13142_v1 = vpack.c.bf16 %v5743_v51, %v5619_v20  ;;  %vm25095_vm8 = vmmov %vm25092_vm12 }
 0x53e   :  { %v24531_v57 = vunpack.i.l.bf16 %v21613_v59  ;;  %15917 = vrot.lane.b32.xlu0 %v21471_v37, %s16191_s15  ;;  %13093 = vmatprep.subr.bf16.mxu0 %v13092_v53 }
 0x53f   :  { %6469 = vrot.lane.b32.xlu1 %v21456_v55, %s16210_s25  ;;  %13095 = vmatpush1.bf16.msra.mxu0 %v13094_v54 }
 0x540   :  { %v21623_v38 = vpop.permute.xlu0 %15677  ;;  %v5620_v19 = vsel %vm700_vm4, %v15645_v15, %v24531_v57  ;;  %v5988_v15 = vsel %vm25085_vm9, %v25084_v49, %v15669_v45  ;;  %v25086_v57 = vunpack.i.h.bf16 %v21187_v44  ;;  %vm25096_vm9 = vmmov %vm25095_vm8 }
 0x541   :  { %v15663_v18 = vpop.permute.xlu1 %15662  ;;  %v13140_v31 = vpack.c.bf16 %v5744_v9, %v5620_v19  ;;  %v24533_v54 = vunpack.i.h.bf16 %v21623_v38  ;;  %v15679_v25 = vunpack.i.l.bf16 %v21623_v38  ;;  %v5989_v19 = vsel %vm25087_vm1, %v15669_v45, %v15670_v40  ;;  %vm25097_vm1 = vmmov %vm25073_vm3 }
 0x542   :  { %v15665_v29 = vunpack.i.h.bf16 %v15663_v18  ;;  %v15664_v53 = vunpack.i.l.bf16 %v15663_v18 }
 0x543   :  { %13141 = vmatprep.subr.bf16.mxu1 %v13140_v31  ;;  %v5990_v49 = vsel %vm25088_vm0, %v15670_v40, %v15679_v25  ;;  %v5991_v44 = vsel %vm25089_vm7, %v15679_v25, %v24533_v54  ;;  %vm25098_vm0 = vmmov %vm25097_vm1 }
 0x544   :  { %v5865_v13 = vsel %vm5854_vm14, %v25086_v57, %v15664_v53  ;;  %13143 = vmatpush1.bf16.msra.mxu1 %v13142_v1  ;;  %v15688_v30 = vpop.permute.xlu0 %15687  ;;  %v5866_v58 = vsel %vm5854_vm14, %v15664_v53, %v15665_v29 }
 0x545   :  { %v21642_v20 = vpop.permute.xlu1 %15672  ;;  %v13096_v9 = vpack.c.bf16 %v5989_v19, %v5866_v58  ;;  %v13098_v51 = vpack.c.bf16 %v5988_v15, %v5865_v13  ;;  %v15690_v57 = vunpack.i.h.bf16 %v15688_v30  ;;  %v15689_v31 = vunpack.i.l.bf16 %v15688_v30 }
 0x546   :  { %v24534_v18 = vunpack.i.h.bf16 %v21642_v20  ;;  %v15674_v24 = vunpack.i.l.bf16 %v21642_v20 }
 0x547   :  { %13097 = vmatprep.subr.bf16.mxu0 %v13096_v9  ;;  %v25090_v9 = vunpack.i.h.bf16 %v21229_v11 }
 0x548   :  { %v5867_v1 = vsel %vm5854_vm14, %v15665_v29, %v15674_v24  ;;  %13099 = vmatpush1.bf16.msra.mxu0 %v13098_v51  ;;  %v21651_v45 = vpop.permute.xlu0 %15692  ;;  %v5868_v13 = vsel %vm5854_vm14, %v15674_v24, %v24534_v18  ;;  %v25091_v29 = vunpack.i.h.bf16 %v21176_v17  ;;  %v6235_v24 = vsel %vm25094_vm11, %v15689_v31, %v15690_v57  ;;  %vm25107_vm11 = vmmov %vm25098_vm0 }
 0x549   :  { %v15683_v53 = vpop.permute.xlu1 %15682  ;;  %v13144_v15 = vpack.c.bf16 %v5991_v44, %v5868_v13  ;;  %v13146_v58 = vpack.c.bf16 %v5990_v49, %v5867_v1  ;;  %v6234_v25 = vsel %vm25073_vm3, %v25090_v9, %v15689_v31  ;;  %v24536_v1 = vunpack.i.h.bf16 %v21651_v45  ;;  %vm25103_vm3 = vmmov %vm25089_vm7 }
 0x54a   :  { %v15685_v40 = vunpack.i.h.bf16 %v15683_v53  ;;  %v15684_v19 = vunpack.i.l.bf16 %v15683_v53  ;;  %v15694_v17 = vunpack.i.l.bf16 %v21651_v45 }
 0x54b   :  { %13145 = vmatprep.subr.bf16.mxu1 %v13144_v15 }
 0x54c   :  { %v6111_v30 = vsel %vm25092_vm12, %v25091_v29, %v15684_v19  ;;  %13147 = vmatpush1.bf16.msra.mxu1 %v13146_v58  ;;  %v15703_v51 = vpop.permute.xlu0 %15702  ;;  %v6112_v54 = vsel %vm25093_vm15, %v15684_v19, %v15685_v40  ;;  %v6114_v58 = vsel %vm25095_vm8, %v15694_v17, %v24536_v1  ;;  %v6113_v19 = vsel %vm25096_vm9, %v15685_v40, %v15694_v17  ;;  %vm25104_vm12 = vmmov %vm25103_vm3 }
 0x54d   :  { %v21664_v18 = vpop.permute.xlu1 %5294  ;;  %v13100_v49 = vpack.c.bf16 %v6235_v24, %v6112_v54  ;;  %v13102_v44 = vpack.c.bf16 %v6234_v25, %v6111_v30  ;;  %v15704_v15 = vunpack.i.l.bf16 %v15703_v51  ;;  %v15705_v9 = vunpack.i.h.bf16 %v15703_v51  ;;  %vm25106_vm15 = vmmov %vm25095_vm8 }
 0x54e   :  { %v5316_v11 = vsel %vm852_vm5, %v21446_v2, %v21664_v18  ;;  %v15640_v40 = vunpack.i.h.bf16 %v21540_v41  ;;  %vm25108_vm9 = vmmov %vm25098_vm0 }
 0x54f   :  { %v21672_v13 = vmax.f32 %v20774_v63, %v5316_v11  ;;  %13101 = vmatprep.subr.bf16.mxu0 %v13100_v49 }
 0x550   :  { %13103 = vmatpush1.bf16.msra.mxu0 %v13102_v44  ;;  %v21674_v53 = vpop.permute.xlu0 %15712 }
 0x551   :  { %v21676_v31 = vpop.permute.xlu1 %15697  ;;  %6627 = vrot.lane.b32.xlu1 %v21672_v13, %s24721_s29  ;;  %6750 = vrot.lane.b32.xlu0 %v21672_v13, %s16191_s15  ;;  %v21686_v63 = vpack.i.bf16 %v21672_v13, %v21456_v55 }
 0x552   :  { %v24535_v2 = vunpack.i.h.bf16 %v21676_v31  ;;  %v15699_v54 = vunpack.i.l.bf16 %v21676_v31 }
 0x554   :  { %v6236_v25 = vsel %vm25097_vm1, %v15690_v57, %v15699_v54  ;;  %v15723_v29 = vpop.permute.xlu0 %15722  ;;  %v6237_v30 = vsel %vm25098_vm0, %v15699_v54, %v24535_v2  ;;  %v6358_v57 = vsel %vm6347_vm10, %v15505_v34, %v15704_v15  ;;  %v15714_v54 = vunpack.i.l.bf16 %v21674_v53  ;;  %vm25109_vm1 = vmmov %vm25098_vm0 }
 0x555   :  { %v15708_v24 = vpop.permute.xlu1 %15707  ;;  %15922 = vrot.lane.b32.xlu1 %v21471_v37, %s16209_s23  ;;  %15927 = vrot.lane.b32.xlu0 %v21686_v63, %s16208_s1  ;;  %v15724_v49 = vunpack.i.l.bf16 %v15723_v29  ;;  %v13148_v44 = vpack.c.bf16 %v6237_v30, %v6114_v58  ;;  %v13150_v11 = vpack.c.bf16 %v6236_v25, %v6113_v19  ;;  %v15715_v2 = vunpack.i.h.bf16 %v21674_v53 }
 0x556   :  { %v15710_v51 = vunpack.i.h.bf16 %v15708_v24  ;;  %v15709_v17 = vunpack.i.l.bf16 %v15708_v24  ;;  %v6359_v19 = vsel %vm6347_vm10, %v15704_v15, %v15705_v9 }
 0x557   :  { %13149 = vmatprep.subr.bf16.mxu1 %v13148_v44  ;;  %v6640_v61 = vsel %vm396_vm2, %v15640_v40, %v15724_v49  ;;  %v6360_v44 = vsel %vm6347_vm10, %v15705_v9, %v15714_v54  ;;  %v6361_v7 = vsel %vm6347_vm10, %v15714_v54, %v15715_v2  ;;  %v15655_v54 = vunpack.i.h.bf16 %v21613_v59 }
 0x558   :  { %v6482_v1 = vsel %vm6471_vm6, %v15510_v35, %v15709_v17  ;;  %13151 = vmatpush1.bf16.msra.mxu1 %v13150_v11  ;;  %v21709_v58 = vpop.permute.xlu0 %15732  ;;  %v6483_v25 = vsel %vm6471_vm6, %v15709_v17, %v15710_v51  ;;  %v6639_v35 = vsel %vm396_vm2, %v15519_v16, %v15640_v40  ;;  %v15725_v11 = vunpack.i.h.bf16 %v15723_v29 }
 0x559   :  { %v21713_v30 = vpop.permute.xlu1 %15717  ;;  %6873 = vrot.lane.b32.xlu1 %v21672_v13, %s16209_s23  ;;  %15937 = vrot.lane.b32.xlu0 %v21686_v63, %s24633_s24  ;;  %v13104_v33 = vpack.c.bf16 %v6483_v25, %v6359_v19  ;;  %v13106_v34 = vpack.c.bf16 %v6482_v1, %v6358_v57  ;;  %v13108_v1 = vpack.c.bf16 %v6640_v61, %v20815_v52  ;;  %v15734_v25 = vunpack.i.l.bf16 %v21709_v58 }
 0x55a   :  { %v15720_v15 = vunpack.i.h.bf16 %v21713_v30  ;;  %v15719_v24 = vunpack.i.l.bf16 %v21713_v30  ;;  %v13110_v57 = vpack.c.bf16 %v6639_v35, %v20556_v5  ;;  %v6641_v19 = vsel %vm396_vm2, %v15724_v49, %v15725_v11 }
 0x55b   :  { %13105 = vmatprep.subr.bf16.mxu0 %v13104_v33  ;;  %v15660_v61 = vunpack.i.h.bf16 %v21586_v47 }
 0x55c   :  { %v6484_v17 = vsel %vm6471_vm6, %v15710_v51, %v15719_v24  ;;  %13107 = vmatpush1.bf16.msra.mxu0 %v13106_v34  ;;  %v21727_v43 = vpop.permute.xlu0 %15742  ;;  %v6485_v16 = vsel %vm6471_vm6, %v15719_v24, %v15720_v15  ;;  %v13158_v24 = vpack.c.bf16 %v6641_v19, %v20959_v28  ;;  %v15735_v19 = vunpack.i.h.bf16 %v21709_v58 }
 0x55d   :  { %15932 = vrot.lane.b32.xlu1 %v21686_v63, %s24629_s27  ;;  %v21738_v9 = vpop.permute.xlu1 %15727  ;;  %15947 = vrot.lane.b32.xlu0 %v21686_v63, %s16211_s21  ;;  %v13152_v29 = vpack.c.bf16 %v6485_v16, %v6361_v7  ;;  %v13154_v40 = vpack.c.bf16 %v6484_v17, %v6360_v44  ;;  %v25099_v44 = vunpack.i.l.bf16 %v21282_v22  ;;  %v6763_v16 = vsel %vm700_vm4, %v15655_v54, %v15734_v25 }
 0x55e   :  { %v15729_v51 = vunpack.i.l.bf16 %v21738_v9  ;;  %13109 = vmatprep.subr.bf16.mxu0 %v13108_v1 }
 0x55f   :  { %13153 = vmatprep.subr.bf16.mxu1 %v13152_v29  ;;  %v6762_v17 = vsel %vm700_vm4, %v25099_v44, %v15655_v54 }
 0x560   :  { %13111 = vmatpush1.bf16.msra.mxu0 %v13110_v57  ;;  %13155 = vmatpush1.bf16.msra.mxu1 %v13154_v40  ;;  %v15753_v33 = vpop.permute.xlu0 %15752  ;;  %v6642_v34 = vsel %vm396_vm2, %v15725_v11, %v15729_v51  ;;  %v24540_v11 = vunpack.i.l.bf16 %v21727_v43  ;;  %v25100_v40 = vunpack.i.l.bf16 %v21328_v23 }
 0x561   :  { %15942 = vrot.lane.b32.xlu1 %v21686_v63, %s16201_s20  ;;  %v15738_v5 = vpop.permute.xlu1 %15737  ;;  %7611 = vrot.lane.b32.xlu0 %v21672_v13, %s16210_s25  ;;  %v13156_v49 = vpack.c.bf16 %v6642_v34, %v20962_v62  ;;  %v15754_v54 = vunpack.i.l.bf16 %v15753_v33  ;;  %v15755_v44 = vunpack.i.h.bf16 %v15753_v33 }
 0x562   :  { %v15739_v35 = vunpack.i.l.bf16 %v15738_v5  ;;  %v15740_v1 = vunpack.i.h.bf16 %v15738_v5  ;;  %v6885_v57 = vsel %vm5730_vm13, %v25100_v40, %v15660_v61  ;;  %v6765_v58 = vsel %vm700_vm4, %v15735_v19, %v24540_v11 }
 0x563   :  { %13157 = vmatprep.subr.bf16.mxu1 %v13156_v49  ;;  %v13114_v49 = vpack.c.bf16 %v6885_v57, %v6762_v17  ;;  %v25101_v40 = vunpack.i.h.bf16 %v21320_v12 }
 0x564   :  { %13159 = vmatpush1.bf16.msra.mxu1 %v13158_v24  ;;  %v21761_v7 = vpop.permute.xlu0 %15762  ;;  %v6886_v29 = vsel %vm5730_vm13, %v15660_v61, %v15739_v35  ;;  %v6887_v24 = vsel %vm5730_vm13, %v15739_v35, %v15740_v1  ;;  %v6764_v61 = vsel %vm700_vm4, %v15734_v25, %v15735_v19 }
 0x565   :  { %15952 = vrot.lane.b32.xlu1 %v21471_v37, %s16210_s25  ;;  %v21771_v22 = vpop.permute.xlu1 %15747  ;;  %v13112_v34 = vpack.c.bf16 %v6886_v29, %v6763_v16  ;;  %v13162_v29 = vpack.c.bf16 %v6887_v24, %v6764_v61  ;;  %v7008_v57 = vsel %vm5854_vm14, %v25101_v40, %v15754_v54  ;;  %v21807_v40 = vpop.f32.mrb[10].mxu1 }
 0x566   :  { %v24538_v5 = vunpack.i.l.bf16 %v21771_v22 }
 0x567   :  { %13113 = vmatprep.subr.bf16.mxu0 %v13112_v34  ;;  %v15764_v34 = vunpack.i.l.bf16 %v21761_v7 }
 0x568   :  { %13115 = vmatpush1.bf16.msra.mxu0 %v13114_v49  ;;  %v21775_v23 = vpop.permute.xlu0 %15772  ;;  %v6888_v37 = vsel %vm5730_vm13, %v15740_v1, %v24538_v5  ;;  %v15765_v49 = vunpack.i.h.bf16 %v21761_v7  ;;  %v25102_v1 = vunpack.i.h.bf16 %v21384_v60 }
 0x569   :  { %15957 = vrot.lane.b32.xlu1 %v21686_v63, %s24721_s29  ;;  %v15758_v35 = vpop.permute.xlu1 %15757  ;;  %v13160_v17 = vpack.c.bf16 %v6888_v37, %v6765_v58  ;;  %v7009_v58 = vsel %vm5854_vm14, %v15754_v54, %v15755_v44  ;;  %v7010_v54 = vsel %vm5854_vm14, %v15755_v44, %v15764_v34 }
 0x56a   :  { %v15760_v16 = vunpack.i.h.bf16 %v15758_v35  ;;  %v15759_v33 = vunpack.i.l.bf16 %v15758_v35 }
 0x56b   :  { %13161 = vmatprep.subr.bf16.mxu1 %v13160_v17 }
 0x56c   :  { %v7131_v25 = vsel %vm25089_vm7, %v25102_v1, %v15759_v33  ;;  %13163 = vmatpush1.bf16.msra.mxu1 %v13162_v29  ;;  %v5297_v19 = vpop.permute.xlu0 %5296  ;;  %v7132_v37 = vsel %vm25103_vm3, %v15759_v33, %v15760_v16  ;;  %v15774_v33 = vunpack.i.l.bf16 %v21775_v23  ;;  %v15775_v1 = vunpack.i.h.bf16 %v21775_v23  ;;  %vm25110_vm7 = vmmov %vm25095_vm8 }
 0x56d   :  { %15962 = vrot.lane.b32.xlu1 %v21686_v63, %s16191_s15  ;;  %v21798_v12 = vpop.permute.xlu1 %15767  ;;  %v5317_v24 = vsel %vm852_vm5, %v21664_v18, %v5297_v19  ;;  %v13116_v61 = vpack.c.bf16 %v7132_v37, %v7009_v58  ;;  %v13118_v35 = vpack.c.bf16 %v7131_v25, %v7008_v57  ;;  %vm25105_vm5 = vmmov %vm25103_vm3  ;;  %v21820_v57 = vpop.f32.mrb[11].mxu1 }
 0x56e   :  { %v15770_v60 = vunpack.i.h.bf16 %v21798_v12  ;;  %v15769_v17 = vunpack.i.l.bf16 %v21798_v12  ;;  %v5357_v29 = vmax.f32 %v21155_v32, %v5317_v24  ;;  %v7011_v32 = vsel %vm5854_vm14, %v15764_v34, %v15765_v49  ;;  %vm25111_vm3 = vmmov %vm25110_vm7 }
 0x56f   :  { %13117 = vmatprep.subr.bf16.mxu0 %v13116_v61  ;;  %v7254_v37 = vsel %vm25106_vm15, %v15575_v4, %v15774_v33 }
 0x570   :  { %v7133_v5 = vsel %vm25104_vm12, %v15760_v16, %v15769_v17  ;;  %13119 = vmatpush1.bf16.msra.mxu0 %v13118_v35  ;;  %7768 = vrot.lane.b32.xlu0 %v5357_v29, %s24721_s29  ;;  %v21812_v18 = vpop.permute.xlu0 %15787  ;;  %v7134_v44 = vsel %vm25105_vm5, %v15769_v17, %v15770_v60  ;;  %v7255_v35 = vsel %vm25095_vm8, %v15774_v33, %v15775_v1  ;;  %v21844_v33 = vpop.f32.mrb[12].mxu1  ;;  %vm25116_vm12 = vcmask 588800  }
 0x571   :  { %v15778_v25 = vpop.permute.xlu1 %15777  ;;  %7891 = vrot.lane.b32.xlu1 %v5357_v29, %s16191_s15  ;;  %v13164_v23 = vpack.c.bf16 %v7134_v44, %v7011_v32  ;;  %v13166_v16 = vpack.c.bf16 %v7133_v5, %v7010_v54  ;;  %v15790_v24 = vunpack.i.h.bf16 %v21812_v18  ;;  %v15789_v34 = vunpack.i.l.bf16 %v21812_v18  ;;  %vm25118_vm5 = vmmov %vm25116_vm12 }
 0x572   :  { %v15780_v19 = vunpack.i.h.bf16 %v15778_v25  ;;  %v15779_v58 = vunpack.i.l.bf16 %v15778_v25  ;;  %vm25120_vm15 = vmmov %vm25118_vm5  ;;  %vm25125_vm8 = vcmask 523264  }
 0x573   :  { %13165 = vmatprep.subr.bf16.mxu1 %v13164_v23 }
 0x574   :  { %v7377_v61 = vsel %vm25107_vm11, %v15580_v21, %v15779_v58  ;;  %13167 = vmatpush1.bf16.msra.mxu1 %v13166_v16  ;;  %15967 = vrot.lane.b32.xlu0 %v21686_v63, %s16209_s23  ;;  %v15798_v5 = vpop.permute.xlu0 %15797  ;;  %v7378_v6 = vsel %vm25108_vm9, %v15779_v58, %v15780_v19  ;;  %v7380_v63 = vsel %vm25109_vm1, %v15789_v34, %v15790_v24  ;;  %vm25122_vm11 = vmmov %vm25118_vm5 }
 0x575   :  { %v21835_v17 = vpop.permute.xlu1 %15782  ;;  %8133 = vrot.lane.b32.xlu1 %v21456_v55, %s16208_s1  ;;  %v13120_v4 = vpack.c.bf16 %v7378_v6, %v7255_v35  ;;  %v13122_v54 = vpack.c.bf16 %v7377_v61, %v7254_v37  ;;  %v15799_v32 = vunpack.i.l.bf16 %v15798_v5  ;;  %v7379_v44 = vsel %vm25098_vm0, %v15780_v19, %v15789_v34  ;;  %v21854_v37 = vpop.f32.mrb[13].mxu1  ;;  %vm25126_vm9 = vmmov %vm25125_vm8 }
 0x576   :  { %v15785_v42 = vunpack.i.h.bf16 %v21835_v17  ;;  %v15784_v21 = vunpack.i.l.bf16 %v21835_v17  ;;  %v15800_v23 = vunpack.i.h.bf16 %v15798_v5  ;;  %vm25127_vm1 = vmmov %vm25125_vm8 }
 0x577   :  { %13121 = vmatprep.subr.bf16.mxu0 %v13120_v4  ;;  %v7623_v5 = vsel %vm6471_vm6, %v15600_v56, %v15799_v32  ;;  %vm25128_vm0 = vmmov %vm25127_vm1 }
 0x578   :  { %v7256_v25 = vsel %vm25110_vm7, %v15775_v1, %v15784_v21  ;;  %13123 = vmatpush1.bf16.msra.mxu0 %v13122_v54  ;;  %8014 = vrot.lane.b32.xlu0 %v5357_v29, %s16209_s23  ;;  %v21849_v16 = vpop.permute.xlu0 %15807  ;;  %v7257_v58 = vsel %vm25111_vm3, %v15784_v21, %v15785_v42  ;;  %v8620_v1 = vld [vmem:[%s24278_s4 + $0x8] sm:$0xff]  ;;  %v7624_v10 = vsel %vm6471_vm6, %v15799_v32, %v15800_v23  ;;  %vm25130_vm7 = vmmov %vm25111_vm3  ;;  %vm25132_vm3 = vcmask 490496  }
 0x579   :  { %v15793_v61 = vpop.permute.xlu1 %15792  ;;  %8137 = vrot.lane.b32.xlu1 %v5357_v29, %s16208_s1  ;;  %v13168_v35 = vpack.c.bf16 %v7380_v63, %v7257_v58  ;;  %v13170_v6 = vpack.c.bf16 %v7379_v44, %v7256_v25  ;;  %v15809_v4 = vunpack.i.l.bf16 %v21849_v16  ;;  %v15810_v29 = vunpack.i.h.bf16 %v21849_v16 }
 0x57a   :  { %v15795_v19 = vunpack.i.h.bf16 %v15793_v61  ;;  %v15794_v34 = vunpack.i.l.bf16 %v15793_v61  ;;  %v15730_v61 = vunpack.i.h.bf16 %v21738_v9 }
 0x57b   :  { %13169 = vmatprep.subr.bf16.mxu1 %v13168_v35  ;;  %v7625_v35 = vsel %vm6471_vm6, %v15800_v23, %v15809_v4 }
 0x57c   :  { %v7500_v54 = vsel %vm6347_vm10, %v15595_v46, %v15794_v34  ;;  %13171 = vmatpush1.bf16.msra.mxu1 %v13170_v6  ;;  %8135 = vrot.lane.b32.xlu0 %v21672_v13, %s16208_s1  ;;  %v21870_v21 = vpop.permute.xlu0 %15817  ;;  %v7501_v63 = vsel %vm6347_vm10, %v15794_v34, %v15795_v19 }
 0x57d   :  { %v21874_v56 = vpop.permute.xlu1 %15802  ;;  %v13124_v44 = vpack.c.bf16 %v7624_v10, %v7501_v63  ;;  %v13126_v25 = vpack.c.bf16 %v7623_v5, %v7500_v54  ;;  %8628 = vperm.xlu1 %15971, %v8620_v1   ;;  %v7626_v1 = vsel %vm6471_vm6, %v15809_v4, %v15810_v29  ;;  %v24541_v10 = vunpack.i.l.bf16 %v21870_v21 }
 0x57e   :  { %v24539_v46 = vunpack.i.h.bf16 %v21874_v56  ;;  %v15804_v58 = vunpack.i.l.bf16 %v21874_v56  ;;  %v25145_v16 = vunpack.i.l.bf16 %v21870_v21 }
 0x57f   :  { %13125 = vmatprep.subr.bf16.mxu0 %v13124_v44 }
 0x580   :  { %v7502_v32 = vsel %vm6347_vm10, %v15795_v19, %v15804_v58  ;;  %13127 = vmatpush1.bf16.msra.mxu0 %v13126_v25  ;;  %8623 = vperm.xlu0 %15035, %v8619_v36   ;;  %v15828_v6 = vpop.permute.xlu0 %15827  ;;  %v7503_v34 = vsel %vm6347_vm10, %v15804_v58, %v24539_v46  ;;  %v25112_v19 = vunpack.i.l.bf16 %v21484_v26  ;;  %v15750_v36 = vunpack.i.h.bf16 %v21771_v22 }
 0x581   :  { %v15813_v5 = vpop.permute.xlu1 %15812  ;;  %v13172_v54 = vpack.c.bf16 %v7626_v1, %v7503_v34  ;;  %v13174_v63 = vpack.c.bf16 %v7625_v35, %v7502_v32  ;;  %v15829_v46 = vunpack.i.l.bf16 %v15828_v6  ;;  %v15745_v32 = vunpack.i.h.bf16 %v21727_v43 }
 0x582   :  { %v15815_v23 = vunpack.i.h.bf16 %v15813_v5  ;;  %v15814_v44 = vunpack.i.l.bf16 %v15813_v5  ;;  %v7780_v25 = vsel %vm396_vm2, %v25112_v19, %v15730_v61  ;;  %v25113_v19 = vunpack.i.l.bf16 %v21516_v27 }
 0x583   :  { %13173 = vmatprep.subr.bf16.mxu1 %v13172_v54  ;;  %v13130_v54 = vpack.c.bf16 %v7780_v25, %v20815_v52  ;;  %v25114_v52 = vunpack.i.l.bf16 %v21497_v3 }
 0x584   :  { %v7782_v58 = vsel %vm396_vm2, %v15814_v44, %v15815_v23  ;;  %13175 = vmatpush1.bf16.msra.mxu1 %v13174_v63  ;;  %v21896_v11 = vpop.permute.xlu0 %15837  ;;  %v7781_v4 = vsel %vm396_vm2, %v15730_v61, %v15814_v44  ;;  %v7783_v35 = vsel %vm396_vm2, %v15815_v23, %v24541_v10  ;;  %v8026_v61 = vsel %vm5730_vm13, %v25113_v19, %v15750_v36 }
 0x585   :  { %v15823_v26 = vpop.permute.xlu1 %15822  ;;  %v13128_v34 = vpack.c.bf16 %v7781_v4, %v20959_v28  ;;  %v13176_v1 = vpack.c.bf16 %v7783_v35, %v21211_v14  ;;  %v13178_v63 = vpack.c.bf16 %v7782_v58, %v20962_v62  ;;  %v24542_v23 = vunpack.i.l.bf16 %v21896_v11 }
 0x586   :  { %v15824_v5 = vunpack.i.l.bf16 %v15823_v26  ;;  %v15825_v44 = vunpack.i.h.bf16 %v15823_v26  ;;  %v8027_v4 = vsel %vm5730_vm13, %v15750_v36, %v15829_v46  ;;  %v7903_v25 = vsel %vm700_vm4, %v25114_v52, %v15745_v32 }
 0x587   :  { %13129 = vmatprep.subr.bf16.mxu0 %v13128_v34  ;;  %13177 = vmatprep.subr.bf16.mxu1 %v13176_v1  ;;  %v15830_v58 = vunpack.i.h.bf16 %v15828_v6  ;;  %v13134_v34 = vpack.c.bf16 %v8026_v61, %v7903_v25  ;;  %v15820_v6 = vunpack.i.h.bf16 %v21870_v21  ;;  %v25115_v52 = vunpack.i.l.bf16 %v21540_v41 }
 0x588   :  { %13131 = vmatpush1.bf16.msra.mxu0 %v13130_v54  ;;  %13179 = vmatpush1.bf16.msra.mxu1 %v13178_v63  ;;  %v8126_v10 = vpop.permute.xlu0 %8125  ;;  %v7904_v28 = vsel %vm700_vm4, %v15745_v32, %v15824_v5  ;;  %v7905_v1 = vsel %vm700_vm4, %v15824_v5, %v15825_v44 }
 0x589   :  { %v21916_v27 = vpop.permute.xlu1 %15832  ;;  %v13132_v35 = vpack.c.bf16 %v8027_v4, %v7904_v28  ;;  %v8029_v3 = vsel %vm5730_vm13, %v15830_v58, %v24542_v23  ;;  %v8028_v32 = vsel %vm5730_vm13, %v15829_v46, %v15830_v58  ;;  %v8149_v46 = vsel %vm5854_vm14, %v21549_v0, %v8126_v10 }
 0x58a   :  { %v24543_v26 = vunpack.i.l.bf16 %v21916_v27  ;;  %v13182_v28 = vpack.c.bf16 %v8028_v32, %v7905_v1  ;;  %v15835_v0 = vunpack.i.h.bf16 %v21916_v27 }
 0x58b   :  { %13133 = vmatprep.subr.bf16.mxu0 %v13132_v35 }
 0x58c   :  { %13135 = vmatpush1.bf16.msra.mxu0 %v13134_v34  ;;  %v8130_v54 = vpop.permute.xlu0 %8129  ;;  %v7906_v36 = vsel %vm700_vm4, %v15825_v44, %v24543_v26  ;;  %v5498_v44 = vsel %vm396_vm2, %v25115_v52, %v15820_v6 }
 0x58d   :  { %v15843_v63 = vpop.permute.xlu1 %15842  ;;  %v13180_v19 = vpack.c.bf16 %v8029_v3, %v7906_v36  ;;  %v13186_v36 = vpack.c.bf16 %v5498_v44, %v20962_v62  ;;  %v25117_v44 = vmov 0.0|0.0  }
 0x58e   :  { %v15844_v61 = vunpack.i.l.bf16 %v15843_v63  ;;  %v15845_v35 = vunpack.i.h.bf16 %v15843_v63 }
 0x58f   :  { %13181 = vmatprep.subr.bf16.mxu1 %v13180_v19  ;;  %v15840_v19 = vunpack.i.h.bf16 %v21896_v11 }
 0x590   :  { %13183 = vmatpush1.bf16.msra.mxu1 %v13182_v28  ;;  %v15848_v5 = vpop.permute.xlu0 %15847  ;;  %v5499_v4 = vsel %vm396_vm2, %v15820_v6, %v15844_v61  ;;  %v5500_v41 = vsel %vm396_vm2, %v15844_v61, %v15845_v35 }
 0x591   :  { %v8128_v25 = vpop.permute.xlu1 %8127  ;;  %v13184_v58 = vpack.c.bf16 %v5499_v4, %v21211_v14  ;;  %v15849_v32 = vunpack.i.l.bf16 %v15848_v5  ;;  %v13233_v28 = vpack.c.bf16 %v5500_v41, %v21382_v8  ;;  %v25121_v41 = vunpack.i.l.bf16 %v21586_v47 }
 0x592   :  { %v8150_v34 = vsel %vm5854_vm14, %v8126_v10, %v8128_v25  ;;  %v15850_v10 = vunpack.i.h.bf16 %v15848_v5  ;;  %v8151_v62 = vsel %vm5854_vm14, %v8128_v25, %v8130_v54 }
 0x593   :  { %9070 = vmatprep.subr.mxu0 %v8150_v34 }
 0x594   :  { %9071 = vmatpush1.msra.mxu0 %v8149_v46  ;;  %v21936_v1 = vpop.permute.xlu0 %15857  ;;  %v5623_v25 = vsel %vm700_vm4, %v15849_v32, %v15850_v10 }
 0x595   :  { %v21939_v3 = vpop.permute.xlu1 %8131  ;;  %9087 = vmatmul.mubr.f32.vlgmr.msra.gmra.mrb[20].mxu0 %v21567_v50  ;;  %13185 = vmatprep.subr.bf16.mxu0 %v13184_v58  ;;  %v15859_v35 = vunpack.i.l.bf16 %v21936_v1  ;;  %v15860_v34 = vunpack.i.h.bf16 %v21936_v1 }
 0x596   :  { %13187 = vmatpush1.bf16.msra.mxu0 %v13186_v36  ;;  %v8152_v6 = vsel %vm5854_vm14, %v8130_v54, %v21939_v3  ;;  %11829 = vmatprep.mubr.msk.f32.mxu0 %vm25116_vm12, %v21576_v39  ;;  %v25119_v54 = vunpack.i.l.bf16 %v21613_v59  ;;  %v5622_v59 = vsel %vm700_vm4, %v15835_v0, %v15849_v32  ;;  %vm25133_vm12 = vmmov %vm25130_vm7 }
 0x597   :  { %9147 = vmatprep.subr.mxu1 %v8152_v6  ;;  %v5745_v6 = vsel %vm5730_vm13, %v25121_v41, %v15840_v19 }
 0x598   :  { %9148 = vmatpush1.msra.mxu1 %v8151_v62  ;;  %v21949_v63 = vpop.permute.xlu0 %15867  ;;  %v5621_v5 = vsel %vm700_vm4, %v25119_v54, %v15835_v0  ;;  %v25123_v0 = vunpack.i.h.bf16 %v21642_v20 }
 0x599   :  { %v15853_v61 = vpop.permute.xlu1 %15852  ;;  %9093 = vmatmul.mubr.f32.gmra.mrb[22].mxu0 %v21592_v48  ;;  %9164 = vmatmul.mubr.f32.vlgmr.msra.gmra.mrb[22].mxu1 %v21567_v50  ;;  %v16156_v50 = vld [vmem:[%s24277_s3 + $0x8] sm:$0xff]  ;;  %v13190_v54 = vpack.c.bf16 %v5745_v6, %v5621_v5  ;;  %v15869_v47 = vunpack.i.l.bf16 %v21949_v63  ;;  %v5870_v5 = vsel %vm5854_vm14, %v15859_v35, %v15860_v34 }
 0x59a   :  { %v15855_v4 = vunpack.i.h.bf16 %v15853_v61  ;;  %v15854_v52 = vunpack.i.l.bf16 %v15853_v61  ;;  %13232 = vmatprep.subr.bf16.mxu1 %v25117_v44  ;;  %11831 = vmatprep.mubr.msk.f32.mxu1 %vm25118_vm5, %v21576_v39  ;;  %v5869_v32 = vsel %vm5854_vm14, %v25123_v0, %v15859_v35  ;;  %vm25134_vm5 = vmmov %vm25132_vm3 }
 0x59b   :  { %13234 = vmatpush1.bf16.msra.mxu1 %v13233_v28  ;;  %11832 = vmatprep.mubr.msk.f32.mxu0 %vm25120_vm15, %v16156_v50  ;;  %vm25135_vm15 = vmmov %vm25130_vm7 }
 0x59c   :  { %v5747_v46 = vsel %vm5730_vm13, %v15854_v52, %v15855_v4  ;;  %v21969_v39 = vpop.permute.xlu0 %15877  ;;  %13235 = vmatprep.subr.bf16.mxu1 %v25117_v44  ;;  %v5746_v58 = vsel %vm5730_vm13, %v15840_v19, %v15854_v52  ;;  %v21974_v36 = vpop.f32.mrb[12].mxu0  ;;  %v15870_v19 = vunpack.i.h.bf16 %v21949_v63 }
 0x59d   :  { %v15863_v10 = vpop.permute.xlu1 %15862  ;;  %9170 = vmatmul.mubr.f32.gmra.mrb[24].mxu1 %v21592_v48  ;;  %v13188_v1 = vpack.c.bf16 %v5746_v58, %v5622_v59  ;;  %v13236_v62 = vpack.c.bf16 %v5747_v46, %v5623_v25  ;;  %v21980_v61 = vpop.f32.mrb[13].mxu0  ;;  %v25124_v48 = vunpack.i.h.bf16 %v21623_v38  ;;  %v15879_v35 = vunpack.i.l.bf16 %v21969_v39 }
 0x59e   :  { %v15865_v28 = vunpack.i.h.bf16 %v15863_v10  ;;  %v15864_v4 = vunpack.i.l.bf16 %v15863_v10  ;;  %11834 = vmatprep.mubr.msk.f32.mxu1 %vm25122_vm11, %v16156_v50  ;;  %v5871_v10 = vsel %vm5854_vm14, %v15860_v34, %v15869_v47  ;;  %vm25136_vm11 = vmmov %vm25130_vm7 }
 0x59f   :  { %13189 = vmatprep.subr.bf16.mxu0 %v13188_v1  ;;  %13237 = vmatpush1.bf16.msra.mxu1 %v13236_v62  ;;  %v22013_v62 = vsel %vm5854_vm14, %v15765_v49, %v15870_v19 }
 0x5a0   :  { %v5992_v52 = vsel %vm25125_vm8, %v25124_v48, %v15864_v4  ;;  %13191 = vmatpush1.bf16.msra.mxu0 %v13190_v54  ;;  %v21991_v25 = vpop.permute.xlu0 %15887  ;;  %v5993_v50 = vsel %vm25126_vm9, %v15864_v4, %v15865_v28  ;;  %13238 = vmatprep.subr.bf16.mxu1 %v25117_v44  ;;  %v21996_v20 = vpop.f32.mrb[14].mxu0  ;;  %v15880_v4 = vunpack.i.h.bf16 %v21969_v39  ;;  %vm25137_vm8 = vmmov %vm25132_vm3 }
 0x5a1   :  { %v13194_v46 = vpack.c.bf16 %v5992_v52, %v5869_v32  ;;  %v21998_v59 = vpop.permute.xlu1 %15872  ;;  %v13192_v58 = vpack.c.bf16 %v5993_v50, %v5870_v5  ;;  %v22000_v41 = vpop.f32.mrb[15].mxu0  ;;  %v15890_v12 = vunpack.i.h.bf16 %v21991_v25  ;;  %v15889_v5 = vunpack.i.l.bf16 %v21991_v25  ;;  %vm25138_vm9 = vmmov %vm25132_vm3 }
 0x5a2   :  { %v15875_v38 = vunpack.i.h.bf16 %v21998_v59  ;;  %v15874_v6 = vunpack.i.l.bf16 %v21998_v59  ;;  %v25131_v50 = vunpack.i.h.bf16 %v21676_v31 }
 0x5a3   :  { %13193 = vmatprep.subr.bf16.mxu0 %v13192_v58  ;;  %v22006_v1 = vpop.f32.mrb[14].mxu1 }
 0x5a4   :  { %v5994_v54 = vsel %vm25127_vm1, %v15865_v28, %v15874_v6  ;;  %v22022_v34 = vsel %vm25128_vm0, %v15770_v60, %v15875_v38  ;;  %13195 = vmatpush1.bf16.msra.mxu0 %v13194_v46  ;;  %v15898_v0 = vpop.permute.xlu0 %15897  ;;  %v22024_v32 = vpop.f32.mrb[15].mxu1  ;;  %v25129_v28 = vunpack.i.h.bf16 %v21651_v45  ;;  %v6116_v6 = vsel %vm25133_vm12, %v15879_v35, %v15880_v4  ;;  %vm25141_vm1 = vmmov %vm25128_vm0 }
 0x5a5   :  { %v13214_v7 = vpack.c.bf16 %v22022_v34, %v22013_v62  ;;  %v13239_v49 = vpack.c.bf16 %v5994_v54, %v5871_v10  ;;  %v15883_v47 = vpop.permute.xlu1 %15882  ;;  %v15900_v23 = vunpack.i.h.bf16 %v15898_v0  ;;  %vm25142_vm12 = vmmov %vm25130_vm7 }
 0x5a6   :  { %v15885_v48 = vunpack.i.h.bf16 %v15883_v47  ;;  %v15884_v39 = vunpack.i.l.bf16 %v15883_v47  ;;  %v6115_v52 = vsel %vm25130_vm7, %v25129_v28, %v15879_v35  ;;  %v22054_v35 = vsel %vm25135_vm15, %v15785_v42, %v15890_v12  ;;  %vm25214_vm15 = vmmov %vm25128_vm0 }
 0x5a7   :  { %13240 = vmatpush1.bf16.msra.mxu1 %v13239_v49  ;;  %v22032_v60 = vpop.f32.mrb[16].mxu1 }
 0x5a8   :  { %v6238_v46 = vsel %vm25132_vm3, %v25131_v50, %v15884_v39  ;;  %v22038_v58 = vpop.permute.xlu0 %15907  ;;  %v6239_v10 = vsel %vm25134_vm5, %v15884_v39, %v15885_v48  ;;  %13241 = vmatprep.subr.bf16.mxu1 %v25117_v44  ;;  %v22043_v45 = vpop.f32.mrb[17].mxu1  ;;  %v15899_v39 = vunpack.i.l.bf16 %v15898_v0  ;;  %v6117_v50 = vsel %vm25136_vm11, %v15880_v4, %v15889_v5  ;;  %vm25143_vm5 = vmmov %vm25132_vm3 }
 0x5a9   :  { %v13198_v54 = vpack.c.bf16 %v6238_v46, %v6115_v52  ;;  %v22045_v49 = vpop.permute.xlu1 %15892  ;;  %v13196_v47 = vpack.c.bf16 %v6239_v10, %v6116_v6  ;;  %v15909_v4 = vunpack.i.l.bf16 %v22038_v58  ;;  %vm25221_vm11 = vmmov %vm25128_vm0 }
 0x5aa   :  { %v15895_v28 = vunpack.i.h.bf16 %v22045_v49  ;;  %v15894_v31 = vunpack.i.l.bf16 %v22045_v49  ;;  %v6362_v18 = vsel %vm6347_vm10, %v15715_v2, %v15899_v39  ;;  %v6363_v5 = vsel %vm6347_vm10, %v15899_v39, %v15900_v23 }
 0x5ab   :  { %13197 = vmatprep.subr.bf16.mxu0 %v13196_v47  ;;  %v6364_v53 = vsel %vm6347_vm10, %v15900_v23, %v15909_v4 }
 0x5ac   :  { %v6240_v52 = vsel %vm25137_vm8, %v15885_v48, %v15894_v31  ;;  %v22063_v46 = vsel %vm25138_vm9, %v15790_v24, %v15895_v28  ;;  %13199 = vmatpush1.bf16.msra.mxu0 %v13198_v54  ;;  %v15913_v6 = vpop.permute.xlu0 %15912  ;;  %vm25222_vm8 = vmmov %vm25128_vm0 }
 0x5ad   :  { %v13218_v17 = vpack.c.bf16 %v22063_v46, %v22054_v35  ;;  %v13242_v42 = vpack.c.bf16 %v6240_v52, %v6117_v50  ;;  %v15903_v10 = vpop.permute.xlu1 %15902  ;;  %v15915_v47 = vunpack.i.h.bf16 %v15913_v6  ;;  %v15914_v26 = vunpack.i.l.bf16 %v15913_v6  ;;  %vm25223_vm9 = vmmov %vm25128_vm0 }
 0x5ae   :  { %v15905_v0 = vunpack.i.h.bf16 %v15903_v10  ;;  %v15904_v48 = vunpack.i.l.bf16 %v15903_v10 }
 0x5af   :  { %13243 = vmatpush1.bf16.msra.mxu1 %v13242_v42  ;;  %v6644_v31 = vsel %vm396_vm2, %v15914_v26, %v15915_v47  ;;  %v6643_v30 = vsel %vm396_vm2, %v15729_v51, %v15914_v26 }
 0x5b0   :  { %v6486_v24 = vsel %vm6471_vm6, %v15720_v15, %v15904_v48  ;;  %v6487_v54 = vsel %vm6471_vm6, %v15904_v48, %v15905_v0  ;;  %13244 = vmatprep.subr.bf16.mxu1 %v25117_v44  ;;  %v13204_v39 = vpack.c.bf16 %v6644_v31, %v21382_v8  ;;  %v13206_v42 = vpack.c.bf16 %v6643_v30, %v21211_v14  ;;  %v15918_v10 = vpop.permute.xlu0 %15917 }
 0x5b1   :  { %v13202_v50 = vpack.c.bf16 %v6486_v24, %v6362_v18  ;;  %v6470_v52 = vpop.permute.xlu1 %6469  ;;  %v13200_v6 = vpack.c.bf16 %v6487_v54, %v6363_v5  ;;  %v15920_v51 = vunpack.i.h.bf16 %v15918_v10  ;;  %v15919_v26 = vunpack.i.l.bf16 %v15918_v10 }
 0x5b2   :  { %v6488_v2 = vsel %vm6471_vm6, %v15905_v0, %v6470_v52  ;;  %v25139_v14 = vunpack.i.l.bf16 %v21727_v43  ;;  %v25140_v31 = vunpack.i.l.bf16 %v21771_v22 }
 0x5b3   :  { %v13245_v15 = vpack.c.bf16 %v6488_v2, %v6364_v53  ;;  %13201 = vmatprep.subr.bf16.mxu0 %v13200_v6 }
 0x5b4   :  { %13203 = vmatpush1.bf16.msra.mxu0 %v13202_v50  ;;  %v6766_v54 = vsel %vm700_vm4, %v25139_v14, %v15919_v26 }
 0x5b5   :  { %13205 = vmatprep.subr.bf16.mxu0 %v13204_v39  ;;  %13246 = vmatpush1.bf16.msra.mxu1 %v13245_v15 }
 0x5b6   :  { %13247 = vmatprep.subr.bf16.mxu1 %v25117_v44 }
 0x5b8   :  { %13207 = vmatpush1.bf16.msra.mxu0 %v13206_v42 }
 0x5c3   :  { %v6628_v23 = vpop.permute.xlu1 %6627  ;;  %v6751_v4 = vpop.permute.xlu0 %6750 }
 0x5c4   :  { %v6645_v0 = vsel %vm396_vm2, %v15915_v47, %v6628_v23  ;;  %v6767_v47 = vsel %vm700_vm4, %v15919_v26, %v15920_v51  ;;  %v6768_v30 = vsel %vm700_vm4, %v15920_v51, %v6751_v4 }
 0x5c5   :  { %v13248_v9 = vpack.c.bf16 %v6645_v0, %v21456_v55 }
 0x5c7   :  { %v15923_v48 = vpop.permute.xlu1 %15922  ;;  %v15928_v18 = vpop.permute.xlu0 %15927  ;;  %13249 = vmatpush1.bf16.msra.mxu1 %v13248_v9 }
 0x5c8   :  { %v15925_v24 = vunpack.i.h.bf16 %v15923_v48  ;;  %v15924_v5 = vunpack.i.l.bf16 %v15923_v48  ;;  %13250 = vmatprep.subr.bf16.mxu1 %v25117_v44  ;;  %v15930_v43 = vunpack.i.h.bf16 %v15928_v18  ;;  %v15929_v10 = vunpack.i.l.bf16 %v15928_v18 }
 0x5ca   :  { %v6889_v50 = vsel %vm5730_vm13, %v25140_v31, %v15924_v5  ;;  %v6890_v52 = vsel %vm5730_vm13, %v15924_v5, %v15925_v24  ;;  %v7014_v48 = vsel %vm5854_vm14, %v15929_v10, %v15930_v43 }
 0x5cb   :  { %v13210_v6 = vpack.c.bf16 %v6889_v50, %v6766_v54  ;;  %v6874_v53 = vpop.permute.xlu1 %6873  ;;  %v13208_v2 = vpack.c.bf16 %v6890_v52, %v6767_v47  ;;  %v15938_v39 = vpop.permute.xlu0 %15937  ;;  %v15910_v47 = vunpack.i.h.bf16 %v22038_v58 }
 0x5cc   :  { %v6891_v15 = vsel %vm5730_vm13, %v15925_v24, %v6874_v53  ;;  %v15940_v9 = vunpack.i.h.bf16 %v15938_v39  ;;  %v15939_v26 = vunpack.i.l.bf16 %v15938_v39  ;;  %v7013_v24 = vsel %vm5854_vm14, %v15870_v19, %v15929_v10 }
 0x5cd   :  { %v13251_v42 = vpack.c.bf16 %v6891_v15, %v6768_v30  ;;  %13209 = vmatprep.subr.bf16.mxu0 %v13208_v2  ;;  %v25144_v39 = vunpack.i.h.bf16 %v21874_v56 }
 0x5ce   :  { %13211 = vmatpush1.bf16.msra.mxu0 %v13210_v6  ;;  %v7260_v52 = vsel %vm25130_vm7, %v15939_v26, %v15940_v9  ;;  %v7259_v19 = vsel %vm25142_vm12, %v15890_v12, %v15939_v26  ;;  %vm25228_vm7 = vmmov %vm25128_vm0 }
 0x5cf   :  { %v15933_v22 = vpop.permute.xlu1 %15932  ;;  %13252 = vmatpush1.bf16.msra.mxu1 %v13251_v42  ;;  %v15948_v51 = vpop.permute.xlu0 %15947  ;;  %v7504_v62 = vsel %vm6347_vm10, %v25144_v39, %v15910_v47  ;;  %vm25235_vm12 = vmmov %vm25128_vm0 }
 0x5d0   :  { %v15935_v23 = vunpack.i.h.bf16 %v15933_v22  ;;  %v15934_v0 = vunpack.i.l.bf16 %v15933_v22  ;;  %13253 = vmatprep.subr.bf16.mxu1 %v25117_v44  ;;  %v15950_v6 = vunpack.i.h.bf16 %v15948_v51  ;;  %v15949_v53 = vunpack.i.l.bf16 %v15948_v51 }
 0x5d2   :  { %v7137_v4 = vsel %vm25141_vm1, %v15934_v0, %v15935_v23  ;;  %v7136_v18 = vsel %vm25128_vm0, %v15875_v38, %v15934_v0  ;;  %v7506_v34 = vsel %vm6347_vm10, %v15949_v53, %v15950_v6  ;;  %v7505_v25 = vsel %vm6347_vm10, %v15910_v47, %v15949_v53  ;;  %vm25213_vm10 = vmmov %vm25128_vm0 }
 0x5d3   :  { %v13254_v5 = vpack.c.bf16 %v7137_v4, %v7014_v48  ;;  %v15943_v14 = vpop.permute.xlu1 %15942  ;;  %v13212_v54 = vpack.c.bf16 %v7136_v18, %v7013_v24  ;;  %vm25224_vm1 = vmmov %vm25128_vm0 }
 0x5d4   :  { %v15945_v31 = vunpack.i.h.bf16 %v15943_v14  ;;  %v15944_v50 = vunpack.i.l.bf16 %v15943_v14  ;;  %v25147_v14 = vunpack.i.l.bf16 %v21896_v11 }
 0x5d5   :  { %13213 = vmatprep.subr.bf16.mxu0 %v13212_v54  ;;  %13255 = vmatpush1.bf16.msra.mxu1 %v13254_v5 }
 0x5d6   :  { %v7383_v63 = vsel %vm25132_vm3, %v15944_v50, %v15945_v31  ;;  %13215 = vmatpush1.bf16.msra.mxu0 %v13214_v7  ;;  %13256 = vmatprep.subr.bf16.mxu1 %v25117_v44  ;;  %v7382_v59 = vsel %vm25143_vm5, %v15895_v28, %v15944_v50  ;;  %v7612_v7 = vpop.permute.xlu0 %7611  ;;  %vm25232_vm3 = vmmov %vm25128_vm0 }
 0x5d7   :  { %v13257_v38 = vpack.c.bf16 %v7383_v63, %v7260_v52  ;;  %v15953_v58 = vpop.permute.xlu1 %15952  ;;  %v13216_v2 = vpack.c.bf16 %v7382_v59, %v7259_v19  ;;  %v16157_v59 = vld [vmem:[#allocation2 + $0x80] sm:$0xff]  ;;  %vm25277_vm5 = vmmov %vm25128_vm0 }
 0x5d8   :  { %v15955_v30 = vunpack.i.h.bf16 %v15953_v58  ;;  %v15954_v15 = vunpack.i.l.bf16 %v15953_v58 }
 0x5d9   :  { %13217 = vmatprep.subr.bf16.mxu0 %v13216_v2  ;;  %13258 = vmatpush1.bf16.msra.mxu1 %v13257_v38 }
 0x5da   :  { %v7627_v12 = vsel %vm6471_vm6, %v15810_v29, %v15954_v15  ;;  %v7629_v49 = vsel %vm6471_vm6, %v15955_v30, %v7612_v7  ;;  %13219 = vmatpush1.bf16.msra.mxu0 %v13218_v17  ;;  %13259 = vmatprep.subr.bf16.mxu1 %v25117_v44  ;;  %v7628_v56 = vsel %vm6471_vm6, %v15954_v15, %v15955_v30  ;;  %v16158_v30 = vld [vmem:[%s24277_s3] sm:$0xff]  ;;  %v16159_v15 = vld [vmem:[%s24277_s3 + $0x18] sm:$0xff]  ;;  %vm25212_vm6 = vmmov %vm25128_vm0 }
 0x5db   :  { %v13222_v28 = vpack.c.bf16 %v7627_v12, %v7504_v62  ;;  %v13260_v42 = vpack.c.bf16 %v7629_v49, %v7506_v34  ;;  %v15958_v43 = vpop.permute.xlu1 %15957  ;;  %v13220_v10 = vpack.c.bf16 %v7628_v56, %v7505_v25 }
 0x5dc   :  { %v15960_v22 = vunpack.i.h.bf16 %v15958_v43  ;;  %v15959_v23 = vunpack.i.l.bf16 %v15958_v43 }
 0x5dd   :  { %13221 = vmatprep.subr.bf16.mxu0 %v13220_v10  ;;  %13261 = vmatpush1.bf16.msra.mxu1 %v13260_v42 }
 0x5de   :  { %v7784_v29 = vsel %vm396_vm2, %v25145_v16, %v15959_v23  ;;  %13223 = vmatpush1.bf16.msra.mxu0 %v13222_v28  ;;  %v7785_v35 = vsel %vm396_vm2, %v15959_v23, %v15960_v22  ;;  %13262 = vmatprep.subr.bf16.mxu1 %v25117_v44 }
 0x5df   :  { %v13226_v46 = vpack.c.bf16 %v7784_v29, %v21382_v8  ;;  %v15963_v17 = vpop.permute.xlu1 %15962  ;;  %v13224_v0 = vpack.c.bf16 %v7785_v35, %v21456_v55  ;;  %v25146_v8 = vunpack.i.l.bf16 %v21916_v27 }
 0x5e0   :  { %v15965_v4 = vunpack.i.h.bf16 %v15963_v17  ;;  %v15964_v51 = vunpack.i.l.bf16 %v15963_v17 }
 0x5e1   :  { %13225 = vmatprep.subr.bf16.mxu0 %v13224_v0 }
 0x5e2   :  { %13227 = vmatpush1.bf16.msra.mxu0 %v13226_v46  ;;  %v7769_v9 = vpop.permute.xlu0 %7768  ;;  %v7907_v55 = vsel %vm700_vm4, %v25146_v8, %v15964_v51  ;;  %v7908_v31 = vsel %vm700_vm4, %v15964_v51, %v15965_v4 }
 0x5e3   :  { %v7786_v26 = vsel %vm396_vm2, %v15960_v22, %v7769_v9  ;;  %v7892_v48 = vpop.permute.xlu1 %7891 }
 0x5e4   :  { %v13263_v21 = vpack.c.bf16 %v7786_v26, %v21672_v13  ;;  %v7909_v53 = vsel %vm700_vm4, %v15965_v4, %v7892_v48  ;;  %vm25148_vm4 = vcmask 588800  }
 0x5e6   :  { %v15968_v24 = vpop.permute.xlu0 %15967  ;;  %13264 = vmatpush1.bf16.msra.mxu1 %v13263_v21 }
 0x5e7   :  { %v15970_v18 = vunpack.i.h.bf16 %v15968_v24  ;;  %v15969_v5 = vunpack.i.l.bf16 %v15968_v24  ;;  %13265 = vmatprep.subr.bf16.mxu1 %v25117_v44  ;;  %v8134_v50 = vpop.permute.xlu1 %8133 }
 0x5e8   :  { %v8153_v38 = vsel %vm5854_vm14, %v21939_v3, %v8134_v50  ;;  %v16160_v3 = vld [vmem:[%s24277_s3 + $0x10] sm:$0xff] }
 0x5e9   :  { %v8030_v54 = vsel %vm5730_vm13, %v25147_v14, %v15969_v5  ;;  %v8031_v13 = vsel %vm5730_vm13, %v15969_v5, %v15970_v18 }
 0x5ea   :  { %v13230_v47 = vpack.c.bf16 %v8030_v54, %v7907_v55  ;;  %v8015_v52 = vpop.permute.xlu0 %8014  ;;  %v13228_v6 = vpack.c.bf16 %v8031_v13, %v7908_v31 }
 0x5eb   :  { %v8032_v63 = vsel %vm5730_vm13, %v15970_v18, %v8015_v52  ;;  %v8138_v58 = vpop.permute.xlu1 %8137  ;;  %vm25149_vm13 = vmmov %vm25148_vm4 }
 0x5ec   :  { %v13266_v19 = vpack.c.bf16 %v8032_v63, %v7909_v53  ;;  %13229 = vmatprep.subr.bf16.mxu0 %v13228_v6 }
 0x5ed   :  { %13231 = vmatpush1.bf16.msra.mxu0 %v13230_v47 }
 0x5ee   :  { %v8136_v27 = vpop.permute.xlu0 %8135  ;;  %13267 = vmatpush1.bf16.msra.mxu1 %v13266_v19 }
 0x5ef   :  { %v8154_v11 = vsel %vm5854_vm14, %v8134_v50, %v8136_v27  ;;  %9301 = vmatprep.subr.mxu1 %v16157_v59  ;;  %v8155_v2 = vsel %vm5854_vm14, %v8136_v27, %v8138_v58  ;;  %vm25211_vm14 = vmmov %vm25128_vm0 }
 0x5f0   :  { %9224 = vmatprep.subr.mxu0 %v8154_v11 }
 0x5f1   :  { %9225 = vmatpush1.msra.mxu0 %v8153_v38 }
 0x5f2   :  { %9241 = vmatmul.mubr.f32.vlgmr.msra.gmra.mrb[24].mxu0 %v16158_v30  ;;  %9302 = vmatpush1.msra.mxu1 %v8155_v2 }
 0x5f3   :  { %9318 = vmatmul.mubr.f32.vlgmr.msra.gmra.mrb[26].mxu1 %v16158_v30  ;;  %11833 = vmatprep.mubr.msk.f32.mxu0 %vm25148_vm4, %v16159_v15  ;;  %v9911_v30 = vld [vmem:[%s24285_s11 + $0x80] sm:$0xff]  ;;  %vm25279_vm4 = vmmov %vm25128_vm0 }
 0x5f4   :  { %11835 = vmatprep.mubr.msk.f32.mxu1 %vm25149_vm13, %v16159_v15  ;;  %v9912_v15 = vld [vmem:[%s24285_s11 + $0x88] sm:$0xff]  ;;  %vm25283_vm13 = vmmov %vm25128_vm0 }
 0x5f6   :  { %9247 = vmatmul.mubr.f32.gmra.mrb[26].mxu0 %v16160_v3 }
 0x5f7   :  { %9323 = vmatmul.mubr.f32.gmra.mrb[28].mxu1 %v16160_v3  ;;  %v9895_v3 = vld [vmem:[%s24285_s11] sm:$0xff] }
 0x5fc   :  { %v22170_v39 = vpop.permute.xlu1 %8628 }
 0x5fd   :  { %v22174_v62 = vadd.f32 %v21854_v37, %v22170_v39  ;;  %v22178_v34 = vadd.f32 %v21996_v20, %v22170_v39  ;;  %v22192_v49 = vadd.f32 %v22032_v60, %v22170_v39  ;;  %v22200_v20 = vadd.f32 %v22043_v45, %v22170_v39 }
 0x5fe   :  { %v22225_v10 = vadd.f32 %v21844_v33, %v22170_v39 }
 0x5ff   :  { %v22180_v7 = vpop.permute.xlu0 %8623  ;;  %v24555_v28 = vmax.f32 %v22174_v62, 0.0  ;;  %v24553_v22 = vmax.f32 %v22192_v49, 0.0  ;;  %v24549_v23 = vmax.f32 %v22200_v20, 0.0 }
 0x600   :  { %v22184_v25 = vadd.f32 %v21807_v40, %v22180_v7  ;;  %v22188_v12 = vadd.f32 %v21980_v61, %v22180_v7  ;;  %v22196_v37 = vadd.f32 %v21820_v57, %v22180_v7  ;;  %v24556_v61 = vmax.f32 %v22178_v34, 0.0 }
 0x601   :  { %v22208_v60 = vadd.f32 %v22006_v1, %v22180_v7  ;;  %v22212_v57 = vadd.f32 %v22024_v32, %v22180_v7  ;;  %v22216_v45 = vadd.f32 %v21974_v36, %v22180_v7  ;;  %v22229_v1 = vadd.f32 %v22000_v41, %v22170_v39 }
 0x602   :  { %v24561_v56 = vmax.f32 %v22184_v25, 0.0  ;;  %v24560_v40 = vmax.f32 %v22188_v12, 0.0  ;;  %v24563_v42 = vmax.f32 %v22196_v37, 0.0  ;;  %v15987_v36 = vpack.i.bf16 %v24556_v61, %v24555_v28  ;;  %v9906_v28 = vld [vmem:[%s24285_s11 + $0x58] sm:$0xff] }
 0x603   :  { %v24562_v32 = vmax.f32 %v22216_v45, 0.0  ;;  %v24559_v33 = vmax.f32 %v22208_v60, 0.0  ;;  %v24554_v16 = vmax.f32 %v22212_v57, 0.0  ;;  %v24558_v46 = vmax.f32 %v22225_v10, 0.0 }
 0x604   :  { %v15977_v43 = vpack.i.bf16 %v24561_v56, %v24560_v40  ;;  %v24557_v17 = vmax.f32 %v22229_v1, 0.0  ;;  %v15997_v0 = vpack.i.bf16 %v24549_v23, %v24553_v22  ;;  %v9955_v40 = vld [vmem:[%s24285_s11 + $0x1e0] sm:$0xff]  ;;  %v9956_v56 = vld [vmem:[%s24285_s11 + $0x1e8] sm:$0xff] }
 0x605   :  { %v15972_v41 = vpack.i.bf16 %v24562_v32, %v24563_v42  ;;  %v15982_v9 = vpack.i.bf16 %v24554_v16, %v24559_v33  ;;  %v9905_v16 = vld [vmem:[%s24285_s11 + $0x50] sm:$0xff]  ;;  %v9908_v33 = vld [vmem:[%s24285_s11 + $0x68] sm:$0xff]  ;;  %v22562_v44 = vpack.c.bf16 %v9956_v56, %v9955_v40 }
 0x606   :  { %15978 = vrot.lane.b32.xlu1 %v15977_v43, %s24721_s29  ;;  %v15992_v18 = vpack.i.bf16 %v24558_v46, %v24557_v17  ;;  %v22325_v43 = vpack.c.bf16 %v9912_v15, %v9911_v30  ;;  %v9930_v15 = vld [vmem:[%s24285_s11 + $0x118] sm:$0xff]  ;;  %v22527_v17 = vpack.c.bf16 %v9906_v28, %v9905_v16  ;;  %v9923_v28 = vld [vmem:[%s24285_s11 + $0xe0] sm:$0xff]  ;;  %v9924_v16 = vld [vmem:[%s24285_s11 + $0xe8] sm:$0xff] }
 0x607   :  { %v8934_v29 = vpop.f32.mrb[16].mxu0  ;;  %15973 = vrot.lane.b32.xlu0 %v15972_v41, %s24721_s29  ;;  %v9943_v41 = vld [vmem:[%s24285_s11 + $0x180] sm:$0xff]  ;;  %25166 = vst [vmem:[#allocation27_spill] sm:$0xff] %v22562_v44 }
 0x608   :  { %v8936_v35 = vpop.f32.mrb[17].mxu0  ;;  %v22258_v26 = vadd.f32 %v8934_v29, %v22180_v7  ;;  %v9944_v29 = vld [vmem:[%s24285_s11 + $0x188] sm:$0xff]  ;;  %13269 = vmatprep.subr.bf16.mxu0 %v22325_v43  ;;  %25162 = vst [vmem:[#allocation23_spill] sm:$0xff] %v22527_v17 }
 0x609   :  { %v22261_v48 = vadd.f32 %v8936_v35, %v22180_v7 }
 0x60a   :  { %15988 = vrot.lane.b32.xlu1 %v15987_v36, %s24721_s29  ;;  %v24552_v31 = vmax.f32 %v22258_v26, 0.0  ;;  %v9896_v36 = vld [vmem:[%s24285_s11 + $0x8] sm:$0xff] }
 0x60b   :  { %v9011_v21 = vpop.f32.mrb[18].mxu1  ;;  %15983 = vrot.lane.b32.xlu0 %v15982_v9, %s24721_s29  ;;  %v24551_v13 = vmax.f32 %v22261_v48, 0.0  ;;  %v22336_v35 = vpack.c.bf16 %v9896_v36, %v9895_v3  ;;  %v9927_v9 = vld [vmem:[%s24285_s11 + $0x100] sm:$0xff]  ;;  %v9916_v36 = vld [vmem:[%s24285_s11 + $0xa8] sm:$0xff] }
 0x60c   :  { %v22264_v4 = vadd.f32 %v9011_v21, %v22180_v7  ;;  %v9013_v51 = vpop.f32.mrb[19].mxu1  ;;  %v8940_v24 = vpop.f32.mrb[18].mxu0  ;;  %v9928_v21 = vld [vmem:[%s24285_s11 + $0x108] sm:$0xff]  ;;  %v9915_v3 = vld [vmem:[%s24285_s11 + $0xa0] sm:$0xff] }
 0x60d   :  { %v22272_v5 = vadd.f32 %v9013_v51, %v22180_v7  ;;  %v22275_v8 = vadd.f32 %v8940_v24, %v22170_v39  ;;  %v8942_v55 = vpop.f32.mrb[19].mxu0  ;;  %v16002_v11 = vpack.i.bf16 %v24551_v13, %v24552_v31  ;;  %v9913_v51 = vld [vmem:[%s24285_s11 + $0x90] sm:$0xff]  ;;  %v22350_v24 = vpack.c.bf16 %v9928_v21, %v9927_v9  ;;  %13271 = vmatpush3.bf16.msra.mxu0 %v22336_v35  ;;  %v9899_v9 = vld [vmem:[%s24285_s11 + $0x20] sm:$0xff]  ;;  %v9900_v21 = vld [vmem:[%s24285_s11 + $0x28] sm:$0xff] }
 0x60e   :  { %v24550_v14 = vmax.f32 %v22264_v4, 0.0  ;;  %15998 = vrot.lane.b32.xlu1 %v15997_v0, %s24721_s29  ;;  %v22280_v54 = vadd.f32 %v8942_v55, %v22170_v39  ;;  %v22338_v0 = vpack.c.bf16 %v9944_v29, %v9943_v41  ;;  %v9897_v55 = vld [vmem:[%s24285_s11 + $0x10] sm:$0xff]  ;;  %v22391_v29 = vpack.c.bf16 %v9916_v36, %v9915_v3 }
 0x60f   :  { %v24545_v50 = vmax.f32 %v22272_v5, 0.0  ;;  %v9017_v47 = vpop.f32.mrb[20].mxu1  ;;  %v24548_v52 = vmax.f32 %v22275_v8, 0.0  ;;  %15993 = vrot.lane.b32.xlu0 %v15992_v18, %s24721_s29  ;;  %v9914_v18 = vld [vmem:[%s24285_s11 + $0x98] sm:$0xff]  ;;  %v9901_v3 = vld [vmem:[%s24285_s11 + $0x30] sm:$0xff] }
 0x610   :  { %v9019_v6 = vpop.f32.mrb[21].mxu1  ;;  %v24547_v63 = vmax.f32 %v22280_v54, 0.0  ;;  %v22293_v19 = vadd.f32 %v9017_v47, %v22170_v39  ;;  %v9898_v47 = vld [vmem:[%s24285_s11 + $0x18] sm:$0xff]  ;;  %13301 = vmatprep.subr.bf16.mxu1 %v22338_v0 }
 0x611   :  { %v16007_v53 = vpack.i.bf16 %v24545_v50, %v24550_v14  ;;  %v22296_v27 = vadd.f32 %v9019_v6, %v22170_v39  ;;  %v22363_v6 = vpack.c.bf16 %v9914_v18, %v9913_v51  ;;  %13303 = vmatpush3.bf16.msra.mxu1 %v22350_v24  ;;  %v9947_v51 = vld [vmem:[%s24285_s11 + $0x1a0] sm:$0xff]  ;;  %v9948_v18 = vld [vmem:[%s24285_s11 + $0x1a8] sm:$0xff]  ;;  %v9953_v14 = vld [vmem:[%s24285_s11 + $0x1d0] sm:$0xff] }
 0x612   :  { %v16012_v59 = vpack.i.bf16 %v24547_v63, %v24548_v52  ;;  %v24546_v38 = vmax.f32 %v22293_v19, 0.0  ;;  %v9952_v50 = vld [vmem:[%s24285_s11 + $0x1c8] sm:$0xff]  ;;  %v9935_v52 = vld [vmem:[%s24285_s11 + $0x140] sm:$0xff] }
 0x613   :  { %16008 = vrot.lane.b32.xlu1 %v16007_v53, %s24721_s29  ;;  %16003 = vrot.lane.b32.xlu0 %v16002_v11, %s24721_s29  ;;  %v24544_v58 = vmax.f32 %v22296_v27, 0.0  ;;  %v22365_v53 = vpack.c.bf16 %v9898_v47, %v9897_v55  ;;  %v9945_v11 = vld [vmem:[%s24285_s11 + $0x190] sm:$0xff]  ;;  %v9931_v55 = vld [vmem:[%s24285_s11 + $0x120] sm:$0xff] }
 0x614   :  { %13273 = vmatprep.subr.bf16.mxu0 %v22363_v6  ;;  %v9932_v47 = vld [vmem:[%s24285_s11 + $0x128] sm:$0xff] }
 0x615   :  { %v16017_v2 = vpack.i.bf16 %v24544_v58, %v24546_v38  ;;  %13275 = vmatpush3.bf16.msra.mxu0 %v22365_v53  ;;  %v22428_v36 = vpack.c.bf16 %v9932_v47, %v9931_v55  ;;  %v9933_v55 = vld [vmem:[%s24285_s11 + $0x130] sm:$0xff]  ;;  %v9934_v47 = vld [vmem:[%s24285_s11 + $0x138] sm:$0xff] }
 0x616   :  { %13277 = vmatprep.subr.bf16.mxu0 %v22391_v29  ;;  %v22467_v38 = vpack.c.bf16 %v9934_v47, %v9933_v55  ;;  %v9936_v55 = vld [vmem:[%s24285_s11 + $0x148] sm:$0xff]  ;;  %v9921_v47 = vld [vmem:[%s24285_s11 + $0xd0] sm:$0xff] }
 0x617   :  { %16013 = vrot.lane.b32.xlu0 %v16012_v59, %s24721_s29  ;;  %v9946_v59 = vld [vmem:[%s24285_s11 + $0x198] sm:$0xff]  ;;  %25151 = vst [vmem:[#allocation16_spill] sm:$0xff] %v22428_v36  ;;  %v22503_v31 = vpack.c.bf16 %v9936_v55, %v9935_v52 }
 0x618   :  { %v22377_v30 = vpack.c.bf16 %v9946_v59, %v9945_v11  ;;  %v22413_v11 = vpack.c.bf16 %v9900_v21, %v9899_v9  ;;  %v22415_v59 = vpack.c.bf16 %v9948_v18, %v9947_v51  ;;  %v9902_v21 = vld [vmem:[%s24285_s11 + $0x38] sm:$0xff]  ;;  %v9949_v51 = vld [vmem:[%s24285_s11 + $0x1b0] sm:$0xff]  ;;  %25155 = vst [vmem:[#allocation12_spill] sm:$0xff] %v22467_v38 }
 0x619   :  { %v9950_v18 = vld [vmem:[%s24285_s11 + $0x1b8] sm:$0xff]  ;;  %25159 = vst [vmem:[#allocation20_spill] sm:$0xff] %v22503_v31 }
 0x61a   :  { %13305 = vmatprep.subr.bf16.mxu1 %v22377_v30  ;;  %25150 = vst [vmem:[#allocation11_spill] sm:$0xff] %v22413_v11  ;;  %v22442_v58 = vpack.c.bf16 %v9950_v18, %v9949_v51  ;;  %13279 = vmatpush3.bf16.msra.mxu0 %v22413_v11  ;;  %v22457_v51 = vpack.c.bf16 %v9902_v21, %v9901_v3  ;;  %v9951_v18 = vld [vmem:[%s24285_s11 + $0x1c0] sm:$0xff]  ;;  %v9904_v21 = vld [vmem:[%s24285_s11 + $0x48] sm:$0xff]  ;;  %v9938_v52 = vld [vmem:[%s24285_s11 + $0x158] sm:$0xff] }
 0x61b   :  { %16018 = vrot.lane.b32.xlu0 %v16017_v2, %s24721_s29  ;;  %v9929_v2 = vld [vmem:[%s24285_s11 + $0x110] sm:$0xff]  ;;  %v9903_v3 = vld [vmem:[%s24285_s11 + $0x40] sm:$0xff]  ;;  %v22481_v23 = vpack.c.bf16 %v9952_v50, %v9951_v18  ;;  %v9954_v50 = vld [vmem:[%s24285_s11 + $0x1d8] sm:$0xff] }
 0x61c   :  { %v22389_v41 = vpack.c.bf16 %v9930_v15, %v9929_v2  ;;  %v9917_v2 = vld [vmem:[%s24285_s11 + $0xb0] sm:$0xff]  ;;  %v9918_v15 = vld [vmem:[%s24285_s11 + $0xb8] sm:$0xff]  ;;  %25153 = vst [vmem:[#allocation19_spill] sm:$0xff] %v22442_v58  ;;  %25154 = vst [vmem:[#allocation18_spill] sm:$0xff] %v22457_v51  ;;  %v22499_v13 = vpack.c.bf16 %v9904_v21, %v9903_v3  ;;  %v22514_v3 = vpack.c.bf16 %v9954_v50, %v9953_v14 }
 0x61d   :  { %v22430_v9 = vpack.c.bf16 %v9918_v15, %v9917_v2  ;;  %v9919_v2 = vld [vmem:[%s24285_s11 + $0xc0] sm:$0xff]  ;;  %v9920_v15 = vld [vmem:[%s24285_s11 + $0xc8] sm:$0xff]  ;;  %25157 = vst [vmem:[#allocation13_spill] sm:$0xff] %v22481_v23  ;;  %v9937_v21 = vld [vmem:[%s24285_s11 + $0x150] sm:$0xff] }
 0x61e   :  { %13307 = vmatpush3.bf16.msra.mxu1 %v22389_v41  ;;  %v22469_v63 = vpack.c.bf16 %v9920_v15, %v9919_v2  ;;  %v9922_v2 = vld [vmem:[%s24285_s11 + $0xd8] sm:$0xff]  ;;  %25158 = vst [vmem:[#allocation17_spill] sm:$0xff] %v22499_v13  ;;  %25161 = vst [vmem:[#allocation22_spill] sm:$0xff] %v22514_v3  ;;  %v22531_v14 = vpack.c.bf16 %v9938_v52, %v9937_v21  ;;  %v9907_v21 = vld [vmem:[%s24285_s11 + $0x60] sm:$0xff]  ;;  %v22549_v52 = vpack.c.bf16 %v9924_v16, %v9923_v28 }
 0x61f   :  { %25152 = vst [vmem:[#allocation14_spill] sm:$0xff] %v22430_v9  ;;  %13309 = vmatprep.subr.bf16.mxu1 %v22415_v59  ;;  %13281 = vmatprep.subr.bf16.mxu0 %v22430_v9  ;;  %v22505_v22 = vpack.c.bf16 %v9922_v2, %v9921_v47  ;;  %v22560_v42 = vpack.c.bf16 %v9908_v33, %v9907_v21  ;;  %v9939_v28 = vld [vmem:[%s24285_s11 + $0x160] sm:$0xff]  ;;  %v9940_v16 = vld [vmem:[%s24285_s11 + $0x168] sm:$0xff]  ;;  %v25176_v9 = vmax.f32 %v22188_v12, 0.0 }
 0x620   :  { %25156 = vst [vmem:[#allocation15_spill] sm:$0xff] %v22469_v63  ;;  %13283 = vmatpush3.bf16.msra.mxu0 %v22457_v51  ;;  %25163 = vst [vmem:[#allocation24_spill] sm:$0xff] %v22531_v14 }
 0x621   :  { %13285 = vmatprep.subr.bf16.mxu0 %v22469_v63  ;;  %25160 = vst [vmem:[#allocation21_spill] sm:$0xff] %v22505_v22  ;;  %25164 = vst [vmem:[#allocation25_spill] sm:$0xff] %v22549_v52  ;;  %v9941_v63 = vld [vmem:[%s24285_s11 + $0x170] sm:$0xff] }
 0x622   :  { %13311 = vmatpush3.bf16.msra.mxu1 %v22428_v36  ;;  %25165 = vst [vmem:[#allocation26_spill] sm:$0xff] %v22560_v42 }
 0x623   :  { %13313 = vmatprep.subr.bf16.mxu1 %v22442_v58 }
 0x624   :  { %13287 = vmatpush3.bf16.msra.mxu0 %v22499_v13 }
 0x625   :  { %13289 = vmatprep.subr.bf16.mxu0 %v22505_v22  ;;  %v9958_v22 = vld [vmem:[%s24285_s11 + $0x1f8] sm:$0xff] }
 0x626   :  { %13315 = vmatpush3.bf16.msra.mxu1 %v22467_v38 }
 0x627   :  { %13317 = vmatprep.subr.bf16.mxu1 %v22481_v23 }
 0x628   :  { %13291 = vmatpush3.bf16.msra.mxu0 %v22527_v17 }
 0x629   :  { %13293 = vmatprep.subr.bf16.mxu0 %v22549_v52 }
 0x62a   :  { %13319 = vmatpush3.bf16.msra.mxu1 %v22503_v31 }
 0x62b   :  { %13321 = vmatprep.subr.bf16.mxu1 %v22514_v3 }
 0x62c   :  { %13295 = vmatpush3.bf16.msra.mxu0 %v22560_v42  ;;  %v9910_v42 = vld [vmem:[%s24285_s11 + $0x78] sm:$0xff] }
 0x62e   :  { %13323 = vmatpush3.bf16.msra.mxu1 %v22531_v14  ;;  %v22571_v14 = vpack.c.bf16 %v9940_v16, %v9939_v28  ;;  %v9925_v28 = vld [vmem:[%s24285_s11 + $0xf0] sm:$0xff] }
 0x62f   :  { %13325 = vmatprep.subr.bf16.mxu1 %v22562_v44  ;;  %v9909_v16 = vld [vmem:[%s24285_s11 + $0x70] sm:$0xff] }
 0x630   :  { %25167 = vst [vmem:[#allocation28_spill] sm:$0xff] %v22571_v14  ;;  %v9957_v44 = vld [vmem:[%s24285_s11 + $0x1f0] sm:$0xff] }
 0x632   :  { %13327 = vmatpush3.bf16.msra.mxu1 %v22571_v14 }
 0x668   :  { %v9088_v15 = vpop.f32.mrb[20].mxu0 }
 0x669   :  { %v9090_v18 = vpop.f32.mrb[21].mxu0 }
 0x66c   :  { %v22522_v55 = vpop.f32.mrb[22].mxu0  ;;  %v9165_v47 = vpop.f32.mrb[22].mxu1 }
 0x66d   :  { %v22524_v2 = vpop.f32.mrb[23].mxu0  ;;  %v9167_v61 = vpop.f32.mrb[23].mxu1  ;;  %v22576_v56 = vadd.f32 %v9165_v47, %v22180_v7  ;;  %v9926_v47 = vld [vmem:[%s24285_s11 + $0xf8] sm:$0xff] }
 0x66e   :  { %v22582_v52 = vadd.f32 %v9167_v61, %v22180_v7  ;;  %v22598_v14 = vpack.c.bf16 %v9926_v47, %v9925_v28  ;;  %v25171_v47 = vmax.f32 %v22216_v45, 0.0  ;;  %v22631_v45 = vpack.c.bf16 %v9910_v42, %v9909_v16  ;;  %v10007_v42 = vld [vmem:[%s24285_s11 + $0x380] sm:$0xff] }
 0x670   :  { %v22534_v50 = vpop.f32.mrb[24].mxu1  ;;  %25168 = vst [vmem:[#allocation29_spill] sm:$0xff] %v22582_v52  ;;  %25169 = vst [vmem:[#allocation30_spill] sm:$0xff] %v22598_v14  ;;  %13297 = vmatprep.subr.bf16.mxu0 %v22598_v14  ;;  %v25175_v14 = vmax.f32 %v22184_v25, 0.0 }
 0x671   :  { %v22536_v46 = vpop.f32.mrb[25].mxu1  ;;  %25172 = vst [vmem:[#allocation31_spill] sm:$0xff] %v22631_v45  ;;  %13299 = vmatpush3.bf16.msra.mxu0 %v22631_v45 }
 0x678   :  { %v15979_v32 = vpop.permute.xlu1 %15978 }
 0x679   :  { %v15980_v17 = vunpack.i.l.bf16 %v15979_v32  ;;  %v15974_v40 = vpop.permute.xlu0 %15973  ;;  %v15981_v3 = vunpack.i.h.bf16 %v15979_v32 }
 0x67a   :  { %v15976_v33 = vunpack.i.h.bf16 %v15974_v40  ;;  %v15975_v21 = vunpack.i.l.bf16 %v15974_v40  ;;  %v22594_v40 = vadd.f32 %v9088_v15, %v22180_v7  ;;  %v22610_v15 = vadd.f32 %v9090_v18, %v22180_v7  ;;  %v9942_v18 = vld [vmem:[%s24285_s11 + $0x178] sm:$0xff] }
 0x67c   :  { %v22579_v31 = vpop.permute.xlu1 %15988  ;;  %v9565_v32 = vsel %vm396_vm2, %v15975_v21, %v15976_v33  ;;  %v9566_v61 = vsel %vm396_vm2, %v15976_v33, %v15980_v17  ;;  %v25170_v33 = vmax.f32 %v22196_v37, 0.0  ;;  %v9564_v51 = vsel %vm396_vm2, %v15981_v3, %v15975_v21  ;;  %v9975_v3 = vld [vmem:[%s24285_s11 + $0x280] sm:$0xff] }
 0x67d   :  { %v22619_v23 = vmax.f32 %v25171_v47, %v9566_v61  ;;  %v15984_v38 = vpop.permute.xlu0 %15983  ;;  %v22637_v47 = vpack.c.bf16 %v9958_v22, %v9957_v44  ;;  %v22651_v44 = vpack.c.bf16 %v9942_v18, %v9941_v63  ;;  %v22660_v36 = vmax.f32 %v25175_v14, %v9564_v51 }
 0x67e   :  { %v22615_v28 = vmax.f32 %v25170_v33, %v9565_v32  ;;  %v15986_v13 = vunpack.i.h.bf16 %v15984_v38  ;;  %v15985_v58 = vunpack.i.l.bf16 %v15984_v38  ;;  %v9976_v38 = vld [vmem:[%s24285_s11 + $0x288] sm:$0xff]  ;;  %v15991_v63 = vunpack.i.h.bf16 %v22579_v31 }
 0x67f   :  { %25173 = vst [vmem:[#allocation32_spill] sm:$0xff] %v22651_v44  ;;  %v22653_v22 = vpack.c.bf16 %v9976_v38, %v9975_v3  ;;  %v10008_v32 = vld [vmem:[%s24285_s11 + $0x388] sm:$0xff]  ;;  %13329 = vmatprep.subr.bf16.mxu1 %v22637_v47  ;;  %v15990_v3 = vunpack.i.l.bf16 %v22579_v31  ;;  %v22682_v14 = vadd.f32 %v22522_v55, %v22170_v39  ;;  %v22697_v55 = vadd.f32 %v22524_v2, %v22170_v39 }
 0x680   :  { %v22628_v37 = vpop.permute.xlu1 %15998  ;;  %v16022_v33 = vpack.i.bf16 %v22619_v23, %v22615_v28  ;;  %v9567_v21 = vsel %vm396_vm2, %v15980_v17, %v15985_v58  ;;  %v9568_v16 = vsel %vm396_vm2, %v15985_v58, %v15986_v13  ;;  %v25177_v17 = vmax.f32 %v22208_v60, 0.0  ;;  %13331 = vmatpush3.bf16.msra.mxu1 %v22651_v44 }
 0x681   :  { %v16000_v61 = vunpack.i.l.bf16 %v22628_v37  ;;  %25174 = vst [vmem:[#allocation33_spill] sm:$0xff] %v22653_v22  ;;  %v22664_v11 = vmax.f32 %v25176_v9, %v9567_v21  ;;  %v15994_v18 = vpop.permute.xlu0 %15993  ;;  %13333 = vmatprep.subr.bf16.mxu0 %v22653_v22  ;;  %v22676_v12 = vpack.c.bf16 %v10008_v32, %v10007_v42  ;;  %v25181_v9 = vmax.f32 %v22225_v10, 0.0 }
 0x682   :  { %v22668_v58 = vmax.f32 %v25177_v17, %v9568_v16  ;;  %16023 = vrot.lane.b32.xlu1 %v16022_v33, %s24629_s27  ;;  %v15996_v25 = vunpack.i.h.bf16 %v15994_v18  ;;  %v15995_v51 = vunpack.i.l.bf16 %v15994_v18  ;;  %v25179_v16 = vmax.f32 %v22576_v56, 0.0 }
 0x683   :  { %25178 = vst [vmem:[#allocation34_spill] sm:$0xff] %v22676_v12  ;;  %v16027_v31 = vpack.i.bf16 %v22664_v11, %v22660_v36  ;;  %13365 = vmatprep.subr.bf16.mxu1 %v22676_v12  ;;  %v25180_v17 = vmax.f32 %v22582_v52, 0.0  ;;  %v25182_v60 = vmax.f32 %v22229_v1, 0.0  ;;  %v9581_v12 = vsel %vm396_vm2, %v15990_v3, %v15991_v63 }
 0x684   :  { %9738 = vrot.lane.b32.xlu0 %v22668_v58, %s24629_s27  ;;  %v9580_v38 = vsel %vm396_vm2, %v15996_v25, %v15990_v3  ;;  %v9582_v32 = vsel %vm396_vm2, %v15991_v63, %v15995_v51  ;;  %v9583_v21 = vsel %vm396_vm2, %v15995_v51, %v16000_v61  ;;  %v25183_v52 = vmax.f32 %v22594_v40, 0.0 }
 0x685   :  { %v22688_v33 = vpop.permute.xlu1 %16008  ;;  %v16037_v18 = vpack.i.bf16 %v25180_v17, %v25179_v16  ;;  %v22705_v25 = vmax.f32 %v25181_v9, %v9580_v38  ;;  %v22709_v42 = vmax.f32 %v25182_v60, %v9583_v21  ;;  %v16004_v51 = vpop.permute.xlu0 %16003  ;;  %v25184_v16 = vmax.f32 %v22610_v15, 0.0 }
 0x686   :  { %16028 = vrot.lane.b32.xlu1 %v16027_v31, %s24629_s27  ;;  %v16006_v2 = vunpack.i.h.bf16 %v16004_v51  ;;  %v16005_v44 = vunpack.i.l.bf16 %v16004_v51  ;;  %v16010_v22 = vunpack.i.l.bf16 %v22688_v33  ;;  %v25185_v9 = vmax.f32 %v22178_v34, 0.0 }
 0x687   :  { %v16032_v10 = vpack.i.bf16 %v25184_v16, %v25183_v52  ;;  %v25186_v1 = vunpack.i.h.bf16 %v22628_v37  ;;  %v25187_v3 = vmax.f32 %v22174_v62, 0.0  ;;  %v25188_v21 = vmax.f32 %v22212_v57, 0.0 }
 0x688   :  { %v22720_v38 = vmax.f32 %v25185_v9, %v9582_v32  ;;  %16038 = vrot.lane.b32.xlu0 %v16037_v18, %s24721_s29  ;;  %v9569_v63 = vsel %vm396_vm2, %v15986_v13, %v16005_v44  ;;  %v16062_v34 = vpack.i.bf16 %v22709_v42, %v22705_v25  ;;  %v24591_v52 = vmax.f32 %v22682_v14, 0.0 }
 0x689   :  { %v9584_v60 = vsel %vm396_vm2, %v16000_v61, %v25186_v1  ;;  %v22729_v31 = vmax.f32 %v25187_v3, %v9581_v12  ;;  %v22733_v17 = vmax.f32 %v25188_v21, %v9569_v63  ;;  %v24590_v32 = vmax.f32 %v22697_v55, 0.0  ;;  %v16014_v21 = vpop.permute.xlu0 %16013 }
 0x68a   :  { %16033 = vrot.lane.b32.xlu1 %v16032_v10, %s24721_s29  ;;  %v9570_v61 = vsel %vm396_vm2, %v16005_v44, %v16006_v2  ;;  %v9571_v13 = vsel %vm396_vm2, %v16006_v2, %v16010_v22  ;;  %v22744_v62 = vadd.f32 %v22534_v50, %v22170_v39  ;;  %v22748_v57 = vadd.f32 %v22536_v46, %v22170_v39 }
 0x68b   :  { %v25190_v12 = vmax.f32 %v22192_v49, 0.0  ;;  %v16042_v51 = vpack.i.bf16 %v22720_v38, %v22729_v31  ;;  %v25192_v44 = vmax.f32 %v22258_v26, 0.0  ;;  %v25193_v50 = vmax.f32 %v22261_v48, 0.0 }
 0x68c   :  { %25189 = vst [vmem:[#allocation35_spill] sm:$0xff] %v22748_v57  ;;  %16063 = vrot.lane.b32.xlu0 %v16062_v34, %s24629_s27  ;;  %v24592_v46 = vunpack.i.h.bf16 %v22688_v33  ;;  %v16047_v10 = vpack.i.bf16 %v24590_v32, %v24591_v52  ;;  %v24589_v26 = vmax.f32 %v22744_v62, 0.0  ;;  %v24588_v9 = vmax.f32 %v22748_v57, 0.0 }
 0x68d   :  { %v22752_v18 = vmax.f32 %v25190_v12, %v9584_v60  ;;  %v22759_v2 = vmax.f32 %v25192_v44, %v9570_v61  ;;  %v22763_v16 = vmax.f32 %v25193_v50, %v9571_v13  ;;  %v25194_v63 = vmax.f32 %v22264_v4, 0.0 }
 0x68e   :  { %16043 = vrot.lane.b32.xlu1 %v16042_v51, %s24629_s27  ;;  %v9572_v1 = vsel %vm396_vm2, %v16010_v22, %v24592_v46  ;;  %v16052_v60 = vpack.i.bf16 %v24588_v9, %v24589_v26  ;;  %v16016_v61 = vunpack.i.h.bf16 %v16014_v21  ;;  %v16015_v22 = vunpack.i.l.bf16 %v16014_v21 }
 0x68f   :  { %25191 = vst [vmem:[#allocation36_spill] sm:$0xff] %v22752_v18  ;;  %v16067_v49 = vpack.i.bf16 %v22733_v17, %v22752_v18  ;;  %v16077_v48 = vpack.i.bf16 %v22763_v16, %v22759_v2  ;;  %v22789_v3 = vmax.f32 %v25194_v63, %v9572_v1  ;;  %v25202_v26 = vmax.f32 %v22200_v20, 0.0 }
 0x690   :  { %v9586_v21 = vsel %vm396_vm2, %v16015_v22, %v16016_v61  ;;  %v25204_v52 = vmax.f32 %v22275_v8, 0.0 }
 0x691   :  { %16068 = vrot.lane.b32.xlu0 %v16067_v49, %s24629_s27  ;;  %25195 = vst [vmem:[#allocation37_spill] sm:$0xff] %v22789_v3 }
 0x692   :  { %16048 = vrot.lane.b32.xlu1 %v16047_v10, %s24721_s29  ;;  %v22804_v10 = vpop.permute.xlu0 %16018  ;;  %v22831_v46 = vmax.f32 %v25204_v52, %v9586_v21 }
 0x694   :  { %25205 = vst [vmem:[#allocation44_spill] sm:$0xff] %v22831_v46 }
 0x695   :  { %16078 = vrot.lane.b32.xlu0 %v16077_v48, %s24629_s27 }
 0x696   :  { %16053 = vrot.lane.b32.xlu1 %v16052_v60, %s24721_s29  ;;  %v25199_v60 = vunpack.i.h.bf16 %v22628_v37  ;;  %v24599_v37 = vunpack.i.h.bf16 %v22804_v10 }
 0x698   :  { %v9585_v63 = vsel %vm396_vm2, %v25199_v60, %v16015_v22  ;;  %v16020_v60 = vunpack.i.l.bf16 %v22804_v10 }
 0x699   :  { %9746 = vrot.lane.b32.xlu0 %v22789_v3, %s24629_s27  ;;  %v22827_v32 = vmax.f32 %v25202_v26, %v9585_v63  ;;  %v25207_v26 = vmax.f32 %v22280_v54, 0.0 }
 0x69a   :  { %v9587_v20 = vsel %vm396_vm2, %v16016_v61, %v16020_v60  ;;  %v9588_v8 = vsel %vm396_vm2, %v16020_v60, %v24599_v37  ;;  %v9991_v60 = vld [vmem:[%s24285_s11 + $0x300] sm:$0xff] }
 0x69b   :  { %25203 = vst [vmem:[#allocation43_spill] sm:$0xff] %v22827_v32  ;;  %v16082_v52 = vpack.i.bf16 %v22831_v46, %v22827_v32  ;;  %v22854_v63 = vmax.f32 %v25207_v26, %v9587_v20  ;;  %v9978_v26 = vld [vmem:[%s24285_s11 + $0x298] sm:$0xff]  ;;  %v9979_v32 = vld [vmem:[%s24285_s11 + $0x2a0] sm:$0xff] }
 0x69d   :  { %25208 = vst [vmem:[#allocation46_spill] sm:$0xff] %v22854_v63 }
 0x6c5   :  { %v9242_v34 = vpop.f32.mrb[24].mxu0 }
 0x6c6   :  { %v22795_v13 = vadd.f32 %v9242_v34, %v22180_v7  ;;  %v9244_v12 = vpop.f32.mrb[25].mxu0  ;;  %v9319_v51 = vpop.f32.mrb[26].mxu1 }
 0x6c7   :  { %v22798_v44 = vadd.f32 %v9244_v12, %v22180_v7  ;;  %v9321_v4 = vpop.f32.mrb[27].mxu1  ;;  %v22802_v49 = vadd.f32 %v9319_v51, %v22180_v7 }
 0x6c8   :  { %25196 = vst [vmem:[#allocation38_spill] sm:$0xff] %v22795_v13  ;;  %v24598_v50 = vmax.f32 %v22795_v13, 0.0  ;;  %v25215_v13 = vmax.f32 %v22576_v56, 0.0  ;;  %v9965_v56 = vld [vmem:[%s24285_s11 + $0x230] sm:$0xff] }
 0x6c9   :  { %25197 = vst [vmem:[#allocation39_spill] sm:$0xff] %v22798_v44  ;;  %25198 = vst [vmem:[#allocation40_spill] sm:$0xff] %v22802_v49  ;;  %v24593_v48 = vmax.f32 %v22798_v44, 0.0  ;;  %v9248_v1 = vpop.f32.mrb[26].mxu0  ;;  %v24597_v22 = vmax.f32 %v22802_v49, 0.0 }
 0x6ca   :  { %v22812_v34 = vadd.f32 %v9248_v1, %v22170_v39  ;;  %v9250_v12 = vpop.f32.mrb[27].mxu0  ;;  %v9324_v4 = vpop.f32.mrb[28].mxu1 }
 0x6cb   :  { %v16057_v7 = vpack.i.bf16 %v24593_v48, %v24598_v50  ;;  %v22819_v51 = vadd.f32 %v9250_v12, %v22170_v39  ;;  %v9326_v9 = vpop.f32.mrb[29].mxu1  ;;  %v22840_v48 = vadd.f32 %v9324_v4, %v22170_v39  ;;  %v25209_v39 = vmax.f32 %v22293_v19, 0.0  ;;  %v9959_v19 = vld [vmem:[%s24285_s11 + $0x200] sm:$0xff]  ;;  %v9994_v50 = vld [vmem:[%s24285_s11 + $0x318] sm:$0xff] }
 0x6cc   :  { %25200 = vst [vmem:[#allocation41_spill] sm:$0xff] %v22812_v34  ;;  %v24596_v1 = vmax.f32 %v22812_v34, 0.0 }
 0x6cd   :  { %25201 = vst [vmem:[#allocation42_spill] sm:$0xff] %v22819_v51  ;;  %v24595_v12 = vmax.f32 %v22819_v51, 0.0  ;;  %16058 = vrot.lane.b32.xlu1 %v16057_v7, %s24721_s29  ;;  %25206 = vst [vmem:[#allocation45_spill] sm:$0xff] %v22840_v48  ;;  %v22858_v21 = vmax.f32 %v25209_v39, %v9588_v8  ;;  %v24594_v4 = vmax.f32 %v22840_v48, 0.0  ;;  %v9960_v7 = vld [vmem:[%s24285_s11 + $0x208] sm:$0xff] }
 0x6ce   :  { %v16072_v9 = vpack.i.bf16 %v24596_v1, %v24597_v22  ;;  %v9992_v8 = vld [vmem:[%s24285_s11 + $0x308] sm:$0xff]  ;;  %v10010_v1 = vld [vmem:[%s24285_s11 + $0x398] sm:$0xff]  ;;  %v9993_v22 = vld [vmem:[%s24285_s11 + $0x310] sm:$0xff] }
 0x6cf   :  { %9560 = vrot.lane.b32.xlu0 %v24595_v12, %s24721_s29  ;;  %25210 = vst [vmem:[#allocation47_spill] sm:$0xff] %v22858_v21  ;;  %v16087_v61 = vpack.i.bf16 %v22858_v21, %v22854_v63  ;;  %v22908_v63 = vpack.c.bf16 %v9960_v7, %v9959_v19  ;;  %v22910_v18 = vpack.c.bf16 %v9992_v8, %v9991_v60  ;;  %v9980_v48 = vld [vmem:[%s24285_s11 + $0x2a8] sm:$0xff]  ;;  %v9963_v19 = vld [vmem:[%s24285_s11 + $0x220] sm:$0xff] }
 0x6d0   :  { %v9964_v7 = vld [vmem:[%s24285_s11 + $0x228] sm:$0xff] }
 0x6d1   :  { %16073 = vrot.lane.b32.xlu1 %v16072_v9, %s24721_s29 }
 0x6d3   :  { %16083 = vrot.lane.b32.xlu0 %v16082_v52, %s24629_s27  ;;  %v9977_v52 = vld [vmem:[%s24285_s11 + $0x290] sm:$0xff] }
 0x6d4   :  { %v22920_v57 = vpack.c.bf16 %v9978_v26, %v9977_v52  ;;  %v9996_v52 = vld [vmem:[%s24285_s11 + $0x328] sm:$0xff] }
 0x6d5   :  { %9562 = vrot.lane.b32.xlu1 %v24594_v4, %s24721_s29  ;;  %v10009_v4 = vld [vmem:[%s24285_s11 + $0x390] sm:$0xff] }
 0x6d9   :  { %16088 = vrot.lane.b32.xlu1 %v16087_v61, %s24629_s27  ;;  %v9961_v61 = vld [vmem:[%s24285_s11 + $0x210] sm:$0xff] }
 0x6f4   :  { %v16024_v54 = vpop.permute.xlu1 %16023 }
 0x6f5   :  { %v16026_v9 = vunpack.i.h.bf16 %v16024_v54  ;;  %v16025_v20 = vunpack.i.l.bf16 %v16024_v54  ;;  %v9962_v54 = vld [vmem:[%s24285_s11 + $0x218] sm:$0xff] }
 0x6f6   :  { %v22886_v39 = vpop.permute.xlu0 %9738 }
 0x6f7   :  { %v9799_v12 = vsel %vm25211_vm14, %v16025_v20, %v16026_v9  ;;  %vm25286_vm14 = vmmov %vm25128_vm0 }
 0x6f8   :  { %v16029_v37 = vpop.permute.xlu1 %16028  ;;  %v9863_v21 = vmax.f32 %v22615_v28, %v9799_v12  ;;  %v22922_v28 = vpack.c.bf16 %v9962_v54, %v9961_v61  ;;  %v22926_v12 = vpack.c.bf16 %v9994_v50, %v9993_v22  ;;  %v10012_v22 = vld [vmem:[%s24285_s11 + $0x3a8] sm:$0xff]  ;;  %v22954_v61 = vpack.c.bf16 %v9980_v48, %v9979_v32 }
 0x6f9   :  { %v16031_v3 = vunpack.i.h.bf16 %v16029_v37  ;;  %v16030_v46 = vunpack.i.l.bf16 %v16029_v37  ;;  %v22924_v37 = vpack.c.bf16 %v10010_v1, %v10009_v4  ;;  %v9995_v4 = vld [vmem:[%s24285_s11 + $0x320] sm:$0xff]  ;;  %v25217_v48 = vunpack.i.h.bf16 %v22688_v33 }
 0x6fa   :  { %v22918_v51 = vpop.permute.xlu0 %16038  ;;  %10087 = vmatprep.mubr.f32.mxu0 %v9863_v21  ;;  %v10011_v21 = vld [vmem:[%s24285_s11 + $0x3a0] sm:$0xff]  ;;  %v22968_v32 = vpack.c.bf16 %v9996_v52, %v9995_v4  ;;  %v25218_v33 = vmax.f32 %v22610_v15, 0.0 }
 0x6fb   :  { %v9798_v60 = vsel %vm25212_vm6, %v16030_v46, %v16025_v20  ;;  %v9800_v8 = vsel %vm25213_vm10, %v16026_v9, %v16031_v3  ;;  %v24614_v1 = vunpack.i.h.bf16 %v22918_v51  ;;  %v16040_v50 = vunpack.i.l.bf16 %v22918_v51  ;;  %vm25287_vm6 = vmmov %vm25128_vm0 }
 0x6fc   :  { %v9862_v46 = vmax.f32 %v22660_v36, %v9798_v60  ;;  %v9864_v9 = vmax.f32 %v22619_v23, %v9800_v8  ;;  %v16034_v20 = vpop.permute.xlu1 %16033  ;;  %v9801_v26 = vsel %vm25214_vm15, %v16031_v3, %v22886_v39  ;;  %v22964_v23 = vpack.c.bf16 %v9964_v7, %v9963_v19  ;;  %v9981_v3 = vld [vmem:[%s24285_s11 + $0x2b0] sm:$0xff]  ;;  %vm25288_vm10 = vmmov %vm25128_vm0 }
 0x6fd   :  { %v9576_v54 = vsel %vm396_vm2, %v16040_v50, %v24614_v1  ;;  %v16036_v44 = vunpack.i.h.bf16 %v16034_v20  ;;  %v16035_v34 = vunpack.i.l.bf16 %v16034_v20  ;;  %v9865_v49 = vmax.f32 %v22664_v11, %v9801_v26  ;;  %v9982_v11 = vld [vmem:[%s24285_s11 + $0x2b8] sm:$0xff]  ;;  %v10013_v8 = vld [vmem:[%s24285_s11 + $0x3b0] sm:$0xff]  ;;  %vm25289_vm15 = vmmov %vm25128_vm0 }
 0x6fe   :  { %v22962_v45 = vmax.f32 %v25215_v13, %v9576_v54  ;;  %v16064_v36 = vpop.permute.xlu0 %16063  ;;  %10088 = vmatmul.mubr.f32.vlgmr.msra.gmra.mrb[28].mxu0 %v9862_v46  ;;  %v22966_v60 = vpack.c.bf16 %v10012_v22, %v10011_v21  ;;  %v9966_v21 = vld [vmem:[%s24285_s11 + $0x238] sm:$0xff]  ;;  %v23008_v15 = vpack.c.bf16 %v9982_v11, %v9981_v3 }
 0x6ff   :  { %v9575_v13 = vsel %vm396_vm2, %v16036_v44, %v16040_v50  ;;  %v9573_v19 = vsel %vm396_vm2, %v25217_v48, %v16035_v34  ;;  %v9574_v7 = vsel %vm396_vm2, %v16035_v34, %v16036_v44  ;;  %10162 = vmatprep.mubr.f32.mxu1 %v9865_v49  ;;  %13335 = vmatpush3.bf16.msra.mxu0 %v22908_v63  ;;  %v10014_v50 = vld [vmem:[%s24285_s11 + $0x3b8] sm:$0xff]  ;;  %v25219_v44 = vmax.f32 %v22272_v5, 0.0  ;;  %v9997_v5 = vld [vmem:[%s24285_s11 + $0x330] sm:$0xff]  ;;  %v9983_v48 = vld [vmem:[%s24285_s11 + $0x2c0] sm:$0xff] }
 0x700   :  { %25216 = vst [vmem:[#allocation48_spill] sm:$0xff] %v22962_v45  ;;  %v22996_v22 = vmax.f32 %v25218_v33, %v9575_v13  ;;  %v25220_v34 = vmax.f32 %v22594_v40, 0.0  ;;  %10163 = vmatmul.mubr.f32.vlgmr.msra.gmra.mrb[30].mxu1 %v9864_v9  ;;  %v16044_v52 = vpop.permute.xlu1 %16043  ;;  %13337 = vmatprep.subr.bf16.mxu0 %v22920_v57  ;;  %v16065_v46 = vunpack.i.l.bf16 %v16064_v36  ;;  %v9998_v40 = vld [vmem:[%s24285_s11 + $0x338] sm:$0xff]  ;;  %v23023_v3 = vpack.c.bf16 %v9966_v21, %v9965_v56  ;;  %v9984_v56 = vld [vmem:[%s24285_s11 + $0x2c8] sm:$0xff]  ;;  %v9967_v21 = vld [vmem:[%s24285_s11 + $0x240] sm:$0xff] }
 0x701   :  { %v23000_v49 = vmax.f32 %v25219_v44, %v9573_v19  ;;  %13367 = vmatpush3.bf16.msra.mxu1 %v22910_v18  ;;  %v16046_v20 = vunpack.i.h.bf16 %v16044_v52  ;;  %v16045_v26 = vunpack.i.l.bf16 %v16044_v52  ;;  %v23025_v11 = vpack.c.bf16 %v10014_v50, %v10013_v8 }
 0x702   :  { %v23004_v4 = vmax.f32 %v25220_v34, %v9574_v7  ;;  %13369 = vmatprep.subr.bf16.mxu1 %v22924_v37  ;;  %v16097_v9 = vpack.i.bf16 %v22962_v45, %v22996_v22  ;;  %v16066_v19 = vunpack.i.h.bf16 %v16064_v36  ;;  %v9968_v36 = vld [vmem:[%s24285_s11 + $0x248] sm:$0xff]  ;;  %v23047_v52 = vpack.c.bf16 %v9998_v40, %v9997_v5 }
 0x703   :  { %v23016_v54 = vpop.permute.xlu0 %16068  ;;  %13339 = vmatpush3.bf16.msra.mxu0 %v22922_v28  ;;  %v9815_v33 = vsel %vm25221_vm11, %v16045_v26, %v16046_v20  ;;  %v9814_v44 = vsel %vm25222_vm8, %v16065_v46, %v16045_v26  ;;  %v23061_v5 = vpack.c.bf16 %v9968_v36, %v9967_v21  ;;  %vm25291_vm11 = vmmov %vm25128_vm0 }
 0x704   :  { %v16092_v13 = vpack.i.bf16 %v23004_v4, %v23000_v49  ;;  %v24616_v7 = vunpack.i.l.bf16 %v23016_v54  ;;  %v16049_v8 = vpop.permute.xlu1 %16048  ;;  %16098 = vrot.lane.b32.xlu1 %v16097_v9, %s24629_s27  ;;  %v9879_v50 = vmax.f32 %v22729_v31, %v9815_v33  ;;  %v9878_v34 = vmax.f32 %v22705_v25, %v9814_v44  ;;  %13341 = vmatprep.subr.bf16.mxu0 %v22954_v61  ;;  %vm25292_vm8 = vmmov %vm25128_vm0 }
 0x705   :  { %13371 = vmatpush3.bf16.msra.mxu1 %v22926_v12  ;;  %v16051_v46 = vunpack.i.h.bf16 %v16049_v8  ;;  %v16050_v26 = vunpack.i.l.bf16 %v16049_v8  ;;  %v9816_v9 = vsel %vm25224_vm1, %v16046_v20, %v16066_v19  ;;  %v23059_v31 = vpack.c.bf16 %v9984_v56, %v9983_v48  ;;  %v9985_v8 = vld [vmem:[%s24285_s11 + $0x2d0] sm:$0xff]  ;;  %vm25295_vm1 = vmmov %vm25128_vm0 }
 0x706   :  { %16093 = vrot.lane.b32.xlu0 %v16092_v13, %s24629_s27  ;;  %v9817_v1 = vsel %vm25223_vm9, %v16066_v19, %v24616_v7  ;;  %10092 = vmatprep.mubr.f32.mxu0 %v9879_v50  ;;  %v16071_v40 = vunpack.i.h.bf16 %v23016_v54  ;;  %v25225_v13 = vunpack.i.h.bf16 %v22804_v10  ;;  %v25226_v48 = vmax.f32 %v22296_v27, 0.0  ;;  %v9986_v27 = vld [vmem:[%s24285_s11 + $0x2d8] sm:$0xff]  ;;  %vm25294_vm9 = vmmov %vm25128_vm0 }
 0x707   :  { %v23055_v45 = vpop.permute.xlu0 %16078  ;;  %13373 = vmatprep.subr.bf16.mxu1 %v22966_v60  ;;  %v9881_v25 = vmax.f32 %v22709_v42, %v9817_v1  ;;  %v9590_v44 = vsel %vm396_vm2, %v16050_v26, %v16051_v46  ;;  %13343 = vmatpush3.bf16.msra.mxu0 %v22964_v23  ;;  %v10015_v42 = vld [vmem:[%s24285_s11 + $0x3c0] sm:$0xff]  ;;  %v10016_v1 = vld [vmem:[%s24285_s11 + $0x3c8] sm:$0xff]  ;;  %v25227_v10 = vmax.f32 %v22682_v14, 0.0  ;;  %v9880_v36 = vmax.f32 %v22720_v38, %v9816_v9 }
 0x708   :  { %v9589_v33 = vsel %vm396_vm2, %v25225_v13, %v16050_v26  ;;  %v24618_v20 = vunpack.i.l.bf16 %v23055_v45  ;;  %10093 = vmatmul.mubr.f32.gmra.mrb[30].mxu0 %v9878_v34  ;;  %v23084_v21 = vpop.permute.xlu1 %16053  ;;  %v24619_v50 = vunpack.i.h.bf16 %v23055_v45  ;;  %13345 = vmatprep.subr.bf16.mxu0 %v23008_v15  ;;  %v23109_v13 = vpack.c.bf16 %v10016_v1, %v10015_v42  ;;  %v10017_v1 = vld [vmem:[%s24285_s11 + $0x3d0] sm:$0xff] }
 0x709   :  { %v23078_v19 = vmax.f32 %v25226_v48, %v9589_v33  ;;  %v23082_v56 = vmax.f32 %v25227_v10, %v9590_v44  ;;  %10167 = vmatprep.mubr.f32.mxu1 %v9881_v25  ;;  %13375 = vmatpush3.bf16.msra.mxu1 %v22968_v32  ;;  %v24617_v14 = vunpack.i.h.bf16 %v23084_v21  ;;  %v16055_v34 = vunpack.i.l.bf16 %v23084_v21  ;;  %v9999_v33 = vld [vmem:[%s24285_s11 + $0x340] sm:$0xff]  ;;  %v10000_v44 = vld [vmem:[%s24285_s11 + $0x348] sm:$0xff] }
 0x70a   :  { %v9803_v38 = vsel %vm25128_vm0, %v16071_v40, %v24618_v20  ;;  %10168 = vmatmul.mubr.f32.gmra.mrb[32].mxu1 %v9880_v36  ;;  %13377 = vmatprep.subr.bf16.mxu1 %v23025_v11  ;;  %v23126_v42 = vpack.c.bf16 %v9986_v27, %v9985_v8  ;;  %v25229_v36 = vmax.f32 %v22697_v55, 0.0  ;;  %v9969_v8 = vld [vmem:[%s24285_s11 + $0x250] sm:$0xff]  ;;  %v9970_v27 = vld [vmem:[%s24285_s11 + $0x258] sm:$0xff]  ;;  %v23152_v55 = vpack.c.bf16 %v10000_v44, %v9999_v33 }
 0x70b   :  { %v23103_v26 = vpop.permute.xlu0 %9746  ;;  %v16102_v9 = vpack.i.bf16 %v23082_v56, %v23078_v19  ;;  %v9867_v25 = vmax.f32 %v22733_v17, %v9803_v38  ;;  %v9591_v48 = vsel %vm396_vm2, %v16051_v46, %v16055_v34  ;;  %v9592_v10 = vsel %vm396_vm2, %v16055_v34, %v24617_v14  ;;  %13347 = vmatpush3.bf16.msra.mxu0 %v23023_v3  ;;  %v10018_v46 = vld [vmem:[%s24285_s11 + $0x3d8] sm:$0xff]  ;;  %v10001_v33 = vld [vmem:[%s24285_s11 + $0x350] sm:$0xff] }
 0x70c   :  { %v9805_v17 = vsel %vm25228_vm7, %v24619_v50, %v23103_v26  ;;  %v23136_v34 = vmax.f32 %v25229_v36, %v9591_v48  ;;  %v25230_v38 = vmax.f32 %v22744_v62, 0.0  ;;  %13349 = vmatprep.subr.bf16.mxu0 %v23059_v31  ;;  %v9987_v62 = vld [vmem:[%s24285_s11 + $0x2e0] sm:$0xff]  ;;  %v10002_v44 = vld [vmem:[%s24285_s11 + $0x358] sm:$0xff]  ;;  %v23172_v48 = vpack.c.bf16 %v9970_v27, %v9969_v8  ;;  %vm25296_vm7 = vmmov %vm25128_vm0 }
 0x70d   :  { %v9869_v14 = vmax.f32 %v22763_v16, %v9805_v17  ;;  %16103 = vrot.lane.b32.xlu0 %v16102_v9, %s24629_s27  ;;  %10237 = vmatprep.mubr.f32.mxu0 %v9867_v25  ;;  %v9988_v16 = vld [vmem:[%s24285_s11 + $0x2e8] sm:$0xff]  ;;  %v23163_v25 = vpack.c.bf16 %v10018_v46, %v10017_v1  ;;  %v9971_v1 = vld [vmem:[%s24285_s11 + $0x260] sm:$0xff]  ;;  %v23191_v36 = vpack.c.bf16 %v10002_v44, %v10001_v33  ;;  %v9990_v8 = vld [vmem:[%s24285_s11 + $0x2f8] sm:$0xff] }
 0x70e   :  { %v23140_v7 = vmax.f32 %v25230_v38, %v9592_v10  ;;  %13379 = vmatpush3.bf16.msra.mxu1 %v23047_v52  ;;  %v10020_v10 = vld [vmem:[%s24285_s11 + $0x3e8] sm:$0xff]  ;;  %v23182_v17 = vpack.c.bf16 %v9988_v16, %v9987_v62  ;;  %v9989_v38 = vld [vmem:[%s24285_s11 + $0x2f0] sm:$0xff]  ;;  %v10003_v62 = vld [vmem:[%s24285_s11 + $0x360] sm:$0xff] }
 0x70f   :  { %13381 = vmatprep.subr.bf16.mxu1 %v23109_v13  ;;  %10312 = vmatprep.mubr.f32.mxu1 %v9869_v14  ;;  %v10019_v14 = vld [vmem:[%s24285_s11 + $0x3e0] sm:$0xff]  ;;  %v9972_v46 = vld [vmem:[%s24285_s11 + $0x268] sm:$0xff]  ;;  %v10021_v33 = vld [vmem:[%s24285_s11 + $0x3f0] sm:$0xff] }
 0x710   :  { %25231 = vst [vmem:[#allocation49_spill] sm:$0xff] %v23140_v7  ;;  %v16107_v9 = vpack.i.bf16 %v23140_v7, %v23136_v34  ;;  %13351 = vmatpush3.bf16.msra.mxu0 %v23061_v5  ;;  %v23200_v27 = vpack.c.bf16 %v10020_v10, %v10019_v14  ;;  %v10004_v16 = vld [vmem:[%s24285_s11 + $0x368] sm:$0xff]  ;;  %v10022_v44 = vld [vmem:[%s24285_s11 + $0x3f8] sm:$0xff]  ;;  %v23218_v14 = vpack.c.bf16 %v9990_v8, %v9989_v38  ;;  %v9973_v10 = vld [vmem:[%s24285_s11 + $0x270] sm:$0xff] }
 0x711   :  { %13353 = vmatprep.subr.bf16.mxu0 %v23126_v42  ;;  %v23230_v20 = vpack.c.bf16 %v10022_v44, %v10021_v33  ;;  %v10005_v38 = vld [vmem:[%s24285_s11 + $0x370] sm:$0xff]  ;;  %v10006_v8 = vld [vmem:[%s24285_s11 + $0x378] sm:$0xff]  ;;  %v25233_v33 = vunpack.i.h.bf16 %v23055_v45  ;;  %v25234_v44 = vunpack.i.l.bf16 %v23055_v45  ;;  %v25239_v45 = vld [vmem:[#allocation19_spill] sm:$0xff] }
 0x712   :  { %16108 = vrot.lane.b32.xlu1 %v16107_v9, %s24629_s27  ;;  %13383 = vmatpush3.bf16.msra.mxu1 %v23152_v55  ;;  %v23209_v9 = vpack.c.bf16 %v9972_v46, %v9971_v1  ;;  %v9974_v1 = vld [vmem:[%s24285_s11 + $0x278] sm:$0xff]  ;;  %v23227_v46 = vpack.c.bf16 %v10004_v16, %v10003_v62  ;;  %v9802_v62 = vsel %vm25232_vm3, %v22886_v39, %v16071_v40  ;;  %vm25298_vm3 = vmmov %vm25128_vm0 }
 0x713   :  { %13385 = vmatprep.subr.bf16.mxu1 %v23163_v25  ;;  %v23239_v50 = vpack.c.bf16 %v9974_v1, %v9973_v10  ;;  %v23247_v16 = vpack.c.bf16 %v10006_v8, %v10005_v38  ;;  %v9804_v10 = vsel %vm25235_vm12, %v25234_v44, %v25233_v33  ;;  %v9866_v1 = vmax.f32 %v22668_v58, %v9802_v62  ;;  %v25247_v58 = vld [vmem:[#allocation22_spill] sm:$0xff]  ;;  %v25249_v40 = vld [vmem:[#allocation25_spill] sm:$0xff]  ;;  %v25250_v38 = vld [vmem:[#allocation24_spill] sm:$0xff] }
 0x714   :  { %13355 = vmatpush3.bf16.msra.mxu0 %v23172_v48  ;;  %v9868_v39 = vmax.f32 %v22759_v2, %v9804_v10  ;;  %v25248_v2 = vld [vmem:[#allocation23_spill] sm:$0xff]  ;;  %v25252_v62 = vld [vmem:[#allocation26_spill] sm:$0xff]  ;;  %v25254_v44 = vld [vmem:[#allocation28_spill] sm:$0xff] }
 0x715   :  { %13357 = vmatprep.subr.bf16.mxu0 %v23182_v17  ;;  %v25251_v8 = vld [vmem:[#allocation27_spill] sm:$0xff]  ;;  %v25253_v33 = vld [vmem:[#allocation30_spill] sm:$0xff]  ;;  %vm25299_vm12 = vmmov %vm25128_vm0 }
 0x716   :  { %13387 = vmatpush3.bf16.msra.mxu1 %v23191_v36  ;;  %v25255_v10 = vld [vmem:[#allocation31_spill] sm:$0xff] }
 0x717   :  { %13389 = vmatprep.subr.bf16.mxu1 %v23200_v27 }
 0x718   :  { %13359 = vmatpush3.bf16.msra.mxu0 %v23209_v9 }
 0x719   :  { %13361 = vmatprep.subr.bf16.mxu0 %v23218_v14 }
 0x71a   :  { %13391 = vmatpush3.bf16.msra.mxu1 %v23227_v46 }
 0x71b   :  { %13393 = vmatprep.subr.bf16.mxu1 %v23230_v20 }
 0x71c   :  { %13363 = vmatpush3.bf16.msra.mxu0 %v23239_v50 }
 0x71d   :  { %13397 = vmatprep.subr.bf16.mxu0 %v22325_v43  ;;  %v25236_v43 = vld [vmem:[#allocation11_spill] sm:$0xff] }
 0x71e   :  { %13395 = vmatpush3.bf16.msra.mxu1 %v23247_v16 }
 0x71f   :  { %10238 = vmatmul.mubr.f32.vlgmr.msra.gmra.mrb[32].mxu0 %v9866_v1  ;;  %13429 = vmatprep.subr.bf16.mxu1 %v22338_v0  ;;  %v25237_v0 = vld [vmem:[#allocation14_spill] sm:$0xff]  ;;  %v25256_v1 = vld [vmem:[#allocation33_spill] sm:$0xff] }
 0x720   :  { %13399 = vmatpush3.bf16.msra.mxu0 %v22336_v35  ;;  %v25238_v35 = vld [vmem:[#allocation16_spill] sm:$0xff] }
 0x721   :  { %10313 = vmatmul.mubr.f32.vlgmr.msra.gmra.mrb[34].mxu1 %v9868_v39  ;;  %13401 = vmatprep.subr.bf16.mxu0 %v22363_v6  ;;  %v25240_v6 = vld [vmem:[#allocation18_spill] sm:$0xff]  ;;  %v25257_v39 = vld [vmem:[#allocation32_spill] sm:$0xff] }
 0x722   :  { %13431 = vmatpush3.bf16.msra.mxu1 %v22350_v24  ;;  %v25241_v24 = vld [vmem:[#allocation15_spill] sm:$0xff] }
 0x723   :  { %13433 = vmatprep.subr.bf16.mxu1 %v22377_v30  ;;  %v25242_v30 = vld [vmem:[#allocation12_spill] sm:$0xff] }
 0x724   :  { %13403 = vmatpush3.bf16.msra.mxu0 %v22365_v53  ;;  %v25243_v53 = vld [vmem:[#allocation13_spill] sm:$0xff] }
 0x725   :  { %13405 = vmatprep.subr.bf16.mxu0 %v22391_v29  ;;  %v25244_v29 = vld [vmem:[#allocation17_spill] sm:$0xff] }
 0x726   :  { %13435 = vmatpush3.bf16.msra.mxu1 %v22389_v41  ;;  %v25245_v41 = vld [vmem:[#allocation21_spill] sm:$0xff] }
 0x727   :  { %13437 = vmatprep.subr.bf16.mxu1 %v22415_v59  ;;  %v25246_v59 = vld [vmem:[#allocation20_spill] sm:$0xff] }
 0x728   :  { %13407 = vmatpush3.bf16.msra.mxu0 %v25236_v43 }
 0x729   :  { %13409 = vmatprep.subr.bf16.mxu0 %v25237_v0  ;;  %v25258_v0 = vld [vmem:[#allocation34_spill] sm:$0xff] }
 0x72a   :  { %13439 = vmatpush3.bf16.msra.mxu1 %v25238_v35 }
 0x72b   :  { %13441 = vmatprep.subr.bf16.mxu1 %v25239_v45 }
 0x72c   :  { %13411 = vmatpush3.bf16.msra.mxu0 %v25240_v6 }
 0x72d   :  { %13413 = vmatprep.subr.bf16.mxu0 %v25241_v24  ;;  %v25259_v24 = vunpack.i.h.bf16 %v22918_v51 }
 0x72e   :  { %13443 = vmatpush3.bf16.msra.mxu1 %v25242_v30 }
 0x72f   :  { %13445 = vmatprep.subr.bf16.mxu1 %v25243_v53 }
 0x730   :  { %13415 = vmatpush3.bf16.msra.mxu0 %v25244_v29  ;;  %v25260_v29 = vld [vmem:[#allocation29_spill] sm:$0xff] }
 0x731   :  { %13417 = vmatprep.subr.bf16.mxu0 %v25245_v41 }
 0x732   :  { %13447 = vmatpush3.bf16.msra.mxu1 %v25246_v59  ;;  %v25262_v59 = vld [vmem:[#allocation38_spill] sm:$0xff] }
 0x733   :  { %13449 = vmatprep.subr.bf16.mxu1 %v25247_v58  ;;  %v25263_v58 = vmax.f32 %v25262_v59, 0.0  ;;  %v25271_v59 = vld [vmem:[#allocation35_spill] sm:$0xff] }
 0x734   :  { %13419 = vmatpush3.bf16.msra.mxu0 %v25248_v2 }
 0x735   :  { %13421 = vmatprep.subr.bf16.mxu0 %v25249_v40 }
 0x736   :  { %13451 = vmatpush3.bf16.msra.mxu1 %v25250_v38 }
 0x737   :  { %13453 = vmatprep.subr.bf16.mxu1 %v25251_v8 }
 0x738   :  { %13423 = vmatpush3.bf16.msra.mxu0 %v25252_v62 }
 0x739   :  { %13425 = vmatprep.subr.bf16.mxu0 %v25253_v33 }
 0x73a   :  { %13455 = vmatpush3.bf16.msra.mxu1 %v25254_v44 }
 0x73b   :  { %13457 = vmatprep.subr.bf16.mxu1 %v22637_v47  ;;  %v25261_v47 = vmax.f32 %v25260_v29, 0.0 }
 0x73c   :  { %13427 = vmatpush3.bf16.msra.mxu0 %v25255_v10  ;;  %v25264_v10 = vld [vmem:[#allocation40_spill] sm:$0xff] }
 0x73d   :  { %13461 = vmatprep.subr.bf16.mxu0 %v25256_v1  ;;  %v25265_v1 = vmax.f32 %v25264_v10, 0.0  ;;  %v25273_v10 = vld [vmem:[#allocation42_spill] sm:$0xff] }
 0x73e   :  { %13459 = vmatpush3.bf16.msra.mxu1 %v25257_v39 }
 0x73f   :  { %v16059_v43 = vpop.permute.xlu1 %16058  ;;  %13493 = vmatprep.subr.bf16.mxu1 %v25258_v0 }
 0x740   :  { %v16061_v35 = vunpack.i.h.bf16 %v16059_v43  ;;  %v16060_v45 = vunpack.i.l.bf16 %v16059_v43  ;;  %v25266_v43 = vunpack.i.h.bf16 %v23084_v21 }
 0x741   :  { %v9561_v6 = vpop.permute.xlu0 %9560 }
 0x742   :  { %v9577_v30 = vsel %vm396_vm2, %v25259_v24, %v16060_v45  ;;  %v9578_v53 = vsel %vm396_vm2, %v16060_v45, %v16061_v35  ;;  %v25267_v45 = vld [vmem:[#allocation41_spill] sm:$0xff] }
 0x743   :  { %v23299_v41 = vmax.f32 %v25261_v47, %v9577_v30  ;;  %v23303_v2 = vmax.f32 %v25263_v58, %v9578_v53  ;;  %v16074_v40 = vpop.permute.xlu1 %16073  ;;  %v25268_v24 = vmax.f32 %v25267_v45, 0.0  ;;  %v25269_v53 = vld [vmem:[#allocation39_spill] sm:$0xff]  ;;  %v25272_v58 = vmax.f32 %v25271_v59, 0.0 }
 0x744   :  { %v16076_v38 = vunpack.i.h.bf16 %v16074_v40  ;;  %v16075_v8 = vunpack.i.l.bf16 %v16074_v40  ;;  %v25270_v29 = vmax.f32 %v25269_v53, 0.0  ;;  %v25278_v53 = vunpack.i.l.bf16 %v23016_v54 }
 0x745   :  { %v16084_v62 = vpop.permute.xlu0 %16083  ;;  %v16112_v33 = vpack.i.bf16 %v23303_v2, %v23299_v41 }
 0x746   :  { %v9594_v51 = vsel %vm396_vm2, %v16076_v38, %v9561_v6  ;;  %v9579_v44 = vsel %vm396_vm2, %v16061_v35, %v16075_v8  ;;  %v9678_v39 = vmax.f32 %v25265_v1, %v16075_v8  ;;  %v9593_v0 = vsel %vm396_vm2, %v25266_v43, %v16076_v38  ;;  %v25275_v43 = vld [vmem:[#allocation45_spill] sm:$0xff] }
 0x747   :  { %v23316_v30 = vmax.f32 %v25268_v24, %v9594_v51  ;;  %v23320_v47 = vmax.f32 %v25270_v29, %v9579_v44  ;;  %v23324_v40 = vmax.f32 %v25272_v58, %v9593_v0  ;;  %v16086_v35 = vunpack.i.h.bf16 %v16084_v62  ;;  %v9563_v7 = vpop.permute.xlu1 %9562  ;;  %16113 = vrot.lane.b32.xlu0 %v16112_v33, %s24629_s27  ;;  %v25281_v29 = vld [vmem:[#allocation36_spill] sm:$0xff] }
 0x748   :  { %v16085_v8 = vunpack.i.l.bf16 %v16084_v62  ;;  %v9595_v21 = vsel %vm396_vm2, %v9561_v6, %v9563_v7  ;;  %v25274_v51 = vmax.f32 %v25273_v10, 0.0  ;;  %v25276_v44 = vmax.f32 %v25275_v43, 0.0  ;;  %v25280_v6 = vld [vmem:[#allocation43_spill] sm:$0xff]  ;;  %vm25282_vm2 = vmmov %vm25128_vm0 }
 0x749   :  { %v16122_v38 = vpack.i.bf16 %v9678_v39, %v23320_v47  ;;  %v16117_v0 = vpack.i.bf16 %v23316_v30, %v23324_v40 }
 0x74a   :  { %v23331_v1 = vmax.f32 %v25274_v51, %v9595_v21  ;;  %v9695_v45 = vmax.f32 %v25276_v44, %v9563_v7  ;;  %v9819_v24 = vsel %vm25277_vm5, %v16085_v8, %v16086_v35  ;;  %v9818_v62 = vsel %vm25279_vm4, %v25278_v53, %v16085_v8  ;;  %v25284_v8 = vld [vmem:[#allocation46_spill] sm:$0xff]  ;;  %v25285_v51 = vld [vmem:[#allocation44_spill] sm:$0xff]  ;;  %vm25300_vm5 = vmmov %vm25128_vm0 }
 0x74b   :  { %v16089_v33 = vpop.permute.xlu1 %16088  ;;  %16123 = vrot.lane.b32.xlu1 %v16122_v38, %s24629_s27  ;;  %16118 = vrot.lane.b32.xlu0 %v16117_v0, %s24629_s27  ;;  %v9883_v39 = vmax.f32 %v25280_v6, %v9819_v24  ;;  %v9882_v59 = vmax.f32 %v25281_v29, %v9818_v62  ;;  %vm25301_vm4 = vmmov %vm25128_vm0 }
 0x74c   :  { %v16091_v58 = vunpack.i.h.bf16 %v16089_v33  ;;  %v16090_v7 = vunpack.i.l.bf16 %v16089_v33  ;;  %v16127_v21 = vpack.i.bf16 %v9695_v45, %v23331_v1 }
 0x74d   :  { %10242 = vmatprep.mubr.f32.mxu0 %v9883_v39 }
 0x74e   :  { %10243 = vmatmul.mubr.f32.gmra.mrb[34].mxu0 %v9882_v59  ;;  %v9821_v10 = vsel %vm25282_vm2, %v16090_v7, %v16091_v58  ;;  %v9820_v54 = vsel %vm25283_vm13, %v16086_v35, %v16090_v7  ;;  %v25290_v59 = vld [vmem:[#allocation37_spill] sm:$0xff]  ;;  %vm25303_vm2 = vmmov %vm25128_vm0 }
 0x74f   :  { %16128 = vrot.lane.b32.xlu1 %v16127_v21, %s24629_s27  ;;  %v9885_v38 = vmax.f32 %v25284_v8, %v9821_v10  ;;  %v9884_v43 = vmax.f32 %v25285_v51, %v9820_v54  ;;  %v25293_v51 = vld [vmem:[#allocation47_spill] sm:$0xff]  ;;  %vm25304_vm13 = vmmov %vm25128_vm0 }
 0x751   :  { %10317 = vmatprep.mubr.f32.mxu1 %v9885_v38 }
 0x752   :  { %10318 = vmatmul.mubr.f32.gmra.mrb[36].mxu1 %v9884_v43 }
 0x776   :  { %v23351_v44 = vpop.permute.xlu1 %16098 }
 0x777   :  { %v16101_v24 = vunpack.i.h.bf16 %v23351_v44  ;;  %v16100_v45 = vunpack.i.l.bf16 %v23351_v44 }
 0x778   :  { %v16094_v0 = vpop.permute.xlu0 %16093 }
 0x779   :  { %v16096_v53 = vunpack.i.h.bf16 %v16094_v0  ;;  %v16095_v62 = vunpack.i.l.bf16 %v16094_v0  ;;  %v9809_v39 = vsel %vm25289_vm15, %v16100_v45, %v16101_v24  ;;  %vm10351_vm15 = vcmask 983808  }
 0x77a   :  { %v9873_v10 = vmax.f32 %v22996_v22, %v9809_v39 }
 0x77b   :  { %v9808_v33 = vsel %vm25286_vm14, %v16096_v53, %v16100_v45  ;;  %v9806_v35 = vsel %vm25287_vm6, %v23103_v26, %v16095_v62  ;;  %v9807_v6 = vsel %vm25288_vm10, %v16095_v62, %v16096_v53  ;;  %vm10323_vm14 = vcmask 196608  }
 0x77c   :  { %v9872_v29 = vmax.f32 %v23004_v4, %v9808_v33  ;;  %v9870_v7 = vmax.f32 %v25290_v59, %v9806_v35  ;;  %v9871_v21 = vmax.f32 %v23000_v49, %v9807_v6  ;;  %10700 = vmatprep.mubr.f32.mxu1 %v9873_v10  ;;  %vm10338_vm6 = vcmask 459008  }
 0x77d   :  { %vm10344_vm10 = vcmask 721408  }
 0x77e   :  { %10625 = vmatprep.mubr.f32.mxu0 %v9871_v21  ;;  %10701 = vmatmul.mubr.f32.vlgmr.msra.gmra.mrb[38].mxu1 %v9872_v29  ;;  %v10329_v21 = vlaneseq }
 0x77f   :  { %10626 = vmatmul.mubr.f32.vlgmr.msra.gmra.mrb[36].mxu0 %v9870_v7  ;;  %v16104_v54 = vpop.permute.xlu0 %16103  ;;  %13495 = vmatpush3.bf16.msra.mxu1 %v22910_v18  ;;  %v16212_v7 = vmov 1983009808  }
 0x780   :  { %13463 = vmatpush3.bf16.msra.mxu0 %v22908_v63  ;;  %v16106_v26 = vunpack.i.h.bf16 %v16104_v54  ;;  %v16105_v8 = vunpack.i.l.bf16 %v16104_v54  ;;  %13497 = vmatprep.subr.bf16.mxu1 %v22924_v37  ;;  %v23422_v54 = vshrl.u32 %v10329_v21, 7 }
 0x781   :  { %13465 = vmatprep.subr.bf16.mxu0 %v22920_v57 }
 0x782   :  { %v9823_v4 = vsel %vm25291_vm11, %v16105_v8, %v16106_v26  ;;  %v9822_v49 = vsel %vm25292_vm8, %v16091_v58, %v16105_v8  ;;  %vm16213_vm11 = vmmov 0   ;;  %vm11533_vm8 = vcmask 1043456  }
 0x783   :  { %v9887_v38 = vmax.f32 %v23078_v19, %v9823_v4  ;;  %v9886_v43 = vmax.f32 %v25293_v51, %v9822_v49  ;;  %13499 = vmatpush3.bf16.msra.mxu1 %v22926_v12 }
 0x784   :  { %v16109_v22 = vpop.permute.xlu1 %16108  ;;  %13467 = vmatpush3.bf16.msra.mxu0 %v22922_v28  ;;  %13501 = vmatprep.subr.bf16.mxu1 %v22966_v60 }
 0x785   :  { %v16111_v18 = vunpack.i.h.bf16 %v16109_v22  ;;  %v16110_v63 = vunpack.i.l.bf16 %v16109_v22  ;;  %13469 = vmatprep.subr.bf16.mxu0 %v22954_v61  ;;  %10630 = vmatprep.mubr.f32.mxu0 %v9887_v38 }
 0x786   :  { %10631 = vmatmul.mubr.f32.gmra.mrb[38].mxu0 %v9886_v43 }
 0x787   :  { %v9825_v57 = vsel %vm25294_vm9, %v16110_v63, %v16111_v18  ;;  %v9824_v37 = vsel %vm25295_vm1, %v16106_v26, %v16110_v63  ;;  %13503 = vmatpush3.bf16.msra.mxu1 %v22968_v32  ;;  %v25297_v32 = vld [vmem:[#allocation48_spill] sm:$0xff]  ;;  %vm16214_vm9 = vmmov 1  }
 0x788   :  { %v9889_v19 = vmax.f32 %v23136_v34, %v9825_v57  ;;  %v9888_v58 = vmax.f32 %v23082_v56, %v9824_v37  ;;  %13471 = vmatpush3.bf16.msra.mxu0 %v22964_v23  ;;  %13505 = vmatprep.subr.bf16.mxu1 %v23025_v11  ;;  %vm13756_vm1 = vmpackc.low %vm11533_vm8, %vm16214_vm9 }
 0x789   :  { %13473 = vmatprep.subr.bf16.mxu0 %v23008_v15 }
 0x78a   :  { %10705 = vmatprep.mubr.f32.mxu1 %v9889_v19 }
 0x78b   :  { %10706 = vmatmul.mubr.f32.gmra.mrb[40].mxu1 %v9888_v58 }
 0x78c   :  { %13475 = vmatpush3.bf16.msra.mxu0 %v23023_v3  ;;  %13507 = vmatpush3.bf16.msra.mxu1 %v23047_v52 }
 0x78d   :  { %13477 = vmatprep.subr.bf16.mxu0 %v23059_v31  ;;  %13509 = vmatprep.subr.bf16.mxu1 %v23109_v13 }
 0x790   :  { %13479 = vmatpush3.bf16.msra.mxu0 %v23061_v5  ;;  %13511 = vmatpush3.bf16.msra.mxu1 %v23152_v55 }
 0x791   :  { %13481 = vmatprep.subr.bf16.mxu0 %v23126_v42  ;;  %13513 = vmatprep.subr.bf16.mxu1 %v23163_v25 }
 0x794   :  { %13483 = vmatpush3.bf16.msra.mxu0 %v23172_v48  ;;  %13515 = vmatpush3.bf16.msra.mxu1 %v23191_v36  ;;  %v25302_v36 = vld [vmem:[#allocation49_spill] sm:$0xff] }
 0x795   :  { %13485 = vmatprep.subr.bf16.mxu0 %v23182_v17  ;;  %13517 = vmatprep.subr.bf16.mxu1 %v23200_v27 }
 0x798   :  { %13487 = vmatpush3.bf16.msra.mxu0 %v23209_v9  ;;  %13519 = vmatpush3.bf16.msra.mxu1 %v23227_v46 }
 0x799   :  { %13489 = vmatprep.subr.bf16.mxu0 %v23218_v14  ;;  %13521 = vmatprep.subr.bf16.mxu1 %v23230_v20 }
 0x79c   :  { %13491 = vmatpush3.bf16.msra.mxu0 %v23239_v50  ;;  %13523 = vmatpush3.bf16.msra.mxu1 %v23247_v16 }
 0x7b9   :  { %v16114_v28 = vpop.permute.xlu0 %16113 }
 0x7ba   :  { %v16116_v12 = vunpack.i.h.bf16 %v16114_v28  ;;  %v16115_v61 = vunpack.i.l.bf16 %v16114_v28 }
 0x7bc   :  { %v9810_v23 = vsel %vm25128_vm0, %v16101_v24, %v16115_v61  ;;  %v9811_v60 = vsel %vm25296_vm7, %v16115_v61, %v16116_v12  ;;  %vm11529_vm0 = vcmask 359424   ;;  %vm11698_vm7 = vcmask 818176  }
 0x7bd   :  { %v9874_v15 = vmax.f32 %v25297_v32, %v9810_v23  ;;  %v16124_v3 = vpop.permute.xlu1 %16123  ;;  %v16119_v11 = vpop.permute.xlu0 %16118  ;;  %v9875_v52 = vmax.f32 %v23299_v41, %v9811_v60 }
 0x7be   :  { %v16126_v31 = vunpack.i.h.bf16 %v16124_v3  ;;  %v16125_v5 = vunpack.i.l.bf16 %v16124_v3  ;;  %v16121_v20 = vunpack.i.h.bf16 %v16119_v11  ;;  %v16120_v56 = vunpack.i.l.bf16 %v16119_v11 }
 0x7bf   :  { %10775 = vmatprep.mubr.f32.mxu0 %v9875_v52 }
 0x7c0   :  { %v9812_v50 = vsel %vm25298_vm3, %v16116_v12, %v16125_v5  ;;  %10776 = vmatmul.mubr.f32.vlgmr.msra.gmra.mrb[40].mxu0 %v9874_v15  ;;  %v9827_v13 = vsel %vm25299_vm12, %v16120_v56, %v16121_v20  ;;  %v9813_v42 = vsel %vm25300_vm5, %v16125_v5, %v16126_v31  ;;  %v9826_v34 = vsel %vm25301_vm4, %v16111_v18, %v16120_v56 }
 0x7c1   :  { %v9876_v55 = vmax.f32 %v23303_v2, %v9812_v50  ;;  %v16129_v25 = vpop.permute.xlu1 %16128  ;;  %v9891_v48 = vmax.f32 %v23324_v40, %v9827_v13  ;;  %v9877_v17 = vmax.f32 %v23320_v47, %v9813_v42  ;;  %v9890_v27 = vmax.f32 %v25302_v36, %v9826_v34  ;;  %v10968_v36 = vld [vmem:[%s24279_s5] sm:$0xff] }
 0x7c2   :  { %v16131_v9 = vunpack.i.h.bf16 %v16129_v25  ;;  %v16130_v14 = vunpack.i.l.bf16 %v16129_v25  ;;  %vm11775_vm3 = vcmask 74752  }
 0x7c3   :  { %10780 = vmatprep.mubr.f32.mxu0 %v9891_v48  ;;  %10850 = vmatprep.mubr.f32.mxu1 %v9877_v17  ;;  %v10969_v48 = vld [vmem:[%s24279_s5 + $0x8] sm:$0xff]  ;;  %v10972_v17 = vld [vmem:[%s24279_s5 + $0x20] sm:$0xff] }
 0x7c4   :  { %10781 = vmatmul.mubr.f32.gmra.mrb[42].mxu0 %v9890_v27  ;;  %10851 = vmatmul.mubr.f32.vlgmr.msra.gmra.mrb[42].mxu1 %v9876_v55  ;;  %v9829_v46 = vsel %vm25303_vm2, %v16130_v14, %v16131_v9  ;;  %v9828_v16 = vsel %vm25304_vm13, %v16121_v20, %v16130_v14  ;;  %v13524_v27 = vpack.c.bf16 %v10972_v17, %v10969_v48  ;;  %v10971_v9 = vld [vmem:[%s24279_s5 + $0x18] sm:$0xff] }
 0x7c5   :  { %v9893_v41 = vmax.f32 %v23331_v1, %v9829_v46  ;;  %v9892_v2 = vmax.f32 %v23316_v30, %v9828_v16  ;;  %v10327_v1 = vunpack.c.l.s4 %v16212_v7  ;;  %v10975_v14 = vld [vmem:[%s24279_s5 + $0x38] sm:$0xff]  ;;  %v10978_v46 = vld [vmem:[%s24279_s5 + $0x50] sm:$0xff]  ;;  %v13526_v16 = vpack.c.bf16 %v10971_v9, %v10968_v36  ;;  %v10996_v7 = vld [vmem:[%s24279_s5 + $0xe0] sm:$0xff] }
 0x7c6   :  { %13525 = vmatprep.subr.bf16.mxu0 %v13524_v27 }
 0x7c7   :  { %10855 = vmatprep.mubr.f32.mxu1 %v9893_v41  ;;  %v10328_v10 = vunpack.c.0.s8 %v10327_v1  ;;  %v13528_v41 = vpack.c.bf16 %v10978_v46, %v10975_v14  ;;  %13527 = vmatpush1.bf16.msra.mxu0 %v13526_v16 }
 0x7c8   :  { %10856 = vmatmul.mubr.f32.gmra.mrb[44].mxu1 %v9892_v2  ;;  %v10974_v2 = vld [vmem:[%s24279_s5 + $0x30] sm:$0xff] }
 0x7c9   :  { %v23425_v51 = vsub.s32 %v10328_v10, %v23422_v54  ;;  %13529 = vmatprep.subr.bf16.mxu0 %v13528_v41  ;;  %v10995_v10 = vld [vmem:[%s24279_s5 + $0xd8] sm:$0xff] }
 0x7d1   :  { %v11890_v40 = vpop.f32.mrb[28].mxu0 }
 0x7d2   :  { %v11891_v47 = vpop.f32.mrb[29].mxu0 }
 0x7d3   :  { %v11892_v44 = vadd.f32 %v11891_v47, %v11890_v40  ;;  %v11928_v0 = vpop.f32.mrb[30].mxu1  ;;  %v10977_v40 = vld [vmem:[%s24279_s5 + $0x48] sm:$0xff] }
 0x7d4   :  { %v11929_v24 = vpop.f32.mrb[31].mxu1  ;;  %v10981_v47 = vld [vmem:[%s24279_s5 + $0x68] sm:$0xff] }
 0x7d5   :  { %v11930_v45 = vadd.f32 %v11929_v24, %v11928_v0  ;;  %v13530_v0 = vpack.c.bf16 %v10977_v40, %v10974_v2  ;;  %v11017_v2 = vld [vmem:[%s24279_s5 + $0x188] sm:$0xff]  ;;  %v11020_v40 = vld [vmem:[%s24279_s5 + $0x1a0] sm:$0xff] }
 0x7d7   :  { %v10165_v53 = vadd.f32 %v11930_v45, %v11892_v44  ;;  %v10984_v44 = vld [vmem:[%s24279_s5 + $0x80] sm:$0xff]  ;;  %13531 = vmatpush1.bf16.msra.mxu0 %v13530_v0 }
 0x7d8   :  { %v13532_v24 = vpack.c.bf16 %v10984_v44, %v10981_v47  ;;  %v10980_v45 = vld [vmem:[%s24279_s5 + $0x60] sm:$0xff]  ;;  %v11018_v47 = vld [vmem:[%s24279_s5 + $0x190] sm:$0xff] }
 0x7da   :  { %13533 = vmatprep.subr.bf16.mxu0 %v13532_v24 }
 0x7db   :  { %v11893_v62 = vpop.f32.mrb[30].mxu0 }
 0x7dc   :  { %v11894_v33 = vpop.f32.mrb[31].mxu0 }
 0x7dd   :  { %v11895_v35 = vadd.f32 %v11894_v33, %v11893_v62  ;;  %v11931_v6 = vpop.f32.mrb[32].mxu1  ;;  %v10987_v62 = vld [vmem:[%s24279_s5 + $0x98] sm:$0xff]  ;;  %v10990_v33 = vld [vmem:[%s24279_s5 + $0xb0] sm:$0xff] }
 0x7de   :  { %v11932_v39 = vpop.f32.mrb[33].mxu1 }
 0x7df   :  { %v11933_v29 = vadd.f32 %v11932_v39, %v11931_v6  ;;  %v13536_v6 = vpack.c.bf16 %v10990_v33, %v10987_v62  ;;  %v10986_v39 = vld [vmem:[%s24279_s5 + $0x90] sm:$0xff]  ;;  %v11016_v62 = vld [vmem:[%s24279_s5 + $0x180] sm:$0xff]  ;;  %v11019_v33 = vld [vmem:[%s24279_s5 + $0x198] sm:$0xff] }
 0x7e1   :  { %v10170_v59 = vadd.f32 %v11933_v29, %v11895_v35  ;;  %v10989_v29 = vld [vmem:[%s24279_s5 + $0xa8] sm:$0xff] }
 0x7e2   :  { %v13538_v1 = vpack.c.bf16 %v10989_v29, %v10986_v39  ;;  %v13558_v29 = vpack.c.bf16 %v11019_v33, %v11016_v62 }
 0x7f2   :  { %v11966_v30 = vpop.f32.mrb[32].mxu0 }
 0x7f3   :  { %v11967_v26 = vpop.f32.mrb[33].mxu0 }
 0x7f4   :  { %v11968_v8 = vadd.f32 %v11967_v26, %v11966_v30  ;;  %v12004_v4 = vpop.f32.mrb[34].mxu1  ;;  %v10992_v30 = vld [vmem:[%s24279_s5 + $0xc0] sm:$0xff]  ;;  %v10999_v26 = vld [vmem:[%s24279_s5 + $0xf8] sm:$0xff] }
 0x7f5   :  { %v12005_v49 = vpop.f32.mrb[35].mxu1 }
 0x7f6   :  { %v10240_v22 = vadd.f32 %v11968_v8, %v10165_v53  ;;  %v12006_v38 = vadd.f32 %v12005_v49, %v12004_v4  ;;  %v10983_v53 = vld [vmem:[%s24279_s5 + $0x78] sm:$0xff]  ;;  %v11002_v8 = vld [vmem:[%s24279_s5 + $0x110] sm:$0xff]  ;;  %v13542_v4 = vpack.c.bf16 %v10995_v10, %v10992_v30 }
 0x7f7   :  { %v13534_v35 = vpack.c.bf16 %v10983_v53, %v10980_v45  ;;  %v13544_v49 = vpack.c.bf16 %v11002_v8, %v10999_v26  ;;  %v13556_v45 = vpack.c.bf16 %v11020_v40, %v11017_v2  ;;  %v11021_v53 = vld [vmem:[%s24279_s5 + $0x1a8] sm:$0xff]  ;;  %v11023_v10 = vld [vmem:[%s24279_s5 + $0x1b8] sm:$0xff]  ;;  %v11026_v26 = vld [vmem:[%s24279_s5 + $0x1d0] sm:$0xff] }
 0x7f8   :  { %v10315_v43 = vadd.f32 %v12006_v38, %v10240_v22  ;;  %v10998_v22 = vld [vmem:[%s24279_s5 + $0xf0] sm:$0xff]  ;;  %v11001_v38 = vld [vmem:[%s24279_s5 + $0x108] sm:$0xff]  ;;  %v13652_v39 = vpack.c.bf16 %v11021_v53, %v11018_v47  ;;  %v11024_v8 = vld [vmem:[%s24279_s5 + $0x1c0] sm:$0xff] }
 0x7f9   :  { %13535 = vmatpush1.bf16.msra.mxu0 %v13534_v35  ;;  %v11039_v2 = vld [vmem:[%s24279_s5 + $0x238] sm:$0xff]  ;;  %v11034_v40 = vld [vmem:[%s24279_s5 + $0x210] sm:$0xff]  ;;  %v11037_v47 = vld [vmem:[%s24279_s5 + $0x228] sm:$0xff] }
 0x7fa   :  { %v10332_v18 = vrot.slane %v10315_v43, %v23425_v51  ;;  %v10353_v63 = vcombine.high %v10315_v43, %v10315_v43  ;;  %10324 = vst.msk [vmem:[#allocation7] sm:$0x1] %vm10323_vm14, %v10315_v43  ;;  %13537 = vmatprep.subr.bf16.mxu0 %v13536_v6  ;;  %v11005_v43 = vld [vmem:[%s24279_s5 + $0x128] sm:$0xff]  ;;  %13653 = vmatprep.subr.bf16.mxu1 %v13652_v39  ;;  %v10991_v53 = vld [vmem:[%s24279_s5 + $0xb8] sm:$0xff]  ;;  %v11044_v39 = vld [vmem:[%s24279_s5 + $0x260] sm:$0xff] }
 0x7fc   :  { %v10360_v57 = vrot.slane %v10353_v63, %v23425_v51  ;;  %v11836_v37 = vrot.slane %v10332_v18, 9  ;;  %v10340_v58 = vcombine.high %v10332_v18, %v10332_v18  ;;  %v11008_v18 = vld [vmem:[%s24279_s5 + $0x140] sm:$0xff]  ;;  %v13546_v63 = vpack.c.bf16 %v11001_v38, %v10998_v22 }
 0x7fd   :  { %13539 = vmatpush1.bf16.msra.mxu0 %v13538_v1  ;;  %v13560_v38 = vpack.c.bf16 %v11026_v26, %v11023_v10  ;;  %v11040_v10 = vld [vmem:[%s24279_s5 + $0x240] sm:$0xff]  ;;  %v11043_v26 = vld [vmem:[%s24279_s5 + $0x258] sm:$0xff] }
 0x7fe   :  { %10335 = vrot.lane.b32.xlu0 %v11836_v37, %s24621_s28  ;;  %v11838_v19 = vrot.slane %v10360_v57, 9  ;;  %10362 = vst.msk [vmem:[#allocation7 + $0x2] sm:$0x1] %vm10323_vm14, %v10360_v57  ;;  %v10369_v28 = vcombine.high %v10360_v57, %v10360_v57  ;;  %v11837_v12 = vrot.slane %v10340_v58, 9  ;;  %v13548_v57 = vpack.c.bf16 %v11008_v18, %v11005_v43  ;;  %v11004_v37 = vld [vmem:[%s24279_s5 + $0x120] sm:$0xff]  ;;  %v11027_v43 = vld [vmem:[%s24279_s5 + $0x1d8] sm:$0xff] }
 0x7ff   :  { %v11022_v18 = vld [vmem:[%s24279_s5 + $0x1b0] sm:$0xff] }
 0x800   :  { %10365 = vrot.lane.b32.xlu1 %v11838_v19, %s24621_s28  ;;  %v11839_v61 = vrot.slane %v10369_v28, 9  ;;  %v11007_v19 = vld [vmem:[%s24279_s5 + $0x138] sm:$0xff] }
 0x802   :  { %10341 = vrot.lane.b32.xlu0 %v10340_v58, %s24629_s27  ;;  %v11011_v58 = vld [vmem:[%s24279_s5 + $0x158] sm:$0xff] }
 0x804   :  { %10370 = vrot.lane.b32.xlu1 %v10369_v28, %s24629_s27  ;;  %v11014_v28 = vld [vmem:[%s24279_s5 + $0x170] sm:$0xff] }
 0x806   :  { %10348 = vrot.lane.b32.xlu0 %v11837_v12, %s16190_s14  ;;  %v13550_v12 = vpack.c.bf16 %v11007_v19, %v11004_v37  ;;  %v13656_v37 = vpack.c.bf16 %v11027_v43, %v11024_v8 }
 0x808   :  { %10376 = vrot.lane.b32.xlu1 %v11839_v61, %s16190_s14  ;;  %v13552_v61 = vpack.c.bf16 %v11014_v28, %v11011_v58  ;;  %v10976_v58 = vld [vmem:[%s24279_s5 + $0x40] sm:$0xff]  ;;  %v10979_v28 = vld [vmem:[%s24279_s5 + $0x58] sm:$0xff] }
 0x821   :  { %v11969_v23 = vpop.f32.mrb[34].mxu0 }
 0x822   :  { %v11970_v60 = vpop.f32.mrb[35].mxu0 }
 0x823   :  { %v11971_v32 = vadd.f32 %v11970_v60, %v11969_v23  ;;  %v11010_v23 = vld [vmem:[%s24279_s5 + $0x150] sm:$0xff]  ;;  %v11013_v60 = vld [vmem:[%s24279_s5 + $0x168] sm:$0xff] }
 0x825   :  { %v10245_v15 = vadd.f32 %v11971_v32, %v10170_v59  ;;  %v12007_v3 = vpop.f32.mrb[36].mxu1  ;;  %v10993_v59 = vld [vmem:[%s24279_s5 + $0xc8] sm:$0xff] }
 0x826   :  { %v12008_v11 = vpop.f32.mrb[37].mxu1  ;;  %v13540_v21 = vpack.c.bf16 %v10996_v7, %v10993_v59  ;;  %v10970_v59 = vld [vmem:[%s24279_s5 + $0x10] sm:$0xff]  ;;  %v10973_v7 = vld [vmem:[%s24279_s5 + $0x28] sm:$0xff] }
 0x827   :  { %v12009_v52 = vadd.f32 %v12008_v11, %v12007_v3  ;;  %v13654_v30 = vpack.c.bf16 %v10973_v7, %v10970_v59 }
 0x828   :  { %13541 = vmatprep.subr.bf16.mxu0 %v13540_v21 }
 0x829   :  { %v10320_v31 = vadd.f32 %v12009_v52, %v10245_v15  ;;  %13543 = vmatpush1.bf16.msra.mxu0 %v13542_v4  ;;  %13655 = vmatpush3.bf16.msra.mxu1 %v13654_v30  ;;  %v11045_v30 = vld [vmem:[%s24279_s5 + $0x268] sm:$0xff] }
 0x82a   :  { %13545 = vmatprep.subr.bf16.mxu0 %v13544_v49  ;;  %13657 = vmatprep.subr.bf16.mxu1 %v13656_v37  ;;  %v11048_v37 = vld [vmem:[%s24279_s5 + $0x280] sm:$0xff] }
 0x82b   :  { %v10388_v5 = vrot.slane %v10320_v31, %v23425_v51  ;;  %v10406_v20 = vcombine.high %v10320_v31, %v10320_v31  ;;  %10380 = vst.msk [vmem:[#allocation7 + $0x4] sm:$0x1] %vm10323_vm14, %v10320_v31 }
 0x82d   :  { %v10413_v56 = vrot.slane %v10406_v20, %v23425_v51  ;;  %v11840_v50 = vrot.slane %v10388_v5, 9  ;;  %v10395_v42 = vcombine.high %v10388_v5, %v10388_v5  ;;  %13547 = vmatpush1.bf16.msra.mxu0 %v13546_v63  ;;  %v13554_v5 = vpack.c.bf16 %v11013_v60, %v11010_v23  ;;  %v11025_v63 = vld [vmem:[%s24279_s5 + $0x1c8] sm:$0xff] }
 0x82e   :  { %13549 = vmatprep.subr.bf16.mxu0 %v13548_v57  ;;  %v13562_v19 = vpack.c.bf16 %v11025_v63, %v11022_v18  ;;  %v13658_v60 = vpack.c.bf16 %v10979_v28, %v10976_v58  ;;  %v11047_v63 = vld [vmem:[%s24279_s5 + $0x278] sm:$0xff] }
 0x82f   :  { %10391 = vrot.lane.b32.xlu0 %v11840_v50, %s24621_s28  ;;  %v11842_v13 = vrot.slane %v10413_v56, 9  ;;  %10415 = vst.msk [vmem:[#allocation7 + $0x6] sm:$0x1] %vm10323_vm14, %v10413_v56  ;;  %v10422_v34 = vcombine.high %v10413_v56, %v10413_v56  ;;  %v11841_v55 = vrot.slane %v10395_v42, 9 }
 0x830   :  { %13659 = vmatpush3.bf16.msra.mxu1 %v13658_v60 }
 0x831   :  { %10418 = vrot.lane.b32.xlu1 %v11842_v13, %s24621_s28  ;;  %v11843_v25 = vrot.slane %v10422_v34, 9  ;;  %13551 = vmatpush1.bf16.msra.mxu0 %v13550_v12 }
 0x832   :  { %13553 = vmatprep.subr.bf16.mxu0 %v13552_v61 }
 0x833   :  { %10396 = vrot.lane.b32.xlu0 %v10395_v42, %s24629_s27 }
 0x835   :  { %10423 = vrot.lane.b32.xlu1 %v10422_v34, %s24629_s27  ;;  %13555 = vmatpush1.bf16.msra.mxu0 %v13554_v5  ;;  %v11033_v5 = vld [vmem:[%s24279_s5 + $0x208] sm:$0xff] }
 0x836   :  { %13557 = vmatprep.subr.bf16.mxu0 %v13556_v45  ;;  %v10988_v45 = vld [vmem:[%s24279_s5 + $0xa0] sm:$0xff] }
 0x837   :  { %10402 = vrot.lane.b32.xlu0 %v11841_v55, %s16190_s14 }
 0x839   :  { %10429 = vrot.lane.b32.xlu1 %v11843_v25, %s16190_s14  ;;  %13559 = vmatpush1.bf16.msra.mxu0 %v13558_v29  ;;  %v11042_v29 = vld [vmem:[%s24279_s5 + $0x250] sm:$0xff] }
 0x83a   :  { %13561 = vmatprep.subr.bf16.mxu0 %v13560_v38  ;;  %v13668_v8 = vpack.c.bf16 %v11045_v30, %v11042_v29  ;;  %v11117_v29 = vld [vmem:[%s24279_s5 + $0x4a8] sm:$0xff] }
 0x83d   :  { %13563 = vmatpush1.bf16.msra.mxu0 %v13562_v19 }
 0x851   :  { %v12080_v15 = vpop.f32.mrb[38].mxu1 }
 0x852   :  { %v12042_v32 = vpop.f32.mrb[36].mxu0  ;;  %v12081_v11 = vpop.f32.mrb[39].mxu1 }
 0x853   :  { %v12043_v3 = vpop.f32.mrb[37].mxu0  ;;  %v12082_v31 = vadd.f32 %v12081_v11, %v12080_v15  ;;  %v11032_v15 = vld [vmem:[%s24279_s5 + $0x200] sm:$0xff] }
 0x854   :  { %v12044_v52 = vadd.f32 %v12043_v3, %v12042_v32  ;;  %v11029_v32 = vld [vmem:[%s24279_s5 + $0x1e8] sm:$0xff]  ;;  %v11030_v3 = vld [vmem:[%s24279_s5 + $0x1f0] sm:$0xff] }
 0x856   :  { %v10703_v20 = vadd.f32 %v12082_v31, %v12044_v52 }
 0x859   :  { %v12045_v56 = vpop.f32.mrb[38].mxu0 }
 0x85a   :  { %v12046_v50 = vpop.f32.mrb[39].mxu0 }
 0x85b   :  { %v12047_v13 = vadd.f32 %v12046_v50, %v12045_v56  ;;  %v11031_v56 = vld [vmem:[%s24279_s5 + $0x1f8] sm:$0xff]  ;;  %v13564_v50 = vpack.c.bf16 %v11032_v15, %v11029_v32  ;;  %v11000_v15 = vld [vmem:[%s24279_s5 + $0x100] sm:$0xff] }
 0x85d   :  { %13565 = vmatprep.subr.bf16.mxu0 %v13564_v50 }
 0x85e   :  { %v12083_v42 = vpop.f32.mrb[40].mxu1 }
 0x85f   :  { %v12084_v34 = vpop.f32.mrb[41].mxu1 }
 0x860   :  { %v12085_v55 = vadd.f32 %v12084_v34, %v12083_v42  ;;  %v10982_v34 = vld [vmem:[%s24279_s5 + $0x70] sm:$0xff] }
 0x862   :  { %v10708_v25 = vadd.f32 %v12085_v55, %v12047_v13  ;;  %v13660_v13 = vpack.c.bf16 %v11033_v5, %v11030_v3  ;;  %v10985_v55 = vld [vmem:[%s24279_s5 + $0x88] sm:$0xff]  ;;  %v11003_v3 = vld [vmem:[%s24279_s5 + $0x118] sm:$0xff]  ;;  %v11056_v5 = vld [vmem:[%s24279_s5 + $0x2c0] sm:$0xff] }
 0x864   :  { %13661 = vmatprep.subr.bf16.mxu1 %v13660_v13 }
 0x870   :  { %v10336_v48 = vpop.permute.xlu0 %10335 }
 0x871   :  { %10339 = vst.msk [vmem:[#allocation7] sm:$0x1] %vm10338_vm6, %v10336_v48 }
 0x872   :  { %v10366_v17 = vpop.permute.xlu1 %10365 }
 0x873   :  { %10368 = vst.msk [vmem:[#allocation7 + $0x2] sm:$0x1] %vm10338_vm6, %v10366_v17 }
 0x874   :  { %v10342_v36 = vpop.permute.xlu0 %10341 }
 0x875   :  { %10345 = vst.msk [vmem:[#allocation7] sm:$0x1] %vm10344_vm10, %v10342_v36  ;;  %v13662_v36 = vpack.c.bf16 %v10985_v55, %v10982_v34  ;;  %v11055_v34 = vld [vmem:[%s24279_s5 + $0x2b8] sm:$0xff]  ;;  %v11006_v55 = vld [vmem:[%s24279_s5 + $0x130] sm:$0xff] }
 0x876   :  { %v10371_v27 = vpop.permute.xlu1 %10370 }
 0x877   :  { %10373 = vst.msk [vmem:[#allocation7 + $0x2] sm:$0x1] %vm10344_vm10, %v10371_v27  ;;  %v11035_v27 = vld [vmem:[%s24279_s5 + $0x218] sm:$0xff]  ;;  %13663 = vmatpush3.bf16.msra.mxu1 %v13662_v36 }
 0x878   :  { %v10349_v9 = vpop.permute.xlu0 %10348  ;;  %v11059_v36 = vld [vmem:[%s24279_s5 + $0x2d8] sm:$0xff] }
 0x879   :  { %10352 = vst.msk [vmem:[#allocation7] sm:$0x1] %vm10351_vm15, %v10349_v9  ;;  %v11038_v9 = vld [vmem:[%s24279_s5 + $0x230] sm:$0xff] }
 0x87a   :  { %v10377_v14 = vpop.permute.xlu1 %10376 }
 0x87b   :  { %10379 = vst.msk [vmem:[#allocation7 + $0x2] sm:$0x1] %vm10351_vm15, %v10377_v14  ;;  %v11036_v14 = vld [vmem:[%s24279_s5 + $0x220] sm:$0xff] }
 0x893   :  { %v12118_v46 = vpop.f32.mrb[40].mxu0 }
 0x894   :  { %v12119_v16 = vpop.f32.mrb[41].mxu0 }
 0x895   :  { %v12120_v41 = vadd.f32 %v12119_v16, %v12118_v46 }
 0x897   :  { %v10778_v44 = vadd.f32 %v12120_v41, %v10703_v20  ;;  %v12121_v0 = vpop.f32.mrb[42].mxu0  ;;  %v12156_v24 = vpop.f32.mrb[42].mxu1  ;;  %v11028_v20 = vld [vmem:[%s24279_s5 + $0x1e0] sm:$0xff] }
 0x898   :  { %v12122_v35 = vpop.f32.mrb[43].mxu0  ;;  %v12157_v6 = vpop.f32.mrb[43].mxu1  ;;  %v13566_v42 = vpack.c.bf16 %v11031_v56, %v11028_v20  ;;  %v11054_v20 = vld [vmem:[%s24279_s5 + $0x2b0] sm:$0xff]  ;;  %v11057_v56 = vld [vmem:[%s24279_s5 + $0x2c8] sm:$0xff] }
 0x899   :  { %v12123_v1 = vadd.f32 %v12122_v35, %v12121_v0  ;;  %v12158_v21 = vadd.f32 %v12157_v6, %v12156_v24  ;;  %v13664_v0 = vpack.c.bf16 %v11039_v2, %v11036_v14  ;;  %v13570_v24 = vpack.c.bf16 %v11037_v47, %v11034_v40  ;;  %v11041_v6 = vld [vmem:[%s24279_s5 + $0x248] sm:$0xff]  ;;  %v11058_v2 = vld [vmem:[%s24279_s5 + $0x2d0] sm:$0xff] }
 0x89a   :  { %13567 = vmatpush1.bf16.msra.mxu0 %v13566_v42  ;;  %v13666_v35 = vpack.c.bf16 %v10991_v53, %v10988_v45  ;;  %v13676_v13 = vpack.c.bf16 %v11057_v56, %v11054_v20  ;;  %v11052_v42 = vld [vmem:[%s24279_s5 + $0x2a0] sm:$0xff]  ;;  %v11075_v20 = vld [vmem:[%s24279_s5 + $0x358] sm:$0xff] }
 0x89b   :  { %v10783_v4 = vadd.f32 %v12123_v1, %v10708_v25  ;;  %v10853_v49 = vadd.f32 %v12158_v21, %v10778_v44  ;;  %v12159_v22 = vpop.f32.mrb[44].mxu1  ;;  %v13568_v44 = vpack.c.bf16 %v11038_v9, %v11035_v27  ;;  %13665 = vmatprep.subr.bf16.mxu1 %v13664_v0  ;;  %v13572_v21 = vpack.c.bf16 %v11044_v39, %v11041_v6  ;;  %v11062_v27 = vld [vmem:[%s24279_s5 + $0x2f0] sm:$0xff]  ;;  %v11012_v0 = vld [vmem:[%s24279_s5 + $0x160] sm:$0xff] }
 0x89c   :  { %v12160_v57 = vpop.f32.mrb[45].mxu1  ;;  %13667 = vmatpush3.bf16.msra.mxu1 %v13666_v35  ;;  %v13584_v14 = vpack.c.bf16 %v11062_v27, %v11059_v36  ;;  %v11068_v35 = vld [vmem:[%s24279_s5 + $0x320] sm:$0xff]  ;;  %v11114_v6 = vld [vmem:[%s24279_s5 + $0x490] sm:$0xff]  ;;  %v11079_v36 = vld [vmem:[%s24279_s5 + $0x378] sm:$0xff] }
 0x89d   :  { %v10869_v12 = vrot.slane %v10853_v49, %v23425_v51  ;;  %v10887_v61 = vcombine.high %v10853_v49, %v10853_v49  ;;  %10861 = vst.msk [vmem:[#allocation7 + $0x1] sm:$0x1] %vm10323_vm14, %v10853_v49  ;;  %v12161_v23 = vadd.f32 %v12160_v57, %v12159_v22  ;;  %13569 = vmatprep.subr.bf16.mxu0 %v13568_v44  ;;  %v10994_v49 = vld [vmem:[%s24279_s5 + $0xd0] sm:$0xff]  ;;  %v10997_v22 = vld [vmem:[%s24279_s5 + $0xe8] sm:$0xff] }
 0x89e   :  { %13571 = vmatpush1.bf16.msra.mxu0 %v13570_v24  ;;  %v13670_v18 = vpack.c.bf16 %v10997_v22, %v10994_v49  ;;  %13669 = vmatprep.subr.bf16.mxu1 %v13668_v8  ;;  %v11050_v57 = vld [vmem:[%s24279_s5 + $0x290] sm:$0xff]  ;;  %v11061_v44 = vld [vmem:[%s24279_s5 + $0x2e8] sm:$0xff]  ;;  %v11015_v24 = vld [vmem:[%s24279_s5 + $0x178] sm:$0xff] }
 0x89f   :  { %v10894_v11 = vrot.slane %v10887_v61, %v23425_v51  ;;  %v10858_v52 = vadd.f32 %v12161_v23, %v10783_v4  ;;  %v11844_v31 = vrot.slane %v10869_v12, 9  ;;  %v10876_v41 = vcombine.high %v10869_v12, %v10869_v12  ;;  %13573 = vmatprep.subr.bf16.mxu0 %v13572_v21  ;;  %v11051_v12 = vld [vmem:[%s24279_s5 + $0x298] sm:$0xff]  ;;  %v11046_v61 = vld [vmem:[%s24279_s5 + $0x270] sm:$0xff]  ;;  %v11049_v23 = vld [vmem:[%s24279_s5 + $0x288] sm:$0xff] }
 0x8a0   :  { %v13574_v4 = vpack.c.bf16 %v11043_v26, %v11040_v10  ;;  %v13576_v28 = vpack.c.bf16 %v11050_v57, %v11047_v63  ;;  %13671 = vmatpush3.bf16.msra.mxu1 %v13670_v18  ;;  %v13672_v60 = vpack.c.bf16 %v11051_v12, %v11048_v37  ;;  %v13578_v32 = vpack.c.bf16 %v11049_v23, %v11046_v61  ;;  %v11064_v18 = vld [vmem:[%s24279_s5 + $0x300] sm:$0xff]  ;;  %v11067_v63 = vld [vmem:[%s24279_s5 + $0x318] sm:$0xff]  ;;  %v11066_v37 = vld [vmem:[%s24279_s5 + $0x310] sm:$0xff] }
 0x8a1   :  { %10896 = vst.msk [vmem:[#allocation7 + $0x3] sm:$0x1] %vm10323_vm14, %v10894_v11  ;;  %v10940_v25 = vcombine.high %v10858_v52, %v10858_v52  ;;  %10914 = vst.msk [vmem:[#allocation7 + $0x5] sm:$0x1] %vm10323_vm14, %v10858_v52  ;;  %10872 = vrot.lane.b32.xlu0 %v11844_v31, %s24621_s28  ;;  %v10392_v48 = vpop.permute.xlu0 %10391  ;;  %v11846_v17 = vrot.slane %v10894_v11, 9  ;;  %v10903_v33 = vcombine.high %v10894_v11, %v10894_v11  ;;  %v11845_v1 = vrot.slane %v10876_v41, 9 }
 0x8a2   :  { %10394 = vst.msk [vmem:[#allocation7 + $0x4] sm:$0x1] %vm10338_vm6, %v10392_v48  ;;  %v10922_v59 = vrot.slane %v10858_v52, %v23425_v51  ;;  %13575 = vmatpush1.bf16.msra.mxu0 %v13574_v4  ;;  %v11053_v11 = vld [vmem:[%s24279_s5 + $0x2a8] sm:$0xff]  ;;  %v13674_v31 = vpack.c.bf16 %v11003_v3, %v11000_v15  ;;  %13673 = vmatprep.subr.bf16.mxu1 %v13672_v60  ;;  %v11071_v12 = vld [vmem:[%s24279_s5 + $0x338] sm:$0xff]  ;;  %v11074_v61 = vld [vmem:[%s24279_s5 + $0x350] sm:$0xff] }
 0x8a3   :  { %v23638_v46 = vrot.slane %v10940_v25, %v23425_v51  ;;  %10899 = vrot.lane.b32.xlu1 %v11846_v17, %s24621_s28  ;;  %v10419_v16 = vpop.permute.xlu1 %10418  ;;  %v11847_v43 = vrot.slane %v10903_v33, 9  ;;  %13577 = vmatprep.subr.bf16.mxu0 %v13576_v28  ;;  %v13580_v50 = vpack.c.bf16 %v11056_v5, %v11053_v11  ;;  %v13582_v48 = vpack.c.bf16 %v11055_v34, %v11052_v42  ;;  %v11009_v17 = vld [vmem:[%s24279_s5 + $0x148] sm:$0xff]  ;;  %v11120_v23 = vld [vmem:[%s24279_s5 + $0x4c0] sm:$0xff]  ;;  %v11123_v60 = vld [vmem:[%s24279_s5 + $0x4d8] sm:$0xff] }
 0x8a4   :  { %10421 = vst.msk [vmem:[#allocation7 + $0x6] sm:$0x1] %vm10338_vm6, %v10419_v16  ;;  %v11848_v58 = vrot.slane %v10922_v59, 9  ;;  %v10929_v25 = vcombine.high %v10922_v59, %v10922_v59  ;;  %13675 = vmatpush3.bf16.msra.mxu1 %v13674_v31  ;;  %v13678_v9 = vpack.c.bf16 %v11009_v17, %v11006_v55  ;;  %v11060_v16 = vld [vmem:[%s24279_s5 + $0x2e0] sm:$0xff]  ;;  %v13586_v53 = vpack.c.bf16 %v11061_v44, %v11058_v2  ;;  %v11073_v31 = vld [vmem:[%s24279_s5 + $0x348] sm:$0xff]  ;;  %v11126_v34 = vld [vmem:[%s24279_s5 + $0x4f0] sm:$0xff] }
 0x8a5   :  { %10949 = vst.msk [vmem:[#allocation7 + $0x7] sm:$0x1] %vm10323_vm14, %v23638_v46  ;;  %10877 = vrot.lane.b32.xlu0 %v10876_v41, %s24629_s27  ;;  %v10397_v62 = vpop.permute.xlu0 %10396  ;;  %v11850_v52 = vrot.slane %v23638_v46, 9  ;;  %v11063_v41 = vld [vmem:[%s24279_s5 + $0x2f8] sm:$0xff]  ;;  %v10956_v40 = vcombine.high %v23638_v46, %v23638_v46  ;;  %13677 = vmatprep.subr.bf16.mxu1 %v13676_v13  ;;  %v13682_v46 = vpack.c.bf16 %v11015_v24, %v11012_v0  ;;  %v11072_v5 = vld [vmem:[%s24279_s5 + $0x340] sm:$0xff]  ;;  %v11129_v55 = vld [vmem:[%s24279_s5 + $0x508] sm:$0xff] }
 0x8a6   :  { %10399 = vst.msk [vmem:[#allocation7 + $0x4] sm:$0x1] %vm10344_vm10, %v10397_v62  ;;  %13579 = vmatpush1.bf16.msra.mxu0 %v13578_v32  ;;  %v13680_v47 = vpack.c.bf16 %v11063_v41, %v11060_v16  ;;  %v11849_v45 = vrot.slane %v10929_v25, 9  ;;  %v13684_v59 = vpack.c.bf16 %v11117_v29, %v11114_v6  ;;  %v13590_v15 = vpack.c.bf16 %v11067_v63, %v11064_v18  ;;  %v11080_v42 = vld [vmem:[%s24279_s5 + $0x380] sm:$0xff]  ;;  %v11081_v16 = vld [vmem:[%s24279_s5 + $0x388] sm:$0xff]  ;;  %v11083_v41 = vld [vmem:[%s24279_s5 + $0x398] sm:$0xff] }
 0x8a7   :  { %10904 = vrot.lane.b32.xlu1 %v10903_v33, %s24629_s27  ;;  %v10424_v7 = vpop.permute.xlu1 %10423  ;;  %13581 = vmatprep.subr.bf16.mxu0 %v13580_v50  ;;  %v11851_v62 = vrot.slane %v10956_v40, 9  ;;  %v11065_v33 = vld [vmem:[%s24279_s5 + $0x308] sm:$0xff]  ;;  %v13592_v50 = vpack.c.bf16 %v11074_v61, %v11071_v12  ;;  %v13688_v13 = vpack.c.bf16 %v11123_v60, %v11120_v23  ;;  %v11076_v17 = vld [vmem:[%s24279_s5 + $0x360] sm:$0xff]  ;;  %v11086_v2 = vld [vmem:[%s24279_s5 + $0x3b0] sm:$0xff] }
 0x8a8   :  { %10426 = vst.msk [vmem:[#allocation7 + $0x6] sm:$0x1] %vm10344_vm10, %v10424_v7  ;;  %13679 = vmatpush3.bf16.msra.mxu1 %v13678_v9  ;;  %v13588_v39 = vpack.c.bf16 %v11068_v35, %v11065_v33  ;;  %v13692_v9 = vpack.c.bf16 %v11129_v55, %v11126_v34  ;;  %v13598_v44 = vpack.c.bf16 %v11079_v36, %v11076_v17  ;;  %v11082_v24 = vld [vmem:[%s24279_s5 + $0x390] sm:$0xff]  ;;  %v11087_v33 = vld [vmem:[%s24279_s5 + $0x3b8] sm:$0xff]  ;;  %v11089_v35 = vld [vmem:[%s24279_s5 + $0x3c8] sm:$0xff] }
 0x8a9   :  { %10883 = vrot.lane.b32.xlu0 %v11845_v1, %s16190_s14  ;;  %v10403_v38 = vpop.permute.xlu0 %10402  ;;  %13681 = vmatprep.subr.bf16.mxu1 %v13680_v47  ;;  %v11135_v47 = vld [vmem:[%s24279_s5 + $0x538] sm:$0xff]  ;;  %v11092_v6 = vld [vmem:[%s24279_s5 + $0x3e0] sm:$0xff]  ;;  %v11141_v29 = vld [vmem:[%s24279_s5 + $0x568] sm:$0xff] }
 0x8aa   :  { %10405 = vst.msk [vmem:[#allocation7 + $0x4] sm:$0x1] %vm10351_vm15, %v10403_v38  ;;  %13583 = vmatpush1.bf16.msra.mxu0 %v13582_v48  ;;  %v13690_v48 = vpack.c.bf16 %v11075_v20, %v11072_v5  ;;  %v11094_v63 = vld [vmem:[%s24279_s5 + $0x3f0] sm:$0xff]  ;;  %v11101_v12 = vld [vmem:[%s24279_s5 + $0x428] sm:$0xff]  ;;  %v11104_v61 = vld [vmem:[%s24279_s5 + $0x440] sm:$0xff] }
 0x8ab   :  { %10910 = vrot.lane.b32.xlu1 %v11847_v43, %s16190_s14  ;;  %v10430_v19 = vpop.permute.xlu1 %10429  ;;  %13585 = vmatprep.subr.bf16.mxu0 %v13584_v14  ;;  %v11078_v14 = vld [vmem:[%s24279_s5 + $0x370] sm:$0xff]  ;;  %v11153_v60 = vld [vmem:[%s24279_s5 + $0x5c8] sm:$0xff] }
 0x8ac   :  { %10432 = vst.msk [vmem:[#allocation7 + $0x6] sm:$0x1] %vm10351_vm15, %v10430_v19  ;;  %13683 = vmatpush3.bf16.msra.mxu1 %v13682_v46  ;;  %v11069_v19 = vld [vmem:[%s24279_s5 + $0x328] sm:$0xff]  ;;  %v13694_v0 = vpack.c.bf16 %v11081_v16, %v11078_v14  ;;  %v11150_v23 = vld [vmem:[%s24279_s5 + $0x5b0] sm:$0xff]  ;;  %v11116_v16 = vld [vmem:[%s24279_s5 + $0x4a0] sm:$0xff] }
 0x8ad   :  { %10925 = vrot.lane.b32.xlu0 %v11848_v58, %s24621_s28  ;;  %13685 = vmatprep.subr.bf16.mxu1 %v13684_v59  ;;  %v13686_v3 = vpack.c.bf16 %v11069_v19, %v11066_v37  ;;  %v13708_v5 = vpack.c.bf16 %v11153_v60, %v11150_v23  ;;  %v11102_v20 = vld [vmem:[%s24279_s5 + $0x430] sm:$0xff]  ;;  %v11109_v36 = vld [vmem:[%s24279_s5 + $0x468] sm:$0xff]  ;;  %v11148_v60 = vld [vmem:[%s24279_s5 + $0x5a0] sm:$0xff] }
 0x8ae   :  { %13587 = vmatpush1.bf16.msra.mxu0 %v13586_v53  ;;  %v13600_v53 = vpack.c.bf16 %v11086_v2, %v11083_v41  ;;  %v11113_v14 = vld [vmem:[%s24279_s5 + $0x488] sm:$0xff] }
 0x8af   :  { %10952 = vrot.lane.b32.xlu1 %v11850_v52, %s24621_s28  ;;  %13589 = vmatprep.subr.bf16.mxu0 %v13588_v39  ;;  %v11070_v52 = vld [vmem:[%s24279_s5 + $0x330] sm:$0xff] }
 0x8b0   :  { %v11138_v39 = vld [vmem:[%s24279_s5 + $0x550] sm:$0xff] }
 0x8b1   :  { %10930 = vrot.lane.b32.xlu0 %v10929_v25, %s24629_s27  ;;  %v13594_v25 = vpack.c.bf16 %v11073_v31, %v11070_v52  ;;  %v11103_v52 = vld [vmem:[%s24279_s5 + $0x438] sm:$0xff]  ;;  %v13612_v31 = vpack.c.bf16 %v11104_v61, %v11101_v12  ;;  %v11152_v12 = vld [vmem:[%s24279_s5 + $0x5c0] sm:$0xff] }
 0x8b3   :  { %10957 = vrot.lane.b32.xlu1 %v10956_v40, %s24629_s27  ;;  %v11132_v40 = vld [vmem:[%s24279_s5 + $0x520] sm:$0xff] }
 0x8b4   :  { %v13696_v46 = vpack.c.bf16 %v11135_v47, %v11132_v40  ;;  %v13620_v40 = vpack.c.bf16 %v11116_v16, %v11113_v14  ;;  %v11112_v47 = vld [vmem:[%s24279_s5 + $0x480] sm:$0xff] }
 0x8b5   :  { %10936 = vrot.lane.b32.xlu0 %v11849_v45, %s16190_s14  ;;  %v11085_v45 = vld [vmem:[%s24279_s5 + $0x3a8] sm:$0xff] }
 0x8b6   :  { %v13602_v59 = vpack.c.bf16 %v11085_v45, %v11082_v24  ;;  %v11122_v24 = vld [vmem:[%s24279_s5 + $0x4d0] sm:$0xff] }
 0x8b7   :  { %10963 = vrot.lane.b32.xlu1 %v11851_v62, %s16190_s14  ;;  %v11084_v62 = vld [vmem:[%s24279_s5 + $0x3a0] sm:$0xff] }
 0x913   :  { %v10873_v7 = vpop.permute.xlu0 %10872 }
 0x914   :  { %10875 = vst.msk [vmem:[#allocation7 + $0x1] sm:$0x1] %vm10338_vm6, %v10873_v7  ;;  %v13698_v7 = vpack.c.bf16 %v11087_v33, %v11084_v62  ;;  %v11121_v62 = vld [vmem:[%s24279_s5 + $0x4c8] sm:$0xff] }
 0x915   :  { %v10900_v1 = vpop.permute.xlu1 %10899  ;;  %v11125_v33 = vld [vmem:[%s24279_s5 + $0x4e8] sm:$0xff] }
 0x916   :  { %10902 = vst.msk [vmem:[#allocation7 + $0x3] sm:$0x1] %vm10338_vm6, %v10900_v1  ;;  %v11088_v1 = vld [vmem:[%s24279_s5 + $0x3c0] sm:$0xff] }
 0x917   :  { %v10878_v21 = vpop.permute.xlu0 %10877 }
 0x918   :  { %10880 = vst.msk [vmem:[#allocation7 + $0x1] sm:$0x1] %vm10344_vm10, %v10878_v21  ;;  %v11091_v21 = vld [vmem:[%s24279_s5 + $0x3d8] sm:$0xff] }
 0x919   :  { %v10905_v30 = vpop.permute.xlu1 %10904 }
 0x91a   :  { %10907 = vst.msk [vmem:[#allocation7 + $0x3] sm:$0x1] %vm10344_vm10, %v10905_v30  ;;  %v13604_v30 = vpack.c.bf16 %v11092_v6, %v11089_v35  ;;  %v11128_v35 = vld [vmem:[%s24279_s5 + $0x500] sm:$0xff] }
 0x91b   :  { %v10884_v10 = vpop.permute.xlu0 %10883 }
 0x91c   :  { %10886 = vst.msk [vmem:[#allocation7 + $0x1] sm:$0x1] %vm10351_vm15, %v10884_v10  ;;  %v13700_v10 = vpack.c.bf16 %v11141_v29, %v11138_v39  ;;  %v13628_v39 = vpack.c.bf16 %v11128_v35, %v11125_v33  ;;  %v11124_v29 = vld [vmem:[%s24279_s5 + $0x4e0] sm:$0xff] }
 0x91d   :  { %v10911_v26 = vpop.permute.xlu1 %10910  ;;  %v11492_v35 = vld [vmem:[%s24281_s7 + $0x40] sm:$0xff] }
 0x91e   :  { %10913 = vst.msk [vmem:[#allocation7 + $0x3] sm:$0x1] %vm10351_vm15, %v10911_v26  ;;  %v11090_v26 = vld [vmem:[%s24279_s5 + $0x3d0] sm:$0xff] }
 0x91f   :  { %v10926_v8 = vpop.permute.xlu0 %10925 }
 0x920   :  { %10928 = vst.msk [vmem:[#allocation7 + $0x5] sm:$0x1] %vm10338_vm6, %v10926_v8  ;;  %v11093_v8 = vld [vmem:[%s24279_s5 + $0x3e8] sm:$0xff] }
 0x921   :  { %v10953_v4 = vpop.permute.xlu1 %10952  ;;  %v13702_v18 = vpack.c.bf16 %v11093_v8, %v11090_v26  ;;  %v11133_v26 = vld [vmem:[%s24279_s5 + $0x528] sm:$0xff] }
 0x922   :  { %10955 = vst.msk [vmem:[#allocation7 + $0x7] sm:$0x1] %vm10338_vm6, %v10953_v4  ;;  %v11095_v4 = vld [vmem:[%s24279_s5 + $0x3f8] sm:$0xff]  ;;  %v11137_v8 = vld [vmem:[%s24279_s5 + $0x548] sm:$0xff] }
 0x923   :  { %v10931_v49 = vpop.permute.xlu0 %10930 }
 0x924   :  { %10933 = vst.msk [vmem:[#allocation7 + $0x5] sm:$0x1] %vm10344_vm10, %v10931_v49  ;;  %v11098_v49 = vld [vmem:[%s24279_s5 + $0x410] sm:$0xff] }
 0x925   :  { %v10958_v22 = vpop.permute.xlu1 %10957  ;;  %v13608_v37 = vpack.c.bf16 %v11098_v49, %v11095_v4  ;;  %v11140_v4 = vld [vmem:[%s24279_s5 + $0x560] sm:$0xff] }
 0x926   :  { %10960 = vst.msk [vmem:[#allocation7 + $0x7] sm:$0x1] %vm10344_vm10, %v10958_v22  ;;  %v11144_v22 = vld [vmem:[%s24279_s5 + $0x580] sm:$0xff] }
 0x927   :  { %v10937_v38 = vpop.permute.xlu0 %10936 }
 0x928   :  { %10939 = vst.msk [vmem:[#allocation7 + $0x5] sm:$0x1] %vm10351_vm15, %v10937_v38  ;;  %v11147_v38 = vld [vmem:[%s24279_s5 + $0x598] sm:$0xff] }
 0x929   :  { %v10964_v43 = vpop.permute.xlu1 %10963  ;;  %v13704_v19 = vpack.c.bf16 %v11147_v38, %v11144_v22  ;;  %v13636_v22 = vpack.c.bf16 %v11140_v4, %v11137_v8  ;;  %v11136_v38 = vld [vmem:[%s24279_s5 + $0x540] sm:$0xff] }
 0x92a   :  { %10966 = vst.msk [vmem:[#allocation7 + $0x7] sm:$0x1] %vm10351_vm15, %v10964_v43  ;;  %v13606_v43 = vpack.c.bf16 %v11091_v21, %v11088_v1  ;;  %v11134_v1 = vld [vmem:[%s24279_s5 + $0x530] sm:$0xff]  ;;  %v11496_v4 = vld [vmem:[%s24281_s7 + $0x60] sm:$0xff] }
 0x931   :  { %v10967_v57 = vld [vmem:[#allocation7] sm:$0xff] }
 0x932   :  { %v11185_v58 = vrot.slane %v10967_v57, %v23425_v51  ;;  %v11178_v28 = vcombine.high %v10967_v57, %v10967_v57  ;;  %v11097_v57 = vld [vmem:[%s24279_s5 + $0x408] sm:$0xff] }
 0x934   :  { %v11193_v32 = vcombine.high %v11185_v58, %v11185_v58  ;;  %v23823_v11 = vrot.slane %v11178_v28, %v23425_v51  ;;  %v11077_v51 = vld [vmem:[%s24279_s5 + $0x368] sm:$0xff]  ;;  %v11099_v28 = vld [vmem:[%s24279_s5 + $0x418] sm:$0xff] }
 0x935   :  { %v13596_v27 = vpack.c.bf16 %v11080_v42, %v11077_v51  ;;  %v11105_v51 = vld [vmem:[%s24279_s5 + $0x448] sm:$0xff]  ;;  %v11159_v42 = vld [vmem:[%s24279_s5 + $0x5f8] sm:$0xff] }
 0x936   :  { %11263 = vmatprep.mubr.f32.mxu0 %v11193_v32  ;;  %11405 = vmatprep.mubr.f32.mxu1 %v11193_v32  ;;  %v11194_v56 = vcombine.high %v23823_v11, %v23823_v11  ;;  %v13610_v32 = vpack.c.bf16 %v11097_v57, %v11094_v63  ;;  %v13710_v55 = vpack.c.bf16 %v11105_v51, %v11102_v20  ;;  %v11146_v63 = vld [vmem:[%s24279_s5 + $0x590] sm:$0xff]  ;;  %v11157_v20 = vld [vmem:[%s24279_s5 + $0x5e8] sm:$0xff] }
 0x937   :  { %11264 = vmatmul.mubr.f32.vlgmr.msra.gmra.mrb[44].mxu0 %v11185_v58  ;;  %11406 = vmatmul.mubr.f32.vlgmr.msra.gmra.mrb[46].mxu1 %v11185_v58  ;;  %v11096_v58 = vld [vmem:[%s24279_s5 + $0x400] sm:$0xff] }
 0x938   :  { %13591 = vmatpush1.bf16.msra.mxu0 %v13590_v15  ;;  %13687 = vmatpush3.bf16.msra.mxu1 %v13686_v3  ;;  %v13706_v15 = vpack.c.bf16 %v11099_v28, %v11096_v58  ;;  %v11100_v3 = vld [vmem:[%s24279_s5 + $0x420] sm:$0xff]  ;;  %v11145_v58 = vld [vmem:[%s24279_s5 + $0x588] sm:$0xff] }
 0x939   :  { %11334 = vmatprep.mubr.f32.mxu0 %v11194_v56  ;;  %11475 = vmatprep.mubr.f32.mxu1 %v11194_v56  ;;  %v11107_v56 = vld [vmem:[%s24279_s5 + $0x458] sm:$0xff]  ;;  %v13614_v34 = vpack.c.bf16 %v11103_v52, %v11100_v3  ;;  %v11149_v28 = vld [vmem:[%s24279_s5 + $0x5a8] sm:$0xff]  ;;  %v11158_v3 = vld [vmem:[%s24279_s5 + $0x5f0] sm:$0xff] }
 0x93a   :  { %13593 = vmatprep.subr.bf16.mxu0 %v13592_v50  ;;  %13689 = vmatprep.subr.bf16.mxu1 %v13688_v13  ;;  %v11110_v50 = vld [vmem:[%s24279_s5 + $0x470] sm:$0xff]  ;;  %v11156_v13 = vld [vmem:[%s24279_s5 + $0x5e0] sm:$0xff]  ;;  %v13644_v23 = vpack.c.bf16 %v11152_v12, %v11149_v28 }
 0x93b   :  { %v13712_v17 = vpack.c.bf16 %v11159_v42, %v11156_v13  ;;  %v11484_v13 = vld [vmem:[%s24281_s7] sm:$0xff] }
 0x93c   :  { %13595 = vmatpush1.bf16.msra.mxu0 %v13594_v25  ;;  %13691 = vmatpush3.bf16.msra.mxu1 %v13690_v48  ;;  %v11106_v25 = vld [vmem:[%s24279_s5 + $0x450] sm:$0xff]  ;;  %v13616_v48 = vpack.c.bf16 %v11110_v50, %v11107_v56  ;;  %v11500_v56 = vld [vmem:[%s24281_s7 + $0x80] sm:$0xff]  ;;  %v11501_v50 = vld [vmem:[%s24281_s7 + $0x88] sm:$0xff] }
 0x93d   :  { %13597 = vmatprep.subr.bf16.mxu0 %v13596_v27  ;;  %13693 = vmatprep.subr.bf16.mxu1 %v13692_v9  ;;  %v11108_v27 = vld [vmem:[%s24279_s5 + $0x460] sm:$0xff]  ;;  %v11111_v9 = vld [vmem:[%s24279_s5 + $0x478] sm:$0xff]  ;;  %v13618_v41 = vpack.c.bf16 %v11109_v36, %v11106_v25  ;;  %v13716_v42 = vpack.c.bf16 %v11501_v50, %v11500_v56 }
 0x93e   :  { %v13714_v2 = vpack.c.bf16 %v11111_v9, %v11108_v27  ;;  %v11487_v36 = vld [vmem:[%s24281_s7 + $0x18] sm:$0xff]  ;;  %v11504_v27 = vld [vmem:[%s24281_s7 + $0xa0] sm:$0xff]  ;;  %v11505_v9 = vld [vmem:[%s24281_s7 + $0xa8] sm:$0xff] }
 0x93f   :  { %v13724_v16 = vpack.c.bf16 %v11505_v9, %v11504_v27  ;;  %v16161_v9 = vld [vmem:[#allocation2 + $0x80] sm:$0xff] }
 0x940   :  { %13599 = vmatpush1.bf16.msra.mxu0 %v13598_v44  ;;  %13695 = vmatpush3.bf16.msra.mxu1 %v13694_v0  ;;  %v11115_v44 = vld [vmem:[%s24279_s5 + $0x498] sm:$0xff] }
 0x941   :  { %13601 = vmatprep.subr.bf16.mxu0 %v13600_v53  ;;  %13697 = vmatprep.subr.bf16.mxu1 %v13696_v46  ;;  %v11119_v0 = vld [vmem:[%s24279_s5 + $0x4b8] sm:$0xff]  ;;  %v13622_v45 = vpack.c.bf16 %v11115_v44, %v11112_v47  ;;  %v11118_v46 = vld [vmem:[%s24279_s5 + $0x4b0] sm:$0xff] }
 0x942   :  { %v13624_v53 = vpack.c.bf16 %v11122_v24, %v11119_v0  ;;  %v13626_v6 = vpack.c.bf16 %v11121_v62, %v11118_v46  ;;  %v11507_v47 = vld [vmem:[%s24281_s7 + $0xb8] sm:$0xff]  ;;  %v11490_v24 = vld [vmem:[%s24281_s7 + $0x30] sm:$0xff]  ;;  %v11509_v46 = vld [vmem:[%s24281_s7 + $0xc8] sm:$0xff] }
 0x944   :  { %13603 = vmatpush1.bf16.msra.mxu0 %v13602_v59  ;;  %13699 = vmatpush3.bf16.msra.mxu1 %v13698_v7  ;;  %v11127_v59 = vld [vmem:[%s24279_s5 + $0x4f8] sm:$0xff] }
 0x945   :  { %13605 = vmatprep.subr.bf16.mxu0 %v13604_v30  ;;  %13701 = vmatprep.subr.bf16.mxu1 %v13700_v10  ;;  %v11131_v7 = vld [vmem:[%s24279_s5 + $0x518] sm:$0xff]  ;;  %v13630_v21 = vpack.c.bf16 %v11127_v59, %v11124_v29  ;;  %v11130_v10 = vld [vmem:[%s24279_s5 + $0x510] sm:$0xff] }
 0x946   :  { %v13632_v30 = vpack.c.bf16 %v11134_v1, %v11131_v7  ;;  %v13634_v49 = vpack.c.bf16 %v11133_v26, %v11130_v10  ;;  %v11511_v29 = vld [vmem:[%s24281_s7 + $0xd8] sm:$0xff]  ;;  %v11494_v1 = vld [vmem:[%s24281_s7 + $0x50] sm:$0xff]  ;;  %v11513_v10 = vld [vmem:[%s24281_s7 + $0xe8] sm:$0xff] }
 0x948   :  { %13607 = vmatpush1.bf16.msra.mxu0 %v13606_v43  ;;  %13703 = vmatpush3.bf16.msra.mxu1 %v13702_v18  ;;  %v11139_v43 = vld [vmem:[%s24279_s5 + $0x558] sm:$0xff] }
 0x949   :  { %13609 = vmatprep.subr.bf16.mxu0 %v13608_v37  ;;  %13705 = vmatprep.subr.bf16.mxu1 %v13704_v19  ;;  %v11143_v18 = vld [vmem:[%s24279_s5 + $0x578] sm:$0xff]  ;;  %v13638_v57 = vpack.c.bf16 %v11139_v43, %v11136_v38  ;;  %v11142_v19 = vld [vmem:[%s24279_s5 + $0x570] sm:$0xff] }
 0x94a   :  { %v13640_v37 = vpack.c.bf16 %v11146_v63, %v11143_v18  ;;  %v13642_v61 = vpack.c.bf16 %v11145_v58, %v11142_v19  ;;  %v11514_v38 = vld [vmem:[%s24281_s7 + $0xf0] sm:$0xff]  ;;  %v11515_v43 = vld [vmem:[%s24281_s7 + $0xf8] sm:$0xff]  ;;  %v25305_v19 = vmov 0.0|0.0  }
 0x94b   :  { %v11498_v18 = vld [vmem:[%s24281_s7 + $0x70] sm:$0xff]  ;;  %v13744_v63 = vpack.c.bf16 %v11515_v43, %v11514_v38 }
 0x94c   :  { %13611 = vmatpush1.bf16.msra.mxu0 %v13610_v32  ;;  %13707 = vmatpush3.bf16.msra.mxu1 %v13706_v15  ;;  %v11151_v32 = vld [vmem:[%s24279_s5 + $0x5b8] sm:$0xff] }
 0x94d   :  { %13613 = vmatprep.subr.bf16.mxu0 %v13612_v31  ;;  %13709 = vmatprep.subr.bf16.mxu1 %v13708_v5  ;;  %v11155_v15 = vld [vmem:[%s24279_s5 + $0x5d8] sm:$0xff]  ;;  %v13646_v52 = vpack.c.bf16 %v11151_v32, %v11148_v60  ;;  %v11154_v5 = vld [vmem:[%s24279_s5 + $0x5d0] sm:$0xff] }
 0x94e   :  { %v13648_v31 = vpack.c.bf16 %v11158_v3, %v11155_v15  ;;  %v13650_v51 = vpack.c.bf16 %v11157_v20, %v11154_v5  ;;  %v11164_v5 = vsub.s32 0, %v23422_v54  ;;  %v11168_v20 = vsub.s32 1, %v23422_v54 }
 0x950   :  { %13615 = vmatpush1.bf16.msra.mxu0 %v13614_v34  ;;  %13711 = vmatpush3.bf16.msra.mxu1 %v13710_v55  ;;  %v11485_v34 = vld [vmem:[%s24281_s7 + $0x8] sm:$0xff]  ;;  %v11503_v55 = vld [vmem:[%s24281_s7 + $0x98] sm:$0xff] }
 0x951   :  { %13617 = vmatprep.subr.bf16.mxu0 %v13616_v48  ;;  %13713 = vmatprep.subr.bf16.mxu1 %v13712_v17  ;;  %v13718_v25 = vpack.c.bf16 %v11485_v34, %v11484_v13  ;;  %v11486_v17 = vld [vmem:[%s24281_s7 + $0x10] sm:$0xff]  ;;  %v11516_v34 = vld [vmem:[%s24281_s7 + $0x100] sm:$0xff] }
 0x952   :  { %v13722_v14 = vpack.c.bf16 %v11487_v36, %v11486_v17  ;;  %v11519_v36 = vld [vmem:[%s24281_s7 + $0x118] sm:$0xff] }
 0x954   :  { %13619 = vmatpush1.bf16.msra.mxu0 %v13618_v41  ;;  %13715 = vmatpush3.bf16.msra.mxu1 %v13714_v2  ;;  %v11488_v41 = vld [vmem:[%s24281_s7 + $0x20] sm:$0xff]  ;;  %v11489_v2 = vld [vmem:[%s24281_s7 + $0x28] sm:$0xff] }
 0x955   :  { %13621 = vmatprep.subr.bf16.mxu0 %v13620_v40  ;;  %13717 = vmatprep.subr.bf16.mxu1 %v13716_v42  ;;  %v11506_v40 = vld [vmem:[%s24281_s7 + $0xb0] sm:$0xff]  ;;  %v13726_v44 = vpack.c.bf16 %v11489_v2, %v11488_v41  ;;  %v11678_v2 = vld [vmem:[%s24283_s9] sm:$0xff] }
 0x956   :  { %v13728_v0 = vpack.c.bf16 %v11507_v47, %v11506_v40  ;;  %v11679_v40 = vld [vmem:[%s24283_s9 + $0x8] sm:$0xff] }
 0x957   :  { %11476 = vmatmul.mubr.f32.vlgmr.msra.gmra.mrb[48].mxu1 %v23823_v11  ;;  %v13759_v47 = vpack.c.bf16 %v11679_v40, %v11678_v2 }
 0x958   :  { %13623 = vmatpush1.bf16.msra.mxu0 %v13622_v45  ;;  %13719 = vmatpush3.bf16.msra.mxu1 %v13718_v25  ;;  %v11491_v45 = vld [vmem:[%s24281_s7 + $0x38] sm:$0xff] }
 0x959   :  { %13625 = vmatprep.subr.bf16.mxu0 %v13624_v53  ;;  %v11508_v53 = vld [vmem:[%s24281_s7 + $0xc0] sm:$0xff]  ;;  %v13730_v62 = vpack.c.bf16 %v11491_v45, %v11490_v24  ;;  %v11681_v24 = vld [vmem:[%s24283_s9 + $0x18] sm:$0xff] }
 0x95a   :  { %v13732_v33 = vpack.c.bf16 %v11509_v46, %v11508_v53  ;;  %v11682_v53 = vld [vmem:[%s24283_s9 + $0x20] sm:$0xff]  ;;  %v11683_v46 = vld [vmem:[%s24283_s9 + $0x28] sm:$0xff] }
 0x95c   :  { %13627 = vmatpush1.bf16.msra.mxu0 %v13626_v6  ;;  %v11493_v6 = vld [vmem:[%s24281_s7 + $0x48] sm:$0xff] }
 0x95d   :  { %13629 = vmatprep.subr.bf16.mxu0 %v13628_v39  ;;  %v11510_v39 = vld [vmem:[%s24281_s7 + $0xd0] sm:$0xff]  ;;  %v13734_v59 = vpack.c.bf16 %v11493_v6, %v11492_v35  ;;  %v11685_v35 = vld [vmem:[%s24283_s9 + $0x38] sm:$0xff]  ;;  %v11686_v6 = vld [vmem:[%s24283_s9 + $0x40] sm:$0xff] }
 0x95e   :  { %v13736_v7 = vpack.c.bf16 %v11511_v29, %v11510_v39  ;;  %v11687_v29 = vld [vmem:[%s24283_s9 + $0x48] sm:$0xff] }
 0x960   :  { %13631 = vmatpush1.bf16.msra.mxu0 %v13630_v21  ;;  %v11495_v21 = vld [vmem:[%s24281_s7 + $0x58] sm:$0xff] }
 0x961   :  { %13633 = vmatprep.subr.bf16.mxu0 %v13632_v30  ;;  %v11512_v30 = vld [vmem:[%s24281_s7 + $0xe0] sm:$0xff]  ;;  %v13738_v26 = vpack.c.bf16 %v11495_v21, %v11494_v1  ;;  %v11689_v1 = vld [vmem:[%s24283_s9 + $0x58] sm:$0xff] }
 0x962   :  { %v13740_v8 = vpack.c.bf16 %v11513_v10, %v11512_v30  ;;  %v11690_v30 = vld [vmem:[%s24283_s9 + $0x60] sm:$0xf] }
 0x964   :  { %13635 = vmatpush1.bf16.msra.mxu0 %v13634_v49  ;;  %v11497_v49 = vld [vmem:[%s24281_s7 + $0x68] sm:$0xff] }
 0x965   :  { %13637 = vmatprep.subr.bf16.mxu0 %v13636_v22  ;;  %v13742_v22 = vpack.c.bf16 %v11497_v49, %v11496_v4  ;;  %v11852_v4 = vld [vmem:[%s24282_s8] ss:$0 sm:$0xff]  ;;  %s16215_s8 = smov [#allocation8]  }
 0x968   :  { %13639 = vmatpush1.bf16.msra.mxu0 %v13638_v57  ;;  %v11499_v57 = vld [vmem:[%s24281_s7 + $0x78] sm:$0xff] }
 0x969   :  { %13641 = vmatprep.subr.bf16.mxu0 %v13640_v37  ;;  %v13746_v37 = vpack.c.bf16 %v11499_v57, %v11498_v18 }
 0x96c   :  { %13643 = vmatpush1.bf16.msra.mxu0 %v13642_v61  ;;  %v11172_v61 = vsub.s32 2, %v23422_v54  ;;  %v11518_v54 = vld [vmem:[%s24281_s7 + $0x110] sm:$0xff] }
 0x96d   :  { %13645 = vmatprep.subr.bf16.mxu0 %v13644_v23  ;;  %v11160_v23 = vld [vmem:[%s24280_s6] sm:$0x7]  ;;  %v13752_v27 = vpack.c.bf16 %v11519_v36, %v11518_v54 }
 0x96e   :  { %v11173_v60 = vrot.slane %v11160_v23, %v11172_v61  ;;  %v11169_v56 = vrot.slane %v11160_v23, %v11168_v20 }
 0x970   :  { %13647 = vmatpush1.bf16.msra.mxu0 %v13646_v52 }
 0x971   :  { %13649 = vmatprep.subr.bf16.mxu0 %v13648_v31 }
 0x974   :  { %13651 = vmatpush1.bf16.msra.mxu0 %v13650_v51  ;;  %v11165_v51 = vrot.slane %v11160_v23, %v11164_v5 }
 0x977   :  { %11335 = vmatmul.mubr.f32.vlgmr.msra.gmra.mrb[44].mxu0 %v23823_v11  ;;  %v11502_v11 = vld [vmem:[%s24281_s7 + $0x90] sm:$0xff] }
 0x978   :  { %v13720_v48 = vpack.c.bf16 %v11503_v55, %v11502_v11  ;;  %v11517_v11 = vld [vmem:[%s24281_s7 + $0x108] sm:$0xff] }
 0x97a   :  { %13721 = vmatprep.subr.bf16.mxu1 %v13720_v48  ;;  %v13749_v48 = vpack.c.bf16 %v11517_v11, %v11516_v34 }
 0x97b   :  { %13723 = vmatpush3.bf16.msra.mxu1 %v13722_v14  ;;  %v11520_v14 = vld [vmem:[%s24281_s7 + $0x120] sm:$0xff] }
 0x97c   :  { %13725 = vmatprep.subr.bf16.mxu1 %v13724_v16  ;;  %v11521_v16 = vld [vmem:[%s24281_s7 + $0x128] sm:$0xf] }
 0x97d   :  { %v13755_v41 = vpack.c.bf16 %v11521_v16, %v11520_v14 }
 0x97f   :  { %13727 = vmatpush3.bf16.msra.mxu1 %v13726_v44 }
 0x980   :  { %13729 = vmatprep.subr.bf16.mxu1 %v13728_v0  ;;  %v11680_v0 = vld [vmem:[%s24283_s9 + $0x10] sm:$0xff] }
 0x981   :  { %v13762_v45 = vpack.c.bf16 %v11681_v24, %v11680_v0 }
 0x983   :  { %13731 = vmatpush3.bf16.msra.mxu1 %v13730_v62  ;;  %v13765_v62 = vpack.c.bf16 %v11683_v46, %v11682_v53 }
 0x984   :  { %13733 = vmatprep.subr.bf16.mxu1 %v13732_v33  ;;  %v11684_v33 = vld [vmem:[%s24283_s9 + $0x30] sm:$0xff] }
 0x985   :  { %v13768_v39 = vpack.c.bf16 %v11685_v35, %v11684_v33 }
 0x987   :  { %13735 = vmatpush3.bf16.msra.mxu1 %v13734_v59  ;;  %v13771_v59 = vpack.c.bf16 %v11687_v29, %v11686_v6 }
 0x988   :  { %13737 = vmatprep.subr.bf16.mxu1 %v13736_v7  ;;  %v11688_v7 = vld [vmem:[%s24283_s9 + $0x50] sm:$0xff]  ;;  %s11795_s9 = sshll.u32 %s16215_s8, 4  ;;  %s11796_s9 = int_to_ptr.vmem [resolvable:$true] %s11795_s9 }
 0x989   :  { %v13774_v21 = vpack.c.bf16 %v11689_v1, %v11688_v7  ;;  %p16167_p1 = scmp.lt.s32.totalorder %s11796_s9, %s11796_s9 }
 0x98b   :  { %13739 = vmatpush3.bf16.msra.mxu1 %v13738_v26 }
 0x98c   :  { %13741 = vmatprep.subr.bf16.mxu1 %v13740_v8 }
 0x98f   :  { %13743 = vmatpush3.bf16.msra.mxu1 %v13742_v22 }
 0x990   :  { %13745 = vmatprep.subr.bf16.mxu1 %v13744_v63  ;;  %v11855_v63 = vld [vmem:[%s24284_s10] ss:$0 sm:$0xff]  ;;  %s16162_s10 = scalar_lea.vmem %s11796_s9, 32 }
 0x991   :  { %p16163_p0 = scmp.ne.s32.totalorder %s11796_s9, %s16162_s10  ;;  %p16168_p2 = scmp.lt.s32.totalorder %s16162_s10, %s16162_s10 }
 0x993   :  { %13747 = vmatpush3.bf16.msra.mxu1 %v13746_v37  ;;  %p16169_p3 = por %p16168_p2, %p16167_p1 }
 0x994   :  { %13748 = vmatprep.subr.bf16.mxu1 %v25305_v19 }
 0x995   :  { %p16170_p4 = pnand %p16169_p3, %p16163_p0 }
 0xa0a   :  { %v12194_v58 = vpop.f32.mrb[46].mxu1 }
 0xa0b   :  { %v12195_v28 = vpop.f32.mrb[47].mxu1 }
 0xa0c   :  { %v12196_v12 = vadd.f32 %v12195_v28, %v12194_v58 }
 0xa0e   :  { %v11408_v3 = vadd.f32 %v12196_v12, %v11173_v60 }
 0xa2a   :  { %v12229_v32 = vpop.f32.mrb[48].mxu1 }
 0xa2b   :  { %v12230_v15 = vpop.f32.mrb[49].mxu1 }
 0xa2c   :  { %v12231_v52 = vadd.f32 %v12230_v15, %v12229_v32 }
 0xa2e   :  { %v11478_v31 = vadd.f32 %v12231_v52, %v11408_v3 }
 0xa30   :  { %v11483_v44 = vmax.f32 %v11478_v31, 0.0 }
 0xa4a   :  { %v11336_v50 = vpop.f32.mrb[44].mxu0 }
 0xa4b   :  { %v13776_v13 = vadd.f32 %v11336_v50, %v11165_v51  ;;  %v11338_v42 = vpop.f32.mrb[45].mxu0 }
 0xa4c   :  { %v13777_v55 = vadd.f32 %v11338_v42, %v11169_v56 }
 0xa4d   :  { %v11481_v17 = vmax.f32 %v13776_v13, 0.0 }
 0xa4e   :  { %v11482_v25 = vmax.f32 %v13777_v55, 0.0 }
 0xa50   :  { %11601 = vmatprep.mubr.f32.mxu1 %v11482_v25 }
 0xa51   :  { %11602 = vmatmul.mubr.f32.vlgmr.msra.gmra.mrb[50].mxu1 %v11481_v17 }
 0xa52   :  { %13750 = vmatpush3.bf16.msra.mxu1 %v13749_v48  ;;  %12300 = vmatprep.mubr.msk.f32.mxu1 %vm16213_vm11, %v16161_v9 }
 0xa53   :  { %13751 = vmatprep.subr.bf16.mxu1 %v25305_v19 }
 0xa56   :  { %13753 = vmatpush3.bf16.msra.mxu1 %v13752_v27 }
 0xa57   :  { %13754 = vmatprep.subr.bf16.mxu1 %v25305_v19 }
 0xa5a   :  { %13757 = vmatpush3.bf16.msk.msra.mxu1 %vm13756_vm1, %v13755_v41 }
 0xa5b   :  { %13758 = vmatprep.subr.bf16.mxu1 %v25305_v19 }
 0xa5d   :  { %12301 = vmatmul.mubr.msk.f32.vlgmr.msra.gmra.mrb[52].mxu1 %vm11529_vm0, %v11483_v44 }
 0xa5e   :  { %13760 = vmatpush3.bf16.msra.mxu1 %v13759_v47  ;;  %12329 = vmatprep.mubr.msk.f32.mxu1 %vm16213_vm11, %v16161_v9 }
 0xa5f   :  { %13761 = vmatprep.subr.bf16.mxu1 %v25305_v19 }
 0xa62   :  { %13763 = vmatpush3.bf16.msra.mxu1 %v13762_v45 }
 0xa63   :  { %13764 = vmatprep.subr.bf16.mxu1 %v25305_v19 }
 0xa66   :  { %13766 = vmatpush3.bf16.msra.mxu1 %v13765_v62 }
 0xa67   :  { %13767 = vmatprep.subr.bf16.mxu1 %v25305_v19 }
 0xa6a   :  { %13769 = vmatpush3.bf16.msra.mxu1 %v13768_v39 }
 0xa6b   :  { %13770 = vmatprep.subr.bf16.mxu1 %v25305_v19 }
 0xa6e   :  { %13772 = vmatpush3.bf16.msra.mxu1 %v13771_v59 }
 0xa6f   :  { %13773 = vmatprep.subr.bf16.mxu1 %v25305_v19 }
 0xa72   :  { %13775 = vmatpush3.bf16.msra.mxu1 %v13774_v21 }
 0xa73   :  { %12327 = vmatprep.subr.mxu1 %v16161_v9 }
 0xa76   :  { %12328 = vmatpush3.msk.msra.mxu1 %vm11533_vm8, %v11690_v30 }
 0xb24   :  { %v12264_v10 = vpop.f32.mrb[50].mxu1 }
 0xb25   :  { %v12265_v26 = vpop.f32.mrb[51].mxu1 }
 0xb26   :  { %v12266_v8 = vadd.f32 %v12265_v26, %v12264_v10 }
 0xb28   :  { %v11604_v49 = vadd.f32 %v12266_v8, %v11852_v4 }
 0xb30   :  { %v11673_v22 = vpop.f32.mrb[52].mxu1 }
 0xb31   :  { %v11674_v38 = vadd.f32 %v11673_v22, %v11604_v49  ;;  %v12302_v43 = vpop.f32.mrb[53].mxu1 }
 0xb33   :  { %v11677_v18 = vmax.f32 %v11674_v38, 0.0 }
 0xb35   :  { %12330 = vmatmul.mubr.msk.f32.vlgmr.msra.gmra.mrb[54].mxu1 %vm11698_vm7, %v11677_v18 }
 0xc08   :  { %v11771_v57 = vpop.f32.mrb[54].mxu1 }
 0xc09   :  { %v11772_v37 = vadd.f32 %v11855_v63, %v11771_v57  ;;  %v12331_v19 = vpop.f32.mrb[55].mxu1 }
 0xc0b   :  { %v11776_v58 = vsel %vm11775_vm3, %v11772_v37, -inf }
 0xc0c   :  { %11777 = vmax.xlane.f32.xlu0 %v11776_v58 }
 0xc99   :  { %v11778_v28 = vpop.xlane.xlu0 %11777 }
 0xc9a   :  { %v11779_v12 = vsub.f32 %v11772_v37, %v11778_v28 }
 0xc9c   :  { %v11780_v61 = vmul.f32 1.442695, %v11779_v12 }
 0xc9e   :  { %16141 = vpow2.f32 %v11780_v61 }
 0xca8   :  { %v16142_v23 = vpop.eup %16141 }
 0xca9   :  { %v11782_v60 = vsel %vm11775_vm3, %v16142_v23, 0.0 }
 0xcaa   :  { %11783 = vadd.xlane.f32.xlu1 %v11782_v60 }
 0xd37   :  { %v11784_v32 = vpop.xlane.xlu1 %11783 }
 0xd38   :  { %16143 = vlog2.f32 %v11784_v32 }
 0xd42   :  { %v16144_v15 = vpop.eup %16143 }
 0xd43   :  { %v11786_v3 = vmul.f32 0.6931472, %v16144_v15 }
 0xd45   :  { %v11787_v52 = vsub.f32 %v11779_v12, %v11786_v3 }
 0xd47   :  { %11788 = vst.msk [vmem:[#allocation8] sm:$0x3] %vm11775_vm3, %v11787_v52 }
 0xd48   :  { %16173 = shalt.err (!%p16170_p4)
}
 0xd49   :  { %s16174_s5 = scalar_lea.hbm %s24286_s12, 32 }
 0xd4a   :  { %p16175_p5 = scmp.ne.s32.totalorder %s24286_s12, %s16174_s5  ;;  %p16178_p6 = scmp.lt.u32.totalorder %s16174_s5, %s24286_s12 }
 0xd4c   :  { %p16180_p7 = pnand %p16178_p6, %p16175_p5 }
 0xd4e   :  { %16183 = shalt.err (!%p16180_p7)
}
 0xd4f   :  { %11798 = dma.vmem_to_hbm [thread:$0]  %s11796_s9, 32, %s24286_s12, [#allocation9]  }
 0xd50   :  { %16184 = dma.done.wait [#allocation9], 32  }
 0xd51   :  { %16185 = vsyncadd [#allocation9], 4294967264 }
 0xd52   :  { %11802 = vsyncpa [#allocation9], 1 }

</bundles_post_ra>
